<compile_context>
chip_gen: v6e
topology: v6e:2x2x1
jax: 0.10.0
libtpu: 0.0.40
codegen_flags: <defaults>
</compile_context>

<pallas_src>
import functools
import math

import jax
import jax.numpy as jnp
from jax.experimental import pallas as pl
from jax.experimental.pallas import tpu as pltpu


# ----------------------------------------------------------------------------
# Parameter handling (PyTorch Conv2d layout: OIHW weights, (C,) bias)
# ----------------------------------------------------------------------------
def init_encoder_params(key, ch_list=(1, 4, 8, 16)):
    params = []
    for i in range(len(ch_list) - 1):
        cin, cout = ch_list[i], ch_list[i + 1]
        key, k1, k2, k3, k4 = jax.random.split(key, 5)
        std1 = (2.0 / (cin * 9)) ** 0.5
        std2 = (2.0 / (cout * 9)) ** 0.5
        w1 = std1 * jax.random.normal(k1, (cout, cin, 3, 3), jnp.float32)
        b1 = 0.01 * jax.random.normal(k2, (cout,), jnp.float32)
        w2 = std2 * jax.random.normal(k3, (cout, cout, 3, 3), jnp.float32)
        b2 = 0.01 * jax.random.normal(k4, (cout,), jnp.float32)
        params.append((w1, b1, w2, b2))
    return params


def pack_encoder_params(params):
    """Pack all conv weights/biases into two padded blobs (done ONCE, outside
    the jitted forward).

    w_blob: (n_convs, K_max, C_max) with per-conv row layout
            k = (dy*3 + dx)*Cin + ci  (matches the in-kernel im2col order).
    b_blob: (n_convs, C_max)
    """
    convs = []
    for (w1, b1, w2, b2) in params:
        convs += [(w1, b1), (w2, b2)]
    k_max = max(9 * w.shape[1] for w, _ in convs)
    c_max = max(w.shape[0] for w, _ in convs)
    w_blob = jnp.zeros((len(convs), k_max, c_max), jnp.float32)
    b_blob = jnp.zeros((len(convs), c_max), jnp.float32)
    for i, (w, b) in enumerate(convs):
        cout, cin = w.shape[0], w.shape[1]
        # (Cout, Cin, 3, 3) -> (3, 3, Cin, Cout) -> (9*Cin, Cout); cross-corr.
        wk = jnp.transpose(w, (2, 3, 1, 0)).reshape(9 * cin, cout)
        w_blob = w_blob.at[i, :9 * cin, :cout].set(wk)
        b_blob = b_blob.at[i, :cout].set(b)
    return w_blob, b_blob


# ----------------------------------------------------------------------------
# Fused encoder forward: a single pallas_call, grid over the batch dim
# ----------------------------------------------------------------------------
def encoder_forward(x_nchw, w_blob, b_blob, *, ch_list=(1, 4, 8, 16),
                    matmul_dtype=jnp.float32):
    """Returns the list of pre-pool block features, in NCHW like PyTorch."""
    N, C0, H, W = x_nchw.shape
    n_blocks = len(ch_list) - 1
    assert C0 == ch_list[0]
    assert H % (2 ** (n_blocks - 1)) == 0 and W % (2 ** (n_blocks - 1)) == 0

    # Static per-block geometry: (h, w, cin, cout).
    blocks = []
    h, w = H, W
    for bi in range(n_blocks):
        blocks.append((h, w, ch_list[bi], ch_list[bi + 1]))
        h, w = h // 2, w // 2

    k_max, c_max = w_blob.shape[1], w_blob.shape[2]
    hw_max = H * W
    x_nhwc = jnp.transpose(x_nchw, (0, 2, 3, 1)).astype(jnp.float32)

    # -------------------- kernel: one grid step == one image -----------------
    def kernel(x_ref, w_ref, b_ref, *rest):
        o_refs = rest[:n_blocks]
        pad_ref = rest[n_blocks]        # (H+2, W+2, C_max) shared pad/pool buf
        im_ref = rest[n_blocks + 1]     # (H*W, K_max)      shared im2col buf

        def conv3x3_relu(x_hwc, conv_idx, cin, cout):
            hh, ww = x_hwc.shape[0], x_hwc.shape[1]
            # Zero only the 1-px halo; the interior is fully overwritten below.
            z_row = jnp.zeros((1, ww + 2, cin), jnp.float32)
            z_col = jnp.zeros((hh + 2, 1, cin), jnp.float32)
            pad_ref[0:1, 0:ww + 2, 0:cin] = z_row
            pad_ref[hh + 1:hh + 2, 0:ww + 2, 0:cin] = z_row
            pad_ref[0:hh + 2, 0:1, 0:cin] = z_col
            pad_ref[0:hh + 2, ww + 1:ww + 2, 0:cin] = z_col
            pad_ref[1:hh + 1, 1:ww + 1, 0:cin] = x_hwc
            # im2col: pack the 9 taps into the contraction dim -> ONE matmul.
            for dy in range(3):
                for dx in range(3):
                    t = dy * 3 + dx
                    im_ref[0:hh * ww, t * cin:(t + 1) * cin] = (
                        pad_ref[dy:dy + hh, dx:dx + ww, 0:cin]
                        .reshape(hh * ww, cin))
            acc = jnp.dot(
                im_ref[0:hh * ww, 0:9 * cin].astype(matmul_dtype),
                w_ref[conv_idx, 0:9 * cin, 0:cout].astype(matmul_dtype),
                preferred_element_type=jnp.float32)
            return jnp.maximum(acc + b_ref[conv_idx:conv_idx + 1, 0:cout], 0.0)

        def maxpool2(y_hwc):
            """MaxPool2d(2,2) via strided Ref reads through the pad scratch."""
            hh, ww, cc = y_hwc.shape
            pad_ref[0:hh, 0:ww, 0:cc] = y_hwc
            rows = jnp.maximum(
                pad_ref[pl.ds(0, hh // 2, stride=2), 0:ww, 0:cc],
                pad_ref[pl.ds(1, hh // 2, stride=2), 0:ww, 0:cc])
            pad_ref[0:hh // 2, 0:ww, 0:cc] = rows
            return jnp.maximum(
                pad_ref[0:hh // 2, pl.ds(0, ww // 2, stride=2), 0:cc],
                pad_ref[0:hh // 2, pl.ds(1, ww // 2, stride=2), 0:cc])

        x = x_ref[0]                                            # (H, W, C0) f32
        for bi, (bh, bw, bcin, bcout) in enumerate(blocks):
            y = conv3x3_relu(x, 2 * bi, bcin, bcout).reshape(bh, bw, bcout)
            y = conv3x3_relu(y, 2 * bi + 1, bcout, bcout)       # (bh*bw, bcout)
            o_refs[bi][0] = y.astype(o_refs[bi].dtype)          # natural layout
            if bi + 1 < n_blocks:            # pooled output of last block unused
                x = maxpool2(y.reshape(bh, bw, bcout))

    # -------------------- specs, footprint, call ------------------------------
    in_specs = [
        pl.BlockSpec((1, H, W, C0), lambda n: (n, 0, 0, 0)),     # per-image block
        pl.BlockSpec(w_blob.shape, lambda n: (0, 0, 0)),         # resident weights
        pl.BlockSpec(b_blob.shape, lambda n: (0, 0)),            # resident biases
    ]
    out_shapes = tuple(jax.ShapeDtypeStruct((N, bh * bw, bc), jnp.float32)
                       for (bh, bw, _, bc) in blocks)
    out_specs = tuple(pl.BlockSpec((1, bh * bw, bc), lambda n: (n, 0, 0))
                      for (bh, bw, _, bc) in blocks)
    scratch_shapes = [
        pltpu.VMEM((H + 2, W + 2, c_max), jnp.float32),   # shared pad / pool buffer
        pltpu.VMEM((hw_max, k_max), jnp.float32),         # shared im2col buffer
    ]

    def nbytes(shape):
        return math.prod(shape) * 4
    footprint = (nbytes((1, H, W, C0)) + nbytes(w_blob.shape)
                 + nbytes(b_blob.shape)
                 + sum(nbytes(s.shape) for s in out_shapes)     # generous
                 + nbytes((H + 2, W + 2, c_max)) + nbytes((hw_max, k_max)))
    # Headroom for double-buffered blocks + compiler temps; stay under v7x phys.
    vmem_limit = int(min(max(4 * footprint, 16 * 1024 * 1024), 56 * 1024 * 1024))

    ftrs_flat = pl.pallas_call(
        kernel,
        grid=(N,),
        out_shape=out_shapes,
        in_specs=in_specs,
        out_specs=out_specs,
        scratch_shapes=scratch_shapes,
        compiler_params=pltpu.CompilerParams(
            dimension_semantics=("parallel",),
            vmem_limit_bytes=vmem_limit),
    )(x_nhwc, w_blob, b_blob)

    # (N, h*w, c) -> NCHW once per returned feature, outside the kernel.
    return [jnp.transpose(f.reshape(N, bh, bw, bc), (0, 3, 1, 2))
            for f, (bh, bw, _, bc) in zip(ftrs_flat, blocks)]


# ----------------------------------------------------------------------------
# Pure-JAX reference (correctness check only)
# ----------------------------------------------------------------------------
def _ref_conv_relu(x_nchw, w, b):
    y = jax.lax.conv_general_dilated(
        x_nchw, w, window_strides=(1, 1), padding=((1, 1), (1, 1)),
        dimension_numbers=("NCHW", "OIHW", "NCHW"))
    return jax.nn.relu(y + b[None, :, None, None])


def _ref_encoder(x_nchw, params):
    ftrs, x = [], x_nchw
    for (w1, b1, w2, b2) in params:
        x = _ref_conv_relu(_ref_conv_relu(x, w1, b1), w2, b2)
        ftrs.append(x)
        x = jax.lax.reduce_window(x, -jnp.inf, jax.lax.max,
                                  (1, 1, 2, 2), (1, 1, 2, 2), "VALID")
    return ftrs


if __name__ == "__main__":
    key = jax.random.PRNGKey(0)
    kx, kp = jax.random.split(key)

    ch_list = (1, 4, 8, 16)
    x = jax.random.normal(kx, (2, 1, 16, 16), jnp.float32)      # NCHW
    params = init_encoder_params(kp, ch_list)
    w_blob, b_blob = pack_encoder_params(params)                # once, outside jit

    fwd = jax.jit(functools.partial(encoder_forward, ch_list=ch_list))
    ftrs = fwd(x, w_blob, b_blob)
    ftrs = [jax.block_until_ready(f) for f in ftrs]

    expected_shapes = [(2, 4, 16, 16), (2, 8, 8, 8), (2, 16, 4, 4)]
    assert [tuple(f.shape) for f in ftrs] == expected_shapes, \
        [tuple(f.shape) for f in ftrs]

    ref = _ref_encoder(x, params)
    for got, want in zip(ftrs, ref):
        assert jnp.allclose(got, want, rtol=1e-4, atol=1e-4), \
            float(jnp.max(jnp.abs(got - want)))

    print("KERNEL_OK")
</pallas_src>

<mosaic_0001>
module attributes {stable_mosaic.version = 11 : i64} {
  func.func @kernel(%arg0: i32, %arg1: memref<1x16x16x1xf32, #tpu.memory_space<vmem>>, %arg2: memref<6x144x16xf32, #tpu.memory_space<vmem>>, %arg3: memref<6x16xf32, #tpu.memory_space<vmem>>, %arg4: memref<1x256x4xf32, #tpu.memory_space<vmem>>, %arg5: memref<1x64x8xf32, #tpu.memory_space<vmem>>, %arg6: memref<1x16x16xf32, #tpu.memory_space<vmem>>, %arg7: memref<18x18x16xf32, #tpu.memory_space<vmem>>, %arg8: memref<256x144xf32, #tpu.memory_space<vmem>>) attributes {dimension_semantics = [#tpu.dimension_semantics<parallel>], iteration_bounds = array<i64: 2>, scalar_prefetch = 0 : i64, scratch_operands = 2 : i64, tpu.core_type = #tpu.core_type<tc>, window_params = [{transform_indices = @transform_0, window_bounds = array<i64: 1, 16, 16, 1>}, {pipeline_mode = #tpu.pipeline_mode<synchronous>, transform_indices = @transform_1, window_bounds = array<i64: 6, 144, 16>}, {pipeline_mode = #tpu.pipeline_mode<synchronous>, transform_indices = @transform_2, window_bounds = array<i64: 6, 16>}, {transform_indices = @transform_3, window_bounds = array<i64: 1, 256, 4>}, {transform_indices = @transform_4, window_bounds = array<i64: 1, 64, 8>}, {transform_indices = @transform_5, window_bounds = array<i64: 1, 16, 16>}]} {
    %c0 = arith.constant 0 : index
    %c0_0 = arith.constant 0 : index
    %c0_1 = arith.constant 0 : index
    %c0_2 = arith.constant 0 : index
    %0 = vector.load %arg1[%c0, %c0_0, %c0_1, %c0_2] : memref<1x16x16x1xf32, #tpu.memory_space<vmem>>, vector<1x16x16x1xf32>
    %1 = vector.shape_cast %0 : vector<1x16x16x1xf32> to vector<16x16x1xf32>
    %cst = arith.constant 0.000000e+00 : f32
    %2 = vector.broadcast %cst : f32 to vector<1x18x1xf32>
    %cst_3 = arith.constant 0.000000e+00 : f32
    %3 = vector.broadcast %cst_3 : f32 to vector<18x1x1xf32>
    %c0_4 = arith.constant 0 : index
    %c0_5 = arith.constant 0 : index
    %c0_6 = arith.constant 0 : index
    %4 = vector.load %arg7[%c0_4, %c0_5, %c0_6] : memref<18x18x16xf32, #tpu.memory_space<vmem>>, vector<1x18x1xf32>
    tpu.vector_store %arg7[%c0_4, %c0_5, %c0_6], %2 {strides = array<i32>} : memref<18x18x16xf32, #tpu.memory_space<vmem>>, vector<1x18x1xf32>,
    %c17 = arith.constant 17 : index
    %c0_7 = arith.constant 0 : index
    %c0_8 = arith.constant 0 : index
    %5 = vector.load %arg7[%c17, %c0_7, %c0_8] : memref<18x18x16xf32, #tpu.memory_space<vmem>>, vector<1x18x1xf32>
    tpu.vector_store %arg7[%c17, %c0_7, %c0_8], %2 {strides = array<i32>} : memref<18x18x16xf32, #tpu.memory_space<vmem>>, vector<1x18x1xf32>,
    %c0_9 = arith.constant 0 : index
    %c0_10 = arith.constant 0 : index
    %c0_11 = arith.constant 0 : index
    %6 = vector.load %arg7[%c0_9, %c0_10, %c0_11] : memref<18x18x16xf32, #tpu.memory_space<vmem>>, vector<18x1x1xf32>
    tpu.vector_store %arg7[%c0_9, %c0_10, %c0_11], %3 {strides = array<i32>} : memref<18x18x16xf32, #tpu.memory_space<vmem>>, vector<18x1x1xf32>,
    %c0_12 = arith.constant 0 : index
    %c17_13 = arith.constant 17 : index
    %c0_14 = arith.constant 0 : index
    %7 = vector.load %arg7[%c0_12, %c17_13, %c0_14] : memref<18x18x16xf32, #tpu.memory_space<vmem>>, vector<18x1x1xf32>
    tpu.vector_store %arg7[%c0_12, %c17_13, %c0_14], %3 {strides = array<i32>} : memref<18x18x16xf32, #tpu.memory_space<vmem>>, vector<18x1x1xf32>,
    %c1 = arith.constant 1 : index
    %c1_15 = arith.constant 1 : index
    %c0_16 = arith.constant 0 : index
    %8 = vector.load %arg7[%c1, %c1_15, %c0_16] : memref<18x18x16xf32, #tpu.memory_space<vmem>>, vector<16x16x1xf32>
    tpu.vector_store %arg7[%c1, %c1_15, %c0_16], %1 {strides = array<i32>} : memref<18x18x16xf32, #tpu.memory_space<vmem>>, vector<16x16x1xf32>,
    %c0_17 = arith.constant 0 : index
    %c0_18 = arith.constant 0 : index
    %c0_19 = arith.constant 0 : index
    %9 = vector.load %arg7[%c0_17, %c0_18, %c0_19] : memref<18x18x16xf32, #tpu.memory_space<vmem>>, vector<16x16x1xf32>
    %10 = vector.shape_cast %9 : vector<16x16x1xf32> to vector<256x1xf32>
    %c0_20 = arith.constant 0 : index
    %c0_21 = arith.constant 0 : index
    %11 = vector.load %arg8[%c0_20, %c0_21] : memref<256x144xf32, #tpu.memory_space<vmem>>, vector<256x1xf32>
    tpu.vector_store %arg8[%c0_20, %c0_21], %10 {strides = array<i32>} : memref<256x144xf32, #tpu.memory_space<vmem>>, vector<256x1xf32>,
    %c0_22 = arith.constant 0 : index
    %c1_23 = arith.constant 1 : index
    %c0_24 = arith.constant 0 : index
    %12 = vector.load %arg7[%c0_22, %c1_23, %c0_24] : memref<18x18x16xf32, #tpu.memory_space<vmem>>, vector<16x16x1xf32>
    %13 = vector.shape_cast %12 : vector<16x16x1xf32> to vector<256x1xf32>
    %c0_25 = arith.constant 0 : index
    %c1_26 = arith.constant 1 : index
    %14 = vector.load %arg8[%c0_25, %c1_26] : memref<256x144xf32, #tpu.memory_space<vmem>>, vector<256x1xf32>
    tpu.vector_store %arg8[%c0_25, %c1_26], %13 {strides = array<i32>} : memref<256x144xf32, #tpu.memory_space<vmem>>, vector<256x1xf32>,
    %c0_27 = arith.constant 0 : index
    %c2 = arith.constant 2 : index
    %c0_28 = arith.constant 0 : index
    %15 = vector.load %arg7[%c0_27, %c2, %c0_28] : memref<18x18x16xf32, #tpu.memory_space<vmem>>, vector<16x16x1xf32>
    %16 = vector.shape_cast %15 : vector<16x16x1xf32> to vector<256x1xf32>
    %c0_29 = arith.constant 0 : index
    %c2_30 = arith.constant 2 : index
    %17 = vector.load %arg8[%c0_29, %c2_30] : memref<256x144xf32, #tpu.memory_space<vmem>>, vector<256x1xf32>
    tpu.vector_store %arg8[%c0_29, %c2_30], %16 {strides = array<i32>} : memref<256x144xf32, #tpu.memory_space<vmem>>, vector<256x1xf32>,
    %c1_31 = arith.constant 1 : index
    %c0_32 = arith.constant 0 : index
    %c0_33 = arith.constant 0 : index
    %18 = vector.load %arg7[%c1_31, %c0_32, %c0_33] : memref<18x18x16xf32, #tpu.memory_space<vmem>>, vector<16x16x1xf32>
    %19 = vector.shape_cast %18 : vector<16x16x1xf32> to vector<256x1xf32>
    %c0_34 = arith.constant 0 : index
    %c3 = arith.constant 3 : index
    %20 = vector.load %arg8[%c0_34, %c3] : memref<256x144xf32, #tpu.memory_space<vmem>>, vector<256x1xf32>
    tpu.vector_store %arg8[%c0_34, %c3], %19 {strides = array<i32>} : memref<256x144xf32, #tpu.memory_space<vmem>>, vector<256x1xf32>,
    %c1_35 = arith.constant 1 : index
    %c1_36 = arith.constant 1 : index
    %c0_37 = arith.constant 0 : index
    %21 = vector.load %arg7[%c1_35, %c1_36, %c0_37] : memref<18x18x16xf32, #tpu.memory_space<vmem>>, vector<16x16x1xf32>
    %22 = vector.shape_cast %21 : vector<16x16x1xf32> to vector<256x1xf32>
    %c0_38 = arith.constant 0 : index
    %c4 = arith.constant 4 : index
    %23 = vector.load %arg8[%c0_38, %c4] : memref<256x144xf32, #tpu.memory_space<vmem>>, vector<256x1xf32>
    tpu.vector_store %arg8[%c0_38, %c4], %22 {strides = array<i32>} : memref<256x144xf32, #tpu.memory_space<vmem>>, vector<256x1xf32>,
    %c1_39 = arith.constant 1 : index
    %c2_40 = arith.constant 2 : index
    %c0_41 = arith.constant 0 : index
    %24 = vector.load %arg7[%c1_39, %c2_40, %c0_41] : memref<18x18x16xf32, #tpu.memory_space<vmem>>, vector<16x16x1xf32>
    %25 = vector.shape_cast %24 : vector<16x16x1xf32> to vector<256x1xf32>
    %c0_42 = arith.constant 0 : index
    %c5 = arith.constant 5 : index
    %26 = vector.load %arg8[%c0_42, %c5] : memref<256x144xf32, #tpu.memory_space<vmem>>, vector<256x1xf32>
    tpu.vector_store %arg8[%c0_42, %c5], %25 {strides = array<i32>} : memref<256x144xf32, #tpu.memory_space<vmem>>, vector<256x1xf32>,
    %c2_43 = arith.constant 2 : index
    %c0_44 = arith.constant 0 : index
    %c0_45 = arith.constant 0 : index
    %27 = vector.load %arg7[%c2_43, %c0_44, %c0_45] : memref<18x18x16xf32, #tpu.memory_space<vmem>>, vector<16x16x1xf32>
    %28 = vector.shape_cast %27 : vector<16x16x1xf32> to vector<256x1xf32>
    %c0_46 = arith.constant 0 : index
    %c6 = arith.constant 6 : index
    %29 = vector.load %arg8[%c0_46, %c6] : memref<256x144xf32, #tpu.memory_space<vmem>>, vector<256x1xf32>
    tpu.vector_store %arg8[%c0_46, %c6], %28 {strides = array<i32>} : memref<256x144xf32, #tpu.memory_space<vmem>>, vector<256x1xf32>,
    %c2_47 = arith.constant 2 : index
    %c1_48 = arith.constant 1 : index
    %c0_49 = arith.constant 0 : index
    %30 = vector.load %arg7[%c2_47, %c1_48, %c0_49] : memref<18x18x16xf32, #tpu.memory_space<vmem>>, vector<16x16x1xf32>
    %31 = vector.shape_cast %30 : vector<16x16x1xf32> to vector<256x1xf32>
    %c0_50 = arith.constant 0 : index
    %c7 = arith.constant 7 : index
    %32 = vector.load %arg8[%c0_50, %c7] : memref<256x144xf32, #tpu.memory_space<vmem>>, vector<256x1xf32>
    tpu.vector_store %arg8[%c0_50, %c7], %31 {strides = array<i32>} : memref<256x144xf32, #tpu.memory_space<vmem>>, vector<256x1xf32>,
    %c2_51 = arith.constant 2 : index
    %c2_52 = arith.constant 2 : index
    %c0_53 = arith.constant 0 : index
    %33 = vector.load %arg7[%c2_51, %c2_52, %c0_53] : memref<18x18x16xf32, #tpu.memory_space<vmem>>, vector<16x16x1xf32>
    %34 = vector.shape_cast %33 : vector<16x16x1xf32> to vector<256x1xf32>
    %c0_54 = arith.constant 0 : index
    %c8 = arith.constant 8 : index
    %35 = vector.load %arg8[%c0_54, %c8] : memref<256x144xf32, #tpu.memory_space<vmem>>, vector<256x1xf32>
    tpu.vector_store %arg8[%c0_54, %c8], %34 {strides = array<i32>} : memref<256x144xf32, #tpu.memory_space<vmem>>, vector<256x1xf32>,
    %c0_55 = arith.constant 0 : index
    %c0_56 = arith.constant 0 : index
    %36 = vector.load %arg8[%c0_55, %c0_56] : memref<256x144xf32, #tpu.memory_space<vmem>>, vector<256x9xf32>
    %c0_57 = arith.constant 0 : index
    %c0_58 = arith.constant 0 : index
    %c0_59 = arith.constant 0 : index
    %37 = vector.load %arg2[%c0_57, %c0_58, %c0_59] : memref<6x144x16xf32, #tpu.memory_space<vmem>>, vector<1x9x4xf32>
    %38 = vector.shape_cast %37 : vector<1x9x4xf32> to vector<9x4xf32>
    %cst_60 = arith.constant dense<0.000000e+00> : vector<256x4xf32>
    %39 = tpu.matmul %36, %38, %cst_60 {dimension_numbers = #tpu.dot_dimension_numbers<[1], [0], [0], [1], [0, 0, 1, 1], [], []>} : vector<256x9xf32>, vector<9x4xf32>, vector<256x4xf32> -> vector<256x4xf32>
    %c0_61 = arith.constant 0 : index
    %c0_62 = arith.constant 0 : index
    %40 = vector.load %arg3[%c0_61, %c0_62] : memref<6x16xf32, #tpu.memory_space<vmem>>, vector<1x4xf32>
    %41 = vector.broadcast %40 : vector<1x4xf32> to vector<256x4xf32>
    %42 = arith.addf %39, %41 : vector<256x4xf32>
    %cst_63 = arith.constant 0.000000e+00 : f32
    %43 = vector.broadcast %cst_63 : f32 to vector<256x4xf32>
    %44 = arith.maximumf %42, %43 : vector<256x4xf32>
    %45 = vector.shape_cast %44 : vector<256x4xf32> to vector<16x16x4xf32>
    %cst_64 = arith.constant 0.000000e+00 : f32
    %46 = vector.broadcast %cst_64 : f32 to vector<1x18x4xf32>
    %cst_65 = arith.constant 0.000000e+00 : f32
    %47 = vector.broadcast %cst_65 : f32 to vector<18x1x4xf32>
    %c0_66 = arith.constant 0 : index
    %c0_67 = arith.constant 0 : index
    %c0_68 = arith.constant 0 : index
    %48 = vector.load %arg7[%c0_66, %c0_67, %c0_68] : memref<18x18x16xf32, #tpu.memory_space<vmem>>, vector<1x18x4xf32>
    tpu.vector_store %arg7[%c0_66, %c0_67, %c0_68], %46 {strides = array<i32>} : memref<18x18x16xf32, #tpu.memory_space<vmem>>, vector<1x18x4xf32>,
    %c17_69 = arith.constant 17 : index
    %c0_70 = arith.constant 0 : index
    %c0_71 = arith.constant 0 : index
    %49 = vector.load %arg7[%c17_69, %c0_70, %c0_71] : memref<18x18x16xf32, #tpu.memory_space<vmem>>, vector<1x18x4xf32>
    tpu.vector_store %arg7[%c17_69, %c0_70, %c0_71], %46 {strides = array<i32>} : memref<18x18x16xf32, #tpu.memory_space<vmem>>, vector<1x18x4xf32>,
    %c0_72 = arith.constant 0 : index
    %c0_73 = arith.constant 0 : index
    %c0_74 = arith.constant 0 : index
    %50 = vector.load %arg7[%c0_72, %c0_73, %c0_74] : memref<18x18x16xf32, #tpu.memory_space<vmem>>, vector<18x1x4xf32>
    tpu.vector_store %arg7[%c0_72, %c0_73, %c0_74], %47 {strides = array<i32>} : memref<18x18x16xf32, #tpu.memory_space<vmem>>, vector<18x1x4xf32>,
    %c0_75 = arith.constant 0 : index
    %c17_76 = arith.constant 17 : index
    %c0_77 = arith.constant 0 : index
    %51 = vector.load %arg7[%c0_75, %c17_76, %c0_77] : memref<18x18x16xf32, #tpu.memory_space<vmem>>, vector<18x1x4xf32>
    tpu.vector_store %arg7[%c0_75, %c17_76, %c0_77], %47 {strides = array<i32>} : memref<18x18x16xf32, #tpu.memory_space<vmem>>, vector<18x1x4xf32>,
    %c1_78 = arith.constant 1 : index
    %c1_79 = arith.constant 1 : index
    %c0_80 = arith.constant 0 : index
    %52 = vector.load %arg7[%c1_78, %c1_79, %c0_80] : memref<18x18x16xf32, #tpu.memory_space<vmem>>, vector<16x16x4xf32>
    tpu.vector_store %arg7[%c1_78, %c1_79, %c0_80], %45 {strides = array<i32>} : memref<18x18x16xf32, #tpu.memory_space<vmem>>, vector<16x16x4xf32>,
    %c0_81 = arith.constant 0 : index
    %c0_82 = arith.constant 0 : index
    %c0_83 = arith.constant 0 : index
    %53 = vector.load %arg7[%c0_81, %c0_82, %c0_83] : memref<18x18x16xf32, #tpu.memory_space<vmem>>, vector<16x16x4xf32>
    %54 = vector.shape_cast %53 : vector<16x16x4xf32> to vector<256x4xf32>
    %c0_84 = arith.constant 0 : index
    %c0_85 = arith.constant 0 : index
    %55 = vector.load %arg8[%c0_84, %c0_85] : memref<256x144xf32, #tpu.memory_space<vmem>>, vector<256x4xf32>
    tpu.vector_store %arg8[%c0_84, %c0_85], %54 {strides = array<i32>} : memref<256x144xf32, #tpu.memory_space<vmem>>, vector<256x4xf32>,
    %c0_86 = arith.constant 0 : index
    %c1_87 = arith.constant 1 : index
    %c0_88 = arith.constant 0 : index
    %56 = vector.load %arg7[%c0_86, %c1_87, %c0_88] : memref<18x18x16xf32, #tpu.memory_space<vmem>>, vector<16x16x4xf32>
    %57 = vector.shape_cast %56 : vector<16x16x4xf32> to vector<256x4xf32>
    %c0_89 = arith.constant 0 : index
    %c4_90 = arith.constant 4 : index
    %58 = vector.load %arg8[%c0_89, %c4_90] : memref<256x144xf32, #tpu.memory_space<vmem>>, vector<256x4xf32>
    tpu.vector_store %arg8[%c0_89, %c4_90], %57 {strides = array<i32>} : memref<256x144xf32, #tpu.memory_space<vmem>>, vector<256x4xf32>,
    %c0_91 = arith.constant 0 : index
    %c2_92 = arith.constant 2 : index
    %c0_93 = arith.constant 0 : index
    %59 = vector.load %arg7[%c0_91, %c2_92, %c0_93] : memref<18x18x16xf32, #tpu.memory_space<vmem>>, vector<16x16x4xf32>
    %60 = vector.shape_cast %59 : vector<16x16x4xf32> to vector<256x4xf32>
    %c0_94 = arith.constant 0 : index
    %c8_95 = arith.constant 8 : index
    %61 = vector.load %arg8[%c0_94, %c8_95] : memref<256x144xf32, #tpu.memory_space<vmem>>, vector<256x4xf32>
    tpu.vector_store %arg8[%c0_94, %c8_95], %60 {strides = array<i32>} : memref<256x144xf32, #tpu.memory_space<vmem>>, vector<256x4xf32>,
    %c1_96 = arith.constant 1 : index
    %c0_97 = arith.constant 0 : index
    %c0_98 = arith.constant 0 : index
    %62 = vector.load %arg7[%c1_96, %c0_97, %c0_98] : memref<18x18x16xf32, #tpu.memory_space<vmem>>, vector<16x16x4xf32>
    %63 = vector.shape_cast %62 : vector<16x16x4xf32> to vector<256x4xf32>
    %c0_99 = arith.constant 0 : index
    %c12 = arith.constant 12 : index
    %64 = vector.load %arg8[%c0_99, %c12] : memref<256x144xf32, #tpu.memory_space<vmem>>, vector<256x4xf32>
    tpu.vector_store %arg8[%c0_99, %c12], %63 {strides = array<i32>} : memref<256x144xf32, #tpu.memory_space<vmem>>, vector<256x4xf32>,
    %c1_100 = arith.constant 1 : index
    %c1_101 = arith.constant 1 : index
    %c0_102 = arith.constant 0 : index
    %65 = vector.load %arg7[%c1_100, %c1_101, %c0_102] : memref<18x18x16xf32, #tpu.memory_space<vmem>>, vector<16x16x4xf32>
    %66 = vector.shape_cast %65 : vector<16x16x4xf32> to vector<256x4xf32>
    %c0_103 = arith.constant 0 : index
    %c16 = arith.constant 16 : index
    %67 = vector.load %arg8[%c0_103, %c16] : memref<256x144xf32, #tpu.memory_space<vmem>>, vector<256x4xf32>
    tpu.vector_store %arg8[%c0_103, %c16], %66 {strides = array<i32>} : memref<256x144xf32, #tpu.memory_space<vmem>>, vector<256x4xf32>,
    %c1_104 = arith.constant 1 : index
    %c2_105 = arith.constant 2 : index
    %c0_106 = arith.constant 0 : index
    %68 = vector.load %arg7[%c1_104, %c2_105, %c0_106] : memref<18x18x16xf32, #tpu.memory_space<vmem>>, vector<16x16x4xf32>
    %69 = vector.shape_cast %68 : vector<16x16x4xf32> to vector<256x4xf32>
    %c0_107 = arith.constant 0 : index
    %c20 = arith.constant 20 : index
    %70 = vector.load %arg8[%c0_107, %c20] : memref<256x144xf32, #tpu.memory_space<vmem>>, vector<256x4xf32>
    tpu.vector_store %arg8[%c0_107, %c20], %69 {strides = array<i32>} : memref<256x144xf32, #tpu.memory_space<vmem>>, vector<256x4xf32>,
    %c2_108 = arith.constant 2 : index
    %c0_109 = arith.constant 0 : index
    %c0_110 = arith.constant 0 : index
    %71 = vector.load %arg7[%c2_108, %c0_109, %c0_110] : memref<18x18x16xf32, #tpu.memory_space<vmem>>, vector<16x16x4xf32>
    %72 = vector.shape_cast %71 : vector<16x16x4xf32> to vector<256x4xf32>
    %c0_111 = arith.constant 0 : index
    %c24 = arith.constant 24 : index
    %73 = vector.load %arg8[%c0_111, %c24] : memref<256x144xf32, #tpu.memory_space<vmem>>, vector<256x4xf32>
    tpu.vector_store %arg8[%c0_111, %c24], %72 {strides = array<i32>} : memref<256x144xf32, #tpu.memory_space<vmem>>, vector<256x4xf32>,
    %c2_112 = arith.constant 2 : index
    %c1_113 = arith.constant 1 : index
    %c0_114 = arith.constant 0 : index
    %74 = vector.load %arg7[%c2_112, %c1_113, %c0_114] : memref<18x18x16xf32, #tpu.memory_space<vmem>>, vector<16x16x4xf32>
    %75 = vector.shape_cast %74 : vector<16x16x4xf32> to vector<256x4xf32>
    %c0_115 = arith.constant 0 : index
    %c28 = arith.constant 28 : index
    %76 = vector.load %arg8[%c0_115, %c28] : memref<256x144xf32, #tpu.memory_space<vmem>>, vector<256x4xf32>
    tpu.vector_store %arg8[%c0_115, %c28], %75 {strides = array<i32>} : memref<256x144xf32, #tpu.memory_space<vmem>>, vector<256x4xf32>,
    %c2_116 = arith.constant 2 : index
    %c2_117 = arith.constant 2 : index
    %c0_118 = arith.constant 0 : index
    %77 = vector.load %arg7[%c2_116, %c2_117, %c0_118] : memref<18x18x16xf32, #tpu.memory_space<vmem>>, vector<16x16x4xf32>
    %78 = vector.shape_cast %77 : vector<16x16x4xf32> to vector<256x4xf32>
    %c0_119 = arith.constant 0 : index
    %c32 = arith.constant 32 : index
    %79 = vector.load %arg8[%c0_119, %c32] : memref<256x144xf32, #tpu.memory_space<vmem>>, vector<256x4xf32>
    tpu.vector_store %arg8[%c0_119, %c32], %78 {strides = array<i32>} : memref<256x144xf32, #tpu.memory_space<vmem>>, vector<256x4xf32>,
    %c0_120 = arith.constant 0 : index
    %c0_121 = arith.constant 0 : index
    %80 = vector.load %arg8[%c0_120, %c0_121] : memref<256x144xf32, #tpu.memory_space<vmem>>, vector<256x36xf32>
    %c1_122 = arith.constant 1 : index
    %c0_123 = arith.constant 0 : index
    %c0_124 = arith.constant 0 : index
    %81 = vector.load %arg2[%c1_122, %c0_123, %c0_124] : memref<6x144x16xf32, #tpu.memory_space<vmem>>, vector<1x36x4xf32>
    %82 = vector.shape_cast %81 : vector<1x36x4xf32> to vector<36x4xf32>
    %cst_125 = arith.constant dense<0.000000e+00> : vector<256x4xf32>
    %83 = tpu.matmul %80, %82, %cst_125 {dimension_numbers = #tpu.dot_dimension_numbers<[1], [0], [0], [1], [0, 0, 1, 1], [], []>} : vector<256x36xf32>, vector<36x4xf32>, vector<256x4xf32> -> vector<256x4xf32>
    %c1_126 = arith.constant 1 : index
    %c0_127 = arith.constant 0 : index
    %84 = vector.load %arg3[%c1_126, %c0_127] : memref<6x16xf32, #tpu.memory_space<vmem>>, vector<1x4xf32>
    %85 = vector.broadcast %84 : vector<1x4xf32> to vector<256x4xf32>
    %86 = arith.addf %83, %85 : vector<256x4xf32>
    %cst_128 = arith.constant 0.000000e+00 : f32
    %87 = vector.broadcast %cst_128 : f32 to vector<256x4xf32>
    %88 = arith.maximumf %86, %87 : vector<256x4xf32>
    %c0_129 = arith.constant 0 : index
    %c0_130 = arith.constant 0 : index
    %c0_131 = arith.constant 0 : index
    %89 = vector.load %arg4[%c0_129, %c0_130, %c0_131] : memref<1x256x4xf32, #tpu.memory_space<vmem>>, vector<1x256x4xf32>
    %90 = vector.shape_cast %89 : vector<1x256x4xf32> to vector<256x4xf32>
    %91 = vector.shape_cast %88 : vector<256x4xf32> to vector<1x256x4xf32>
    tpu.vector_store %arg4[%c0_129, %c0_130, %c0_131], %91 {strides = array<i32>} : memref<1x256x4xf32, #tpu.memory_space<vmem>>, vector<1x256x4xf32>,
    %92 = vector.shape_cast %88 : vector<256x4xf32> to vector<16x16x4xf32>
    %c0_132 = arith.constant 0 : index
    %c0_133 = arith.constant 0 : index
    %c0_134 = arith.constant 0 : index
    %93 = vector.load %arg7[%c0_132, %c0_133, %c0_134] : memref<18x18x16xf32, #tpu.memory_space<vmem>>, vector<16x16x4xf32>
    tpu.vector_store %arg7[%c0_132, %c0_133, %c0_134], %92 {strides = array<i32>} : memref<18x18x16xf32, #tpu.memory_space<vmem>>, vector<16x16x4xf32>,
    %c0_135 = arith.constant 0 : index
    %c0_136 = arith.constant 0 : index
    %c0_137 = arith.constant 0 : index
    %94 = tpu.strided_load %arg7[%c0_135, %c0_136, %c0_137] {strides = array<i32: 2, 1, 1>} : memref<18x18x16xf32, #tpu.memory_space<vmem>>, vector<8x16x4xf32>
    %c1_138 = arith.constant 1 : index
    %c0_139 = arith.constant 0 : index
    %c0_140 = arith.constant 0 : index
    %95 = tpu.strided_load %arg7[%c1_138, %c0_139, %c0_140] {strides = array<i32: 2, 1, 1>} : memref<18x18x16xf32, #tpu.memory_space<vmem>>, vector<8x16x4xf32>
    %96 = arith.maximumf %94, %95 : vector<8x16x4xf32>
    %c0_141 = arith.constant 0 : index
    %c0_142 = arith.constant 0 : index
    %c0_143 = arith.constant 0 : index
    %97 = vector.load %arg7[%c0_141, %c0_142, %c0_143] : memref<18x18x16xf32, #tpu.memory_space<vmem>>, vector<8x16x4xf32>
    tpu.vector_store %arg7[%c0_141, %c0_142, %c0_143], %96 {strides = array<i32>} : memref<18x18x16xf32, #tpu.memory_space<vmem>>, vector<8x16x4xf32>,
    %c0_144 = arith.constant 0 : index
    %c0_145 = arith.constant 0 : index
    %c0_146 = arith.constant 0 : index
    %98 = tpu.strided_load %arg7[%c0_144, %c0_145, %c0_146] {strides = array<i32: 1, 2, 1>} : memref<18x18x16xf32, #tpu.memory_space<vmem>>, vector<8x8x4xf32>
    %c0_147 = arith.constant 0 : index
    %c1_148 = arith.constant 1 : index
    %c0_149 = arith.constant 0 : index
    %99 = tpu.strided_load %arg7[%c0_147, %c1_148, %c0_149] {strides = array<i32: 1, 2, 1>} : memref<18x18x16xf32, #tpu.memory_space<vmem>>, vector<8x8x4xf32>
    %100 = arith.maximumf %98, %99 : vector<8x8x4xf32>
    %cst_150 = arith.constant 0.000000e+00 : f32
    %101 = vector.broadcast %cst_150 : f32 to vector<1x10x4xf32>
    %cst_151 = arith.constant 0.000000e+00 : f32
    %102 = vector.broadcast %cst_151 : f32 to vector<10x1x4xf32>
    %c0_152 = arith.constant 0 : index
    %c0_153 = arith.constant 0 : index
    %c0_154 = arith.constant 0 : index
    %103 = vector.load %arg7[%c0_152, %c0_153, %c0_154] : memref<18x18x16xf32, #tpu.memory_space<vmem>>, vector<1x10x4xf32>
    tpu.vector_store %arg7[%c0_152, %c0_153, %c0_154], %101 {strides = array<i32>} : memref<18x18x16xf32, #tpu.memory_space<vmem>>, vector<1x10x4xf32>,
    %c9 = arith.constant 9 : index
    %c0_155 = arith.constant 0 : index
    %c0_156 = arith.constant 0 : index
    %104 = vector.load %arg7[%c9, %c0_155, %c0_156] : memref<18x18x16xf32, #tpu.memory_space<vmem>>, vector<1x10x4xf32>
    tpu.vector_store %arg7[%c9, %c0_155, %c0_156], %101 {strides = array<i32>} : memref<18x18x16xf32, #tpu.memory_space<vmem>>, vector<1x10x4xf32>,
    %c0_157 = arith.constant 0 : index
    %c0_158 = arith.constant 0 : index
    %c0_159 = arith.constant 0 : index
    %105 = vector.load %arg7[%c0_157, %c0_158, %c0_159] : memref<18x18x16xf32, #tpu.memory_space<vmem>>, vector<10x1x4xf32>
    tpu.vector_store %arg7[%c0_157, %c0_158, %c0_159], %102 {strides = array<i32>} : memref<18x18x16xf32, #tpu.memory_space<vmem>>, vector<10x1x4xf32>,
    %c0_160 = arith.constant 0 : index
    %c9_161 = arith.constant 9 : index
    %c0_162 = arith.constant 0 : index
    %106 = vector.load %arg7[%c0_160, %c9_161, %c0_162] : memref<18x18x16xf32, #tpu.memory_space<vmem>>, vector<10x1x4xf32>
    tpu.vector_store %arg7[%c0_160, %c9_161, %c0_162], %102 {strides = array<i32>} : memref<18x18x16xf32, #tpu.memory_space<vmem>>, vector<10x1x4xf32>,
    %c1_163 = arith.constant 1 : index
    %c1_164 = arith.constant 1 : index
    %c0_165 = arith.constant 0 : index
    %107 = vector.load %arg7[%c1_163, %c1_164, %c0_165] : memref<18x18x16xf32, #tpu.memory_space<vmem>>, vector<8x8x4xf32>
    tpu.vector_store %arg7[%c1_163, %c1_164, %c0_165], %100 {strides = array<i32>} : memref<18x18x16xf32, #tpu.memory_space<vmem>>, vector<8x8x4xf32>,
    %c0_166 = arith.constant 0 : index
    %c0_167 = arith.constant 0 : index
    %c0_168 = arith.constant 0 : index
    %108 = vector.load %arg7[%c0_166, %c0_167, %c0_168] : memref<18x18x16xf32, #tpu.memory_space<vmem>>, vector<8x8x4xf32>
    %109 = vector.shape_cast %108 : vector<8x8x4xf32> to vector<64x4xf32>
    %c0_169 = arith.constant 0 : index
    %c0_170 = arith.constant 0 : index
    %110 = vector.load %arg8[%c0_169, %c0_170] : memref<256x144xf32, #tpu.memory_space<vmem>>, vector<64x4xf32>
    tpu.vector_store %arg8[%c0_169, %c0_170], %109 {strides = array<i32>} : memref<256x144xf32, #tpu.memory_space<vmem>>, vector<64x4xf32>,
    %c0_171 = arith.constant 0 : index
    %c1_172 = arith.constant 1 : index
    %c0_173 = arith.constant 0 : index
    %111 = vector.load %arg7[%c0_171, %c1_172, %c0_173] : memref<18x18x16xf32, #tpu.memory_space<vmem>>, vector<8x8x4xf32>
    %112 = vector.shape_cast %111 : vector<8x8x4xf32> to vector<64x4xf32>
    %c0_174 = arith.constant 0 : index
    %c4_175 = arith.constant 4 : index
    %113 = vector.load %arg8[%c0_174, %c4_175] : memref<256x144xf32, #tpu.memory_space<vmem>>, vector<64x4xf32>
    tpu.vector_store %arg8[%c0_174, %c4_175], %112 {strides = array<i32>} : memref<256x144xf32, #tpu.memory_space<vmem>>, vector<64x4xf32>,
    %c0_176 = arith.constant 0 : index
    %c2_177 = arith.constant 2 : index
    %c0_178 = arith.constant 0 : index
    %114 = vector.load %arg7[%c0_176, %c2_177, %c0_178] : memref<18x18x16xf32, #tpu.memory_space<vmem>>, vector<8x8x4xf32>
    %115 = vector.shape_cast %114 : vector<8x8x4xf32> to vector<64x4xf32>
    %c0_179 = arith.constant 0 : index
    %c8_180 = arith.constant 8 : index
    %116 = vector.load %arg8[%c0_179, %c8_180] : memref<256x144xf32, #tpu.memory_space<vmem>>, vector<64x4xf32>
    tpu.vector_store %arg8[%c0_179, %c8_180], %115 {strides = array<i32>} : memref<256x144xf32, #tpu.memory_space<vmem>>, vector<64x4xf32>,
    %c1_181 = arith.constant 1 : index
    %c0_182 = arith.constant 0 : index
    %c0_183 = arith.constant 0 : index
    %117 = vector.load %arg7[%c1_181, %c0_182, %c0_183] : memref<18x18x16xf32, #tpu.memory_space<vmem>>, vector<8x8x4xf32>
    %118 = vector.shape_cast %117 : vector<8x8x4xf32> to vector<64x4xf32>
    %c0_184 = arith.constant 0 : index
    %c12_185 = arith.constant 12 : index
    %119 = vector.load %arg8[%c0_184, %c12_185] : memref<256x144xf32, #tpu.memory_space<vmem>>, vector<64x4xf32>
    tpu.vector_store %arg8[%c0_184, %c12_185], %118 {strides = array<i32>} : memref<256x144xf32, #tpu.memory_space<vmem>>, vector<64x4xf32>,
    %c1_186 = arith.constant 1 : index
    %c1_187 = arith.constant 1 : index
    %c0_188 = arith.constant 0 : index
    %120 = vector.load %arg7[%c1_186, %c1_187, %c0_188] : memref<18x18x16xf32, #tpu.memory_space<vmem>>, vector<8x8x4xf32>
    %121 = vector.shape_cast %120 : vector<8x8x4xf32> to vector<64x4xf32>
    %c0_189 = arith.constant 0 : index
    %c16_190 = arith.constant 16 : index
    %122 = vector.load %arg8[%c0_189, %c16_190] : memref<256x144xf32, #tpu.memory_space<vmem>>, vector<64x4xf32>
    tpu.vector_store %arg8[%c0_189, %c16_190], %121 {strides = array<i32>} : memref<256x144xf32, #tpu.memory_space<vmem>>, vector<64x4xf32>,
    %c1_191 = arith.constant 1 : index
    %c2_192 = arith.constant 2 : index
    %c0_193 = arith.constant 0 : index
    %123 = vector.load %arg7[%c1_191, %c2_192, %c0_193] : memref<18x18x16xf32, #tpu.memory_space<vmem>>, vector<8x8x4xf32>
    %124 = vector.shape_cast %123 : vector<8x8x4xf32> to vector<64x4xf32>
    %c0_194 = arith.constant 0 : index
    %c20_195 = arith.constant 20 : index
    %125 = vector.load %arg8[%c0_194, %c20_195] : memref<256x144xf32, #tpu.memory_space<vmem>>, vector<64x4xf32>
    tpu.vector_store %arg8[%c0_194, %c20_195], %124 {strides = array<i32>} : memref<256x144xf32, #tpu.memory_space<vmem>>, vector<64x4xf32>,
    %c2_196 = arith.constant 2 : index
    %c0_197 = arith.constant 0 : index
    %c0_198 = arith.constant 0 : index
    %126 = vector.load %arg7[%c2_196, %c0_197, %c0_198] : memref<18x18x16xf32, #tpu.memory_space<vmem>>, vector<8x8x4xf32>
    %127 = vector.shape_cast %126 : vector<8x8x4xf32> to vector<64x4xf32>
    %c0_199 = arith.constant 0 : index
    %c24_200 = arith.constant 24 : index
    %128 = vector.load %arg8[%c0_199, %c24_200] : memref<256x144xf32, #tpu.memory_space<vmem>>, vector<64x4xf32>
    tpu.vector_store %arg8[%c0_199, %c24_200], %127 {strides = array<i32>} : memref<256x144xf32, #tpu.memory_space<vmem>>, vector<64x4xf32>,
    %c2_201 = arith.constant 2 : index
    %c1_202 = arith.constant 1 : index
    %c0_203 = arith.constant 0 : index
    %129 = vector.load %arg7[%c2_201, %c1_202, %c0_203] : memref<18x18x16xf32, #tpu.memory_space<vmem>>, vector<8x8x4xf32>
    %130 = vector.shape_cast %129 : vector<8x8x4xf32> to vector<64x4xf32>
    %c0_204 = arith.constant 0 : index
    %c28_205 = arith.constant 28 : index
    %131 = vector.load %arg8[%c0_204, %c28_205] : memref<256x144xf32, #tpu.memory_space<vmem>>, vector<64x4xf32>
    tpu.vector_store %arg8[%c0_204, %c28_205], %130 {strides = array<i32>} : memref<256x144xf32, #tpu.memory_space<vmem>>, vector<64x4xf32>,
    %c2_206 = arith.constant 2 : index
    %c2_207 = arith.constant 2 : index
    %c0_208 = arith.constant 0 : index
    %132 = vector.load %arg7[%c2_206, %c2_207, %c0_208] : memref<18x18x16xf32, #tpu.memory_space<vmem>>, vector<8x8x4xf32>
    %133 = vector.shape_cast %132 : vector<8x8x4xf32> to vector<64x4xf32>
    %c0_209 = arith.constant 0 : index
    %c32_210 = arith.constant 32 : index
    %134 = vector.load %arg8[%c0_209, %c32_210] : memref<256x144xf32, #tpu.memory_space<vmem>>, vector<64x4xf32>
    tpu.vector_store %arg8[%c0_209, %c32_210], %133 {strides = array<i32>} : memref<256x144xf32, #tpu.memory_space<vmem>>, vector<64x4xf32>,
    %c0_211 = arith.constant 0 : index
    %c0_212 = arith.constant 0 : index
    %135 = vector.load %arg8[%c0_211, %c0_212] : memref<256x144xf32, #tpu.memory_space<vmem>>, vector<64x36xf32>
    %c2_213 = arith.constant 2 : index
    %c0_214 = arith.constant 0 : index
    %c0_215 = arith.constant 0 : index
    %136 = vector.load %arg2[%c2_213, %c0_214, %c0_215] : memref<6x144x16xf32, #tpu.memory_space<vmem>>, vector<1x36x8xf32>
    %137 = vector.shape_cast %136 : vector<1x36x8xf32> to vector<36x8xf32>
    %cst_216 = arith.constant dense<0.000000e+00> : vector<64x8xf32>
    %138 = tpu.matmul %135, %137, %cst_216 {dimension_numbers = #tpu.dot_dimension_numbers<[1], [0], [0], [1], [0, 0, 1, 1], [], []>} : vector<64x36xf32>, vector<36x8xf32>, vector<64x8xf32> -> vector<64x8xf32>
    %c2_217 = arith.constant 2 : index
    %c0_218 = arith.constant 0 : index
    %139 = vector.load %arg3[%c2_217, %c0_218] : memref<6x16xf32, #tpu.memory_space<vmem>>, vector<1x8xf32>
    %140 = vector.broadcast %139 : vector<1x8xf32> to vector<64x8xf32>
    %141 = arith.addf %138, %140 : vector<64x8xf32>
    %cst_219 = arith.constant 0.000000e+00 : f32
    %142 = vector.broadcast %cst_219 : f32 to vector<64x8xf32>
    %143 = arith.maximumf %141, %142 : vector<64x8xf32>
    %144 = vector.shape_cast %143 : vector<64x8xf32> to vector<8x8x8xf32>
    %cst_220 = arith.constant 0.000000e+00 : f32
    %145 = vector.broadcast %cst_220 : f32 to vector<1x10x8xf32>
    %cst_221 = arith.constant 0.000000e+00 : f32
    %146 = vector.broadcast %cst_221 : f32 to vector<10x1x8xf32>
    %c0_222 = arith.constant 0 : index
    %c0_223 = arith.constant 0 : index
    %c0_224 = arith.constant 0 : index
    %147 = vector.load %arg7[%c0_222, %c0_223, %c0_224] : memref<18x18x16xf32, #tpu.memory_space<vmem>>, vector<1x10x8xf32>
    tpu.vector_store %arg7[%c0_222, %c0_223, %c0_224], %145 {strides = array<i32>} : memref<18x18x16xf32, #tpu.memory_space<vmem>>, vector<1x10x8xf32>,
    %c9_225 = arith.constant 9 : index
    %c0_226 = arith.constant 0 : index
    %c0_227 = arith.constant 0 : index
    %148 = vector.load %arg7[%c9_225, %c0_226, %c0_227] : memref<18x18x16xf32, #tpu.memory_space<vmem>>, vector<1x10x8xf32>
    tpu.vector_store %arg7[%c9_225, %c0_226, %c0_227], %145 {strides = array<i32>} : memref<18x18x16xf32, #tpu.memory_space<vmem>>, vector<1x10x8xf32>,
    %c0_228 = arith.constant 0 : index
    %c0_229 = arith.constant 0 : index
    %c0_230 = arith.constant 0 : index
    %149 = vector.load %arg7[%c0_228, %c0_229, %c0_230] : memref<18x18x16xf32, #tpu.memory_space<vmem>>, vector<10x1x8xf32>
    tpu.vector_store %arg7[%c0_228, %c0_229, %c0_230], %146 {strides = array<i32>} : memref<18x18x16xf32, #tpu.memory_space<vmem>>, vector<10x1x8xf32>,
    %c0_231 = arith.constant 0 : index
    %c9_232 = arith.constant 9 : index
    %c0_233 = arith.constant 0 : index
    %150 = vector.load %arg7[%c0_231, %c9_232, %c0_233] : memref<18x18x16xf32, #tpu.memory_space<vmem>>, vector<10x1x8xf32>
    tpu.vector_store %arg7[%c0_231, %c9_232, %c0_233], %146 {strides = array<i32>} : memref<18x18x16xf32, #tpu.memory_space<vmem>>, vector<10x1x8xf32>,
    %c1_234 = arith.constant 1 : index
    %c1_235 = arith.constant 1 : index
    %c0_236 = arith.constant 0 : index
    %151 = vector.load %arg7[%c1_234, %c1_235, %c0_236] : memref<18x18x16xf32, #tpu.memory_space<vmem>>, vector<8x8x8xf32>
    tpu.vector_store %arg7[%c1_234, %c1_235, %c0_236], %144 {strides = array<i32>} : memref<18x18x16xf32, #tpu.memory_space<vmem>>, vector<8x8x8xf32>,
    %c0_237 = arith.constant 0 : index
    %c0_238 = arith.constant 0 : index
    %c0_239 = arith.constant 0 : index
    %152 = vector.load %arg7[%c0_237, %c0_238, %c0_239] : memref<18x18x16xf32, #tpu.memory_space<vmem>>, vector<8x8x8xf32>
    %153 = vector.shape_cast %152 : vector<8x8x8xf32> to vector<64x8xf32>
    %c0_240 = arith.constant 0 : index
    %c0_241 = arith.constant 0 : index
    %154 = vector.load %arg8[%c0_240, %c0_241] : memref<256x144xf32, #tpu.memory_space<vmem>>, vector<64x8xf32>
    tpu.vector_store %arg8[%c0_240, %c0_241], %153 {strides = array<i32>} : memref<256x144xf32, #tpu.memory_space<vmem>>, vector<64x8xf32>,
    %c0_242 = arith.constant 0 : index
    %c1_243 = arith.constant 1 : index
    %c0_244 = arith.constant 0 : index
    %155 = vector.load %arg7[%c0_242, %c1_243, %c0_244] : memref<18x18x16xf32, #tpu.memory_space<vmem>>, vector<8x8x8xf32>
    %156 = vector.shape_cast %155 : vector<8x8x8xf32> to vector<64x8xf32>
    %c0_245 = arith.constant 0 : index
    %c8_246 = arith.constant 8 : index
    %157 = vector.load %arg8[%c0_245, %c8_246] : memref<256x144xf32, #tpu.memory_space<vmem>>, vector<64x8xf32>
    tpu.vector_store %arg8[%c0_245, %c8_246], %156 {strides = array<i32>} : memref<256x144xf32, #tpu.memory_space<vmem>>, vector<64x8xf32>,
    %c0_247 = arith.constant 0 : index
    %c2_248 = arith.constant 2 : index
    %c0_249 = arith.constant 0 : index
    %158 = vector.load %arg7[%c0_247, %c2_248, %c0_249] : memref<18x18x16xf32, #tpu.memory_space<vmem>>, vector<8x8x8xf32>
    %159 = vector.shape_cast %158 : vector<8x8x8xf32> to vector<64x8xf32>
    %c0_250 = arith.constant 0 : index
    %c16_251 = arith.constant 16 : index
    %160 = vector.load %arg8[%c0_250, %c16_251] : memref<256x144xf32, #tpu.memory_space<vmem>>, vector<64x8xf32>
    tpu.vector_store %arg8[%c0_250, %c16_251], %159 {strides = array<i32>} : memref<256x144xf32, #tpu.memory_space<vmem>>, vector<64x8xf32>,
    %c1_252 = arith.constant 1 : index
    %c0_253 = arith.constant 0 : index
    %c0_254 = arith.constant 0 : index
    %161 = vector.load %arg7[%c1_252, %c0_253, %c0_254] : memref<18x18x16xf32, #tpu.memory_space<vmem>>, vector<8x8x8xf32>
    %162 = vector.shape_cast %161 : vector<8x8x8xf32> to vector<64x8xf32>
    %c0_255 = arith.constant 0 : index
    %c24_256 = arith.constant 24 : index
    %163 = vector.load %arg8[%c0_255, %c24_256] : memref<256x144xf32, #tpu.memory_space<vmem>>, vector<64x8xf32>
    tpu.vector_store %arg8[%c0_255, %c24_256], %162 {strides = array<i32>} : memref<256x144xf32, #tpu.memory_space<vmem>>, vector<64x8xf32>,
    %c1_257 = arith.constant 1 : index
    %c1_258 = arith.constant 1 : index
    %c0_259 = arith.constant 0 : index
    %164 = vector.load %arg7[%c1_257, %c1_258, %c0_259] : memref<18x18x16xf32, #tpu.memory_space<vmem>>, vector<8x8x8xf32>
    %165 = vector.shape_cast %164 : vector<8x8x8xf32> to vector<64x8xf32>
    %c0_260 = arith.constant 0 : index
    %c32_261 = arith.constant 32 : index
    %166 = vector.load %arg8[%c0_260, %c32_261] : memref<256x144xf32, #tpu.memory_space<vmem>>, vector<64x8xf32>
    tpu.vector_store %arg8[%c0_260, %c32_261], %165 {strides = array<i32>} : memref<256x144xf32, #tpu.memory_space<vmem>>, vector<64x8xf32>,
    %c1_262 = arith.constant 1 : index
    %c2_263 = arith.constant 2 : index
    %c0_264 = arith.constant 0 : index
    %167 = vector.load %arg7[%c1_262, %c2_263, %c0_264] : memref<18x18x16xf32, #tpu.memory_space<vmem>>, vector<8x8x8xf32>
    %168 = vector.shape_cast %167 : vector<8x8x8xf32> to vector<64x8xf32>
    %c0_265 = arith.constant 0 : index
    %c40 = arith.constant 40 : index
    %169 = vector.load %arg8[%c0_265, %c40] : memref<256x144xf32, #tpu.memory_space<vmem>>, vector<64x8xf32>
    tpu.vector_store %arg8[%c0_265, %c40], %168 {strides = array<i32>} : memref<256x144xf32, #tpu.memory_space<vmem>>, vector<64x8xf32>,
    %c2_266 = arith.constant 2 : index
    %c0_267 = arith.constant 0 : index
    %c0_268 = arith.constant 0 : index
    %170 = vector.load %arg7[%c2_266, %c0_267, %c0_268] : memref<18x18x16xf32, #tpu.memory_space<vmem>>, vector<8x8x8xf32>
    %171 = vector.shape_cast %170 : vector<8x8x8xf32> to vector<64x8xf32>
    %c0_269 = arith.constant 0 : index
    %c48 = arith.constant 48 : index
    %172 = vector.load %arg8[%c0_269, %c48] : memref<256x144xf32, #tpu.memory_space<vmem>>, vector<64x8xf32>
    tpu.vector_store %arg8[%c0_269, %c48], %171 {strides = array<i32>} : memref<256x144xf32, #tpu.memory_space<vmem>>, vector<64x8xf32>,
    %c2_270 = arith.constant 2 : index
    %c1_271 = arith.constant 1 : index
    %c0_272 = arith.constant 0 : index
    %173 = vector.load %arg7[%c2_270, %c1_271, %c0_272] : memref<18x18x16xf32, #tpu.memory_space<vmem>>, vector<8x8x8xf32>
    %174 = vector.shape_cast %173 : vector<8x8x8xf32> to vector<64x8xf32>
    %c0_273 = arith.constant 0 : index
    %c56 = arith.constant 56 : index
    %175 = vector.load %arg8[%c0_273, %c56] : memref<256x144xf32, #tpu.memory_space<vmem>>, vector<64x8xf32>
    tpu.vector_store %arg8[%c0_273, %c56], %174 {strides = array<i32>} : memref<256x144xf32, #tpu.memory_space<vmem>>, vector<64x8xf32>,
    %c2_274 = arith.constant 2 : index
    %c2_275 = arith.constant 2 : index
    %c0_276 = arith.constant 0 : index
    %176 = vector.load %arg7[%c2_274, %c2_275, %c0_276] : memref<18x18x16xf32, #tpu.memory_space<vmem>>, vector<8x8x8xf32>
    %177 = vector.shape_cast %176 : vector<8x8x8xf32> to vector<64x8xf32>
    %c0_277 = arith.constant 0 : index
    %c64 = arith.constant 64 : index
    %178 = vector.load %arg8[%c0_277, %c64] : memref<256x144xf32, #tpu.memory_space<vmem>>, vector<64x8xf32>
    tpu.vector_store %arg8[%c0_277, %c64], %177 {strides = array<i32>} : memref<256x144xf32, #tpu.memory_space<vmem>>, vector<64x8xf32>,
    %c0_278 = arith.constant 0 : index
    %c0_279 = arith.constant 0 : index
    %179 = vector.load %arg8[%c0_278, %c0_279] : memref<256x144xf32, #tpu.memory_space<vmem>>, vector<64x72xf32>
    %c3_280 = arith.constant 3 : index
    %c0_281 = arith.constant 0 : index
    %c0_282 = arith.constant 0 : index
    %180 = vector.load %arg2[%c3_280, %c0_281, %c0_282] : memref<6x144x16xf32, #tpu.memory_space<vmem>>, vector<1x72x8xf32>
    %181 = vector.shape_cast %180 : vector<1x72x8xf32> to vector<72x8xf32>
    %cst_283 = arith.constant dense<0.000000e+00> : vector<64x8xf32>
    %182 = tpu.matmul %179, %181, %cst_283 {dimension_numbers = #tpu.dot_dimension_numbers<[1], [0], [0], [1], [0, 0, 1, 1], [], []>} : vector<64x72xf32>, vector<72x8xf32>, vector<64x8xf32> -> vector<64x8xf32>
    %c3_284 = arith.constant 3 : index
    %c0_285 = arith.constant 0 : index
    %183 = vector.load %arg3[%c3_284, %c0_285] : memref<6x16xf32, #tpu.memory_space<vmem>>, vector<1x8xf32>
    %184 = vector.broadcast %183 : vector<1x8xf32> to vector<64x8xf32>
    %185 = arith.addf %182, %184 : vector<64x8xf32>
    %cst_286 = arith.constant 0.000000e+00 : f32
    %186 = vector.broadcast %cst_286 : f32 to vector<64x8xf32>
    %187 = arith.maximumf %185, %186 : vector<64x8xf32>
    %c0_287 = arith.constant 0 : index
    %c0_288 = arith.constant 0 : index
    %c0_289 = arith.constant 0 : index
    %188 = vector.load %arg5[%c0_287, %c0_288, %c0_289] : memref<1x64x8xf32, #tpu.memory_space<vmem>>, vector<1x64x8xf32>
    %189 = vector.shape_cast %188 : vector<1x64x8xf32> to vector<64x8xf32>
    %190 = vector.shape_cast %187 : vector<64x8xf32> to vector<1x64x8xf32>
    tpu.vector_store %arg5[%c0_287, %c0_288, %c0_289], %190 {strides = array<i32>} : memref<1x64x8xf32, #tpu.memory_space<vmem>>, vector<1x64x8xf32>,
    %191 = vector.shape_cast %187 : vector<64x8xf32> to vector<8x8x8xf32>
    %c0_290 = arith.constant 0 : index
    %c0_291 = arith.constant 0 : index
    %c0_292 = arith.constant 0 : index
    %192 = vector.load %arg7[%c0_290, %c0_291, %c0_292] : memref<18x18x16xf32, #tpu.memory_space<vmem>>, vector<8x8x8xf32>
    tpu.vector_store %arg7[%c0_290, %c0_291, %c0_292], %191 {strides = array<i32>} : memref<18x18x16xf32, #tpu.memory_space<vmem>>, vector<8x8x8xf32>,
    %c0_293 = arith.constant 0 : index
    %c0_294 = arith.constant 0 : index
    %c0_295 = arith.constant 0 : index
    %193 = tpu.strided_load %arg7[%c0_293, %c0_294, %c0_295] {strides = array<i32: 2, 1, 1>} : memref<18x18x16xf32, #tpu.memory_space<vmem>>, vector<4x8x8xf32>
    %c1_296 = arith.constant 1 : index
    %c0_297 = arith.constant 0 : index
    %c0_298 = arith.constant 0 : index
    %194 = tpu.strided_load %arg7[%c1_296, %c0_297, %c0_298] {strides = array<i32: 2, 1, 1>} : memref<18x18x16xf32, #tpu.memory_space<vmem>>, vector<4x8x8xf32>
    %195 = arith.maximumf %193, %194 : vector<4x8x8xf32>
    %c0_299 = arith.constant 0 : index
    %c0_300 = arith.constant 0 : index
    %c0_301 = arith.constant 0 : index
    %196 = vector.load %arg7[%c0_299, %c0_300, %c0_301] : memref<18x18x16xf32, #tpu.memory_space<vmem>>, vector<4x8x8xf32>
    tpu.vector_store %arg7[%c0_299, %c0_300, %c0_301], %195 {strides = array<i32>} : memref<18x18x16xf32, #tpu.memory_space<vmem>>, vector<4x8x8xf32>,
    %c0_302 = arith.constant 0 : index
    %c0_303 = arith.constant 0 : index
    %c0_304 = arith.constant 0 : index
    %197 = tpu.strided_load %arg7[%c0_302, %c0_303, %c0_304] {strides = array<i32: 1, 2, 1>} : memref<18x18x16xf32, #tpu.memory_space<vmem>>, vector<4x4x8xf32>
    %c0_305 = arith.constant 0 : index
    %c1_306 = arith.constant 1 : index
    %c0_307 = arith.constant 0 : index
    %198 = tpu.strided_load %arg7[%c0_305, %c1_306, %c0_307] {strides = array<i32: 1, 2, 1>} : memref<18x18x16xf32, #tpu.memory_space<vmem>>, vector<4x4x8xf32>
    %199 = arith.maximumf %197, %198 : vector<4x4x8xf32>
    %cst_308 = arith.constant 0.000000e+00 : f32
    %200 = vector.broadcast %cst_308 : f32 to vector<1x6x8xf32>
    %cst_309 = arith.constant 0.000000e+00 : f32
    %201 = vector.broadcast %cst_309 : f32 to vector<6x1x8xf32>
    %c0_310 = arith.constant 0 : index
    %c0_311 = arith.constant 0 : index
    %c0_312 = arith.constant 0 : index
    %202 = vector.load %arg7[%c0_310, %c0_311, %c0_312] : memref<18x18x16xf32, #tpu.memory_space<vmem>>, vector<1x6x8xf32>
    tpu.vector_store %arg7[%c0_310, %c0_311, %c0_312], %200 {strides = array<i32>} : memref<18x18x16xf32, #tpu.memory_space<vmem>>, vector<1x6x8xf32>,
    %c5_313 = arith.constant 5 : index
    %c0_314 = arith.constant 0 : index
    %c0_315 = arith.constant 0 : index
    %203 = vector.load %arg7[%c5_313, %c0_314, %c0_315] : memref<18x18x16xf32, #tpu.memory_space<vmem>>, vector<1x6x8xf32>
    tpu.vector_store %arg7[%c5_313, %c0_314, %c0_315], %200 {strides = array<i32>} : memref<18x18x16xf32, #tpu.memory_space<vmem>>, vector<1x6x8xf32>,
    %c0_316 = arith.constant 0 : index
    %c0_317 = arith.constant 0 : index
    %c0_318 = arith.constant 0 : index
    %204 = vector.load %arg7[%c0_316, %c0_317, %c0_318] : memref<18x18x16xf32, #tpu.memory_space<vmem>>, vector<6x1x8xf32>
    tpu.vector_store %arg7[%c0_316, %c0_317, %c0_318], %201 {strides = array<i32>} : memref<18x18x16xf32, #tpu.memory_space<vmem>>, vector<6x1x8xf32>,
    %c0_319 = arith.constant 0 : index
    %c5_320 = arith.constant 5 : index
    %c0_321 = arith.constant 0 : index
    %205 = vector.load %arg7[%c0_319, %c5_320, %c0_321] : memref<18x18x16xf32, #tpu.memory_space<vmem>>, vector<6x1x8xf32>
    tpu.vector_store %arg7[%c0_319, %c5_320, %c0_321], %201 {strides = array<i32>} : memref<18x18x16xf32, #tpu.memory_space<vmem>>, vector<6x1x8xf32>,
    %c1_322 = arith.constant 1 : index
    %c1_323 = arith.constant 1 : index
    %c0_324 = arith.constant 0 : index
    %206 = vector.load %arg7[%c1_322, %c1_323, %c0_324] : memref<18x18x16xf32, #tpu.memory_space<vmem>>, vector<4x4x8xf32>
    tpu.vector_store %arg7[%c1_322, %c1_323, %c0_324], %199 {strides = array<i32>} : memref<18x18x16xf32, #tpu.memory_space<vmem>>, vector<4x4x8xf32>,
    %c0_325 = arith.constant 0 : index
    %c0_326 = arith.constant 0 : index
    %c0_327 = arith.constant 0 : index
    %207 = vector.load %arg7[%c0_325, %c0_326, %c0_327] : memref<18x18x16xf32, #tpu.memory_space<vmem>>, vector<4x4x8xf32>
    %208 = vector.shape_cast %207 : vector<4x4x8xf32> to vector<16x8xf32>
    %c0_328 = arith.constant 0 : index
    %c0_329 = arith.constant 0 : index
    %209 = vector.load %arg8[%c0_328, %c0_329] : memref<256x144xf32, #tpu.memory_space<vmem>>, vector<16x8xf32>
    tpu.vector_store %arg8[%c0_328, %c0_329], %208 {strides = array<i32>} : memref<256x144xf32, #tpu.memory_space<vmem>>, vector<16x8xf32>,
    %c0_330 = arith.constant 0 : index
    %c1_331 = arith.constant 1 : index
    %c0_332 = arith.constant 0 : index
    %210 = vector.load %arg7[%c0_330, %c1_331, %c0_332] : memref<18x18x16xf32, #tpu.memory_space<vmem>>, vector<4x4x8xf32>
    %211 = vector.shape_cast %210 : vector<4x4x8xf32> to vector<16x8xf32>
    %c0_333 = arith.constant 0 : index
    %c8_334 = arith.constant 8 : index
    %212 = vector.load %arg8[%c0_333, %c8_334] : memref<256x144xf32, #tpu.memory_space<vmem>>, vector<16x8xf32>
    tpu.vector_store %arg8[%c0_333, %c8_334], %211 {strides = array<i32>} : memref<256x144xf32, #tpu.memory_space<vmem>>, vector<16x8xf32>,
    %c0_335 = arith.constant 0 : index
    %c2_336 = arith.constant 2 : index
    %c0_337 = arith.constant 0 : index
    %213 = vector.load %arg7[%c0_335, %c2_336, %c0_337] : memref<18x18x16xf32, #tpu.memory_space<vmem>>, vector<4x4x8xf32>
    %214 = vector.shape_cast %213 : vector<4x4x8xf32> to vector<16x8xf32>
    %c0_338 = arith.constant 0 : index
    %c16_339 = arith.constant 16 : index
    %215 = vector.load %arg8[%c0_338, %c16_339] : memref<256x144xf32, #tpu.memory_space<vmem>>, vector<16x8xf32>
    tpu.vector_store %arg8[%c0_338, %c16_339], %214 {strides = array<i32>} : memref<256x144xf32, #tpu.memory_space<vmem>>, vector<16x8xf32>,
    %c1_340 = arith.constant 1 : index
    %c0_341 = arith.constant 0 : index
    %c0_342 = arith.constant 0 : index
    %216 = vector.load %arg7[%c1_340, %c0_341, %c0_342] : memref<18x18x16xf32, #tpu.memory_space<vmem>>, vector<4x4x8xf32>
    %217 = vector.shape_cast %216 : vector<4x4x8xf32> to vector<16x8xf32>
    %c0_343 = arith.constant 0 : index
    %c24_344 = arith.constant 24 : index
    %218 = vector.load %arg8[%c0_343, %c24_344] : memref<256x144xf32, #tpu.memory_space<vmem>>, vector<16x8xf32>
    tpu.vector_store %arg8[%c0_343, %c24_344], %217 {strides = array<i32>} : memref<256x144xf32, #tpu.memory_space<vmem>>, vector<16x8xf32>,
    %c1_345 = arith.constant 1 : index
    %c1_346 = arith.constant 1 : index
    %c0_347 = arith.constant 0 : index
    %219 = vector.load %arg7[%c1_345, %c1_346, %c0_347] : memref<18x18x16xf32, #tpu.memory_space<vmem>>, vector<4x4x8xf32>
    %220 = vector.shape_cast %219 : vector<4x4x8xf32> to vector<16x8xf32>
    %c0_348 = arith.constant 0 : index
    %c32_349 = arith.constant 32 : index
    %221 = vector.load %arg8[%c0_348, %c32_349] : memref<256x144xf32, #tpu.memory_space<vmem>>, vector<16x8xf32>
    tpu.vector_store %arg8[%c0_348, %c32_349], %220 {strides = array<i32>} : memref<256x144xf32, #tpu.memory_space<vmem>>, vector<16x8xf32>,
    %c1_350 = arith.constant 1 : index
    %c2_351 = arith.constant 2 : index
    %c0_352 = arith.constant 0 : index
    %222 = vector.load %arg7[%c1_350, %c2_351, %c0_352] : memref<18x18x16xf32, #tpu.memory_space<vmem>>, vector<4x4x8xf32>
    %223 = vector.shape_cast %222 : vector<4x4x8xf32> to vector<16x8xf32>
    %c0_353 = arith.constant 0 : index
    %c40_354 = arith.constant 40 : index
    %224 = vector.load %arg8[%c0_353, %c40_354] : memref<256x144xf32, #tpu.memory_space<vmem>>, vector<16x8xf32>
    tpu.vector_store %arg8[%c0_353, %c40_354], %223 {strides = array<i32>} : memref<256x144xf32, #tpu.memory_space<vmem>>, vector<16x8xf32>,
    %c2_355 = arith.constant 2 : index
    %c0_356 = arith.constant 0 : index
    %c0_357 = arith.constant 0 : index
    %225 = vector.load %arg7[%c2_355, %c0_356, %c0_357] : memref<18x18x16xf32, #tpu.memory_space<vmem>>, vector<4x4x8xf32>
    %226 = vector.shape_cast %225 : vector<4x4x8xf32> to vector<16x8xf32>
    %c0_358 = arith.constant 0 : index
    %c48_359 = arith.constant 48 : index
    %227 = vector.load %arg8[%c0_358, %c48_359] : memref<256x144xf32, #tpu.memory_space<vmem>>, vector<16x8xf32>
    tpu.vector_store %arg8[%c0_358, %c48_359], %226 {strides = array<i32>} : memref<256x144xf32, #tpu.memory_space<vmem>>, vector<16x8xf32>,
    %c2_360 = arith.constant 2 : index
    %c1_361 = arith.constant 1 : index
    %c0_362 = arith.constant 0 : index
    %228 = vector.load %arg7[%c2_360, %c1_361, %c0_362] : memref<18x18x16xf32, #tpu.memory_space<vmem>>, vector<4x4x8xf32>
    %229 = vector.shape_cast %228 : vector<4x4x8xf32> to vector<16x8xf32>
    %c0_363 = arith.constant 0 : index
    %c56_364 = arith.constant 56 : index
    %230 = vector.load %arg8[%c0_363, %c56_364] : memref<256x144xf32, #tpu.memory_space<vmem>>, vector<16x8xf32>
    tpu.vector_store %arg8[%c0_363, %c56_364], %229 {strides = array<i32>} : memref<256x144xf32, #tpu.memory_space<vmem>>, vector<16x8xf32>,
    %c2_365 = arith.constant 2 : index
    %c2_366 = arith.constant 2 : index
    %c0_367 = arith.constant 0 : index
    %231 = vector.load %arg7[%c2_365, %c2_366, %c0_367] : memref<18x18x16xf32, #tpu.memory_space<vmem>>, vector<4x4x8xf32>
    %232 = vector.shape_cast %231 : vector<4x4x8xf32> to vector<16x8xf32>
    %c0_368 = arith.constant 0 : index
    %c64_369 = arith.constant 64 : index
    %233 = vector.load %arg8[%c0_368, %c64_369] : memref<256x144xf32, #tpu.memory_space<vmem>>, vector<16x8xf32>
    tpu.vector_store %arg8[%c0_368, %c64_369], %232 {strides = array<i32>} : memref<256x144xf32, #tpu.memory_space<vmem>>, vector<16x8xf32>,
    %c0_370 = arith.constant 0 : index
    %c0_371 = arith.constant 0 : index
    %234 = vector.load %arg8[%c0_370, %c0_371] : memref<256x144xf32, #tpu.memory_space<vmem>>, vector<16x72xf32>
    %c4_372 = arith.constant 4 : index
    %c0_373 = arith.constant 0 : index
    %c0_374 = arith.constant 0 : index
    %235 = vector.load %arg2[%c4_372, %c0_373, %c0_374] : memref<6x144x16xf32, #tpu.memory_space<vmem>>, vector<1x72x16xf32>
    %236 = vector.shape_cast %235 : vector<1x72x16xf32> to vector<72x16xf32>
    %cst_375 = arith.constant dense<0.000000e+00> : vector<16x16xf32>
    %237 = tpu.matmul %234, %236, %cst_375 {dimension_numbers = #tpu.dot_dimension_numbers<[1], [0], [0], [1], [0, 0, 1, 1], [], []>} : vector<16x72xf32>, vector<72x16xf32>, vector<16x16xf32> -> vector<16x16xf32>
    %c4_376 = arith.constant 4 : index
    %c0_377 = arith.constant 0 : index
    %238 = vector.load %arg3[%c4_376, %c0_377] : memref<6x16xf32, #tpu.memory_space<vmem>>, vector<1x16xf32>
    %239 = vector.broadcast %238 : vector<1x16xf32> to vector<16x16xf32>
    %240 = arith.addf %237, %239 : vector<16x16xf32>
    %cst_378 = arith.constant 0.000000e+00 : f32
    %241 = vector.broadcast %cst_378 : f32 to vector<16x16xf32>
    %242 = arith.maximumf %240, %241 : vector<16x16xf32>
    %243 = vector.shape_cast %242 : vector<16x16xf32> to vector<4x4x16xf32>
    %cst_379 = arith.constant 0.000000e+00 : f32
    %244 = vector.broadcast %cst_379 : f32 to vector<1x6x16xf32>
    %cst_380 = arith.constant 0.000000e+00 : f32
    %245 = vector.broadcast %cst_380 : f32 to vector<6x1x16xf32>
    %c0_381 = arith.constant 0 : index
    %c0_382 = arith.constant 0 : index
    %c0_383 = arith.constant 0 : index
    %246 = vector.load %arg7[%c0_381, %c0_382, %c0_383] : memref<18x18x16xf32, #tpu.memory_space<vmem>>, vector<1x6x16xf32>
    tpu.vector_store %arg7[%c0_381, %c0_382, %c0_383], %244 {strides = array<i32>} : memref<18x18x16xf32, #tpu.memory_space<vmem>>, vector<1x6x16xf32>,
    %c5_384 = arith.constant 5 : index
    %c0_385 = arith.constant 0 : index
    %c0_386 = arith.constant 0 : index
    %247 = vector.load %arg7[%c5_384, %c0_385, %c0_386] : memref<18x18x16xf32, #tpu.memory_space<vmem>>, vector<1x6x16xf32>
    tpu.vector_store %arg7[%c5_384, %c0_385, %c0_386], %244 {strides = array<i32>} : memref<18x18x16xf32, #tpu.memory_space<vmem>>, vector<1x6x16xf32>,
    %c0_387 = arith.constant 0 : index
    %c0_388 = arith.constant 0 : index
    %c0_389 = arith.constant 0 : index
    %248 = vector.load %arg7[%c0_387, %c0_388, %c0_389] : memref<18x18x16xf32, #tpu.memory_space<vmem>>, vector<6x1x16xf32>
    tpu.vector_store %arg7[%c0_387, %c0_388, %c0_389], %245 {strides = array<i32>} : memref<18x18x16xf32, #tpu.memory_space<vmem>>, vector<6x1x16xf32>,
    %c0_390 = arith.constant 0 : index
    %c5_391 = arith.constant 5 : index
    %c0_392 = arith.constant 0 : index
    %249 = vector.load %arg7[%c0_390, %c5_391, %c0_392] : memref<18x18x16xf32, #tpu.memory_space<vmem>>, vector<6x1x16xf32>
    tpu.vector_store %arg7[%c0_390, %c5_391, %c0_392], %245 {strides = array<i32>} : memref<18x18x16xf32, #tpu.memory_space<vmem>>, vector<6x1x16xf32>,
    %c1_393 = arith.constant 1 : index
    %c1_394 = arith.constant 1 : index
    %c0_395 = arith.constant 0 : index
    %250 = vector.load %arg7[%c1_393, %c1_394, %c0_395] : memref<18x18x16xf32, #tpu.memory_space<vmem>>, vector<4x4x16xf32>
    tpu.vector_store %arg7[%c1_393, %c1_394, %c0_395], %243 {strides = array<i32>} : memref<18x18x16xf32, #tpu.memory_space<vmem>>, vector<4x4x16xf32>,
    %c0_396 = arith.constant 0 : index
    %c0_397 = arith.constant 0 : index
    %c0_398 = arith.constant 0 : index
    %251 = vector.load %arg7[%c0_396, %c0_397, %c0_398] : memref<18x18x16xf32, #tpu.memory_space<vmem>>, vector<4x4x16xf32>
    %252 = vector.shape_cast %251 : vector<4x4x16xf32> to vector<16x16xf32>
    %c0_399 = arith.constant 0 : index
    %c0_400 = arith.constant 0 : index
    %253 = vector.load %arg8[%c0_399, %c0_400] : memref<256x144xf32, #tpu.memory_space<vmem>>, vector<16x16xf32>
    tpu.vector_store %arg8[%c0_399, %c0_400], %252 {strides = array<i32>} : memref<256x144xf32, #tpu.memory_space<vmem>>, vector<16x16xf32>,
    %c0_401 = arith.constant 0 : index
    %c1_402 = arith.constant 1 : index
    %c0_403 = arith.constant 0 : index
    %254 = vector.load %arg7[%c0_401, %c1_402, %c0_403] : memref<18x18x16xf32, #tpu.memory_space<vmem>>, vector<4x4x16xf32>
    %255 = vector.shape_cast %254 : vector<4x4x16xf32> to vector<16x16xf32>
    %c0_404 = arith.constant 0 : index
    %c16_405 = arith.constant 16 : index
    %256 = vector.load %arg8[%c0_404, %c16_405] : memref<256x144xf32, #tpu.memory_space<vmem>>, vector<16x16xf32>
    tpu.vector_store %arg8[%c0_404, %c16_405], %255 {strides = array<i32>} : memref<256x144xf32, #tpu.memory_space<vmem>>, vector<16x16xf32>,
    %c0_406 = arith.constant 0 : index
    %c2_407 = arith.constant 2 : index
    %c0_408 = arith.constant 0 : index
    %257 = vector.load %arg7[%c0_406, %c2_407, %c0_408] : memref<18x18x16xf32, #tpu.memory_space<vmem>>, vector<4x4x16xf32>
    %258 = vector.shape_cast %257 : vector<4x4x16xf32> to vector<16x16xf32>
    %c0_409 = arith.constant 0 : index
    %c32_410 = arith.constant 32 : index
    %259 = vector.load %arg8[%c0_409, %c32_410] : memref<256x144xf32, #tpu.memory_space<vmem>>, vector<16x16xf32>
    tpu.vector_store %arg8[%c0_409, %c32_410], %258 {strides = array<i32>} : memref<256x144xf32, #tpu.memory_space<vmem>>, vector<16x16xf32>,
    %c1_411 = arith.constant 1 : index
    %c0_412 = arith.constant 0 : index
    %c0_413 = arith.constant 0 : index
    %260 = vector.load %arg7[%c1_411, %c0_412, %c0_413] : memref<18x18x16xf32, #tpu.memory_space<vmem>>, vector<4x4x16xf32>
    %261 = vector.shape_cast %260 : vector<4x4x16xf32> to vector<16x16xf32>
    %c0_414 = arith.constant 0 : index
    %c48_415 = arith.constant 48 : index
    %262 = vector.load %arg8[%c0_414, %c48_415] : memref<256x144xf32, #tpu.memory_space<vmem>>, vector<16x16xf32>
    tpu.vector_store %arg8[%c0_414, %c48_415], %261 {strides = array<i32>} : memref<256x144xf32, #tpu.memory_space<vmem>>, vector<16x16xf32>,
    %c1_416 = arith.constant 1 : index
    %c1_417 = arith.constant 1 : index
    %c0_418 = arith.constant 0 : index
    %263 = vector.load %arg7[%c1_416, %c1_417, %c0_418] : memref<18x18x16xf32, #tpu.memory_space<vmem>>, vector<4x4x16xf32>
    %264 = vector.shape_cast %263 : vector<4x4x16xf32> to vector<16x16xf32>
    %c0_419 = arith.constant 0 : index
    %c64_420 = arith.constant 64 : index
    %265 = vector.load %arg8[%c0_419, %c64_420] : memref<256x144xf32, #tpu.memory_space<vmem>>, vector<16x16xf32>
    tpu.vector_store %arg8[%c0_419, %c64_420], %264 {strides = array<i32>} : memref<256x144xf32, #tpu.memory_space<vmem>>, vector<16x16xf32>,
    %c1_421 = arith.constant 1 : index
    %c2_422 = arith.constant 2 : index
    %c0_423 = arith.constant 0 : index
    %266 = vector.load %arg7[%c1_421, %c2_422, %c0_423] : memref<18x18x16xf32, #tpu.memory_space<vmem>>, vector<4x4x16xf32>
    %267 = vector.shape_cast %266 : vector<4x4x16xf32> to vector<16x16xf32>
    %c0_424 = arith.constant 0 : index
    %c80 = arith.constant 80 : index
    %268 = vector.load %arg8[%c0_424, %c80] : memref<256x144xf32, #tpu.memory_space<vmem>>, vector<16x16xf32>
    tpu.vector_store %arg8[%c0_424, %c80], %267 {strides = array<i32>} : memref<256x144xf32, #tpu.memory_space<vmem>>, vector<16x16xf32>,
    %c2_425 = arith.constant 2 : index
    %c0_426 = arith.constant 0 : index
    %c0_427 = arith.constant 0 : index
    %269 = vector.load %arg7[%c2_425, %c0_426, %c0_427] : memref<18x18x16xf32, #tpu.memory_space<vmem>>, vector<4x4x16xf32>
    %270 = vector.shape_cast %269 : vector<4x4x16xf32> to vector<16x16xf32>
    %c0_428 = arith.constant 0 : index
    %c96 = arith.constant 96 : index
    %271 = vector.load %arg8[%c0_428, %c96] : memref<256x144xf32, #tpu.memory_space<vmem>>, vector<16x16xf32>
    tpu.vector_store %arg8[%c0_428, %c96], %270 {strides = array<i32>} : memref<256x144xf32, #tpu.memory_space<vmem>>, vector<16x16xf32>,
    %c2_429 = arith.constant 2 : index
    %c1_430 = arith.constant 1 : index
    %c0_431 = arith.constant 0 : index
    %272 = vector.load %arg7[%c2_429, %c1_430, %c0_431] : memref<18x18x16xf32, #tpu.memory_space<vmem>>, vector<4x4x16xf32>
    %273 = vector.shape_cast %272 : vector<4x4x16xf32> to vector<16x16xf32>
    %c0_432 = arith.constant 0 : index
    %c112 = arith.constant 112 : index
    %274 = vector.load %arg8[%c0_432, %c112] : memref<256x144xf32, #tpu.memory_space<vmem>>, vector<16x16xf32>
    tpu.vector_store %arg8[%c0_432, %c112], %273 {strides = array<i32>} : memref<256x144xf32, #tpu.memory_space<vmem>>, vector<16x16xf32>,
    %c2_433 = arith.constant 2 : index
    %c2_434 = arith.constant 2 : index
    %c0_435 = arith.constant 0 : index
    %275 = vector.load %arg7[%c2_433, %c2_434, %c0_435] : memref<18x18x16xf32, #tpu.memory_space<vmem>>, vector<4x4x16xf32>
    %276 = vector.shape_cast %275 : vector<4x4x16xf32> to vector<16x16xf32>
    %c0_436 = arith.constant 0 : index
    %c128 = arith.constant 128 : index
    %277 = vector.load %arg8[%c0_436, %c128] : memref<256x144xf32, #tpu.memory_space<vmem>>, vector<16x16xf32>
    tpu.vector_store %arg8[%c0_436, %c128], %276 {strides = array<i32>} : memref<256x144xf32, #tpu.memory_space<vmem>>, vector<16x16xf32>,
    %c0_437 = arith.constant 0 : index
    %c0_438 = arith.constant 0 : index
    %278 = vector.load %arg8[%c0_437, %c0_438] : memref<256x144xf32, #tpu.memory_space<vmem>>, vector<16x144xf32>
    %c5_439 = arith.constant 5 : index
    %c0_440 = arith.constant 0 : index
    %c0_441 = arith.constant 0 : index
    %279 = vector.load %arg2[%c5_439, %c0_440, %c0_441] : memref<6x144x16xf32, #tpu.memory_space<vmem>>, vector<1x144x16xf32>
    %280 = vector.shape_cast %279 : vector<1x144x16xf32> to vector<144x16xf32>
    %cst_442 = arith.constant dense<0.000000e+00> : vector<16x16xf32>
    %281 = tpu.matmul %278, %280, %cst_442 {dimension_numbers = #tpu.dot_dimension_numbers<[1], [0], [0], [1], [0, 0, 1, 1], [], []>} : vector<16x144xf32>, vector<144x16xf32>, vector<16x16xf32> -> vector<16x16xf32>
    %c5_443 = arith.constant 5 : index
    %c0_444 = arith.constant 0 : index
    %282 = vector.load %arg3[%c5_443, %c0_444] : memref<6x16xf32, #tpu.memory_space<vmem>>, vector<1x16xf32>
    %283 = vector.broadcast %282 : vector<1x16xf32> to vector<16x16xf32>
    %284 = arith.addf %281, %283 : vector<16x16xf32>
    %cst_445 = arith.constant 0.000000e+00 : f32
    %285 = vector.broadcast %cst_445 : f32 to vector<16x16xf32>
    %286 = arith.maximumf %284, %285 : vector<16x16xf32>
    %c0_446 = arith.constant 0 : index
    %c0_447 = arith.constant 0 : index
    %c0_448 = arith.constant 0 : index
    %287 = vector.load %arg6[%c0_446, %c0_447, %c0_448] : memref<1x16x16xf32, #tpu.memory_space<vmem>>, vector<1x16x16xf32>
    %288 = vector.shape_cast %287 : vector<1x16x16xf32> to vector<16x16xf32>
    %289 = vector.shape_cast %286 : vector<16x16xf32> to vector<1x16x16xf32>
    tpu.vector_store %arg6[%c0_446, %c0_447, %c0_448], %289 {strides = array<i32>} : memref<1x16x16xf32, #tpu.memory_space<vmem>>, vector<1x16x16xf32>,
    return
  }
  func.func @transform_0(%arg0: i32) -> (i32, i32, i32, i32) {
    %c0_i32 = arith.constant 0 : i32
    %c0_i32_0 = arith.constant 0 : i32
    %c0_i32_1 = arith.constant 0 : i32
    %c0_i32_2 = arith.constant 0 : i32
    return %arg0, %c0_i32, %c0_i32_0, %c0_i32_1 : i32, i32, i32, i32
  }
  func.func @transform_1(%arg0: i32) -> (i32, i32, i32) {
    %c0_i32 = arith.constant 0 : i32
    %c0_i32_0 = arith.constant 0 : i32
    %c0_i32_1 = arith.constant 0 : i32
    %c0_i32_2 = arith.constant 0 : i32
    return %c0_i32, %c0_i32_0, %c0_i32_1 : i32, i32, i32
  }
  func.func @transform_2(%arg0: i32) -> (i32, i32) {
    %c0_i32 = arith.constant 0 : i32
    %c0_i32_0 = arith.constant 0 : i32
    %c0_i32_1 = arith.constant 0 : i32
    return %c0_i32, %c0_i32_0 : i32, i32
  }
  func.func @transform_3(%arg0: i32) -> (i32, i32, i32) {
    %c0_i32 = arith.constant 0 : i32
    %c0_i32_0 = arith.constant 0 : i32
    %c0_i32_1 = arith.constant 0 : i32
    return %arg0, %c0_i32, %c0_i32_0 : i32, i32, i32
  }
  func.func @transform_4(%arg0: i32) -> (i32, i32, i32) {
    %c0_i32 = arith.constant 0 : i32
    %c0_i32_0 = arith.constant 0 : i32
    %c0_i32_1 = arith.constant 0 : i32
    return %arg0, %c0_i32, %c0_i32_0 : i32, i32, i32
  }
  func.func @transform_5(%arg0: i32) -> (i32, i32, i32) {
    %c0_i32 = arith.constant 0 : i32
    %c0_i32_0 = arith.constant 0 : i32
    %c0_i32_1 = arith.constant 0 : i32
    return %arg0, %c0_i32, %c0_i32_0 : i32, i32, i32
  }
}

</mosaic_0001>

<bundles_post_ra>
// kernel: encoder_forward.1
= control target key start
LH: loop header
LB: loop body
LE: loop exit
PB: predicated region body
PF: predicated region fallthrough
CT: control target
= control target key end

     0   :  { %11 = vsyncpa [#allocation5], 0  ;;  %s10201_s0 = inlined_call_operand.vmem [shape: f32[2,16,16,1], index: 0, kind: input, shape index: {}]   ;;  %s10202_s1 = inlined_call_operand.vmem [shape: f32[6,144,16], index: 1, kind: input, shape index: {}]   ;;  %s10203_s2 = inlined_call_operand.vmem [shape: f32[6,16], index: 2, kind: input, shape index: {}]   ;;  %s10204_s3 = inlined_call_operand.vmem [shape: f32[2,256,4], index: 3, kind: output, shape index: {0}]   ;;  %s10205_s4 = inlined_call_operand.vmem [shape: f32[2,64,8], index: 4, kind: output, shape index: {1}]   ;;  %s10206_s5 = inlined_call_operand.hbm [shape: f32[2,16,16], index: 5, kind: output, shape index: {2}]  }
   0x1   :  { %13 = vsyncpa [#allocation5 + $0x1], 0  ;;  %s7260_s18 = smov 0   ;;  %s7262_s19 = smov 0  }
   0x2   :  { %s7264_s20 = smov 0   ;;  %s7266_s21 = smov 0  }
   0x3 LB: > { %s7281_s22 = sadd.s32 4294967295, %s7204_s21   ;;  %s6581_s23 = sadd.s32 4294967294, %s7204_s21   ;;  %s7204_s21 = sphi %s7266_s21, %s10212_s21   ;;  %s7200_s20 = sphi %s7264_s20, %s10211_s20   ;;  %s7196_s19 = sphi %s7262_s19, %s10210_s19   ;;  %s7192_s18 = sphi %s7260_s18, %s10209_s18  }
   0x4   : > { %s7285_s24 = sadd.s32 1, %s7204_s21   ;;  %s146_s25 = sadd.s32 1, %s7200_s20 }
   0x5   : > { %s143_s26 = ssub.s32 %s7204_s21, %s7285_s24  ;;  %p156_p0 = scmp.ne.s32.totalorder %s7200_s20, %s7196_s19 }
   0x6   : > { %p144_p1 = scmp.eq.s32.totalorder %s143_s26, 0  ;;  %p157_p2 = scmp.eq.s32.totalorder %s7281_s22, 1 }
   0x7   : > { %p162_p3 = scmp.ne.s32.totalorder %s7196_s19, %s7192_s18  ;;  %p163_p4 = scmp.eq.s32.totalorder %s6581_s23, 1 }
   0x8   : > { %s7296_s27 = scalar_select %p144_p1, %s7200_s20, %s146_s25  }
   0x9   : > { %p7298_p5 = por %p157_p2, %p156_p0  ;;  %p7302_p6 = por %p163_p4, %p162_p3 }
   0xa   : > { %p6584_p7 = scmp.ge.s32.totalorder %s7204_s21, 1  ;;  %p195_p8 = scmp.lt.s32.totalorder %s7204_s21, 3 }
   0xc   : > { %p196_p9 = pnand %p6584_p7, %p195_p8 }
   0xd   : > { %p233_p10 = scmp.lt.s32.totalorder (!%p196_p9), %s7281_s22, 1  ;;  %s7207_s10 = smov (!%p196_p9), 2  }
   0xe   : > { %199 = sbr.rel (%p196_p9) target bundleno = 2918 (0xb66), region = 32  ;;  %s7208_s11 = smov (!%p196_p9), 1  }
   0xf   : > { %s7209_s12 = smov (!%p196_p9), 3   ;;  %s7210_s13 = smov (!%p196_p9), 4  }
  0x10   : > { %s7211_s14 = smov (!%p196_p9), 5   ;;  %s7212_s15 = smov (!%p196_p9), 6  }
  0x11   : > { %s7213_s16 = smov (!%p196_p9), 7   ;;  %s7214_s17 = smov (!%p196_p9), 8  }
  0x12   : > { %s7220_s23 = smov (!%p196_p9), 32   ;;  %s7223_s8 = smov (!%p196_p9), 56  }
  0x13   : > { %vm280_vm0 = vcmask 7168   ;;  %vm283_vm1 = vcmask 1024   ;;  %vm289_vm2 = vcmask 0   ;;  %v7206_v0 = vmov 0.0   ;;  %s7392_s30 = scalar_select %p233_p10, %s7281_s22, 1  ;;  %v2000_v43 = vld [vmem:[%s10202_s1] sm:$0xff] }
  0x14   : > { %281 = vst.msk [vmem:[#allocation2] sm:$0xff] %vm280_vm0, %v7206_v0  ;;  %282 = vst.msk [vmem:[#allocation2 + $0x8] sm:$0xff] %vm280_vm0, %v7206_v0  ;;  %vm2368_vm3 = vcmask 25600   ;;  %vm2373_vm4 = vcmask 24576   ;;  %vm2365_vm5 = vcmask 31744   ;;  %vm2104_vm6 = vcmask 1040384  }
  0x15   : > { %286 = vst.msk [vmem:[#allocation2 + $0x198] sm:$0xff] %vm280_vm0, %v7206_v0  ;;  %287 = vst.msk [vmem:[#allocation2 + $0x1a0] sm:$0xff] %vm280_vm0, %v7206_v0  ;;  %s6736_s6 = sshll.u32 %s7392_s30, 8  ;;  %v2001_v42 = vld [vmem:[%s10202_s1 + $0x8] sm:$0x1]  ;;  %vm583_vm7 = vcmask 15368  }
  0x16   : > { %284 = vst.msk [vmem:[#allocation2 + $0x10] sm:$0x3] %vm283_vm1, %v7206_v0  ;;  %288 = vst.msk [vmem:[#allocation2 + $0x1a8] sm:$0x3] %vm283_vm1, %v7206_v0  ;;  %s7400_s9 = scalar_lea.vmem %s10201_s0, %s6736_s6  ;;  %6852 = vmatprep.subr.msk.mxu0 %vm2104_vm6, %v2001_v42  ;;  %vm776_vm8 = vcmask 23568   ;;  %vm969_vm9 = vcmask 31768  }
  0x17   : > { %291 = vst.msk [vmem:[#allocation2 + $0x18] sm:$0x1] %vm289_vm2, %v7206_v0  ;;  %292 = vst.msk [vmem:[#allocation2 + $0x30] sm:$0x1] %vm289_vm2, %v7206_v0  ;;  %v248_v1 = vld [vmem:[%s7400_s9] sm:$0xff]  ;;  %v249_v2 = vld [vmem:[%s7400_s9 + $0x8] sm:$0xff]  ;;  %6853 = vmatpush3.msk.msra.mxu0 %vm2104_vm6, %v2001_v42 }
  0x18   : > { %293 = vst.msk [vmem:[#allocation2 + $0x48] sm:$0x1] %vm289_vm2, %v7206_v0  ;;  %294 = vst.msk [vmem:[#allocation2 + $0x60] sm:$0x1] %vm289_vm2, %v7206_v0  ;;  %v250_v3 = vld [vmem:[%s7400_s9 + $0x10] sm:$0xff]  ;;  %v251_v8 = vld [vmem:[%s7400_s9 + $0x18] sm:$0xff]  ;;  %6854 = vmatprep.subr.mxu0 %v2000_v43 }
  0x19   : > { %295 = vst.msk [vmem:[#allocation2 + $0x78] sm:$0x1] %vm289_vm2, %v7206_v0  ;;  %296 = vst.msk [vmem:[#allocation2 + $0x90] sm:$0x1] %vm289_vm2, %v7206_v0  ;;  %v252_v9 = vld [vmem:[%s7400_s9 + $0x20] sm:$0xff]  ;;  %v253_v10 = vld [vmem:[%s7400_s9 + $0x28] sm:$0xff]  ;;  %6855 = vmatpush3.msra.mxu0 %v2000_v43 }
  0x1a   : > { %297 = vst.msk [vmem:[#allocation2 + $0xa8] sm:$0x1] %vm289_vm2, %v7206_v0  ;;  %298 = vst.msk [vmem:[#allocation2 + $0xc0] sm:$0x1] %vm289_vm2, %v7206_v0  ;;  %v254_v11 = vld [vmem:[%s7400_s9 + $0x30] sm:$0xff]  ;;  %v255_v12 = vld [vmem:[%s7400_s9 + $0x38] sm:$0xff] }
  0x1b   : > { %299 = vst.msk [vmem:[#allocation2 + $0xd8] sm:$0x1] %vm289_vm2, %v7206_v0  ;;  %300 = vst.msk [vmem:[#allocation2 + $0xf0] sm:$0x1] %vm289_vm2, %v7206_v0  ;;  %v616_v4 = vld [vmem:[#allocation2 + $0x2] sm:$0xff]  ;;  %v258_v35 = vld [vmem:[%s7400_s9 + $0x50] sm:$0xff] }
  0x1c   : > { %301 = vst.msk [vmem:[#allocation2 + $0x108] sm:$0x1] %vm289_vm2, %v7206_v0  ;;  %302 = vst.msk [vmem:[#allocation2 + $0x120] sm:$0x1] %vm289_vm2, %v7206_v0  ;;  %v423_v5 = vld [vmem:[#allocation2 + $0x1] sm:$0xff]  ;;  %680 = vrot.lane.b32.xlu1 %v616_v4, %s7207_s10  ;;  %v259_v36 = vld [vmem:[%s7400_s9 + $0x58] sm:$0xff] }
  0x1d   : > { %303 = vst.msk [vmem:[#allocation2 + $0x138] sm:$0x1] %vm289_vm2, %v7206_v0  ;;  %304 = vst.msk [vmem:[#allocation2 + $0x150] sm:$0x1] %vm289_vm2, %v7206_v0  ;;  %v424_v6 = vld [vmem:[#allocation2 + $0x9] sm:$0xff]  ;;  %487 = vrot.lane.b32.xlu0 %v423_v5, %s7208_s11  ;;  %v256_v15 = vld [vmem:[%s7400_s9 + $0x40] sm:$0xff] }
  0x1e   : > { %305 = vst.msk [vmem:[#allocation2 + $0x168] sm:$0x1] %vm289_vm2, %v7206_v0  ;;  %306 = vst.msk [vmem:[#allocation2 + $0x180] sm:$0x1] %vm289_vm2, %v7206_v0  ;;  %v360_v14 = vld [vmem:[#allocation2 + $0x8] sm:$0xff]  ;;  %v260_v45 = vld [vmem:[%s7400_s9 + $0x60] sm:$0xff] }
  0x1f   : > { %309 = vst.msk [vmem:[#allocation2 + $0x29] sm:$0x1] %vm289_vm2, %v7206_v0  ;;  %310 = vst.msk [vmem:[#allocation2 + $0x41] sm:$0x1] %vm289_vm2, %v7206_v0  ;;  %v257_v16 = vld [vmem:[%s7400_s9 + $0x48] sm:$0xff]  ;;  %v262_v53 = vld [vmem:[%s7400_s9 + $0x70] sm:$0xff] }
  0x20   : > { %311 = vst.msk [vmem:[#allocation2 + $0x59] sm:$0x1] %vm289_vm2, %v7206_v0  ;;  %312 = vst.msk [vmem:[#allocation2 + $0x71] sm:$0x1] %vm289_vm2, %v7206_v0  ;;  %v261_v47 = vld [vmem:[%s7400_s9 + $0x68] sm:$0xff]  ;;  %v263_v55 = vld [vmem:[%s7400_s9 + $0x78] sm:$0xff] }
  0x21   : > { %313 = vst.msk [vmem:[#allocation2 + $0x89] sm:$0x1] %vm289_vm2, %v7206_v0  ;;  %314 = vst.msk [vmem:[#allocation2 + $0xa1] sm:$0x1] %vm289_vm2, %v7206_v0  ;;  %489 = vrot.lane.b32.xlu0 %v424_v6, %s7208_s11  ;;  %v264_v61 = vld [vmem:[%s7400_s9 + $0x80] sm:$0xff]  ;;  %v265_v4 = vld [vmem:[%s7400_s9 + $0x88] sm:$0xff] }
  0x22   : > { %315 = vst.msk [vmem:[#allocation2 + $0xb9] sm:$0x1] %vm289_vm2, %v7206_v0  ;;  %316 = vst.msk [vmem:[#allocation2 + $0xd1] sm:$0x1] %vm289_vm2, %v7206_v0  ;;  %vm1162_vm10 = vcmask 39968   ;;  %vm1355_vm11 = vcmask 48168  }
  0x23   : > { %317 = vst.msk [vmem:[#allocation2 + $0xe9] sm:$0x1] %vm289_vm2, %v7206_v0  ;;  %318 = vst.msk [vmem:[#allocation2 + $0x101] sm:$0x1] %vm289_vm2, %v7206_v0  ;;  %vm1549_vm12 = vcmask 56368   ;;  %vm1742_vm13 = vcmask 64568  }
  0x24   : > { %319 = vst.msk [vmem:[#allocation2 + $0x119] sm:$0x1] %vm289_vm2, %v7206_v0  ;;  %320 = vst.msk [vmem:[#allocation2 + $0x131] sm:$0x1] %vm289_vm2, %v7206_v0  ;;  %vm1935_vm14 = vcmask 72768   ;;  %vm2007_vm15 = vcmask 72704  }
  0x25   : > { %321 = vst.msk [vmem:[#allocation2 + $0x149] sm:$0x1] %vm289_vm2, %v7206_v0  ;;  %322 = vst.msk [vmem:[#allocation2 + $0x161] sm:$0x1] %vm289_vm2, %v7206_v0  ;;  %vm2666_vm1 = vcmask 64544   ;;  %vm3052_vm6 = vcmask 130144  }
  0x26   : > { %323 = vst.msk [vmem:[#allocation2 + $0x179] sm:$0x1] %vm289_vm2, %v7206_v0  ;;  %324 = vst.msk [vmem:[#allocation2 + $0x191] sm:$0x1] %vm289_vm2, %v7206_v0  ;;  %s6738_s7 = sshll.u32 %s7392_s30, 6  ;;  %s7227_s30 = smov 112  }
  0x27   : > { %308 = vst.msk [vmem:[#allocation2 + $0x11] sm:$0x1] %vm289_vm2, %v7206_v0  ;;  %290 = vst.msk [vmem:[#allocation2] sm:$0x1] %vm289_vm2, %v7206_v0 }
  0x28   : > { %307 = vst.msk [vmem:[#allocation2 + $0x198] sm:$0x1] %vm289_vm2, %v7206_v0  ;;  %325 = vst.msk [vmem:[#allocation2 + $0x1a9] sm:$0x1] %vm289_vm2, %v7206_v0  ;;  %vm2859_vm2 = vcmask 97344  }
  0x29   : > { %327 = vst.msk [vmem:[#allocation2 + $0x19] sm:$0xff] %vm280_vm0, %v248_v1  ;;  %328 = vst.msk [vmem:[#allocation2 + $0x21] sm:$0xff] %vm280_vm0, %v249_v2 }
  0x2a   : > { %329 = vst.msk [vmem:[#allocation2 + $0x31] sm:$0xff] %vm280_vm0, %v250_v3  ;;  %330 = vst.msk [vmem:[#allocation2 + $0x39] sm:$0xff] %vm280_vm0, %v251_v8 }
  0x2b   : > { %331 = vst.msk [vmem:[#allocation2 + $0x49] sm:$0xff] %vm280_vm0, %v252_v9  ;;  %332 = vst.msk [vmem:[#allocation2 + $0x51] sm:$0xff] %vm280_vm0, %v253_v10 }
  0x2c   : > { %333 = vst.msk [vmem:[#allocation2 + $0x61] sm:$0xff] %vm280_vm0, %v254_v11  ;;  %334 = vst.msk [vmem:[#allocation2 + $0x69] sm:$0xff] %vm280_vm0, %v255_v12 }
  0x2d   : > { %392 = vst.msk [vmem:[#allocation3 + $0x10] sm:$0xff] %vm280_vm0, %v360_v14  ;;  %335 = vst.msk [vmem:[#allocation2 + $0x79] sm:$0xff] %vm280_vm0, %v256_v15 }
  0x2e   : > { %v617_v7 = vld [vmem:[#allocation2 + $0xa] sm:$0xff]  ;;  %v359_v13 = vld [vmem:[#allocation2] sm:$0xff]  ;;  %336 = vst.msk [vmem:[#allocation2 + $0x81] sm:$0xff] %vm280_vm0, %v257_v16  ;;  %337 = vst.msk [vmem:[#allocation2 + $0x91] sm:$0xff] %vm280_vm0, %v258_v35 }
  0x2f   : > { %2369 = vst.msk [vmem:[#allocation2 + $0x10] sm:$0x3] %vm2368_vm3, %v7206_v0  ;;  %682 = vrot.lane.b32.xlu1 %v617_v7, %s7207_s10 }
  0x30   : > { %2392 = vst.msk [vmem:[#allocation2 + $0x11] sm:$0x1] %vm2373_vm4, %v7206_v0  ;;  %v810_v17 = vld [vmem:[#allocation2 + $0x20] sm:$0xff]  ;;  %v809_v18 = vld [vmem:[#allocation2 + $0x18] sm:$0xff] }
  0x31   : > { %391 = vst.msk [vmem:[#allocation3] sm:$0xff] %vm280_vm0, %v359_v13  ;;  %v1196_v19 = vld [vmem:[#allocation2 + $0x22] sm:$0xff]  ;;  %393 = vst.msk [vmem:[#allocation3 + $0x20] sm:$0xff] %vm280_vm0, %v809_v18  ;;  %873 = vrot.lane.b32.xlu0 %v809_v18, %s7209_s12  ;;  %v1389_v20 = vld [vmem:[#allocation2 + $0x30] sm:$0xff] }
  0x32   : > { %2366 = vst.msk [vmem:[#allocation2] sm:$0xff] %vm2365_vm5, %v7206_v0  ;;  %2367 = vst.msk [vmem:[#allocation2 + $0x8] sm:$0xff] %vm2365_vm5, %v7206_v0  ;;  %v1390_v21 = vld [vmem:[#allocation2 + $0x38] sm:$0xff]  ;;  %v7452_v24 = vld [vmem:[#allocation2 + $0x48] sm:$0xff] }
  0x33   : > { %2374 = vst.msk [vmem:[#allocation2] sm:$0x1] %vm2373_vm4, %v7206_v0  ;;  %2375 = vst.msk [vmem:[#allocation2 + $0x18] sm:$0x1] %vm2373_vm4, %v7206_v0  ;;  %875 = vrot.lane.b32.xlu1 %v810_v17, %s7209_s12  ;;  %v1002_v22 = vld [vmem:[#allocation2 + $0x19] sm:$0xff]  ;;  %v7456_v25 = vld [vmem:[#allocation2 + $0x50] sm:$0xff] }
  0x34   : > { %394 = vst.msk [vmem:[#allocation3 + $0x30] sm:$0xff] %vm280_vm0, %v810_v17  ;;  %v7446_v23 = vld [vmem:[#allocation2 + $0x3a] sm:$0xff]  ;;  %395 = vst.msk [vmem:[#allocation3 + $0x40] sm:$0xff] %vm280_vm0, %v1389_v20  ;;  %v7458_v26 = vld [vmem:[#allocation2 + $0x52] sm:$0xff] }
  0x35   : > { %2393 = vst.msk [vmem:[#allocation2 + $0x29] sm:$0x1] %vm2373_vm4, %v7206_v0  ;;  %2376 = vst.msk [vmem:[#allocation2 + $0x30] sm:$0x1] %vm2373_vm4, %v7206_v0  ;;  %1066 = vrot.lane.b32.xlu0 %v1002_v22, %s7210_s13  ;;  %v7468_v27 = vld [vmem:[#allocation2 + $0x60] sm:$0xff]  ;;  %v7472_v28 = vld [vmem:[#allocation2 + $0x68] sm:$0xff] }
  0x36   : > { %396 = vst.msk [vmem:[#allocation3 + $0x50] sm:$0xff] %vm280_vm0, %v1390_v21  ;;  %397 = vst.msk [vmem:[#allocation3 + $0x60] sm:$0xff] %vm280_vm0, %v7452_v24  ;;  %v1195_v29 = vld [vmem:[#allocation2 + $0x1a] sm:$0xff]  ;;  %v7474_v31 = vld [vmem:[#allocation2 + $0x6a] sm:$0xff] }
  0x37   : > { %2394 = vst.msk [vmem:[#allocation2 + $0x41] sm:$0x1] %vm2373_vm4, %v7206_v0  ;;  %2377 = vst.msk [vmem:[#allocation2 + $0x48] sm:$0x1] %vm2373_vm4, %v7206_v0  ;;  %491 = vrot.lane.b32.xlu1 %v1002_v22, %s7208_s11  ;;  %v1003_v30 = vld [vmem:[#allocation2 + $0x21] sm:$0xff]  ;;  %v7482_v32 = vld [vmem:[#allocation2 + $0x78] sm:$0xff] }
  0x38   : > { %398 = vst.msk [vmem:[#allocation3 + $0x70] sm:$0xff] %vm280_vm0, %v7456_v25  ;;  %399 = vst.msk [vmem:[#allocation3 + $0x80] sm:$0xff] %vm280_vm0, %v7468_v27  ;;  %v7486_v33 = vld [vmem:[#allocation2 + $0x80] sm:$0xff]  ;;  %v7507_v37 = vld [vmem:[#allocation2 + $0x90] sm:$0xff] }
  0x39   : > { %2395 = vst.msk [vmem:[#allocation2 + $0x59] sm:$0x1] %vm2373_vm4, %v7206_v0  ;;  %2378 = vst.msk [vmem:[#allocation2 + $0x60] sm:$0x1] %vm2373_vm4, %v7206_v0  ;;  %1068 = vrot.lane.b32.xlu0 %v1003_v30, %s7210_s13  ;;  %v7494_v34 = vld [vmem:[#allocation2 + $0x82] sm:$0xff]  ;;  %v1582_v38 = vld [vmem:[#allocation2 + $0x31] sm:$0xff] }
  0x3a   : > { %400 = vst.msk [vmem:[#allocation3 + $0x90] sm:$0xff] %vm280_vm0, %v7472_v28  ;;  %401 = vst.msk [vmem:[#allocation3 + $0xa0] sm:$0xff] %vm280_vm0, %v7482_v32  ;;  %v620_v40 = vld [vmem:[#allocation2 + $0x32] sm:$0xff]  ;;  %v1584_v48 = vld [vmem:[#allocation2 + $0x49] sm:$0xff] }
  0x3b   : > { %2396 = vst.msk [vmem:[#allocation2 + $0x71] sm:$0x1] %vm2373_vm4, %v7206_v0  ;;  %2379 = vst.msk [vmem:[#allocation2 + $0x78] sm:$0x1] %vm2373_vm4, %v7206_v0  ;;  %1259 = vrot.lane.b32.xlu1 %v1195_v29, %s7211_s14  ;;  %v1583_v41 = vld [vmem:[#allocation2 + $0x39] sm:$0xff]  ;;  %v622_v50 = vld [vmem:[#allocation2 + $0x4a] sm:$0xff] }
  0x3c   : > { %402 = vst.msk [vmem:[#allocation3 + $0xb0] sm:$0xff] %vm280_vm0, %v7486_v33  ;;  %338 = vst.msk [vmem:[#allocation2 + $0x99] sm:$0xff] %vm280_vm0, %v259_v36  ;;  %v1585_v51 = vld [vmem:[#allocation2 + $0x51] sm:$0xff]  ;;  %v1586_v56 = vld [vmem:[#allocation2 + $0x61] sm:$0xff] }
  0x3d   : > { %2397 = vst.msk [vmem:[#allocation2 + $0x89] sm:$0x1] %vm2373_vm4, %v7206_v0  ;;  %493 = vrot.lane.b32.xlu0 %v1003_v30, %s7208_s11  ;;  %2380 = vst.msk [vmem:[#allocation2 + $0x90] sm:$0x1] %vm2373_vm4, %v7206_v0  ;;  %v1587_v58 = vld [vmem:[#allocation2 + $0x69] sm:$0xff]  ;;  %v1588_v7 = vld [vmem:[#allocation2 + $0x79] sm:$0xff] }
  0x3e   : > { %403 = vst.msk [vmem:[#allocation3 + $0xc0] sm:$0xff] %vm280_vm0, %v7507_v37  ;;  %339 = vst.msk [vmem:[#allocation2 + $0xa9] sm:$0xff] %vm280_vm0, %v260_v45  ;;  %v1779_v59 = vld [vmem:[#allocation2 + $0x62] sm:$0xff]  ;;  %v1781_v14 = vld [vmem:[#allocation2 + $0x7a] sm:$0xff] }
  0x3f   : > { %684 = vrot.lane.b32.xlu1 %v1195_v29, %s7207_s10  ;;  %340 = vst.msk [vmem:[#allocation2 + $0xb1] sm:$0xff] %vm280_vm0, %v261_v47  ;;  %341 = vst.msk [vmem:[#allocation2 + $0xc1] sm:$0xff] %vm280_vm0, %v262_v53  ;;  %v1589_v13 = vld [vmem:[#allocation2 + $0x81] sm:$0xff]  ;;  %v266_v22 = vld [vmem:[%s7400_s9 + $0x90] sm:$0xff] }
  0x40   : > { %342 = vst.msk [vmem:[#allocation2 + $0xc9] sm:$0xff] %vm280_vm0, %v263_v55  ;;  %343 = vst.msk [vmem:[#allocation2 + $0xd9] sm:$0xff] %vm280_vm0, %v264_v61  ;;  %v269_v61 = vld [vmem:[%s7400_s9 + $0xa8] sm:$0xff] }
  0x41   : > { %1261 = vrot.lane.b32.xlu0 %v1196_v19, %s7211_s14  ;;  %344 = vst.msk [vmem:[#allocation2 + $0xe1] sm:$0xff] %vm280_vm0, %v265_v4  ;;  %345 = vst.msk [vmem:[#allocation2 + $0xf1] sm:$0xff] %vm280_vm0, %v266_v22 }
  0x42   : > { %348 = vst.msk [vmem:[#allocation2 + $0x111] sm:$0xff] %vm280_vm0, %v269_v61 }
  0x43   : > { %1453 = vrot.lane.b32.xlu1 %v1389_v20, %s7212_s15  ;;  %v7516_v39 = vld [vmem:[#allocation2 + $0x98] sm:$0xff] }
  0x44   : > { %404 = vst.msk [vmem:[#allocation3 + $0xd0] sm:$0xff] %vm280_vm0, %v7516_v39  ;;  %v7534_v44 = vld [vmem:[#allocation2 + $0x9a] sm:$0xff] }
  0x45   : > { %686 = vrot.lane.b32.xlu0 %v1196_v19, %s7207_s10  ;;  %2398 = vst.msk [vmem:[#allocation2 + $0xa1] sm:$0x1] %vm2373_vm4, %v7206_v0  ;;  %v7545_v46 = vld [vmem:[#allocation2 + $0xa8] sm:$0xff] }
  0x46   : > { %405 = vst.msk [vmem:[#allocation3 + $0xe0] sm:$0xff] %vm280_vm0, %v7545_v46  ;;  %v7561_v49 = vld [vmem:[#allocation2 + $0xb0] sm:$0xff]  ;;  %v7586_v54 = vld [vmem:[#allocation2 + $0xc0] sm:$0xff] }
  0x47   : > { %877 = vrot.lane.b32.xlu1 %v1389_v20, %s7209_s12  ;;  %2381 = vst.msk [vmem:[#allocation2 + $0xa8] sm:$0x1] %vm2373_vm4, %v7206_v0  ;;  %v7575_v52 = vld [vmem:[#allocation2 + $0xb2] sm:$0xff]  ;;  %2382 = vst.msk [vmem:[#allocation2 + $0xc0] sm:$0x1] %vm2373_vm4, %v7206_v0  ;;  %v7602_v57 = vld [vmem:[#allocation2 + $0xc8] sm:$0xff] }
  0x48   : > { %406 = vst.msk [vmem:[#allocation3 + $0xf0] sm:$0xff] %vm280_vm0, %v7561_v49  ;;  %407 = vst.msk [vmem:[#allocation3 + $0x100] sm:$0xff] %vm280_vm0, %v7586_v54  ;;  %v7616_v60 = vld [vmem:[#allocation2 + $0xca] sm:$0xff]  ;;  %v7630_v3 = vld [vmem:[#allocation2 + $0xd8] sm:$0xff] }
  0x49   : > { %1455 = vrot.lane.b32.xlu0 %v1390_v21, %s7212_s15  ;;  %2399 = vst.msk [vmem:[#allocation2 + $0xb9] sm:$0x1] %vm2373_vm4, %v7206_v0  ;;  %2400 = vst.msk [vmem:[#allocation2 + $0xd1] sm:$0x1] %vm2373_vm4, %v7206_v0  ;;  %v7651_v10 = vld [vmem:[#allocation2 + $0xe0] sm:$0xff] }
  0x4a   : > { %408 = vst.msk [vmem:[#allocation3 + $0x110] sm:$0xff] %vm280_vm0, %v7602_v57  ;;  %409 = vst.msk [vmem:[#allocation3 + $0x120] sm:$0xff] %vm280_vm0, %v7630_v3  ;;  %v1596_v61 = vld [vmem:[#allocation2 + $0xd9] sm:$0xff] }
  0x4b   : > { %1646 = vrot.lane.b32.xlu1 %v1582_v38, %s7213_s16  ;;  %2383 = vst.msk [vmem:[#allocation2 + $0xd8] sm:$0x1] %vm2373_vm4, %v7206_v0 }
  0x4c   : > { %410 = vst.msk [vmem:[#allocation3 + $0x130] sm:$0xff] %vm280_vm0, %v7651_v10 }
  0x4d   : > { %879 = vrot.lane.b32.xlu0 %v1390_v21, %s7209_s12  ;;  %v7673_v21 = vld [vmem:[#allocation2 + $0xe2] sm:$0xff] }
  0x4e   : > { %2401 = vst.msk [vmem:[#allocation2 + $0xe9] sm:$0x1] %vm2373_vm4, %v7206_v0 }
  0x4f   : > { %1070 = vrot.lane.b32.xlu1 %v1582_v38, %s7210_s13 }
  0x51   : > { %1648 = vrot.lane.b32.xlu0 %v1583_v41, %s7213_s16 }
  0x53   : > { %1839 = vrot.lane.b32.xlu1 %v620_v40, %s7214_s17 }
  0x55   : > { %495 = vrot.lane.b32.xlu0 %v1582_v38, %s7208_s11  ;;  %v1591_v38 = vld [vmem:[#allocation2 + $0x99] sm:$0xff] }
  0x57   : > { %1072 = vrot.lane.b32.xlu1 %v1583_v41, %s7210_s13 }
  0x59   : > { %1263 = vrot.lane.b32.xlu0 %v620_v40, %s7211_s14 }
  0x5b   : > { %1841 = vrot.lane.b32.xlu1 %v7446_v23, %s7214_s17 }
  0x5d   : > { %497 = vrot.lane.b32.xlu0 %v1583_v41, %s7208_s11 }
  0x5f   : > { %688 = vrot.lane.b32.xlu1 %v620_v40, %s7207_s10  ;;  %v1783_v40 = vld [vmem:[#allocation2 + $0x92] sm:$0xff] }
  0x61   : > { %1265 = vrot.lane.b32.xlu0 %v7446_v23, %s7211_s14 }
  0x63   : > { %1457 = vrot.lane.b32.xlu1 %v7452_v24, %s7212_s15 }
  0x65   : > { %690 = vrot.lane.b32.xlu0 %v7446_v23, %s7207_s10 }
  0x67   : > { %881 = vrot.lane.b32.xlu1 %v7452_v24, %s7209_s12 }
  0x69   : > { %1459 = vrot.lane.b32.xlu0 %v7456_v25, %s7212_s15 }
  0x6b   : > { %1650 = vrot.lane.b32.xlu1 %v1584_v48, %s7213_s16 }
  0x6d   : > { %883 = vrot.lane.b32.xlu0 %v7456_v25, %s7209_s12 }
  0x6f   : > { %1074 = vrot.lane.b32.xlu1 %v1584_v48, %s7210_s13 }
  0x71   : > { %1652 = vrot.lane.b32.xlu0 %v1585_v51, %s7213_s16 }
  0x73   : > { %1843 = vrot.lane.b32.xlu1 %v622_v50, %s7214_s17 }
  0x75   : > { %499 = vrot.lane.b32.xlu0 %v1584_v48, %s7208_s11 }
  0x77   : > { %1076 = vrot.lane.b32.xlu1 %v1585_v51, %s7210_s13 }
  0x79   : > { %1267 = vrot.lane.b32.xlu0 %v622_v50, %s7211_s14 }
  0x7b   : > { %1845 = vrot.lane.b32.xlu1 %v7458_v26, %s7214_s17 }
  0x7d   : > { %501 = vrot.lane.b32.xlu0 %v1585_v51, %s7208_s11  ;;  %v268_v51 = vld [vmem:[%s7400_s9 + $0xa0] sm:$0xff] }
  0x7e   : > { %347 = vst.msk [vmem:[#allocation2 + $0x109] sm:$0xff] %vm280_vm0, %v268_v51 }
  0x7f   : > { %692 = vrot.lane.b32.xlu1 %v622_v50, %s7207_s10 }
  0x81   : > { %1269 = vrot.lane.b32.xlu0 %v7458_v26, %s7211_s14 }
  0x83   : > { %1461 = vrot.lane.b32.xlu1 %v7468_v27, %s7212_s15 }
  0x85   : > { %694 = vrot.lane.b32.xlu0 %v7458_v26, %s7207_s10 }
  0x87   : > { %885 = vrot.lane.b32.xlu1 %v7468_v27, %s7209_s12  ;;  %v7688_v27 = vld [vmem:[#allocation2 + $0xf0] sm:$0xff] }
  0x88   : > { %411 = vst.msk [vmem:[#allocation3 + $0x140] sm:$0xff] %vm280_vm0, %v7688_v27 }
  0x89   : > { %1463 = vrot.lane.b32.xlu0 %v7472_v28, %s7212_s15  ;;  %2384 = vst.msk [vmem:[#allocation2 + $0xf0] sm:$0x1] %vm2373_vm4, %v7206_v0 }
  0x8b   : > { %1654 = vrot.lane.b32.xlu1 %v1586_v56, %s7213_s16 }
  0x8d   : > { %887 = vrot.lane.b32.xlu0 %v7472_v28, %s7209_s12  ;;  %v267_v28 = vld [vmem:[%s7400_s9 + $0x98] sm:$0xff] }
  0x8e   : > { %v681_v62 = vpop.permute.xlu1 %680  ;;  %346 = vst.msk [vmem:[#allocation2 + $0xf9] sm:$0xff] %vm280_vm0, %v267_v28  ;;  %v1594_v28 = vld [vmem:[#allocation2 + $0xc1] sm:$0xff] }
  0x8f   : > { %1078 = vrot.lane.b32.xlu1 %v1586_v56, %s7210_s13  ;;  %v488_v63 = vpop.permute.xlu0 %487 }
  0x90   : > { %584 = vst.msk [vmem:[#allocation3] sm:$0xff] %vm583_vm7, %v488_v63 }
  0x91   : > { %1656 = vrot.lane.b32.xlu0 %v1587_v58, %s7213_s16  ;;  %777 = vst.msk [vmem:[#allocation3] sm:$0xff] %vm776_vm8, %v681_v62 }
  0x93   : > { %1847 = vrot.lane.b32.xlu1 %v1779_v59, %s7214_s17  ;;  %v490_v2 = vpop.permute.xlu0 %489 }
  0x94   : > { %585 = vst.msk [vmem:[#allocation3 + $0x10] sm:$0xff] %vm583_vm7, %v490_v2 }
  0x95   : > { %503 = vrot.lane.b32.xlu0 %v1586_v56, %s7208_s11  ;;  %v7708_v35 = vld [vmem:[#allocation2 + $0xf8] sm:$0xff] }
  0x96   : > { %412 = vst.msk [vmem:[#allocation3 + $0x150] sm:$0xff] %vm280_vm0, %v7708_v35  ;;  %v7732_v50 = vld [vmem:[#allocation2 + $0xfa] sm:$0xff] }
  0x97   : > { %1080 = vrot.lane.b32.xlu1 %v1587_v58, %s7210_s13  ;;  %2402 = vst.msk [vmem:[#allocation2 + $0x101] sm:$0x1] %vm2373_vm4, %v7206_v0 }
  0x99   : > { %1271 = vrot.lane.b32.xlu0 %v1779_v59, %s7211_s14 }
  0x9b   : > { %1849 = vrot.lane.b32.xlu1 %v7474_v31, %s7214_s17 }
  0x9d   : > { %505 = vrot.lane.b32.xlu0 %v1587_v58, %s7208_s11 }
  0x9f   : > { %696 = vrot.lane.b32.xlu1 %v1779_v59, %s7207_s10  ;;  %v7747_v59 = vld [vmem:[#allocation2 + $0x108] sm:$0xff] }
  0xa0   : > { %413 = vst.msk [vmem:[#allocation3 + $0x160] sm:$0xff] %vm280_vm0, %v7747_v59 }
  0xa1   : > { %v683_v1 = vpop.permute.xlu1 %682  ;;  %1273 = vrot.lane.b32.xlu0 %v7474_v31, %s7211_s14  ;;  %2385 = vst.msk [vmem:[#allocation2 + $0x108] sm:$0x1] %vm2373_vm4, %v7206_v0 }
  0xa2   : > { %778 = vst.msk [vmem:[#allocation3 + $0x10] sm:$0xff] %vm776_vm8, %v683_v1  ;;  %v1592_v1 = vld [vmem:[#allocation2 + $0xa9] sm:$0xff] }
  0xa3   : > { %1465 = vrot.lane.b32.xlu1 %v7482_v32, %s7212_s15  ;;  %v874_v6 = vpop.permute.xlu0 %873 }
  0xa4   : > { %970 = vst.msk [vmem:[#allocation3] sm:$0xff] %vm969_vm9, %v874_v6 }
  0xa5   : > { %v876_v5 = vpop.permute.xlu1 %875  ;;  %698 = vrot.lane.b32.xlu0 %v7474_v31, %s7207_s10  ;;  %v1590_v31 = vld [vmem:[#allocation2 + $0x91] sm:$0xff] }
  0xa6   : > { %971 = vst.msk [vmem:[#allocation3 + $0x10] sm:$0xff] %vm969_vm9, %v876_v5  ;;  %v7767_v5 = vld [vmem:[#allocation2 + $0x110] sm:$0xff] }
  0xa7   : > { %889 = vrot.lane.b32.xlu1 %v7482_v32, %s7209_s12  ;;  %v1067_v8 = vpop.permute.xlu0 %1066  ;;  %414 = vst.msk [vmem:[#allocation3 + $0x170] sm:$0xff] %vm280_vm0, %v7767_v5 }
  0xa8   : > { %1163 = vst.msk [vmem:[#allocation3] sm:$0xff] %vm1162_vm10, %v1067_v8  ;;  %v1785_v8 = vld [vmem:[#allocation2 + $0xaa] sm:$0xff] }
  0xa9   : > { %v492_v9 = vpop.permute.xlu1 %491  ;;  %1467 = vrot.lane.b32.xlu0 %v7486_v33, %s7212_s15 }
  0xaa   : > { %586 = vst.msk [vmem:[#allocation3 + $0x20] sm:$0xff] %vm583_vm7, %v492_v9 }
  0xab   : > { %1658 = vrot.lane.b32.xlu1 %v1588_v7, %s7213_s16  ;;  %v1069_v11 = vpop.permute.xlu0 %1068 }
  0xac   : > { %1164 = vst.msk [vmem:[#allocation3 + $0x10] sm:$0xff] %vm1162_vm10, %v1069_v11 }
  0xad   : > { %v1260_v12 = vpop.permute.xlu1 %1259  ;;  %891 = vrot.lane.b32.xlu0 %v7486_v33, %s7209_s12 }
  0xae   : > { %1356 = vst.msk [vmem:[#allocation3] sm:$0xff] %vm1355_vm11, %v1260_v12 }
  0xaf   : > { %1082 = vrot.lane.b32.xlu1 %v1588_v7, %s7210_s13  ;;  %v494_v15 = vpop.permute.xlu0 %493 }
  0xb0   : > { %587 = vst.msk [vmem:[#allocation3 + $0x30] sm:$0xff] %vm583_vm7, %v494_v15 }
  0xb1   : > { %v685_v16 = vpop.permute.xlu1 %684  ;;  %1660 = vrot.lane.b32.xlu0 %v1589_v13, %s7213_s16 }
  0xb2   : > { %779 = vst.msk [vmem:[#allocation3 + $0x20] sm:$0xff] %vm776_vm8, %v685_v16  ;;  %v7791_v16 = vld [vmem:[#allocation2 + $0x112] sm:$0xff] }
  0xb3   : > { %1851 = vrot.lane.b32.xlu1 %v1781_v14, %s7214_s17  ;;  %v1262_v17 = vpop.permute.xlu0 %1261  ;;  %2403 = vst.msk [vmem:[#allocation2 + $0x119] sm:$0x1] %vm2373_vm4, %v7206_v0 }
  0xb4   : > { %1357 = vst.msk [vmem:[#allocation3 + $0x10] sm:$0xff] %vm1355_vm11, %v1262_v17  ;;  %v270_v17 = vld [vmem:[%s7400_s9 + $0xb0] sm:$0xff] }
  0xb5   : > { %v1454_v18 = vpop.permute.xlu1 %1453  ;;  %507 = vrot.lane.b32.xlu0 %v1588_v7, %s7208_s11  ;;  %v1593_v7 = vld [vmem:[#allocation2 + $0xb1] sm:$0xff]  ;;  %349 = vst.msk [vmem:[#allocation2 + $0x121] sm:$0xff] %vm280_vm0, %v270_v17 }
  0xb6   : > { %1550 = vst.msk [vmem:[#allocation3] sm:$0xff] %vm1549_vm12, %v1454_v18 }
  0xb7   : > { %1084 = vrot.lane.b32.xlu1 %v1589_v13, %s7210_s13  ;;  %v687_v19 = vpop.permute.xlu0 %686 }
  0xb8   : > { %780 = vst.msk [vmem:[#allocation3 + $0x30] sm:$0xff] %vm776_vm8, %v687_v19 }
  0xb9   : > { %v878_v20 = vpop.permute.xlu1 %877  ;;  %1275 = vrot.lane.b32.xlu0 %v1781_v14, %s7211_s14 }
  0xba   : > { %972 = vst.msk [vmem:[#allocation3 + $0x20] sm:$0xff] %vm969_vm9, %v878_v20 }
  0xbb   : > { %1853 = vrot.lane.b32.xlu1 %v7494_v34, %s7214_s17  ;;  %v1456_v23 = vpop.permute.xlu0 %1455 }
  0xbc   : > { %1551 = vst.msk [vmem:[#allocation3 + $0x10] sm:$0xff] %vm1549_vm12, %v1456_v23  ;;  %v7806_v23 = vld [vmem:[#allocation2 + $0x120] sm:$0xff] }
  0xbd   : > { %v1647_v24 = vpop.permute.xlu1 %1646  ;;  %509 = vrot.lane.b32.xlu0 %v1589_v13, %s7208_s11  ;;  %415 = vst.msk [vmem:[#allocation3 + $0x180] sm:$0xff] %vm280_vm0, %v7806_v23 }
  0xbe   : > { %1743 = vst.msk [vmem:[#allocation3] sm:$0xff] %vm1742_vm13, %v1647_v24  ;;  %v271_v24 = vld [vmem:[%s7400_s9 + $0xb8] sm:$0xff] }
  0xbf   : > { %700 = vrot.lane.b32.xlu1 %v1781_v14, %s7207_s10  ;;  %v880_v25 = vpop.permute.xlu0 %879  ;;  %350 = vst.msk [vmem:[#allocation2 + $0x129] sm:$0xff] %vm280_vm0, %v271_v24  ;;  %v1598_v24 = vld [vmem:[#allocation2 + $0xf1] sm:$0xff] }
  0xc0   : > { %973 = vst.msk [vmem:[#allocation3 + $0x30] sm:$0xff] %vm969_vm9, %v880_v25 }
  0xc1   : > { %v1071_v26 = vpop.permute.xlu1 %1070  ;;  %1277 = vrot.lane.b32.xlu0 %v7494_v34, %s7211_s14  ;;  %2386 = vst.msk [vmem:[#allocation2 + $0x120] sm:$0x1] %vm2373_vm4, %v7206_v0 }
  0xc2   : > { %1165 = vst.msk [vmem:[#allocation3 + $0x20] sm:$0xff] %vm1162_vm10, %v1071_v26 }
  0xc3   : > { %1469 = vrot.lane.b32.xlu1 %v7507_v37, %s7212_s15  ;;  %v1649_v29 = vpop.permute.xlu0 %1648 }
  0xc4   : > { %1744 = vst.msk [vmem:[#allocation3 + $0x10] sm:$0xff] %vm1742_vm13, %v1649_v29 }
  0xc5   : > { %v1840_v30 = vpop.permute.xlu1 %1839  ;;  %702 = vrot.lane.b32.xlu0 %v7494_v34, %s7207_s10 }
  0xc6   : > { %1936 = vst.msk [vmem:[#allocation3] sm:$0xff] %vm1935_vm14, %v1840_v30 }
  0xc7   : > { %893 = vrot.lane.b32.xlu1 %v7507_v37, %s7209_s12  ;;  %v496_v32 = vpop.permute.xlu0 %495 }
  0xc8   : > { %588 = vst.msk [vmem:[#allocation3 + $0x40] sm:$0xff] %vm583_vm7, %v496_v32 }
  0xc9   : > { %v1073_v33 = vpop.permute.xlu1 %1072  ;;  %1471 = vrot.lane.b32.xlu0 %v7516_v39, %s7212_s15 }
  0xca   : > { %1166 = vst.msk [vmem:[#allocation3 + $0x30] sm:$0xff] %vm1162_vm10, %v1073_v33  ;;  %v1595_v33 = vld [vmem:[#allocation2 + $0xc9] sm:$0xff] }
  0xcb   : > { %1662 = vrot.lane.b32.xlu1 %v1590_v31, %s7213_s16  ;;  %v1264_v34 = vpop.permute.xlu0 %1263 }
  0xcc   : > { %1358 = vst.msk [vmem:[#allocation3 + $0x20] sm:$0xff] %vm1355_vm11, %v1264_v34  ;;  %v1787_v34 = vld [vmem:[#allocation2 + $0xc2] sm:$0xff] }
  0xcd   : > { %v1842_v36 = vpop.permute.xlu1 %1841  ;;  %v1968_v37 = vld [vmem:[#allocation3] sm:$0xff]  ;;  %895 = vrot.lane.b32.xlu0 %v7516_v39, %s7209_s12 }
  0xce   : > { %1937 = vst.msk [vmem:[#allocation3 + $0x10] sm:$0xff] %vm1935_vm14, %v1842_v36  ;;  %6856 = vmatprep.mubr.msk.f32.mxu0 %vm2007_vm15, %v1968_v37 }
  0xcf   : > { %1086 = vrot.lane.b32.xlu1 %v1590_v31, %s7210_s13  ;;  %v498_v41 = vpop.permute.xlu0 %497 }
  0xd0   : > { %589 = vst.msk [vmem:[#allocation3 + $0x50] sm:$0xff] %vm583_vm7, %v498_v41 }
  0xd1   : > { %v689_v42 = vpop.permute.xlu1 %688  ;;  %1664 = vrot.lane.b32.xlu0 %v1591_v38, %s7213_s16 }
  0xd2   : > { %781 = vst.msk [vmem:[#allocation3 + $0x40] sm:$0xff] %vm776_vm8, %v689_v42 }
  0xd3   : > { %1855 = vrot.lane.b32.xlu1 %v1783_v40, %s7214_s17  ;;  %v1266_v43 = vpop.permute.xlu0 %1265 }
  0xd4   : > { %1359 = vst.msk [vmem:[#allocation3 + $0x30] sm:$0xff] %vm1355_vm11, %v1266_v43  ;;  %v7850_v43 = vld [vmem:[#allocation2 + $0x12a] sm:$0xff] }
  0xd5   : > { %v1458_v45 = vpop.permute.xlu1 %1457  ;;  %v1969_v47 = vld [vmem:[#allocation3 + $0x10] sm:$0xff]  ;;  %511 = vrot.lane.b32.xlu0 %v1590_v31, %s7208_s11  ;;  %v7826_v31 = vld [vmem:[#allocation2 + $0x128] sm:$0xff]  ;;  %2404 = vst.msk [vmem:[#allocation2 + $0x131] sm:$0x1] %vm2373_vm4, %v7206_v0 }
  0xd6   : > { %1552 = vst.msk [vmem:[#allocation3 + $0x20] sm:$0xff] %vm1549_vm12, %v1458_v45  ;;  %6857 = vmatmul.mubr.msk.f32.vlgmr.msra.gmra.mxu0 %vm2007_vm15, %v1969_v47  ;;  %v272_v45 = vld [vmem:[%s7400_s9 + $0xc0] sm:$0xff] }
  0xd7   : > { %1088 = vrot.lane.b32.xlu1 %v1591_v38, %s7210_s13  ;;  %v691_v39 = vpop.permute.xlu0 %690  ;;  %416 = vst.msk [vmem:[#allocation3 + $0x190] sm:$0xff] %vm280_vm0, %v7826_v31  ;;  %351 = vst.msk [vmem:[#allocation2 + $0x139] sm:$0xff] %vm280_vm0, %v272_v45 }
  0xd8   : > { %782 = vst.msk [vmem:[#allocation3 + $0x50] sm:$0xff] %vm776_vm8, %v691_v39 }
  0xd9   : > { %v882_v48 = vpop.permute.xlu1 %881  ;;  %1279 = vrot.lane.b32.xlu0 %v1783_v40, %s7211_s14 }
  0xda   : > { %974 = vst.msk [vmem:[#allocation3 + $0x40] sm:$0xff] %vm969_vm9, %v882_v48 }
  0xdb   : > { %1857 = vrot.lane.b32.xlu1 %v7534_v44, %s7214_s17  ;;  %v1460_v53 = vpop.permute.xlu0 %1459 }
  0xdc   : > { %1553 = vst.msk [vmem:[#allocation3 + $0x30] sm:$0xff] %vm1549_vm12, %v1460_v53 }
  0xdd   : > { %v1651_v55 = vpop.permute.xlu1 %1650  ;;  %513 = vrot.lane.b32.xlu0 %v1591_v38, %s7208_s11 }
  0xde   : > { %1745 = vst.msk [vmem:[#allocation3 + $0x20] sm:$0xff] %vm1742_vm13, %v1651_v55  ;;  %v7865_v53 = vld [vmem:[#allocation2 + $0x138] sm:$0xff]  ;;  %v273_v55 = vld [vmem:[%s7400_s9 + $0xc8] sm:$0xff] }
  0xdf   : > { %704 = vrot.lane.b32.xlu1 %v1783_v40, %s7207_s10  ;;  %v884_v56 = vpop.permute.xlu0 %883  ;;  %352 = vst.msk [vmem:[#allocation2 + $0x141] sm:$0xff] %vm280_vm0, %v273_v55  ;;  %417 = vst.msk [vmem:[#allocation3 + $0x1a0] sm:$0xff] %vm280_vm0, %v7865_v53  ;;  %v1600_v55 = vld [vmem:[#allocation2 + $0x109] sm:$0xff] }
  0xe0   : > { %975 = vst.msk [vmem:[#allocation3 + $0x50] sm:$0xff] %vm969_vm9, %v884_v56 }
  0xe1   : > { %v1075_v58 = vpop.permute.xlu1 %1074  ;;  %1281 = vrot.lane.b32.xlu0 %v7534_v44, %s7211_s14  ;;  %2387 = vst.msk [vmem:[#allocation2 + $0x138] sm:$0x1] %vm2373_vm4, %v7206_v0 }
  0xe2   : > { %1167 = vst.msk [vmem:[#allocation3 + $0x40] sm:$0xff] %vm1162_vm10, %v1075_v58 }
  0xe3   : > { %1473 = vrot.lane.b32.xlu1 %v7545_v46, %s7212_s15  ;;  %v1653_v62 = vpop.permute.xlu0 %1652 }
  0xe4   : > { %1746 = vst.msk [vmem:[#allocation3 + $0x30] sm:$0xff] %vm1742_vm13, %v1653_v62 }
  0xe5   : > { %v1844_v63 = vpop.permute.xlu1 %1843  ;;  %706 = vrot.lane.b32.xlu0 %v7534_v44, %s7207_s10 }
  0xe6   : > { %1938 = vst.msk [vmem:[#allocation3 + $0x20] sm:$0xff] %vm1935_vm14, %v1844_v63 }
  0xe7   : > { %897 = vrot.lane.b32.xlu1 %v7545_v46, %s7209_s12  ;;  %v500_v2 = vpop.permute.xlu0 %499 }
  0xe8   : > { %590 = vst.msk [vmem:[#allocation3 + $0x60] sm:$0xff] %vm583_vm7, %v500_v2 }
  0xe9   : > { %v1077_v4 = vpop.permute.xlu1 %1076  ;;  %1475 = vrot.lane.b32.xlu0 %v7561_v49, %s7212_s15 }
  0xea   : > { %1168 = vst.msk [vmem:[#allocation3 + $0x50] sm:$0xff] %vm1162_vm10, %v1077_v4  ;;  %v1597_v4 = vld [vmem:[#allocation2 + $0xe1] sm:$0xff] }
  0xeb   : > { %1666 = vrot.lane.b32.xlu1 %v1592_v1, %s7213_s16  ;;  %v1268_v44 = vpop.permute.xlu0 %1267 }
  0xec   : > { %1360 = vst.msk [vmem:[#allocation3 + $0x40] sm:$0xff] %vm1355_vm11, %v1268_v44  ;;  %v1789_v44 = vld [vmem:[#allocation2 + $0xda] sm:$0xff] }
  0xed   : > { %v1846_v6 = vpop.permute.xlu1 %1845  ;;  %v1970_v46 = vld [vmem:[#allocation3 + $0x20] sm:$0xff]  ;;  %899 = vrot.lane.b32.xlu0 %v7561_v49, %s7209_s12 }
  0xee   : > { %1939 = vst.msk [vmem:[#allocation3 + $0x30] sm:$0xff] %vm1935_vm14, %v1846_v6  ;;  %6859 = vmatprep.mubr.msk.f32.mxu0 %vm2007_vm15, %v1970_v46 }
  0xef   : > { %1090 = vrot.lane.b32.xlu1 %v1592_v1, %s7210_s13  ;;  %v502_v9 = vpop.permute.xlu0 %501 }
  0xf0   : > { %591 = vst.msk [vmem:[#allocation3 + $0x70] sm:$0xff] %vm583_vm7, %v502_v9 }
  0xf1   : > { %v693_v11 = vpop.permute.xlu1 %692  ;;  %1668 = vrot.lane.b32.xlu0 %v1593_v7, %s7213_s16 }
  0xf2   : > { %783 = vst.msk [vmem:[#allocation3 + $0x60] sm:$0xff] %vm776_vm8, %v693_v11 }
  0xf3   : > { %1859 = vrot.lane.b32.xlu1 %v1785_v8, %s7214_s17  ;;  %v1270_v12 = vpop.permute.xlu0 %1269 }
  0xf4   : > { %1361 = vst.msk [vmem:[#allocation3 + $0x50] sm:$0xff] %vm1355_vm11, %v1270_v12  ;;  %v7909_v12 = vld [vmem:[#allocation2 + $0x142] sm:$0xff] }
  0xf5   : > { %v1462_v13 = vpop.permute.xlu1 %1461  ;;  %v1971_v14 = vld [vmem:[#allocation3 + $0x30] sm:$0xff]  ;;  %515 = vrot.lane.b32.xlu0 %v1592_v1, %s7208_s11  ;;  %2405 = vst.msk [vmem:[#allocation2 + $0x149] sm:$0x1] %vm2373_vm4, %v7206_v0 }
  0xf6   : > { %1554 = vst.msk [vmem:[#allocation3 + $0x40] sm:$0xff] %vm1549_vm12, %v1462_v13  ;;  %6860 = vmatmul.mubr.msk.f32.gmra.mxu0 %vm2007_vm15, %v1971_v14  ;;  %v7885_v1 = vld [vmem:[#allocation2 + $0x140] sm:$0xff]  ;;  %v274_v13 = vld [vmem:[%s7400_s9 + $0xd0] sm:$0xff] }
  0xf7   : > { %1092 = vrot.lane.b32.xlu1 %v1593_v7, %s7210_s13  ;;  %v695_v49 = vpop.permute.xlu0 %694  ;;  %418 = vst.msk [vmem:[#allocation3 + $0x1b0] sm:$0xff] %vm280_vm0, %v7885_v1  ;;  %353 = vst.msk [vmem:[#allocation2 + $0x151] sm:$0xff] %vm280_vm0, %v274_v13 }
  0xf8   : > { %784 = vst.msk [vmem:[#allocation3 + $0x70] sm:$0xff] %vm776_vm8, %v695_v49 }
  0xf9   : > { %v886_v15 = vpop.permute.xlu1 %885  ;;  %1283 = vrot.lane.b32.xlu0 %v1785_v8, %s7211_s14 }
  0xfa   : > { %976 = vst.msk [vmem:[#allocation3 + $0x60] sm:$0xff] %vm969_vm9, %v886_v15 }
  0xfb   : > { %1861 = vrot.lane.b32.xlu1 %v7575_v52, %s7214_s17  ;;  %v1464_v18 = vpop.permute.xlu0 %1463 }
  0xfc   : > { %1555 = vst.msk [vmem:[#allocation3 + $0x50] sm:$0xff] %vm1549_vm12, %v1464_v18 }
  0xfd   : > { %v1655_v19 = vpop.permute.xlu1 %1654  ;;  %517 = vrot.lane.b32.xlu0 %v1593_v7, %s7208_s11 }
  0xfe   : > { %1747 = vst.msk [vmem:[#allocation3 + $0x40] sm:$0xff] %vm1742_vm13, %v1655_v19  ;;  %v7924_v18 = vld [vmem:[#allocation2 + $0x150] sm:$0xff]  ;;  %v275_v19 = vld [vmem:[%s7400_s9 + $0xd8] sm:$0xff] }
  0xff   : > { %708 = vrot.lane.b32.xlu1 %v1785_v8, %s7207_s10  ;;  %v888_v20 = vpop.permute.xlu0 %887  ;;  %354 = vst.msk [vmem:[#allocation2 + $0x159] sm:$0xff] %vm280_vm0, %v275_v19  ;;  %419 = vst.msk [vmem:[#allocation3 + $0x1c0] sm:$0xff] %vm280_vm0, %v7924_v18  ;;  %v1602_v19 = vld [vmem:[#allocation2 + $0x121] sm:$0xff] }
 0x100   : > { %977 = vst.msk [vmem:[#allocation3 + $0x70] sm:$0xff] %vm969_vm9, %v888_v20 }
 0x101   : > { %v1079_v22 = vpop.permute.xlu1 %1078  ;;  %1285 = vrot.lane.b32.xlu0 %v7575_v52, %s7211_s14  ;;  %2388 = vst.msk [vmem:[#allocation2 + $0x150] sm:$0x1] %vm2373_vm4, %v7206_v0 }
 0x102   : > { %1169 = vst.msk [vmem:[#allocation3 + $0x60] sm:$0xff] %vm1162_vm10, %v1079_v22 }
 0x103   : > { %1477 = vrot.lane.b32.xlu1 %v7586_v54, %s7212_s15  ;;  %v1657_v25 = vpop.permute.xlu0 %1656 }
 0x104   : > { %1748 = vst.msk [vmem:[#allocation3 + $0x50] sm:$0xff] %vm1742_vm13, %v1657_v25 }
 0x105   : > { %v1848_v26 = vpop.permute.xlu1 %1847  ;;  %710 = vrot.lane.b32.xlu0 %v7575_v52, %s7207_s10 }
 0x106   : > { %1940 = vst.msk [vmem:[#allocation3 + $0x40] sm:$0xff] %vm1935_vm14, %v1848_v26 }
 0x107   : > { %901 = vrot.lane.b32.xlu1 %v7586_v54, %s7209_s12  ;;  %v504_v29 = vpop.permute.xlu0 %503 }
 0x108   : > { %592 = vst.msk [vmem:[#allocation3 + $0x80] sm:$0xff] %vm583_vm7, %v504_v29 }
 0x109   : > { %v1081_v30 = vpop.permute.xlu1 %1080  ;;  %1479 = vrot.lane.b32.xlu0 %v7602_v57, %s7212_s15 }
 0x10a   : > { %1170 = vst.msk [vmem:[#allocation3 + $0x70] sm:$0xff] %vm1162_vm10, %v1081_v30  ;;  %v1599_v30 = vld [vmem:[#allocation2 + $0xf9] sm:$0xff] }
 0x10b   : > { %1670 = vrot.lane.b32.xlu1 %v1594_v28, %s7213_s16  ;;  %v1272_v52 = vpop.permute.xlu0 %1271 }
 0x10c   : > { %1362 = vst.msk [vmem:[#allocation3 + $0x60] sm:$0xff] %vm1355_vm11, %v1272_v52  ;;  %v1791_v52 = vld [vmem:[#allocation2 + $0xf2] sm:$0xff] }
 0x10d   : > { %v1850_v32 = vpop.permute.xlu1 %1849  ;;  %v1972_v54 = vld [vmem:[#allocation3 + $0x40] sm:$0xff]  ;;  %903 = vrot.lane.b32.xlu0 %v7602_v57, %s7209_s12 }
 0x10e   : > { %1941 = vst.msk [vmem:[#allocation3 + $0x50] sm:$0xff] %vm1935_vm14, %v1850_v32  ;;  %6862 = vmatprep.mubr.msk.f32.mxu0 %vm2007_vm15, %v1972_v54 }
 0x10f   : > { %1094 = vrot.lane.b32.xlu1 %v1594_v28, %s7210_s13  ;;  %v506_v36 = vpop.permute.xlu0 %505 }
 0x110   : > { %593 = vst.msk [vmem:[#allocation3 + $0x90] sm:$0xff] %vm583_vm7, %v506_v36 }
 0x111   : > { %v697_v37 = vpop.permute.xlu1 %696  ;;  %1672 = vrot.lane.b32.xlu0 %v1595_v33, %s7213_s16 }
 0x112   : > { %785 = vst.msk [vmem:[#allocation3 + $0x80] sm:$0xff] %vm776_vm8, %v697_v37 }
 0x113   : > { %1863 = vrot.lane.b32.xlu1 %v1787_v34, %s7214_s17  ;;  %v1274_v38 = vpop.permute.xlu0 %1273 }
 0x114   : > { %1363 = vst.msk [vmem:[#allocation3 + $0x70] sm:$0xff] %vm1355_vm11, %v1274_v38  ;;  %v7968_v38 = vld [vmem:[#allocation2 + $0x15a] sm:$0xff] }
 0x115   : > { %v1466_v40 = vpop.permute.xlu1 %1465  ;;  %v1973_v41 = vld [vmem:[#allocation3 + $0x50] sm:$0xff]  ;;  %519 = vrot.lane.b32.xlu0 %v1594_v28, %s7208_s11  ;;  %v7944_v28 = vld [vmem:[#allocation2 + $0x158] sm:$0xff]  ;;  %2406 = vst.msk [vmem:[#allocation2 + $0x161] sm:$0x1] %vm2373_vm4, %v7206_v0 }
 0x116   : > { %1556 = vst.msk [vmem:[#allocation3 + $0x60] sm:$0xff] %vm1549_vm12, %v1466_v40  ;;  %6863 = vmatmul.mubr.msk.f32.gmra.mxu0 %vm2007_vm15, %v1973_v41  ;;  %v276_v40 = vld [vmem:[%s7400_s9 + $0xe0] sm:$0xff] }
 0x117   : > { %1096 = vrot.lane.b32.xlu1 %v1595_v33, %s7210_s13  ;;  %v699_v57 = vpop.permute.xlu0 %698  ;;  %420 = vst.msk [vmem:[#allocation3 + $0x1d0] sm:$0xff] %vm280_vm0, %v7944_v28  ;;  %355 = vst.msk [vmem:[#allocation2 + $0x169] sm:$0xff] %vm280_vm0, %v276_v40 }
 0x118   : > { %786 = vst.msk [vmem:[#allocation3 + $0x90] sm:$0xff] %vm776_vm8, %v699_v57 }
 0x119   : > { %v890_v42 = vpop.permute.xlu1 %889  ;;  %1287 = vrot.lane.b32.xlu0 %v1787_v34, %s7211_s14 }
 0x11a   : > { %978 = vst.msk [vmem:[#allocation3 + $0x80] sm:$0xff] %vm969_vm9, %v890_v42 }
 0x11b   : > { %1865 = vrot.lane.b32.xlu1 %v7616_v60, %s7214_s17  ;;  %v1468_v47 = vpop.permute.xlu0 %1467 }
 0x11c   : > { %1557 = vst.msk [vmem:[#allocation3 + $0x70] sm:$0xff] %vm1549_vm12, %v1468_v47 }
 0x11d   : > { %v1659_v39 = vpop.permute.xlu1 %1658  ;;  %521 = vrot.lane.b32.xlu0 %v1595_v33, %s7208_s11 }
 0x11e   : > { %1749 = vst.msk [vmem:[#allocation3 + $0x60] sm:$0xff] %vm1742_vm13, %v1659_v39  ;;  %v7983_v47 = vld [vmem:[#allocation2 + $0x168] sm:$0xff] }
 0x11f   : > { %712 = vrot.lane.b32.xlu1 %v1787_v34, %s7207_s10  ;;  %v892_v48 = vpop.permute.xlu0 %891  ;;  %v277_v39 = vld [vmem:[%s7400_s9 + $0xe8] sm:$0xff]  ;;  %421 = vst.msk [vmem:[#allocation3 + $0x1e0] sm:$0xff] %vm280_vm0, %v7983_v47 }
 0x120   : > { %979 = vst.msk [vmem:[#allocation3 + $0x90] sm:$0xff] %vm969_vm9, %v892_v48 }
 0x121   : > { %v1083_v51 = vpop.permute.xlu1 %1082  ;;  %1289 = vrot.lane.b32.xlu0 %v7616_v60, %s7211_s14  ;;  %356 = vst.msk [vmem:[#allocation2 + $0x171] sm:$0xff] %vm280_vm0, %v277_v39 }
 0x122   : > { %1171 = vst.msk [vmem:[#allocation3 + $0x80] sm:$0xff] %vm1162_vm10, %v1083_v51 }
 0x123   : > { %1481 = vrot.lane.b32.xlu1 %v7630_v3, %s7212_s15  ;;  %v1661_v56 = vpop.permute.xlu0 %1660  ;;  %2389 = vst.msk [vmem:[#allocation2 + $0x168] sm:$0x1] %vm2373_vm4, %v7206_v0 }
 0x124   : > { %1750 = vst.msk [vmem:[#allocation3 + $0x70] sm:$0xff] %vm1742_vm13, %v1661_v56 }
 0x125   : > { %v1852_v58 = vpop.permute.xlu1 %1851  ;;  %714 = vrot.lane.b32.xlu0 %v7616_v60, %s7207_s10 }
 0x126   : > { %1942 = vst.msk [vmem:[#allocation3 + $0x60] sm:$0xff] %vm1935_vm14, %v1852_v58 }
 0x127   : > { %905 = vrot.lane.b32.xlu1 %v7630_v3, %s7209_s12  ;;  %v508_v62 = vpop.permute.xlu0 %507 }
 0x128   : > { %594 = vst.msk [vmem:[#allocation3 + $0xa0] sm:$0xff] %vm583_vm7, %v508_v62 }
 0x129   : > { %v1085_v63 = vpop.permute.xlu1 %1084  ;;  %1483 = vrot.lane.b32.xlu0 %v7651_v10, %s7212_s15 }
 0x12a   : > { %1172 = vst.msk [vmem:[#allocation3 + $0x90] sm:$0xff] %vm1162_vm10, %v1085_v63  ;;  %v1601_v63 = vld [vmem:[#allocation2 + $0x111] sm:$0xff] }
 0x12b   : > { %1674 = vrot.lane.b32.xlu1 %v1596_v61, %s7213_s16  ;;  %v1276_v60 = vpop.permute.xlu0 %1275 }
 0x12c   : > { %1364 = vst.msk [vmem:[#allocation3 + $0x80] sm:$0xff] %vm1355_vm11, %v1276_v60  ;;  %v1793_v60 = vld [vmem:[#allocation2 + $0x10a] sm:$0xff] }
 0x12d   : > { %v1854_v2 = vpop.permute.xlu1 %1853  ;;  %v1974_v3 = vld [vmem:[#allocation3 + $0x60] sm:$0xff]  ;;  %907 = vrot.lane.b32.xlu0 %v7651_v10, %s7209_s12 }
 0x12e   : > { %1943 = vst.msk [vmem:[#allocation3 + $0x70] sm:$0xff] %vm1935_vm14, %v1854_v2  ;;  %6865 = vmatprep.mubr.msk.f32.mxu0 %vm2007_vm15, %v1974_v3 }
 0x12f   : > { %1098 = vrot.lane.b32.xlu1 %v1596_v61, %s7210_s13  ;;  %v510_v6 = vpop.permute.xlu0 %509 }
 0x130   : > { %595 = vst.msk [vmem:[#allocation3 + $0xb0] sm:$0xff] %vm583_vm7, %v510_v6 }
 0x131   : > { %v701_v46 = vpop.permute.xlu1 %700  ;;  %1676 = vrot.lane.b32.xlu0 %v1597_v4, %s7213_s16 }
 0x132   : > { %787 = vst.msk [vmem:[#allocation3 + $0xa0] sm:$0xff] %vm776_vm8, %v701_v46 }
 0x133   : > { %1867 = vrot.lane.b32.xlu1 %v1789_v44, %s7214_s17  ;;  %v1278_v7 = vpop.permute.xlu0 %1277 }
 0x134   : > { %1365 = vst.msk [vmem:[#allocation3 + $0x90] sm:$0xff] %vm1355_vm11, %v1278_v7  ;;  %v8027_v7 = vld [vmem:[#allocation2 + $0x172] sm:$0xff] }
 0x135   : > { %v1470_v8 = vpop.permute.xlu1 %1469  ;;  %v1975_v9 = vld [vmem:[#allocation3 + $0x70] sm:$0xff]  ;;  %523 = vrot.lane.b32.xlu0 %v1596_v61, %s7208_s11  ;;  %v8003_v61 = vld [vmem:[#allocation2 + $0x170] sm:$0xff]  ;;  %2407 = vst.msk [vmem:[#allocation2 + $0x179] sm:$0x1] %vm2373_vm4, %v7206_v0 }
 0x136   : > { %1558 = vst.msk [vmem:[#allocation3 + $0x80] sm:$0xff] %vm1549_vm12, %v1470_v8  ;;  %6866 = vmatmul.mubr.msk.f32.gmra.mxu0 %vm2007_vm15, %v1975_v9  ;;  %v278_v8 = vld [vmem:[%s7400_s9 + $0xf0] sm:$0xff] }
 0x137   : > { %1100 = vrot.lane.b32.xlu1 %v1597_v4, %s7210_s13  ;;  %v703_v10 = vpop.permute.xlu0 %702  ;;  %422 = vst.msk [vmem:[#allocation3 + $0x1f0] sm:$0xff] %vm280_vm0, %v8003_v61  ;;  %357 = vst.msk [vmem:[#allocation2 + $0x181] sm:$0xff] %vm280_vm0, %v278_v8 }
 0x138   : > { %788 = vst.msk [vmem:[#allocation3 + $0xb0] sm:$0xff] %vm776_vm8, %v703_v10 }
 0x139   : > { %v894_v11 = vpop.permute.xlu1 %893  ;;  %1291 = vrot.lane.b32.xlu0 %v1789_v44, %s7211_s14 }
 0x13a   : > { %980 = vst.msk [vmem:[#allocation3 + $0xa0] sm:$0xff] %vm969_vm9, %v894_v11 }
 0x13b   : > { %1869 = vrot.lane.b32.xlu1 %v7673_v21, %s7214_s17  ;;  %v1472_v14 = vpop.permute.xlu0 %1471 }
 0x13c   : > { %1559 = vst.msk [vmem:[#allocation3 + $0x90] sm:$0xff] %vm1549_vm12, %v1472_v14 }
 0x13d   : > { %v1663_v49 = vpop.permute.xlu1 %1662  ;;  %525 = vrot.lane.b32.xlu0 %v1597_v4, %s7208_s11 }
 0x13e   : > { %1751 = vst.msk [vmem:[#allocation3 + $0x80] sm:$0xff] %vm1742_vm13, %v1663_v49  ;;  %v8042_v14 = vld [vmem:[#allocation2 + $0x180] sm:$0xff]  ;;  %v279_v49 = vld [vmem:[%s7400_s9 + $0xf8] sm:$0xff]  ;;  %s8945_s9 = scalar_lea.vmem %s10204_s3, %s6736_s6  ;;  %s9882_s6 = scalar_lea.vmem %s10205_s4, %s6738_s7 }
 0x13f   : > { %716 = vrot.lane.b32.xlu1 %v1789_v44, %s7207_s10  ;;  %v896_v15 = vpop.permute.xlu0 %895  ;;  %2390 = vst.msk [vmem:[#allocation2 + $0x180] sm:$0x1] %vm2373_vm4, %v7206_v0  ;;  %s7226_s7 = smov 96  }
 0x140   : > { %981 = vst.msk [vmem:[#allocation3 + $0xb0] sm:$0xff] %vm969_vm9, %v896_v15 }
 0x141   : > { %v1087_v17 = vpop.permute.xlu1 %1086  ;;  %1293 = vrot.lane.b32.xlu0 %v7673_v21, %s7211_s14  ;;  %358 = vst.msk [vmem:[#allocation2 + $0x189] sm:$0xff] %vm280_vm0, %v279_v49  ;;  %vm4190_vm0 = vcmask 1043456  }
 0x142   : > { %1173 = vst.msk [vmem:[#allocation3 + $0xa0] sm:$0xff] %vm1162_vm10, %v1087_v17 }
 0x143   : > { %1485 = vrot.lane.b32.xlu1 %v7688_v27, %s7212_s15  ;;  %v1665_v20 = vpop.permute.xlu0 %1664 }
 0x144   : > { %1752 = vst.msk [vmem:[#allocation3 + $0x90] sm:$0xff] %vm1742_vm13, %v1665_v20 }
 0x145   : > { %v1856_v22 = vpop.permute.xlu1 %1855  ;;  %718 = vrot.lane.b32.xlu0 %v7673_v21, %s7207_s10 }
 0x146   : > { %1944 = vst.msk [vmem:[#allocation3 + $0x80] sm:$0xff] %vm1935_vm14, %v1856_v22 }
 0x147   : > { %909 = vrot.lane.b32.xlu1 %v7688_v27, %s7209_s12  ;;  %v512_v25 = vpop.permute.xlu0 %511 }
 0x148   : > { %596 = vst.msk [vmem:[#allocation3 + $0xc0] sm:$0xff] %vm583_vm7, %v512_v25  ;;  %v8087_v40 = vld [vmem:[#allocation2 + $0x18a] sm:$0xff] }
 0x149   : > { %v1089_v26 = vpop.permute.xlu1 %1088  ;;  %1487 = vrot.lane.b32.xlu0 %v7708_v35, %s7212_s15  ;;  %2408 = vst.msk [vmem:[#allocation2 + $0x191] sm:$0x1] %vm2373_vm4, %v7206_v0 }
 0x14a   : > { %1174 = vst.msk [vmem:[#allocation3 + $0xb0] sm:$0xff] %vm1162_vm10, %v1089_v26 }
 0x14b   : > { %1678 = vrot.lane.b32.xlu1 %v1598_v24, %s7213_s16  ;;  %v1280_v21 = vpop.permute.xlu0 %1279 }
 0x14c   : > { %1366 = vst.msk [vmem:[#allocation3 + $0xa0] sm:$0xff] %vm1355_vm11, %v1280_v21 }
 0x14d   : > { %v1858_v29 = vpop.permute.xlu1 %1857  ;;  %v1976_v27 = vld [vmem:[#allocation3 + $0x80] sm:$0xff]  ;;  %911 = vrot.lane.b32.xlu0 %v7708_v35, %s7209_s12 }
 0x14e   : > { %1945 = vst.msk [vmem:[#allocation3 + $0x90] sm:$0xff] %vm1935_vm14, %v1858_v29  ;;  %6868 = vmatprep.mubr.msk.f32.mxu0 %vm2007_vm15, %v1976_v27  ;;  %v8076_v27 = vld [vmem:[%s10203_s2] ss:$0 sm:$0xff] }
 0x14f   : > { %1102 = vrot.lane.b32.xlu1 %v1598_v24, %s7210_s13  ;;  %v514_v32 = vpop.permute.xlu0 %513 }
 0x150   : > { %597 = vst.msk [vmem:[#allocation3 + $0xd0] sm:$0xff] %vm583_vm7, %v514_v32 }
 0x151   : > { %v705_v54 = vpop.permute.xlu1 %704  ;;  %1680 = vrot.lane.b32.xlu0 %v1599_v30, %s7213_s16 }
 0x152   : > { %789 = vst.msk [vmem:[#allocation3 + $0xc0] sm:$0xff] %vm776_vm8, %v705_v54 }
 0x153   : > { %1871 = vrot.lane.b32.xlu1 %v1791_v52, %s7214_s17  ;;  %v1282_v33 = vpop.permute.xlu0 %1281 }
 0x154   : > { %1367 = vst.msk [vmem:[#allocation3 + $0xb0] sm:$0xff] %vm1355_vm11, %v1282_v33 }
 0x155   : > { %v1474_v34 = vpop.permute.xlu1 %1473  ;;  %v1977_v36 = vld [vmem:[#allocation3 + $0x90] sm:$0xff]  ;;  %527 = vrot.lane.b32.xlu0 %v1598_v24, %s7208_s11 }
 0x156   : > { %1560 = vst.msk [vmem:[#allocation3 + $0xa0] sm:$0xff] %vm1549_vm12, %v1474_v34  ;;  %6869 = vmatmul.mubr.msk.f32.gmra.mxu0 %vm2007_vm15, %v1977_v36 }
 0x157   : > { %1104 = vrot.lane.b32.xlu1 %v1599_v30, %s7210_s13  ;;  %v707_v35 = vpop.permute.xlu0 %706 }
 0x158   : > { %790 = vst.msk [vmem:[#allocation3 + $0xd0] sm:$0xff] %vm776_vm8, %v707_v35 }
 0x159   : > { %v898_v37 = vpop.permute.xlu1 %897  ;;  %1295 = vrot.lane.b32.xlu0 %v1791_v52, %s7211_s14 }
 0x15a   : > { %982 = vst.msk [vmem:[#allocation3 + $0xc0] sm:$0xff] %vm969_vm9, %v898_v37 }
 0x15b   : > { %1873 = vrot.lane.b32.xlu1 %v7732_v50, %s7214_s17  ;;  %v1476_v41 = vpop.permute.xlu0 %1475 }
 0x15c   : > { %1561 = vst.msk [vmem:[#allocation3 + $0xb0] sm:$0xff] %vm1549_vm12, %v1476_v41 }
 0x15d   : > { %v1667_v57 = vpop.permute.xlu1 %1666  ;;  %529 = vrot.lane.b32.xlu0 %v1599_v30, %s7208_s11 }
 0x15e   : > { %1753 = vst.msk [vmem:[#allocation3 + $0xa0] sm:$0xff] %vm1742_vm13, %v1667_v57 }
 0x15f   : > { %720 = vrot.lane.b32.xlu1 %v1791_v52, %s7207_s10  ;;  %v900_v42 = vpop.permute.xlu0 %899 }
 0x160   : > { %983 = vst.msk [vmem:[#allocation3 + $0xd0] sm:$0xff] %vm969_vm9, %v900_v42 }
 0x161   : > { %v1091_v45 = vpop.permute.xlu1 %1090  ;;  %1297 = vrot.lane.b32.xlu0 %v7732_v50, %s7211_s14 }
 0x162   : > { %1175 = vst.msk [vmem:[#allocation3 + $0xc0] sm:$0xff] %vm1162_vm10, %v1091_v45 }
 0x163   : > { %1489 = vrot.lane.b32.xlu1 %v7747_v59, %s7212_s15  ;;  %v1669_v48 = vpop.permute.xlu0 %1668 }
 0x164   : > { %1754 = vst.msk [vmem:[#allocation3 + $0xb0] sm:$0xff] %vm1742_vm13, %v1669_v48 }
 0x165   : > { %v1860_v51 = vpop.permute.xlu1 %1859  ;;  %722 = vrot.lane.b32.xlu0 %v7732_v50, %s7207_s10 }
 0x166   : > { %1946 = vst.msk [vmem:[#allocation3 + $0xa0] sm:$0xff] %vm1935_vm14, %v1860_v51 }
 0x167   : > { %913 = vrot.lane.b32.xlu1 %v7747_v59, %s7209_s12  ;;  %v516_v56 = vpop.permute.xlu0 %515 }
 0x168   : > { %598 = vst.msk [vmem:[#allocation3 + $0xe0] sm:$0xff] %vm583_vm7, %v516_v56 }
 0x169   : > { %v1093_v58 = vpop.permute.xlu1 %1092  ;;  %1491 = vrot.lane.b32.xlu0 %v7767_v5, %s7212_s15 }
 0x16a   : > { %1176 = vst.msk [vmem:[#allocation3 + $0xd0] sm:$0xff] %vm1162_vm10, %v1093_v58  ;;  %v8110_v58 = vld [vmem:[#allocation2 + $0x198] sm:$0xff] }
 0x16b   : > { %1682 = vrot.lane.b32.xlu1 %v1600_v55, %s7213_s16  ;;  %v1284_v50 = vpop.permute.xlu0 %1283 }
 0x16c   : > { %1368 = vst.msk [vmem:[#allocation3 + $0xc0] sm:$0xff] %vm1355_vm11, %v1284_v50  ;;  %v8112_v50 = vld [vmem:[#allocation2 + $0x1a0] sm:$0xff] }
 0x16d   : > { %v1862_v62 = vpop.permute.xlu1 %1861  ;;  %v1978_v59 = vld [vmem:[#allocation3 + $0xa0] sm:$0xff]  ;;  %915 = vrot.lane.b32.xlu0 %v7767_v5, %s7209_s12 }
 0x16e   : > { %1947 = vst.msk [vmem:[#allocation3 + $0xb0] sm:$0xff] %vm1935_vm14, %v1862_v62  ;;  %6871 = vmatprep.mubr.msk.f32.mxu0 %vm2007_vm15, %v1978_v59  ;;  %v8114_v62 = vld [vmem:[#allocation2 + $0x199] sm:$0xff]  ;;  %v8122_v59 = vld [vmem:[#allocation2 + $0x1a1] sm:$0xff] }
 0x16f   : > { %1106 = vrot.lane.b32.xlu1 %v1600_v55, %s7210_s13  ;;  %v518_v2 = vpop.permute.xlu0 %517 }
 0x170   : > { %599 = vst.msk [vmem:[#allocation3 + $0xf0] sm:$0xff] %vm583_vm7, %v518_v2  ;;  %v1604_v2 = vld [vmem:[#allocation2 + $0x139] sm:$0xff] }
 0x171   : > { %v709_v3 = vpop.permute.xlu1 %708  ;;  %1684 = vrot.lane.b32.xlu0 %v1601_v63, %s7213_s16 }
 0x172   : > { %791 = vst.msk [vmem:[#allocation3 + $0xe0] sm:$0xff] %vm776_vm8, %v709_v3 }
 0x173   : > { %1875 = vrot.lane.b32.xlu1 %v1793_v60, %s7214_s17  ;;  %v1286_v4 = vpop.permute.xlu0 %1285 }
 0x174   : > { %1369 = vst.msk [vmem:[#allocation3 + $0xd0] sm:$0xff] %vm1355_vm11, %v1286_v4 }
 0x175   : > { %v1478_v44 = vpop.permute.xlu1 %1477  ;;  %v1979_v6 = vld [vmem:[#allocation3 + $0xb0] sm:$0xff]  ;;  %531 = vrot.lane.b32.xlu0 %v1600_v55, %s7208_s11 }
 0x176   : > { %1562 = vst.msk [vmem:[#allocation3 + $0xc0] sm:$0xff] %vm1549_vm12, %v1478_v44  ;;  %6872 = vmatmul.mubr.msk.f32.gmra.mxu0 %vm2007_vm15, %v1979_v6  ;;  %v1605_v6 = vld [vmem:[#allocation2 + $0x141] sm:$0xff] }
 0x177   : > { %1108 = vrot.lane.b32.xlu1 %v1601_v63, %s7210_s13  ;;  %v711_v5 = vpop.permute.xlu0 %710 }
 0x178   : > { %792 = vst.msk [vmem:[#allocation3 + $0xf0] sm:$0xff] %vm776_vm8, %v711_v5  ;;  %v1797_v5 = vld [vmem:[#allocation2 + $0x13a] sm:$0xff] }
 0x179   : > { %v902_v46 = vpop.permute.xlu1 %901  ;;  %1299 = vrot.lane.b32.xlu0 %v1793_v60, %s7211_s14 }
 0x17a   : > { %984 = vst.msk [vmem:[#allocation3 + $0xe0] sm:$0xff] %vm969_vm9, %v902_v46 }
 0x17b   : > { %1877 = vrot.lane.b32.xlu1 %v7791_v16, %s7214_s17  ;;  %v1480_v9 = vpop.permute.xlu0 %1479 }
 0x17c   : > { %1563 = vst.msk [vmem:[#allocation3 + $0xd0] sm:$0xff] %vm1549_vm12, %v1480_v9 }
 0x17d   : > { %v1671_v10 = vpop.permute.xlu1 %1670  ;;  %533 = vrot.lane.b32.xlu0 %v1601_v63, %s7208_s11  ;;  %v8124_v63 = vld [vmem:[#allocation2 + $0x19a] sm:$0xff] }
 0x17e   : > { %1755 = vst.msk [vmem:[#allocation3 + $0xc0] sm:$0xff] %vm1742_vm13, %v1671_v10 }
 0x17f   : > { %724 = vrot.lane.b32.xlu1 %v1793_v60, %s7207_s10  ;;  %v904_v11 = vpop.permute.xlu0 %903  ;;  %v8126_v60 = vld [vmem:[#allocation2 + $0x1a2] sm:$0xff]  ;;  %2370 = vst.msk [vmem:[#allocation2 + $0x198] sm:$0xff] %vm2365_vm5, %v7206_v0 }
 0x180   : > { %985 = vst.msk [vmem:[#allocation3 + $0xf0] sm:$0xff] %vm969_vm9, %v904_v11 }
 0x181   : > { %v1095_v13 = vpop.permute.xlu1 %1094  ;;  %1301 = vrot.lane.b32.xlu0 %v7791_v16, %s7211_s14  ;;  %2371 = vst.msk [vmem:[#allocation2 + $0x1a0] sm:$0xff] %vm2365_vm5, %v7206_v0 }
 0x182   : > { %1177 = vst.msk [vmem:[#allocation3 + $0xe0] sm:$0xff] %vm1162_vm10, %v1095_v13 }
 0x183   : > { %1493 = vrot.lane.b32.xlu1 %v7806_v23, %s7212_s15  ;;  %v1673_v15 = vpop.permute.xlu0 %1672  ;;  %2372 = vst.msk [vmem:[#allocation2 + $0x1a8] sm:$0x3] %vm2368_vm3, %v7206_v0 }
 0x184   : > { %1756 = vst.msk [vmem:[#allocation3 + $0xd0] sm:$0xff] %vm1742_vm13, %v1673_v15 }
 0x185   : > { %v1864_v17 = vpop.permute.xlu1 %1863  ;;  %726 = vrot.lane.b32.xlu0 %v7791_v16, %s7207_s10  ;;  %v1603_v16 = vld [vmem:[#allocation2 + $0x129] sm:$0xff]  ;;  %2391 = vst.msk [vmem:[#allocation2 + $0x198] sm:$0x1] %vm2373_vm4, %v7206_v0  ;;  %2409 = vst.msk [vmem:[#allocation2 + $0x1a9] sm:$0x1] %vm2373_vm4, %v7206_v0 }
 0x186   : > { %1948 = vst.msk [vmem:[#allocation3 + $0xc0] sm:$0xff] %vm1935_vm14, %v1864_v17 }
 0x187   : > { %917 = vrot.lane.b32.xlu1 %v7806_v23, %s7209_s12  ;;  %v520_v20 = vpop.permute.xlu0 %519  ;;  %v1795_v23 = vld [vmem:[#allocation2 + $0x122] sm:$0xff] }
 0x188   : > { %600 = vst.msk [vmem:[#allocation3 + $0x100] sm:$0xff] %vm583_vm7, %v520_v20 }
 0x189   : > { %v1097_v22 = vpop.permute.xlu1 %1096  ;;  %1495 = vrot.lane.b32.xlu0 %v7826_v31, %s7212_s15 }
 0x18a   : > { %1178 = vst.msk [vmem:[#allocation3 + $0xf0] sm:$0xff] %vm1162_vm10, %v1097_v22 }
 0x18b   : > { %1686 = vrot.lane.b32.xlu1 %v1602_v19, %s7213_s16  ;;  %v1288_v24 = vpop.permute.xlu0 %1287 }
 0x18c   : > { %1370 = vst.msk [vmem:[#allocation3 + $0xe0] sm:$0xff] %vm1355_vm11, %v1288_v24 }
 0x18d   : > { %v1866_v25 = vpop.permute.xlu1 %1865  ;;  %v1980_v26 = vld [vmem:[#allocation3 + $0xc0] sm:$0xff]  ;;  %919 = vrot.lane.b32.xlu0 %v7826_v31, %s7209_s12 }
 0x18e   : > { %1949 = vst.msk [vmem:[#allocation3 + $0xd0] sm:$0xff] %vm1935_vm14, %v1866_v25  ;;  %6874 = vmatprep.mubr.msk.f32.mxu0 %vm2007_vm15, %v1980_v26 }
 0x18f   : > { %1110 = vrot.lane.b32.xlu1 %v1602_v19, %s7210_s13  ;;  %v522_v21 = vpop.permute.xlu0 %521 }
 0x190   : > { %601 = vst.msk [vmem:[#allocation3 + $0x110] sm:$0xff] %vm583_vm7, %v522_v21 }
 0x191   : > { %v713_v29 = vpop.permute.xlu1 %712  ;;  %1688 = vrot.lane.b32.xlu0 %v1603_v16, %s7213_s16 }
 0x192   : > { %793 = vst.msk [vmem:[#allocation3 + $0x100] sm:$0xff] %vm776_vm8, %v713_v29 }
 0x193   : > { %1879 = vrot.lane.b32.xlu1 %v1795_v23, %s7214_s17  ;;  %v1290_v31 = vpop.permute.xlu0 %1289 }
 0x194   : > { %1371 = vst.msk [vmem:[#allocation3 + $0xf0] sm:$0xff] %vm1355_vm11, %v1290_v31 }
 0x195   : > { %v1482_v30 = vpop.permute.xlu1 %1481  ;;  %v1981_v52 = vld [vmem:[#allocation3 + $0xd0] sm:$0xff]  ;;  %535 = vrot.lane.b32.xlu0 %v1602_v19, %s7208_s11 }
 0x196   : > { %1564 = vst.msk [vmem:[#allocation3 + $0xe0] sm:$0xff] %vm1549_vm12, %v1482_v30  ;;  %v6858_v32 = vpop.f32.mrf.mxu0  ;;  %6875 = vmatmul.mubr.msk.f32.gmra.mxu0 %vm2007_vm15, %v1981_v52  ;;  %v1606_v30 = vld [vmem:[#allocation2 + $0x151] sm:$0xff] }
 0x197   : > { %1112 = vrot.lane.b32.xlu1 %v1603_v16, %s7210_s13  ;;  %v2180_v54 = vadd.f32 %v6858_v32, %v8076_v27  ;;  %v715_v34 = vpop.permute.xlu0 %714 }
 0x198   : > { %v2174_v33 = vpop.f32.mrf.mxu0  ;;  %794 = vst.msk [vmem:[#allocation3 + $0x110] sm:$0xff] %vm776_vm8, %v715_v34 }
 0x199   : > { %v906_v36 = vpop.permute.xlu1 %905  ;;  %v2334_v35 = vmax.f32 %v2180_v54, 0.0  ;;  %v2175_v37 = vadd.f32 %v8076_v27, %v2174_v33  ;;  %1303 = vrot.lane.b32.xlu0 %v1795_v23, %s7211_s14 }
 0x19a   : > { %986 = vst.msk [vmem:[#allocation3 + $0x100] sm:$0xff] %vm969_vm9, %v906_v36 }
 0x19b   : > { %1881 = vrot.lane.b32.xlu1 %v7850_v43, %s7214_s17  ;;  %2411 = vst.msk [vmem:[#allocation2 + $0x21] sm:$0xff] %vm2365_vm5, %v2334_v35  ;;  %v2333_v41 = vmax.f32 %v2175_v37, 0.0  ;;  %v1484_v57 = vpop.permute.xlu0 %1483 }
 0x19c   : > { %1565 = vst.msk [vmem:[#allocation3 + $0xf0] sm:$0xff] %vm1549_vm12, %v1484_v57 }
 0x19d   : > { %v1675_v42 = vpop.permute.xlu1 %1674  ;;  %2410 = vst.msk [vmem:[#allocation2 + $0x19] sm:$0xff] %vm2365_vm5, %v2333_v41  ;;  %537 = vrot.lane.b32.xlu0 %v1603_v16, %s7208_s11 }
 0x19e   : > { %1757 = vst.msk [vmem:[#allocation3 + $0xe0] sm:$0xff] %vm1742_vm13, %v1675_v42 }
 0x19f   : > { %728 = vrot.lane.b32.xlu1 %v1795_v23, %s7207_s10  ;;  %v908_v45 = vpop.permute.xlu0 %907 }
 0x1a0   : > { %987 = vst.msk [vmem:[#allocation3 + $0x110] sm:$0xff] %vm969_vm9, %v908_v45 }
 0x1a1   : > { %v1099_v39 = vpop.permute.xlu1 %1098  ;;  %1305 = vrot.lane.b32.xlu0 %v7850_v43, %s7211_s14 }
 0x1a2   : > { %1179 = vst.msk [vmem:[#allocation3 + $0x100] sm:$0xff] %vm1162_vm10, %v1099_v39 }
 0x1a3   : > { %1497 = vrot.lane.b32.xlu1 %v7865_v53, %s7212_s15  ;;  %v1677_v55 = vpop.permute.xlu0 %1676 }
 0x1a4   : > { %v8106_v48 = vld [vmem:[#allocation2 + $0x18] sm:$0xff]  ;;  %v8108_v51 = vld [vmem:[#allocation2 + $0x20] sm:$0xff]  ;;  %1758 = vst.msk [vmem:[#allocation3 + $0xf0] sm:$0xff] %vm1742_vm13, %v1677_v55 }
 0x1a5   : > { %v1868_v56 = vpop.permute.xlu1 %1867  ;;  %2476 = vst.msk [vmem:[#allocation3 + $0x20] sm:$0xff] %vm2365_vm5, %v8106_v48  ;;  %2477 = vst.msk [vmem:[#allocation3 + $0x30] sm:$0xff] %vm2365_vm5, %v8108_v51  ;;  %730 = vrot.lane.b32.xlu0 %v7850_v43, %s7207_s10 }
 0x1a6   : > { %1950 = vst.msk [vmem:[#allocation3 + $0xe0] sm:$0xff] %vm1935_vm14, %v1868_v56 }
 0x1a7   : > { %921 = vrot.lane.b32.xlu1 %v7865_v53, %s7209_s12  ;;  %v524_v43 = vpop.permute.xlu0 %523 }
 0x1a8   : > { %602 = vst.msk [vmem:[#allocation3 + $0x120] sm:$0xff] %vm583_vm7, %v524_v43 }
 0x1a9   : > { %v1101_v3 = vpop.permute.xlu1 %1100  ;;  %1499 = vrot.lane.b32.xlu0 %v7885_v1, %s7212_s15 }
 0x1aa   : > { %1180 = vst.msk [vmem:[#allocation3 + $0x110] sm:$0xff] %vm1162_vm10, %v1101_v3 }
 0x1ab   : > { %1690 = vrot.lane.b32.xlu1 %v1604_v2, %s7213_s16  ;;  %v1292_v53 = vpop.permute.xlu0 %1291 }
 0x1ac   : > { %1372 = vst.msk [vmem:[#allocation3 + $0x100] sm:$0xff] %vm1355_vm11, %v1292_v53 }
 0x1ad   : > { %v1870_v4 = vpop.permute.xlu1 %1869  ;;  %v1982_v44 = vld [vmem:[#allocation3 + $0xe0] sm:$0xff]  ;;  %923 = vrot.lane.b32.xlu0 %v7885_v1, %s7209_s12 }
 0x1ae   : > { %1951 = vst.msk [vmem:[#allocation3 + $0xf0] sm:$0xff] %vm1935_vm14, %v1870_v4  ;;  %6877 = vmatprep.mubr.msk.f32.mxu0 %vm2007_vm15, %v1982_v44 }
 0x1af   : > { %1114 = vrot.lane.b32.xlu1 %v1604_v2, %s7210_s13  ;;  %v526_v46 = vpop.permute.xlu0 %525 }
 0x1b0   : > { %603 = vst.msk [vmem:[#allocation3 + $0x130] sm:$0xff] %vm583_vm7, %v526_v46 }
 0x1b1   : > { %v717_v8 = vpop.permute.xlu1 %716  ;;  %1692 = vrot.lane.b32.xlu0 %v1605_v6, %s7213_s16 }
 0x1b2   : > { %795 = vst.msk [vmem:[#allocation3 + $0x120] sm:$0xff] %vm776_vm8, %v717_v8 }
 0x1b3   : > { %1883 = vrot.lane.b32.xlu1 %v1797_v5, %s7214_s17  ;;  %v1294_v9 = vpop.permute.xlu0 %1293 }
 0x1b4   : > { %1373 = vst.msk [vmem:[#allocation3 + $0x110] sm:$0xff] %vm1355_vm11, %v1294_v9  ;;  %v1608_v9 = vld [vmem:[#allocation2 + $0x169] sm:$0xff] }
 0x1b5   : > { %v1486_v10 = vpop.permute.xlu1 %1485  ;;  %v1983_v11 = vld [vmem:[#allocation3 + $0xf0] sm:$0xff]  ;;  %539 = vrot.lane.b32.xlu0 %v1604_v2, %s7208_s11 }
 0x1b6   : > { %1566 = vst.msk [vmem:[#allocation3 + $0x100] sm:$0xff] %vm1549_vm12, %v1486_v10  ;;  %v6861_v1 = vpop.f32.mrf.mxu0  ;;  %6878 = vmatmul.mubr.msk.f32.gmra.mxu0 %vm2007_vm15, %v1983_v11 }
 0x1b7   : > { %1116 = vrot.lane.b32.xlu1 %v1605_v6, %s7210_s13  ;;  %v2190_v13 = vadd.f32 %v6861_v1, %v8076_v27  ;;  %v719_v15 = vpop.permute.xlu0 %718 }
 0x1b8   : > { %v2184_v49 = vpop.f32.mrf.mxu0  ;;  %796 = vst.msk [vmem:[#allocation3 + $0x130] sm:$0xff] %vm776_vm8, %v719_v15 }
 0x1b9   : > { %v910_v17 = vpop.permute.xlu1 %909  ;;  %v2336_v19 = vmax.f32 %v2190_v13, 0.0  ;;  %v2185_v20 = vadd.f32 %v8076_v27, %v2184_v49  ;;  %1307 = vrot.lane.b32.xlu0 %v1797_v5, %s7211_s14 }
 0x1ba   : > { %988 = vst.msk [vmem:[#allocation3 + $0x120] sm:$0xff] %vm969_vm9, %v910_v17 }
 0x1bb   : > { %1885 = vrot.lane.b32.xlu1 %v7909_v12, %s7214_s17  ;;  %2413 = vst.msk [vmem:[#allocation2 + $0x39] sm:$0xff] %vm2365_vm5, %v2336_v19  ;;  %v2335_v22 = vmax.f32 %v2185_v20, 0.0  ;;  %v1488_v24 = vpop.permute.xlu0 %1487 }
 0x1bc   : > { %1567 = vst.msk [vmem:[#allocation3 + $0x110] sm:$0xff] %vm1549_vm12, %v1488_v24 }
 0x1bd   : > { %v1679_v25 = vpop.permute.xlu1 %1678  ;;  %2412 = vst.msk [vmem:[#allocation2 + $0x31] sm:$0xff] %vm2365_vm5, %v2335_v22  ;;  %541 = vrot.lane.b32.xlu0 %v1605_v6, %s7208_s11 }
 0x1be   : > { %1759 = vst.msk [vmem:[#allocation3 + $0x100] sm:$0xff] %vm1742_vm13, %v1679_v25 }
 0x1bf   : > { %732 = vrot.lane.b32.xlu1 %v1797_v5, %s7207_s10  ;;  %v912_v26 = vpop.permute.xlu0 %911 }
 0x1c0   : > { %989 = vst.msk [vmem:[#allocation3 + $0x130] sm:$0xff] %vm969_vm9, %v912_v26 }
 0x1c1   : > { %v1103_v16 = vpop.permute.xlu1 %1102  ;;  %1309 = vrot.lane.b32.xlu0 %v7909_v12, %s7211_s14 }
 0x1c2   : > { %1181 = vst.msk [vmem:[#allocation3 + $0x120] sm:$0xff] %vm1162_vm10, %v1103_v16 }
 0x1c3   : > { %1501 = vrot.lane.b32.xlu1 %v7924_v18, %s7212_s15  ;;  %v1681_v29 = vpop.permute.xlu0 %1680 }
 0x1c4   : > { %v8181_v23 = vld [vmem:[#allocation2 + $0x30] sm:$0xff]  ;;  %v8183_v21 = vld [vmem:[#allocation2 + $0x38] sm:$0xff]  ;;  %1760 = vst.msk [vmem:[#allocation3 + $0x110] sm:$0xff] %vm1742_vm13, %v1681_v29 }
 0x1c5   : > { %v1872_v31 = vpop.permute.xlu1 %1871  ;;  %2478 = vst.msk [vmem:[#allocation3 + $0x40] sm:$0xff] %vm2365_vm5, %v8181_v23  ;;  %2479 = vst.msk [vmem:[#allocation3 + $0x50] sm:$0xff] %vm2365_vm5, %v8183_v21  ;;  %734 = vrot.lane.b32.xlu0 %v7909_v12, %s7207_s10  ;;  %v1607_v12 = vld [vmem:[#allocation2 + $0x159] sm:$0xff] }
 0x1c6   : > { %1952 = vst.msk [vmem:[#allocation3 + $0x100] sm:$0xff] %vm1935_vm14, %v1872_v31 }
 0x1c7   : > { %925 = vrot.lane.b32.xlu1 %v7924_v18, %s7209_s12  ;;  %v528_v52 = vpop.permute.xlu0 %527  ;;  %v1799_v18 = vld [vmem:[#allocation2 + $0x152] sm:$0xff] }
 0x1c8   : > { %604 = vst.msk [vmem:[#allocation3 + $0x140] sm:$0xff] %vm583_vm7, %v528_v52 }
 0x1c9   : > { %v1105_v32 = vpop.permute.xlu1 %1104  ;;  %1503 = vrot.lane.b32.xlu0 %v7944_v28, %s7212_s15 }
 0x1ca   : > { %1182 = vst.msk [vmem:[#allocation3 + $0x130] sm:$0xff] %vm1162_vm10, %v1105_v32 }
 0x1cb   : > { %1694 = vrot.lane.b32.xlu1 %v1606_v30, %s7213_s16  ;;  %v1296_v54 = vpop.permute.xlu0 %1295 }
 0x1cc   : > { %1374 = vst.msk [vmem:[#allocation3 + $0x120] sm:$0xff] %vm1355_vm11, %v1296_v54 }
 0x1cd   : > { %v1874_v33 = vpop.permute.xlu1 %1873  ;;  %v1984_v34 = vld [vmem:[#allocation3 + $0x100] sm:$0xff]  ;;  %927 = vrot.lane.b32.xlu0 %v7944_v28, %s7209_s12 }
 0x1ce   : > { %1953 = vst.msk [vmem:[#allocation3 + $0x110] sm:$0xff] %vm1935_vm14, %v1874_v33  ;;  %6880 = vmatprep.mubr.msk.f32.mxu0 %vm2007_vm15, %v1984_v34 }
 0x1cf   : > { %1118 = vrot.lane.b32.xlu1 %v1606_v30, %s7210_s13  ;;  %v530_v36 = vpop.permute.xlu0 %529 }
 0x1d0   : > { %605 = vst.msk [vmem:[#allocation3 + $0x150] sm:$0xff] %vm583_vm7, %v530_v36 }
 0x1d1   : > { %v721_v35 = vpop.permute.xlu1 %720  ;;  %1696 = vrot.lane.b32.xlu0 %v1607_v12, %s7213_s16 }
 0x1d2   : > { %797 = vst.msk [vmem:[#allocation3 + $0x140] sm:$0xff] %vm776_vm8, %v721_v35  ;;  %v1418_v35 = vld [vmem:[#allocation2 + $0x188] sm:$0xff] }
 0x1d3   : > { %1887 = vrot.lane.b32.xlu1 %v1799_v18, %s7214_s17  ;;  %v1298_v37 = vpop.permute.xlu0 %1297 }
 0x1d4   : > { %1375 = vst.msk [vmem:[#allocation3 + $0x130] sm:$0xff] %vm1355_vm11, %v1298_v37  ;;  %v1610_v37 = vld [vmem:[#allocation2 + $0x181] sm:$0xff] }
 0x1d5   : > { %v1490_v41 = vpop.permute.xlu1 %1489  ;;  %v1985_v57 = vld [vmem:[#allocation3 + $0x110] sm:$0xff]  ;;  %543 = vrot.lane.b32.xlu0 %v1606_v30, %s7208_s11 }
 0x1d6   : > { %1568 = vst.msk [vmem:[#allocation3 + $0x120] sm:$0xff] %vm1549_vm12, %v1490_v41  ;;  %v6864_v28 = vpop.f32.mrf.mxu0  ;;  %6881 = vmatmul.mubr.msk.f32.gmra.mxu0 %vm2007_vm15, %v1985_v57 }
 0x1d7   : > { %1120 = vrot.lane.b32.xlu1 %v1607_v12, %s7210_s13  ;;  %v2200_v42 = vadd.f32 %v6864_v28, %v8076_v27  ;;  %v723_v39 = vpop.permute.xlu0 %722 }
 0x1d8   : > { %v2194_v45 = vpop.f32.mrf.mxu0  ;;  %798 = vst.msk [vmem:[#allocation3 + $0x150] sm:$0xff] %vm776_vm8, %v723_v39 }
 0x1d9   : > { %v914_v55 = vpop.permute.xlu1 %913  ;;  %v2338_v56 = vmax.f32 %v2200_v42, 0.0  ;;  %v2195_v2 = vadd.f32 %v8076_v27, %v2194_v45  ;;  %1311 = vrot.lane.b32.xlu0 %v1799_v18, %s7211_s14 }
 0x1da   : > { %990 = vst.msk [vmem:[#allocation3 + $0x140] sm:$0xff] %vm969_vm9, %v914_v55 }
 0x1db   : > { %1889 = vrot.lane.b32.xlu1 %v7968_v38, %s7214_s17  ;;  %2415 = vst.msk [vmem:[#allocation2 + $0x51] sm:$0xff] %vm2365_vm5, %v2338_v56  ;;  %v2337_v43 = vmax.f32 %v2195_v2, 0.0  ;;  %v1492_v3 = vpop.permute.xlu0 %1491 }
 0x1dc   : > { %1569 = vst.msk [vmem:[#allocation3 + $0x130] sm:$0xff] %vm1549_vm12, %v1492_v3 }
 0x1dd   : > { %v1683_v53 = vpop.permute.xlu1 %1682  ;;  %2414 = vst.msk [vmem:[#allocation2 + $0x49] sm:$0xff] %vm2365_vm5, %v2337_v43  ;;  %545 = vrot.lane.b32.xlu0 %v1607_v12, %s7208_s11 }
 0x1de   : > { %1761 = vst.msk [vmem:[#allocation3 + $0x120] sm:$0xff] %vm1742_vm13, %v1683_v53 }
 0x1df   : > { %736 = vrot.lane.b32.xlu1 %v1799_v18, %s7207_s10  ;;  %v916_v4 = vpop.permute.xlu0 %915 }
 0x1e0   : > { %991 = vst.msk [vmem:[#allocation3 + $0x150] sm:$0xff] %vm969_vm9, %v916_v4 }
 0x1e1   : > { %v1107_v44 = vpop.permute.xlu1 %1106  ;;  %1313 = vrot.lane.b32.xlu0 %v7968_v38, %s7211_s14 }
 0x1e2   : > { %1183 = vst.msk [vmem:[#allocation3 + $0x140] sm:$0xff] %vm1162_vm10, %v1107_v44 }
 0x1e3   : > { %1505 = vrot.lane.b32.xlu1 %v7983_v47, %s7212_s15  ;;  %v1685_v5 = vpop.permute.xlu0 %1684 }
 0x1e4   : > { %v2449_v6 = vld [vmem:[#allocation2 + $0x50] sm:$0xff]  ;;  %v2448_v8 = vld [vmem:[#allocation2 + $0x48] sm:$0xff]  ;;  %1762 = vst.msk [vmem:[#allocation3 + $0x130] sm:$0xff] %vm1742_vm13, %v1685_v5 }
 0x1e5   : > { %v1876_v46 = vpop.permute.xlu1 %1875  ;;  %2481 = vst.msk [vmem:[#allocation3 + $0x70] sm:$0xff] %vm2365_vm5, %v2449_v6  ;;  %2480 = vst.msk [vmem:[#allocation3 + $0x60] sm:$0xff] %vm2365_vm5, %v2448_v8  ;;  %738 = vrot.lane.b32.xlu0 %v7968_v38, %s7207_s10  ;;  %v1609_v38 = vld [vmem:[#allocation2 + $0x171] sm:$0xff] }
 0x1e6   : > { %1954 = vst.msk [vmem:[#allocation3 + $0x120] sm:$0xff] %vm1935_vm14, %v1876_v46 }
 0x1e7   : > { %929 = vrot.lane.b32.xlu1 %v7983_v47, %s7209_s12  ;;  %v532_v10 = vpop.permute.xlu0 %531  ;;  %v1801_v47 = vld [vmem:[#allocation2 + $0x16a] sm:$0xff] }
 0x1e8   : > { %606 = vst.msk [vmem:[#allocation3 + $0x160] sm:$0xff] %vm583_vm7, %v532_v10 }
 0x1e9   : > { %v1109_v11 = vpop.permute.xlu1 %1108  ;;  %1507 = vrot.lane.b32.xlu0 %v8003_v61, %s7212_s15 }
 0x1ea   : > { %1184 = vst.msk [vmem:[#allocation3 + $0x150] sm:$0xff] %vm1162_vm10, %v1109_v11 }
 0x1eb   : > { %1698 = vrot.lane.b32.xlu1 %v1608_v9, %s7213_s16  ;;  %v1300_v1 = vpop.permute.xlu0 %1299 }
 0x1ec   : > { %1376 = vst.msk [vmem:[#allocation3 + $0x140] sm:$0xff] %vm1355_vm11, %v1300_v1 }
 0x1ed   : > { %v1878_v13 = vpop.permute.xlu1 %1877  ;;  %v1986_v49 = vld [vmem:[#allocation3 + $0x120] sm:$0xff]  ;;  %931 = vrot.lane.b32.xlu0 %v8003_v61, %s7209_s12 }
 0x1ee   : > { %1955 = vst.msk [vmem:[#allocation3 + $0x130] sm:$0xff] %vm1935_vm14, %v1878_v13  ;;  %6883 = vmatprep.mubr.msk.f32.mxu0 %vm2007_vm15, %v1986_v49 }
 0x1ef   : > { %1122 = vrot.lane.b32.xlu1 %v1608_v9, %s7210_s13  ;;  %v534_v15 = vpop.permute.xlu0 %533 }
 0x1f0   : > { %607 = vst.msk [vmem:[#allocation3 + $0x170] sm:$0xff] %vm583_vm7, %v534_v15 }
 0x1f1   : > { %v725_v17 = vpop.permute.xlu1 %724  ;;  %1700 = vrot.lane.b32.xlu0 %v1609_v38, %s7213_s16 }
 0x1f2   : > { %799 = vst.msk [vmem:[#allocation3 + $0x160] sm:$0xff] %vm776_vm8, %v725_v17 }
 0x1f3   : > { %1891 = vrot.lane.b32.xlu1 %v1801_v47, %s7214_s17  ;;  %v1302_v19 = vpop.permute.xlu0 %1301 }
 0x1f4   : > { %1377 = vst.msk [vmem:[#allocation3 + $0x150] sm:$0xff] %vm1355_vm11, %v1302_v19 }
 0x1f5   : > { %v1494_v20 = vpop.permute.xlu1 %1493  ;;  %v1987_v22 = vld [vmem:[#allocation3 + $0x130] sm:$0xff]  ;;  %547 = vrot.lane.b32.xlu0 %v1608_v9, %s7208_s11 }
 0x1f6   : > { %1570 = vst.msk [vmem:[#allocation3 + $0x140] sm:$0xff] %vm1549_vm12, %v1494_v20  ;;  %v6867_v61 = vpop.f32.mrf.mxu0  ;;  %6884 = vmatmul.mubr.msk.f32.gmra.mxu0 %vm2007_vm15, %v1987_v22 }
 0x1f7   : > { %1124 = vrot.lane.b32.xlu1 %v1609_v38, %s7210_s13  ;;  %v2210_v24 = vadd.f32 %v6867_v61, %v8076_v27  ;;  %v727_v26 = vpop.permute.xlu0 %726 }
 0x1f8   : > { %v2204_v25 = vpop.f32.mrf.mxu0  ;;  %800 = vst.msk [vmem:[#allocation3 + $0x170] sm:$0xff] %vm776_vm8, %v727_v26 }
 0x1f9   : > { %v918_v16 = vpop.permute.xlu1 %917  ;;  %v2340_v29 = vmax.f32 %v2210_v24, 0.0  ;;  %v2205_v31 = vadd.f32 %v8076_v27, %v2204_v25  ;;  %1315 = vrot.lane.b32.xlu0 %v1801_v47, %s7211_s14 }
 0x1fa   : > { %992 = vst.msk [vmem:[#allocation3 + $0x160] sm:$0xff] %vm969_vm9, %v918_v16 }
 0x1fb   : > { %1893 = vrot.lane.b32.xlu1 %v8027_v7, %s7214_s17  ;;  %2417 = vst.msk [vmem:[#allocation2 + $0x69] sm:$0xff] %vm2365_vm5, %v2340_v29  ;;  %v2339_v30 = vmax.f32 %v2205_v31, 0.0  ;;  %v1496_v52 = vpop.permute.xlu0 %1495 }
 0x1fc   : > { %1571 = vst.msk [vmem:[#allocation3 + $0x150] sm:$0xff] %vm1549_vm12, %v1496_v52 }
 0x1fd   : > { %v1687_v32 = vpop.permute.xlu1 %1686  ;;  %2416 = vst.msk [vmem:[#allocation2 + $0x61] sm:$0xff] %vm2365_vm5, %v2339_v30  ;;  %549 = vrot.lane.b32.xlu0 %v1609_v38, %s7208_s11  ;;  %v2512_v38 = vld [vmem:[#allocation2 + $0x49] sm:$0xff]  ;;  %s7216_s11 = smov 16  }
 0x1fe   : > { %1763 = vst.msk [vmem:[#allocation3 + $0x140] sm:$0xff] %vm1742_vm13, %v1687_v32 }
 0x1ff   : > { %740 = vrot.lane.b32.xlu1 %v1801_v47, %s7207_s10  ;;  %v920_v54 = vpop.permute.xlu0 %919 }
 0x200   : > { %993 = vst.msk [vmem:[#allocation3 + $0x170] sm:$0xff] %vm969_vm9, %v920_v54 }
 0x201   : > { %v1111_v33 = vpop.permute.xlu1 %1110  ;;  %1317 = vrot.lane.b32.xlu0 %v8027_v7, %s7211_s14 }
 0x202   : > { %1185 = vst.msk [vmem:[#allocation3 + $0x160] sm:$0xff] %vm1162_vm10, %v1111_v33  ;;  %v3092_v33 = vld [vmem:[#allocation2 + $0x69] sm:$0xff] }
 0x203   : > { %1509 = vrot.lane.b32.xlu1 %v8042_v14, %s7212_s15  ;;  %v1689_v18 = vpop.permute.xlu0 %1688 }
 0x204   : > { %v8281_v34 = vld [vmem:[#allocation2 + $0x68] sm:$0xff]  ;;  %v8283_v12 = vld [vmem:[#allocation2 + $0x60] sm:$0xff]  ;;  %1764 = vst.msk [vmem:[#allocation3 + $0x150] sm:$0xff] %vm1742_vm13, %v1689_v18 }
 0x205   : > { %v1880_v36 = vpop.permute.xlu1 %1879  ;;  %2482 = vst.msk [vmem:[#allocation3 + $0x80] sm:$0xff] %vm2365_vm5, %v8283_v12  ;;  %2483 = vst.msk [vmem:[#allocation3 + $0x90] sm:$0xff] %vm2365_vm5, %v8281_v34  ;;  %742 = vrot.lane.b32.xlu0 %v8027_v7, %s7207_s10  ;;  %v1611_v7 = vld [vmem:[#allocation2 + $0x189] sm:$0xff]  ;;  %s7215_s10 = smov 12   ;;  %v2514_v25 = vld [vmem:[#allocation2 + $0x61] sm:$0xff] }
 0x206   : > { %1956 = vst.msk [vmem:[#allocation3 + $0x140] sm:$0xff] %vm1935_vm14, %v1880_v36  ;;  %v3284_v54 = vld [vmem:[#allocation2 + $0x62] sm:$0xff] }
 0x207   : > { %933 = vrot.lane.b32.xlu1 %v8042_v14, %s7209_s12  ;;  %v536_v41 = vpop.permute.xlu0 %535  ;;  %v1803_v14 = vld [vmem:[#allocation2 + $0x182] sm:$0xff] }
 0x208   : > { %608 = vst.msk [vmem:[#allocation3 + $0x180] sm:$0xff] %vm583_vm7, %v536_v41 }
 0x209   : > { %v1113_v57 = vpop.permute.xlu1 %1112  ;;  %1511 = vrot.lane.b32.xlu0 %v1418_v35, %s7212_s15 }
 0x20a   : > { %1186 = vst.msk [vmem:[#allocation3 + $0x170] sm:$0xff] %vm1162_vm10, %v1113_v57 }
 0x20b   : > { %1702 = vrot.lane.b32.xlu1 %v1610_v37, %s7213_s16  ;;  %v1304_v28 = vpop.permute.xlu0 %1303 }
 0x20c   : > { %1378 = vst.msk [vmem:[#allocation3 + $0x160] sm:$0xff] %vm1355_vm11, %v1304_v28 }
 0x20d   : > { %v1882_v42 = vpop.permute.xlu1 %1881  ;;  %v1988_v45 = vld [vmem:[#allocation3 + $0x140] sm:$0xff]  ;;  %935 = vrot.lane.b32.xlu0 %v1418_v35, %s7209_s12  ;;  %s7217_s12 = smov 20  }
 0x20e   : > { %1957 = vst.msk [vmem:[#allocation3 + $0x150] sm:$0xff] %vm1935_vm14, %v1882_v42  ;;  %6886 = vmatprep.mubr.msk.f32.mxu0 %vm2007_vm15, %v1988_v45 }
 0x20f   : > { %1126 = vrot.lane.b32.xlu1 %v1610_v37, %s7210_s13  ;;  %v538_v39 = vpop.permute.xlu0 %537  ;;  %v3285_v37 = vld [vmem:[#allocation2 + $0x6a] sm:$0xff] }
 0x210   : > { %609 = vst.msk [vmem:[#allocation3 + $0x190] sm:$0xff] %vm583_vm7, %v538_v39  ;;  %v6630_v39 = vld [vmem:[%s10202_s1 + $0xb0] sm:$0xf] }
 0x211   : > { %v729_v55 = vpop.permute.xlu1 %728  ;;  %1704 = vrot.lane.b32.xlu0 %v1611_v7, %s7213_s16  ;;  %7035 = vmatprep.subr.msk.mxu1 %vm4190_vm0, %v6630_v39 }
 0x212   : > { %801 = vst.msk [vmem:[#allocation3 + $0x180] sm:$0xff] %vm776_vm8, %v729_v55  ;;  %6904 = vmatprep.subr.msk.mxu0 %vm4190_vm0, %v6630_v39  ;;  %7040 = vmatpush3.msk.msra.mxu1 %vm4190_vm0, %v6630_v39 }
 0x213   : > { %1895 = vrot.lane.b32.xlu1 %v1803_v14, %s7214_s17  ;;  %v1306_v56 = vpop.permute.xlu0 %1305  ;;  %6905 = vmatpush3.msk.msra.mxu0 %vm4190_vm0, %v6630_v39 }
 0x214   : > { %1379 = vst.msk [vmem:[#allocation3 + $0x170] sm:$0xff] %vm1355_vm11, %v1306_v56 }
 0x215   : > { %v1498_v2 = vpop.permute.xlu1 %1497  ;;  %v1989_v43 = vld [vmem:[#allocation3 + $0x150] sm:$0xff]  ;;  %1128 = vrot.lane.b32.xlu0 %v1611_v7, %s7210_s13 }
 0x216   : > { %1572 = vst.msk [vmem:[#allocation3 + $0x160] sm:$0xff] %vm1549_vm12, %v1498_v2  ;;  %v6870_v3 = vpop.f32.mrf.mxu0  ;;  %6887 = vmatmul.mubr.msk.f32.gmra.mxu0 %vm2007_vm15, %v1989_v43  ;;  %v6629_v43 = vld [vmem:[%s10202_s1 + $0xa8] sm:$0xff] }
 0x217   : > { %1319 = vrot.lane.b32.xlu1 %v1803_v14, %s7211_s14  ;;  %v2220_v53 = vadd.f32 %v6870_v3, %v8076_v27  ;;  %v731_v44 = vpop.permute.xlu0 %730  ;;  %7036 = vmatprep.subr.mxu1 %v6629_v43  ;;  %v6628_v3 = vld [vmem:[%s10202_s1 + $0xa0] sm:$0xff] }
 0x218   : > { %v2214_v4 = vpop.f32.mrf.mxu0  ;;  %802 = vst.msk [vmem:[#allocation3 + $0x190] sm:$0xff] %vm776_vm8, %v731_v44  ;;  %7041 = vmatpush3.msra.mxu1 %v6629_v43  ;;  %6906 = vmatprep.subr.mxu0 %v6629_v43  ;;  %v6627_v44 = vld [vmem:[%s10202_s1 + $0x98] sm:$0xff] }
 0x219   : > { %v922_v6 = vpop.permute.xlu1 %921  ;;  %v2342_v5 = vmax.f32 %v2220_v53, 0.0  ;;  %v2215_v46 = vadd.f32 %v8076_v27, %v2214_v4  ;;  %1897 = vrot.lane.b32.xlu0 %v8087_v40, %s7214_s17  ;;  %7037 = vmatprep.subr.mxu1 %v6628_v3 }
 0x21a   : > { %994 = vst.msk [vmem:[#allocation3 + $0x180] sm:$0xff] %vm969_vm9, %v922_v6  ;;  %6907 = vmatpush3.msra.mxu0 %v6629_v43  ;;  %7042 = vmatpush3.msra.mxu1 %v6628_v3 }
 0x21b   : > { %1321 = vrot.lane.b32.xlu1 %v8087_v40, %s7211_s14  ;;  %2419 = vst.msk [vmem:[#allocation2 + $0x81] sm:$0xff] %vm2365_vm5, %v2342_v5  ;;  %v2341_v8 = vmax.f32 %v2215_v46, 0.0  ;;  %v1500_v9 = vpop.permute.xlu0 %1499  ;;  %s7218_s14 = smov 24   ;;  %6908 = vmatprep.subr.mxu0 %v6628_v3  ;;  %v6626_v46 = vld [vmem:[%s10202_s1 + $0x90] sm:$0xff] }
 0x21c   : > { %1573 = vst.msk [vmem:[#allocation3 + $0x170] sm:$0xff] %vm1549_vm12, %v1500_v9  ;;  %7038 = vmatprep.subr.mxu1 %v6627_v44  ;;  %6909 = vmatpush3.msra.mxu0 %v6628_v3 }
 0x21d   : > { %v1691_v10 = vpop.permute.xlu1 %1690  ;;  %2418 = vst.msk [vmem:[#allocation2 + $0x79] sm:$0xff] %vm2365_vm5, %v2341_v8  ;;  %1513 = vrot.lane.b32.xlu0 %v8110_v58, %s7212_s15  ;;  %7043 = vmatpush3.msra.mxu1 %v6627_v44 }
 0x21e   : > { %1765 = vst.msk [vmem:[#allocation3 + $0x160] sm:$0xff] %vm1742_vm13, %v1691_v10  ;;  %6910 = vmatprep.subr.mxu0 %v6627_v44  ;;  %7039 = vmatprep.subr.mxu1 %v6626_v46 }
 0x21f   : > { %1515 = vrot.lane.b32.xlu1 %v8112_v50, %s7212_s15  ;;  %v924_v11 = vpop.permute.xlu0 %923  ;;  %s7219_s15 = smov 28   ;;  %7044 = vmatpush3.msra.mxu1 %v6626_v46 }
 0x220   : > { %995 = vst.msk [vmem:[#allocation3 + $0x190] sm:$0xff] %vm969_vm9, %v924_v11  ;;  %6911 = vmatpush3.msra.mxu0 %v6627_v44 }
 0x221   : > { %v1115_v1 = vpop.permute.xlu1 %1114  ;;  %1706 = vrot.lane.b32.xlu0 %v8114_v62, %s7213_s16  ;;  %6912 = vmatprep.subr.mxu0 %v6626_v46 }
 0x222   : > { %1187 = vst.msk [vmem:[#allocation3 + $0x180] sm:$0xff] %vm1162_vm10, %v1115_v1  ;;  %v3671_v5 = vld [vmem:[#allocation2 + $0x81] sm:$0xff]  ;;  %6913 = vmatpush3.msra.mxu0 %v6626_v46 }
 0x223   : > { %1708 = vrot.lane.b32.xlu1 %v8122_v59, %s7213_s16  ;;  %v1693_v58 = vpop.permute.xlu0 %1692  ;;  %v2513_v59 = vld [vmem:[#allocation2 + $0x51] sm:$0xff] }
 0x224   : > { %v8335_v40 = vld [vmem:[#allocation2 + $0x78] sm:$0xff]  ;;  %v8337_v13 = vld [vmem:[#allocation2 + $0x80] sm:$0xff]  ;;  %1766 = vst.msk [vmem:[#allocation3 + $0x170] sm:$0xff] %vm1742_vm13, %v1693_v58 }
 0x225   : > { %v1884_v49 = vpop.permute.xlu1 %1883  ;;  %2484 = vst.msk [vmem:[#allocation3 + $0xa0] sm:$0xff] %vm2365_vm5, %v8335_v40  ;;  %2485 = vst.msk [vmem:[#allocation3 + $0xb0] sm:$0xff] %vm2365_vm5, %v8337_v13  ;;  %1899 = vrot.lane.b32.xlu0 %v8124_v63, %s7214_s17  ;;  %v2706_v63 = vld [vmem:[#allocation2 + $0x52] sm:$0xff]  ;;  %v3863_v6 = vld [vmem:[#allocation2 + $0x7a] sm:$0xff] }
 0x226   : > { %1958 = vst.msk [vmem:[#allocation3 + $0x160] sm:$0xff] %vm1935_vm14, %v1884_v49  ;;  %v3670_v14 = vld [vmem:[#allocation2 + $0x79] sm:$0xff] }
 0x227   : > { %1901 = vrot.lane.b32.xlu1 %v8126_v60, %s7214_s17  ;;  %v540_v50 = vpop.permute.xlu0 %539  ;;  %v2705_v60 = vld [vmem:[#allocation2 + $0x4a] sm:$0xff] }
 0x228   : > { %610 = vst.msk [vmem:[#allocation3 + $0x1a0] sm:$0xff] %vm583_vm7, %v540_v50 }
 0x229   : > { %v1117_v62 = vpop.permute.xlu1 %1116  ;;  %2582 = vrot.lane.b32.xlu0 %v2512_v38, %s7210_s13 }
 0x22a   : > { %1188 = vst.msk [vmem:[#allocation3 + $0x190] sm:$0xff] %vm1162_vm10, %v1117_v62  ;;  %v3864_v62 = vld [vmem:[#allocation2 + $0x82] sm:$0xff] }
 0x22b   : > { %2584 = vrot.lane.b32.xlu1 %v2513_v59, %s7210_s13  ;;  %v1308_v47 = vpop.permute.xlu0 %1307 }
 0x22c   : > { %1380 = vst.msk [vmem:[#allocation3 + $0x180] sm:$0xff] %vm1355_vm11, %v1308_v47 }
 0x22d   : > { %v1886_v15 = vpop.permute.xlu1 %1885  ;;  %v1990_v17 = vld [vmem:[#allocation3 + $0x160] sm:$0xff]  ;;  %2775 = vrot.lane.b32.xlu0 %v2705_v60, %s7214_s17 }
 0x22e   : > { %1959 = vst.msk [vmem:[#allocation3 + $0x170] sm:$0xff] %vm1935_vm14, %v1886_v15  ;;  %6889 = vmatprep.mubr.msk.f32.mxu0 %vm2007_vm15, %v1990_v17 }
 0x22f   : > { %2777 = vrot.lane.b32.xlu1 %v2706_v63, %s7214_s17  ;;  %v542_v19 = vpop.permute.xlu0 %541 }
 0x230   : > { %611 = vst.msk [vmem:[#allocation3 + $0x1b0] sm:$0xff] %vm583_vm7, %v542_v19 }
 0x231   : > { %v733_v20 = vpop.permute.xlu1 %732  ;;  %2968 = vrot.lane.b32.xlu0 %v8283_v12, %s7215_s10 }
 0x232   : > { %803 = vst.msk [vmem:[#allocation3 + $0x1a0] sm:$0xff] %vm776_vm8, %v733_v20 }
 0x233   : > { %2970 = vrot.lane.b32.xlu1 %v8281_v34, %s7215_s10  ;;  %v1310_v22 = vpop.permute.xlu0 %1309 }
 0x234   : > { %1381 = vst.msk [vmem:[#allocation3 + $0x190] sm:$0xff] %vm1355_vm11, %v1310_v22 }
 0x235   : > { %v1502_v61 = vpop.permute.xlu1 %1501  ;;  %v1991_v24 = vld [vmem:[#allocation3 + $0x170] sm:$0xff]  ;;  %3161 = vrot.lane.b32.xlu0 %v2514_v25, %s7216_s11 }
 0x236   : > { %1574 = vst.msk [vmem:[#allocation3 + $0x180] sm:$0xff] %vm1549_vm12, %v1502_v61  ;;  %v6873_v26 = vpop.f32.mrf.mxu0  ;;  %6890 = vmatmul.mubr.msk.f32.gmra.mxu0 %vm2007_vm15, %v1991_v24 }
 0x237   : > { %2586 = vrot.lane.b32.xlu1 %v2514_v25, %s7210_s13  ;;  %v2230_v16 = vadd.f32 %v6873_v26, %v8076_v27  ;;  %v735_v31 = vpop.permute.xlu0 %734 }
 0x238   : > { %v2224_v29 = vpop.f32.mrf.mxu0  ;;  %804 = vst.msk [vmem:[#allocation3 + $0x1b0] sm:$0xff] %vm776_vm8, %v735_v31 }
 0x239   : > { %v926_v30 = vpop.permute.xlu1 %925  ;;  %v2344_v52 = vmax.f32 %v2230_v16, 0.0  ;;  %v2225_v32 = vadd.f32 %v8076_v27, %v2224_v29  ;;  %3163 = vrot.lane.b32.xlu0 %v3092_v33, %s7216_s11 }
 0x23a   : > { %996 = vst.msk [vmem:[#allocation3 + $0x1a0] sm:$0xff] %vm969_vm9, %v926_v30 }
 0x23b   : > { %3354 = vrot.lane.b32.xlu1 %v3284_v54, %s7217_s12  ;;  %2421 = vst.msk [vmem:[#allocation2 + $0x99] sm:$0xff] %vm2365_vm5, %v2344_v52  ;;  %v2343_v34 = vmax.f32 %v2225_v32, 0.0  ;;  %v1504_v12 = vpop.permute.xlu0 %1503 }
 0x23c   : > { %1575 = vst.msk [vmem:[#allocation3 + $0x190] sm:$0xff] %vm1549_vm12, %v1504_v12 }
 0x23d   : > { %v1695_v18 = vpop.permute.xlu1 %1694  ;;  %2420 = vst.msk [vmem:[#allocation2 + $0x91] sm:$0xff] %vm2365_vm5, %v2343_v34  ;;  %2588 = vrot.lane.b32.xlu0 %v3092_v33, %s7210_s13  ;;  %v8491_v34 = vld [vmem:[%s10203_s2] ss:$0 sm:$0xff] }
 0x23e   : > { %1767 = vst.msk [vmem:[#allocation3 + $0x180] sm:$0xff] %vm1742_vm13, %v1695_v18 }
 0x23f   : > { %2779 = vrot.lane.b32.xlu1 %v3284_v54, %s7214_s17  ;;  %v928_v36 = vpop.permute.xlu0 %927 }
 0x240   : > { %997 = vst.msk [vmem:[#allocation3 + $0x1b0] sm:$0xff] %vm969_vm9, %v928_v36 }
 0x241   : > { %v1119_v35 = vpop.permute.xlu1 %1118  ;;  %3356 = vrot.lane.b32.xlu0 %v3285_v37, %s7217_s12 }
 0x242   : > { %1189 = vst.msk [vmem:[#allocation3 + $0x1a0] sm:$0xff] %vm1162_vm10, %v1119_v35  ;;  %v3673_v30 = vld [vmem:[#allocation2 + $0x99] sm:$0xff] }
 0x243   : > { %3547 = vrot.lane.b32.xlu1 %v8335_v40, %s7218_s14  ;;  %v1697_v28 = vpop.permute.xlu0 %1696 }
 0x244   : > { %v8386_v41 = vld [vmem:[#allocation2 + $0x90] sm:$0xff]  ;;  %v8388_v57 = vld [vmem:[#allocation2 + $0x98] sm:$0xff]  ;;  %1768 = vst.msk [vmem:[#allocation3 + $0x190] sm:$0xff] %vm1742_vm13, %v1697_v28 }
 0x245   : > { %v1888_v42 = vpop.permute.xlu1 %1887  ;;  %2486 = vst.msk [vmem:[#allocation3 + $0xc0] sm:$0xff] %vm2365_vm5, %v8386_v41  ;;  %2487 = vst.msk [vmem:[#allocation3 + $0xd0] sm:$0xff] %vm2365_vm5, %v8388_v57  ;;  %2781 = vrot.lane.b32.xlu0 %v3285_v37, %s7214_s17  ;;  %v3672_v61 = vld [vmem:[#allocation2 + $0x91] sm:$0xff] }
 0x246   : > { %1960 = vst.msk [vmem:[#allocation3 + $0x180] sm:$0xff] %vm1935_vm14, %v1888_v42  ;;  %v3865_v31 = vld [vmem:[#allocation2 + $0x92] sm:$0xff] }
 0x247   : > { %2972 = vrot.lane.b32.xlu1 %v8335_v40, %s7215_s10  ;;  %v544_v45 = vpop.permute.xlu0 %543 }
 0x248   : > { %612 = vst.msk [vmem:[#allocation3 + $0x1c0] sm:$0xff] %vm583_vm7, %v544_v45 }
 0x249   : > { %v1121_v7 = vpop.permute.xlu1 %1120  ;;  %3549 = vrot.lane.b32.xlu0 %v8337_v13, %s7218_s14 }
 0x24a   : > { %1190 = vst.msk [vmem:[#allocation3 + $0x1b0] sm:$0xff] %vm1162_vm10, %v1121_v7 }
 0x24b   : > { %3740 = vrot.lane.b32.xlu1 %v3670_v14, %s7219_s15  ;;  %v1312_v55 = vpop.permute.xlu0 %1311 }
 0x24c   : > { %1382 = vst.msk [vmem:[#allocation3 + $0x1a0] sm:$0xff] %vm1355_vm11, %v1312_v55 }
 0x24d   : > { %v1890_v56 = vpop.permute.xlu1 %1889  ;;  %v1992_v2 = vld [vmem:[#allocation3 + $0x180] sm:$0xff]  ;;  %2974 = vrot.lane.b32.xlu0 %v8337_v13, %s7215_s10 }
 0x24e   : > { %1961 = vst.msk [vmem:[#allocation3 + $0x190] sm:$0xff] %vm1935_vm14, %v1890_v56  ;;  %6892 = vmatprep.mubr.msk.f32.mxu0 %vm2007_vm15, %v1992_v2 }
 0x24f   : > { %3165 = vrot.lane.b32.xlu1 %v3670_v14, %s7216_s11  ;;  %v546_v53 = vpop.permute.xlu0 %545 }
 0x250   : > { %613 = vst.msk [vmem:[#allocation3 + $0x1d0] sm:$0xff] %vm583_vm7, %v546_v53 }
 0x251   : > { %v737_v4 = vpop.permute.xlu1 %736  ;;  %3742 = vrot.lane.b32.xlu0 %v3671_v5, %s7219_s15 }
 0x252   : > { %805 = vst.msk [vmem:[#allocation3 + $0x1c0] sm:$0xff] %vm776_vm8, %v737_v4 }
 0x253   : > { %3933 = vrot.lane.b32.xlu1 %v3863_v6, %s7220_s23  ;;  %v1314_v8 = vpop.permute.xlu0 %1313 }
 0x254   : > { %1383 = vst.msk [vmem:[#allocation3 + $0x1b0] sm:$0xff] %vm1355_vm11, %v1314_v8 }
 0x255   : > { %v1506_v9 = vpop.permute.xlu1 %1505  ;;  %v1993_v10 = vld [vmem:[#allocation3 + $0x190] sm:$0xff]  ;;  %2590 = vrot.lane.b32.xlu0 %v3670_v14, %s7210_s13 }
 0x256   : > { %1576 = vst.msk [vmem:[#allocation3 + $0x1a0] sm:$0xff] %vm1549_vm12, %v1506_v9  ;;  %v6876_v11 = vpop.f32.mrf.mxu0  ;;  %6893 = vmatmul.mubr.msk.f32.gmra.mxu0 %vm2007_vm15, %v1993_v10 }
 0x257   : > { %3167 = vrot.lane.b32.xlu1 %v3671_v5, %s7216_s11  ;;  %v2240_v1 = vadd.f32 %v6876_v11, %v8076_v27  ;;  %v739_v13 = vpop.permute.xlu0 %738 }
 0x258   : > { %v2234_v40 = vpop.f32.mrf.mxu0  ;;  %806 = vst.msk [vmem:[#allocation3 + $0x1d0] sm:$0xff] %vm776_vm8, %v739_v13 }
 0x259   : > { %v930_v58 = vpop.permute.xlu1 %929  ;;  %v2346_v49 = vmax.f32 %v2240_v1, 0.0  ;;  %v2235_v50 = vadd.f32 %v8076_v27, %v2234_v40  ;;  %3358 = vrot.lane.b32.xlu0 %v3863_v6, %s7217_s12 }
 0x25a   : > { %998 = vst.msk [vmem:[#allocation3 + $0x1c0] sm:$0xff] %vm969_vm9, %v930_v58 }
 0x25b   : > { %3935 = vrot.lane.b32.xlu1 %v3864_v62, %s7220_s23  ;;  %2423 = vst.msk [vmem:[#allocation2 + $0xb1] sm:$0xff] %vm2365_vm5, %v2346_v49  ;;  %v2345_v59 = vmax.f32 %v2235_v50, 0.0  ;;  %v1508_v38 = vpop.permute.xlu0 %1507 }
 0x25c   : > { %1577 = vst.msk [vmem:[#allocation3 + $0x1b0] sm:$0xff] %vm1549_vm12, %v1508_v38 }
 0x25d   : > { %v1699_v47 = vpop.permute.xlu1 %1698  ;;  %2422 = vst.msk [vmem:[#allocation2 + $0xa9] sm:$0xff] %vm2365_vm5, %v2345_v59  ;;  %2592 = vrot.lane.b32.xlu0 %v3671_v5, %s7210_s13 }
 0x25e   : > { %1769 = vst.msk [vmem:[#allocation3 + $0x1a0] sm:$0xff] %vm1742_vm13, %v1699_v47 }
 0x25f   : > { %2783 = vrot.lane.b32.xlu1 %v3863_v6, %s7214_s17  ;;  %v932_v27 = vpop.permute.xlu0 %931 }
 0x260   : > { %999 = vst.msk [vmem:[#allocation3 + $0x1d0] sm:$0xff] %vm969_vm9, %v932_v27 }
 0x261   : > { %v1123_v15 = vpop.permute.xlu1 %1122  ;;  %3360 = vrot.lane.b32.xlu0 %v3864_v62, %s7217_s12 }
 0x262   : > { %1191 = vst.msk [vmem:[#allocation3 + $0x1c0] sm:$0xff] %vm1162_vm10, %v1123_v15  ;;  %v3675_v9 = vld [vmem:[#allocation2 + $0xb1] sm:$0xff] }
 0x263   : > { %3551 = vrot.lane.b32.xlu1 %v8386_v41, %s7218_s14  ;;  %v1701_v60 = vpop.permute.xlu0 %1700  ;;  %v3868_v38 = vld [vmem:[#allocation2 + $0xb2] sm:$0xff] }
 0x264   : > { %v8455_v17 = vld [vmem:[#allocation2 + $0xa8] sm:$0xff]  ;;  %v8457_v63 = vld [vmem:[#allocation2 + $0xb0] sm:$0xff]  ;;  %1770 = vst.msk [vmem:[#allocation3 + $0x1b0] sm:$0xff] %vm1742_vm13, %v1701_v60 }
 0x265   : > { %v1892_v19 = vpop.permute.xlu1 %1891  ;;  %2488 = vst.msk [vmem:[#allocation3 + $0xe0] sm:$0xff] %vm2365_vm5, %v8455_v17  ;;  %2489 = vst.msk [vmem:[#allocation3 + $0xf0] sm:$0xff] %vm2365_vm5, %v8457_v63  ;;  %2785 = vrot.lane.b32.xlu0 %v3864_v62, %s7214_s17  ;;  %v3674_v53 = vld [vmem:[#allocation2 + $0xa9] sm:$0xff] }
 0x266   : > { %1962 = vst.msk [vmem:[#allocation3 + $0x1a0] sm:$0xff] %vm1935_vm14, %v1892_v19  ;;  %v3867_v8 = vld [vmem:[#allocation2 + $0xaa] sm:$0xff] }
 0x267   : > { %2976 = vrot.lane.b32.xlu1 %v8386_v41, %s7215_s10  ;;  %v548_v20 = vpop.permute.xlu0 %547 }
 0x268   : > { %614 = vst.msk [vmem:[#allocation3 + $0x1e0] sm:$0xff] %vm583_vm7, %v548_v20 }
 0x269   : > { %v1125_v22 = vpop.permute.xlu1 %1124  ;;  %3553 = vrot.lane.b32.xlu0 %v8388_v57, %s7218_s14 }
 0x26a   : > { %1192 = vst.msk [vmem:[#allocation3 + $0x1d0] sm:$0xff] %vm1162_vm10, %v1125_v22 }
 0x26b   : > { %3744 = vrot.lane.b32.xlu1 %v3672_v61, %s7219_s15  ;;  %v1316_v24 = vpop.permute.xlu0 %1315 }
 0x26c   : > { %1384 = vst.msk [vmem:[#allocation3 + $0x1c0] sm:$0xff] %vm1355_vm11, %v1316_v24 }
 0x26d   : > { %v1894_v25 = vpop.permute.xlu1 %1893  ;;  %v1994_v26 = vld [vmem:[#allocation3 + $0x1a0] sm:$0xff]  ;;  %2978 = vrot.lane.b32.xlu0 %v8388_v57, %s7215_s10  ;;  %v3866_v57 = vld [vmem:[#allocation2 + $0x9a] sm:$0xff] }
 0x26e   : > { %1963 = vst.msk [vmem:[#allocation3 + $0x1b0] sm:$0xff] %vm1935_vm14, %v1894_v25  ;;  %6895 = vmatprep.mubr.msk.f32.mxu0 %vm2007_vm15, %v1994_v26 }
 0x26f   : > { %3169 = vrot.lane.b32.xlu1 %v3672_v61, %s7216_s11  ;;  %v550_v16 = vpop.permute.xlu0 %549 }
 0x270   : > { %615 = vst.msk [vmem:[#allocation3 + $0x1f0] sm:$0xff] %vm583_vm7, %v550_v16  ;;  %vm3245_vm7 = vcmask 162944  }
 0x271   : > { %v741_v29 = vpop.permute.xlu1 %740  ;;  %3746 = vrot.lane.b32.xlu0 %v3673_v30, %s7219_s15 }
 0x272   : > { %807 = vst.msk [vmem:[#allocation3 + $0x1e0] sm:$0xff] %vm776_vm8, %v741_v29 }
 0x273   : > { %3937 = vrot.lane.b32.xlu1 %v3865_v31, %s7220_s23  ;;  %v1318_v52 = vpop.permute.xlu0 %1317 }
 0x274   : > { %1385 = vst.msk [vmem:[#allocation3 + $0x1d0] sm:$0xff] %vm1355_vm11, %v1318_v52 }
 0x275   : > { %v1510_v32 = vpop.permute.xlu1 %1509  ;;  %v1995_v54 = vld [vmem:[#allocation3 + $0x1b0] sm:$0xff]  ;;  %2594 = vrot.lane.b32.xlu0 %v3672_v61, %s7210_s13 }
 0x276   : > { %1578 = vst.msk [vmem:[#allocation3 + $0x1c0] sm:$0xff] %vm1549_vm12, %v1510_v32  ;;  %v6879_v33 = vpop.f32.mrf.mxu0  ;;  %6896 = vmatmul.mubr.msk.f32.gmra.mxu0 %vm2007_vm15, %v1995_v54 }
 0x277   : > { %3171 = vrot.lane.b32.xlu1 %v3673_v30, %s7216_s11  ;;  %v2250_v12 = vadd.f32 %v8491_v34, %v6879_v33  ;;  %v743_v36 = vpop.permute.xlu0 %742 }
 0x278   : > { %v2244_v18 = vpop.f32.mrf.mxu0  ;;  %808 = vst.msk [vmem:[#allocation3 + $0x1f0] sm:$0xff] %vm776_vm8, %v743_v36  ;;  %vm3438_vm8 = vcmask 195744  }
 0x279   : > { %v934_v35 = vpop.permute.xlu1 %933  ;;  %v2348_v37 = vmax.f32 %v2250_v12, 0.0  ;;  %v2245_v41 = vadd.f32 %v8491_v34, %v2244_v18  ;;  %3362 = vrot.lane.b32.xlu0 %v3865_v31, %s7217_s12 }
 0x27a   : > { %1000 = vst.msk [vmem:[#allocation3 + $0x1e0] sm:$0xff] %vm969_vm9, %v934_v35 }
 0x27b   : > { %3939 = vrot.lane.b32.xlu1 %v3866_v57, %s7220_s23  ;;  %2425 = vst.msk [vmem:[#allocation2 + $0xc9] sm:$0xff] %vm2365_vm5, %v2348_v37  ;;  %v2347_v28 = vmax.f32 %v2245_v41, 0.0  ;;  %v1512_v42 = vpop.permute.xlu0 %1511 }
 0x27c   : > { %1579 = vst.msk [vmem:[#allocation3 + $0x1d0] sm:$0xff] %vm1549_vm12, %v1512_v42 }
 0x27d   : > { %v1703_v45 = vpop.permute.xlu1 %1702  ;;  %2424 = vst.msk [vmem:[#allocation2 + $0xc1] sm:$0xff] %vm2365_vm5, %v2347_v28  ;;  %2596 = vrot.lane.b32.xlu0 %v3673_v30, %s7210_s13 }
 0x27e   : > { %1771 = vst.msk [vmem:[#allocation3 + $0x1c0] sm:$0xff] %vm1742_vm13, %v1703_v45 }
 0x27f   : > { %2787 = vrot.lane.b32.xlu1 %v3865_v31, %s7214_s17  ;;  %v936_v7 = vpop.permute.xlu0 %935 }
 0x280   : > { %1001 = vst.msk [vmem:[#allocation3 + $0x1f0] sm:$0xff] %vm969_vm9, %v936_v7  ;;  %vm3631_vm9 = vcmask 228544  }
 0x281   : > { %v1127_v14 = vpop.permute.xlu1 %1126  ;;  %3364 = vrot.lane.b32.xlu0 %v3866_v57, %s7217_s12 }
 0x282   : > { %1193 = vst.msk [vmem:[#allocation3 + $0x1e0] sm:$0xff] %vm1162_vm10, %v1127_v14  ;;  %v3677_v54 = vld [vmem:[#allocation2 + $0xc9] sm:$0xff] }
 0x283   : > { %3555 = vrot.lane.b32.xlu1 %v8455_v17, %s7218_s14  ;;  %v1705_v56 = vpop.permute.xlu0 %1704  ;;  %v3870_v42 = vld [vmem:[#allocation2 + $0xca] sm:$0xff] }
 0x284   : > { %v8510_v39 = vld [vmem:[#allocation2 + $0xc0] sm:$0xff]  ;;  %v8512_v55 = vld [vmem:[#allocation2 + $0xc8] sm:$0xff]  ;;  %1772 = vst.msk [vmem:[#allocation3 + $0x1d0] sm:$0xff] %vm1742_vm13, %v1705_v56 }
 0x285   : > { %v1896_v2 = vpop.permute.xlu1 %1895  ;;  %2490 = vst.msk [vmem:[#allocation3 + $0x100] sm:$0xff] %vm2365_vm5, %v8510_v39  ;;  %2491 = vst.msk [vmem:[#allocation3 + $0x110] sm:$0xff] %vm2365_vm5, %v8512_v55  ;;  %2789 = vrot.lane.b32.xlu0 %v3866_v57, %s7214_s17  ;;  %v3676_v16 = vld [vmem:[#allocation2 + $0xc1] sm:$0xff] }
 0x286   : > { %1964 = vst.msk [vmem:[#allocation3 + $0x1c0] sm:$0xff] %vm1935_vm14, %v1896_v2  ;;  %v3869_v32 = vld [vmem:[#allocation2 + $0xc2] sm:$0xff] }
 0x287   : > { %2980 = vrot.lane.b32.xlu1 %v8455_v17, %s7215_s10  ;;  %v1129_v43 = vpop.permute.xlu0 %1128 }
 0x288   : > { %1194 = vst.msk [vmem:[#allocation3 + $0x1f0] sm:$0xff] %vm1162_vm10, %v1129_v43  ;;  %vm3824_vm10 = vcmask 261344  }
 0x289   : > { %v1320_v3 = vpop.permute.xlu1 %1319  ;;  %3557 = vrot.lane.b32.xlu0 %v8457_v63, %s7218_s14 }
 0x28a   : > { %1386 = vst.msk [vmem:[#allocation3 + $0x1e0] sm:$0xff] %vm1355_vm11, %v1320_v3 }
 0x28b   : > { %3748 = vrot.lane.b32.xlu1 %v3674_v53, %s7219_s15  ;;  %v1898_v4 = vpop.permute.xlu0 %1897 }
 0x28c   : > { %1965 = vst.msk [vmem:[#allocation3 + $0x1d0] sm:$0xff] %vm1935_vm14, %v1898_v4 }
 0x28d   : > { %v1322_v44 = vpop.permute.xlu1 %1321  ;;  %v1996_v6 = vld [vmem:[#allocation3 + $0x1c0] sm:$0xff]  ;;  %2982 = vrot.lane.b32.xlu0 %v8457_v63, %s7215_s10 }
 0x28e   : > { %1387 = vst.msk [vmem:[#allocation3 + $0x1f0] sm:$0xff] %vm1355_vm11, %v1322_v44  ;;  %6898 = vmatprep.mubr.msk.f32.mxu0 %vm2007_vm15, %v1996_v6  ;;  %vm4017_vm11 = vcmask 294144  }
 0x28f   : > { %3173 = vrot.lane.b32.xlu1 %v3674_v53, %s7216_s11  ;;  %v1514_v5 = vpop.permute.xlu0 %1513 }
 0x290   : > { %1580 = vst.msk [vmem:[#allocation3 + $0x1e0] sm:$0xff] %vm1549_vm12, %v1514_v5 }
 0x291   : > { %v1516_v46 = vpop.permute.xlu1 %1515  ;;  %3750 = vrot.lane.b32.xlu0 %v3675_v9, %s7219_s15 }
 0x292   : > { %1581 = vst.msk [vmem:[#allocation3 + $0x1f0] sm:$0xff] %vm1549_vm12, %v1516_v46  ;;  %vm4093_vm12 = vcmask 293888  }
 0x293   : > { %3941 = vrot.lane.b32.xlu1 %v3867_v8, %s7220_s23  ;;  %v1707_v10 = vpop.permute.xlu0 %1706  ;;  %v1997_v1 = vld [vmem:[#allocation3 + $0x1d0] sm:$0xff] }
 0x294   : > { %1773 = vst.msk [vmem:[#allocation3 + $0x1e0] sm:$0xff] %vm1742_vm13, %v1707_v10  ;;  %6899 = vmatmul.mubr.msk.f32.gmra.mxu0 %vm2007_vm15, %v1997_v1 }
 0x295   : > { %v1709_v11 = vpop.permute.xlu1 %1708  ;;  %2598 = vrot.lane.b32.xlu0 %v3674_v53, %s7210_s13 }
 0x296   : > { %1774 = vst.msk [vmem:[#allocation3 + $0x1f0] sm:$0xff] %vm1742_vm13, %v1709_v11  ;;  %v6882_v40 = vpop.f32.mrf.mxu0  ;;  %vm5301_vm13 = vcmask 130112  }
 0x297   : > { %3175 = vrot.lane.b32.xlu1 %v3675_v9, %s7216_s11  ;;  %v2260_v13 = vadd.f32 %v8491_v34, %v6882_v40  ;;  %v1900_v49 = vpop.permute.xlu0 %1899 }
 0x298   : > { %v2254_v58 = vpop.f32.mrf.mxu0  ;;  %1966 = vst.msk [vmem:[#allocation3 + $0x1e0] sm:$0xff] %vm1935_vm14, %v1900_v49 }
 0x299   : > { %v1902_v50 = vpop.permute.xlu1 %1901  ;;  %v2350_v62 = vmax.f32 %v2260_v13, 0.0  ;;  %v2255_v59 = vadd.f32 %v8491_v34, %v2254_v58  ;;  %3366 = vrot.lane.b32.xlu0 %v3867_v8, %s7217_s12 }
 0x29a   : > { %1967 = vst.msk [vmem:[#allocation3 + $0x1f0] sm:$0xff] %vm1935_vm14, %v1902_v50  ;;  %vm5350_vm14 = vcmask 195712  }
 0x29b   : > { %3943 = vrot.lane.b32.xlu1 %v3868_v38, %s7220_s23  ;;  %2427 = vst.msk [vmem:[#allocation2 + $0xe1] sm:$0xff] %vm2365_vm5, %v2350_v62  ;;  %v2349_v47 = vmax.f32 %v2255_v59, 0.0  ;;  %v2583_v15 = vpop.permute.xlu0 %2582 }
 0x29c   : > { %2673 = vst.msk [vmem:[#allocation3 + $0x60] sm:$0xff] %vm2666_vm1, %v2583_v15 }
 0x29d   : > { %v2585_v27 = vpop.permute.xlu1 %2584  ;;  %2426 = vst.msk [vmem:[#allocation2 + $0xd9] sm:$0xff] %vm2365_vm5, %v2349_v47  ;;  %2600 = vrot.lane.b32.xlu0 %v3675_v9, %s7210_s13 }
 0x29e   : > { %2674 = vst.msk [vmem:[#allocation3 + $0x70] sm:$0xff] %vm2666_vm1, %v2585_v27 }
 0x29f   : > { %2791 = vrot.lane.b32.xlu1 %v3867_v8, %s7214_s17  ;;  %v2776_v63 = vpop.permute.xlu0 %2775  ;;  %v1998_v60 = vld [vmem:[#allocation3 + $0x1e0] sm:$0xff] }
 0x2a0   : > { %2866 = vst.msk [vmem:[#allocation3 + $0x60] sm:$0xff] %vm2859_vm2, %v2776_v63  ;;  %6901 = vmatprep.mubr.msk.f32.mxu0 %vm2007_vm15, %v1998_v60 }
 0x2a1   : > { %v2778_v17 = vpop.permute.xlu1 %2777  ;;  %v1999_v19 = vld [vmem:[#allocation3 + $0x1f0] sm:$0xff]  ;;  %3368 = vrot.lane.b32.xlu0 %v3868_v38, %s7217_s12 }
 0x2a2   : > { %2867 = vst.msk [vmem:[#allocation3 + $0x70] sm:$0xff] %vm2859_vm2, %v2778_v17  ;;  %6902 = vmatmul.mubr.msk.f32.gmra.mxu0 %vm2007_vm15, %v1999_v19  ;;  %v3679_v11 = vld [vmem:[#allocation2 + $0xe1] sm:$0xff]  ;;  %vm5399_vm15 = vcmask 261312  }
 0x2a3   : > { %3559 = vrot.lane.b32.xlu1 %v8510_v39, %s7218_s14  ;;  %v2969_v24 = vpop.permute.xlu0 %2968  ;;  %v3872_v27 = vld [vmem:[#allocation2 + $0xe2] sm:$0xff] }
 0x2a4   : > { %v8562_v20 = vld [vmem:[#allocation2 + $0xd8] sm:$0xff]  ;;  %v8564_v22 = vld [vmem:[#allocation2 + $0xe0] sm:$0xff]  ;;  %3059 = vst.msk [vmem:[#allocation3 + $0x60] sm:$0xff] %vm3052_vm6, %v2969_v24 }
 0x2a5   : > { %v2971_v61 = vpop.permute.xlu1 %2970  ;;  %2492 = vst.msk [vmem:[#allocation3 + $0x120] sm:$0xff] %vm2365_vm5, %v8562_v20  ;;  %2493 = vst.msk [vmem:[#allocation3 + $0x130] sm:$0xff] %vm2365_vm5, %v8564_v22  ;;  %2793 = vrot.lane.b32.xlu0 %v3868_v38, %s7214_s17  ;;  %v3678_v44 = vld [vmem:[#allocation2 + $0xd9] sm:$0xff] }
 0x2a6   : > { %3060 = vst.msk [vmem:[#allocation3 + $0x70] sm:$0xff] %vm3052_vm6, %v2971_v61  ;;  %v3871_v10 = vld [vmem:[#allocation2 + $0xda] sm:$0xff] }
 0x2a7   : > { %2984 = vrot.lane.b32.xlu1 %v8510_v39, %s7215_s10  ;;  %v3162_v26 = vpop.permute.xlu0 %3161 }
 0x2a8   : > { %3252 = vst.msk [vmem:[#allocation3 + $0x60] sm:$0xff] %vm3245_vm7, %v3162_v26 }
 0x2a9   : > { %v2587_v25 = vpop.permute.xlu1 %2586  ;;  %3561 = vrot.lane.b32.xlu0 %v8512_v55, %s7218_s14 }
 0x2aa   : > { %2675 = vst.msk [vmem:[#allocation3 + $0x80] sm:$0xff] %vm2666_vm1, %v2587_v25  ;;  %v2442_v25 = vld [vmem:[#allocation2] sm:$0xff] }
 0x2ab   : > { %3752 = vrot.lane.b32.xlu1 %v3676_v16, %s7219_s15  ;;  %v3164_v31 = vpop.permute.xlu0 %3163  ;;  %2474 = vst.msk [vmem:[#allocation3] sm:$0xff] %vm2365_vm5, %v2442_v25 }
 0x2ac   : > { %3253 = vst.msk [vmem:[#allocation3 + $0x70] sm:$0xff] %vm3245_vm7, %v3164_v31 }
 0x2ad   : > { %v3355_v29 = vpop.permute.xlu1 %3354  ;;  %2986 = vrot.lane.b32.xlu0 %v8512_v55, %s7215_s10 }
 0x2ae   : > { %3445 = vst.msk [vmem:[#allocation3 + $0x60] sm:$0xff] %vm3438_vm8, %v3355_v29 }
 0x2af   : > { %3177 = vrot.lane.b32.xlu1 %v3676_v16, %s7216_s11  ;;  %v2589_v52 = vpop.permute.xlu0 %2588 }
 0x2b0   : > { %2676 = vst.msk [vmem:[#allocation3 + $0x90] sm:$0xff] %vm2666_vm1, %v2589_v52 }
 0x2b1   : > { %v2780_v30 = vpop.permute.xlu1 %2779  ;;  %3754 = vrot.lane.b32.xlu0 %v3677_v54, %s7219_s15 }
 0x2b2   : > { %2868 = vst.msk [vmem:[#allocation3 + $0x80] sm:$0xff] %vm2859_vm2, %v2780_v30 }
 0x2b3   : > { %3945 = vrot.lane.b32.xlu1 %v3869_v32, %s7220_s23  ;;  %v3357_v12 = vpop.permute.xlu0 %3356 }
 0x2b4   : > { %3446 = vst.msk [vmem:[#allocation3 + $0x70] sm:$0xff] %vm3438_vm8, %v3357_v12 }
 0x2b5   : > { %v3548_v33 = vpop.permute.xlu1 %3547  ;;  %2602 = vrot.lane.b32.xlu0 %v3676_v16, %s7210_s13 }
 0x2b6   : > { %3638 = vst.msk [vmem:[#allocation3 + $0x60] sm:$0xff] %vm3631_vm9, %v3548_v33  ;;  %v6885_v18 = vpop.f32.mrf.mxu0 }
 0x2b7   : > { %3179 = vrot.lane.b32.xlu1 %v3677_v54, %s7216_s11  ;;  %v2270_v36 = vadd.f32 %v8491_v34, %v6885_v18  ;;  %v2782_v41 = vpop.permute.xlu0 %2781 }
 0x2b8   : > { %v2264_v35 = vpop.f32.mrf.mxu0  ;;  %2869 = vst.msk [vmem:[#allocation3 + $0x90] sm:$0xff] %vm2859_vm2, %v2782_v41 }
 0x2b9   : > { %v2973_v37 = vpop.permute.xlu1 %2972  ;;  %v2352_v57 = vmax.f32 %v2270_v36, 0.0  ;;  %v2265_v28 = vadd.f32 %v8491_v34, %v2264_v35  ;;  %3370 = vrot.lane.b32.xlu0 %v3869_v32, %s7217_s12  ;;  %v2506_v36 = vld [vmem:[#allocation2 + $0x1] sm:$0xff] }
 0x2ba   : > { %3061 = vst.msk [vmem:[#allocation3 + $0x80] sm:$0xff] %vm3052_vm6, %v2973_v37 }
 0x2bb   : > { %3947 = vrot.lane.b32.xlu1 %v3870_v42, %s7220_s23  ;;  %2429 = vst.msk [vmem:[#allocation2 + $0xf9] sm:$0xff] %vm2365_vm5, %v2352_v57  ;;  %v2351_v45 = vmax.f32 %v2265_v28, 0.0  ;;  %v3550_v14 = vpop.permute.xlu0 %3549 }
 0x2bc   : > { %3639 = vst.msk [vmem:[#allocation3 + $0x70] sm:$0xff] %vm3631_vm9, %v3550_v14 }
 0x2bd   : > { %v3741_v7 = vpop.permute.xlu1 %3740  ;;  %2428 = vst.msk [vmem:[#allocation2 + $0xf1] sm:$0xff] %vm2365_vm5, %v2351_v45  ;;  %2604 = vrot.lane.b32.xlu0 %v3677_v54, %s7210_s13 }
 0x2be   : > { %3831 = vst.msk [vmem:[#allocation3 + $0x60] sm:$0xff] %vm3824_vm10, %v3741_v7 }
 0x2bf   : > { %2795 = vrot.lane.b32.xlu1 %v3869_v32, %s7214_s17  ;;  %v2975_v55 = vpop.permute.xlu0 %2974  ;;  %v2443_v32 = vld [vmem:[#allocation2 + $0x8] sm:$0xff] }
 0x2c0   : > { %3062 = vst.msk [vmem:[#allocation3 + $0x90] sm:$0xff] %vm3052_vm6, %v2975_v55 }
 0x2c1   : > { %v3166_v39 = vpop.permute.xlu1 %3165  ;;  %3372 = vrot.lane.b32.xlu0 %v3870_v42, %s7217_s12  ;;  %2475 = vst.msk [vmem:[#allocation3 + $0x10] sm:$0xff] %vm2365_vm5, %v2443_v32 }
 0x2c2   : > { %3254 = vst.msk [vmem:[#allocation3 + $0x80] sm:$0xff] %vm3245_vm7, %v3166_v39  ;;  %v3681_v18 = vld [vmem:[#allocation2 + $0xf9] sm:$0xff] }
 0x2c3   : > { %3563 = vrot.lane.b32.xlu1 %v8562_v20, %s7218_s14  ;;  %v3743_v3 = vpop.permute.xlu0 %3742 }
 0x2c4   : > { %v8610_v56 = vld [vmem:[#allocation2 + $0xf0] sm:$0xff]  ;;  %v8612_v2 = vld [vmem:[#allocation2 + $0xf8] sm:$0xff]  ;;  %3832 = vst.msk [vmem:[#allocation3 + $0x70] sm:$0xff] %vm3824_vm10, %v3743_v3 }
 0x2c5   : > { %v3934_v43 = vpop.permute.xlu1 %3933  ;;  %2494 = vst.msk [vmem:[#allocation3 + $0x140] sm:$0xff] %vm2365_vm5, %v8610_v56  ;;  %2495 = vst.msk [vmem:[#allocation3 + $0x150] sm:$0xff] %vm2365_vm5, %v8612_v2  ;;  %2797 = vrot.lane.b32.xlu0 %v3870_v42, %s7214_s17  ;;  %v3680_v29 = vld [vmem:[#allocation2 + $0xf1] sm:$0xff]  ;;  %v3874_v3 = vld [vmem:[#allocation2 + $0xfa] sm:$0xff] }
 0x2c6   : > { %4024 = vst.msk [vmem:[#allocation3 + $0x60] sm:$0xff] %vm4017_vm11, %v3934_v43  ;;  %v3873_v12 = vld [vmem:[#allocation2 + $0xf2] sm:$0xff] }
 0x2c7   : > { %2988 = vrot.lane.b32.xlu1 %v8562_v20, %s7215_s10  ;;  %v2591_v4 = vpop.permute.xlu0 %2590 }
 0x2c8   : > { %2677 = vst.msk [vmem:[#allocation3 + $0xa0] sm:$0xff] %vm2666_vm1, %v2591_v4 }
 0x2c9   : > { %v3168_v53 = vpop.permute.xlu1 %3167  ;;  %3565 = vrot.lane.b32.xlu0 %v8564_v22, %s7218_s14 }
 0x2ca   : > { %3255 = vst.msk [vmem:[#allocation3 + $0x90] sm:$0xff] %vm3245_vm7, %v3168_v53  ;;  %v2699_v53 = vld [vmem:[#allocation2 + $0x2] sm:$0xff] }
 0x2cb   : > { %3756 = vrot.lane.b32.xlu1 %v3678_v44, %s7219_s15  ;;  %v3359_v5 = vpop.permute.xlu0 %3358 }
 0x2cc   : > { %3447 = vst.msk [vmem:[#allocation3 + $0x80] sm:$0xff] %vm3438_vm8, %v3359_v5 }
 0x2cd   : > { %v3936_v6 = vpop.permute.xlu1 %3935  ;;  %v4056_v46 = vld [vmem:[#allocation3 + $0x60] sm:$0xff]  ;;  %2990 = vrot.lane.b32.xlu0 %v8564_v22, %s7215_s10 }
 0x2ce   : > { %4025 = vst.msk [vmem:[#allocation3 + $0x70] sm:$0xff] %vm4017_vm11, %v3936_v6  ;;  %6923 = vmatprep.mubr.msk.f32.mxu1 %vm4093_vm12, %v4056_v46 }
 0x2cf   : > { %3181 = vrot.lane.b32.xlu1 %v3678_v44, %s7216_s11  ;;  %v2593_v9 = vpop.permute.xlu0 %2592 }
 0x2d0   : > { %2678 = vst.msk [vmem:[#allocation3 + $0xb0] sm:$0xff] %vm2666_vm1, %v2593_v9  ;;  %v2700_v9 = vld [vmem:[#allocation2 + $0xa] sm:$0xff] }
 0x2d1   : > { %v2784_v8 = vpop.permute.xlu1 %2783  ;;  %3758 = vrot.lane.b32.xlu0 %v3679_v11, %s7219_s15 }
 0x2d2   : > { %2870 = vst.msk [vmem:[#allocation3 + $0xa0] sm:$0xff] %vm2859_vm2, %v2784_v8 }
 0x2d3   : > { %3949 = vrot.lane.b32.xlu1 %v3871_v10, %s7220_s23  ;;  %v3361_v40 = vpop.permute.xlu0 %3360 }
 0x2d4   : > { %3448 = vst.msk [vmem:[#allocation3 + $0x90] sm:$0xff] %vm3438_vm8, %v3361_v40 }
 0x2d5   : > { %v3552_v1 = vpop.permute.xlu1 %3551  ;;  %v4057_v13 = vld [vmem:[#allocation3 + $0x70] sm:$0xff]  ;;  %2606 = vrot.lane.b32.xlu0 %v3678_v44, %s7210_s13 }
 0x2d6   : > { %3640 = vst.msk [vmem:[#allocation3 + $0x80] sm:$0xff] %vm3631_vm9, %v3552_v1  ;;  %6924 = vmatmul.mubr.msk.f32.vlgmr.msra.gmra.mxu1 %vm4093_vm12, %v4057_v13  ;;  %v6888_v58 = vpop.f32.mrf.mxu0 }
 0x2d7   : > { %3183 = vrot.lane.b32.xlu1 %v3679_v11, %s7216_s11  ;;  %v2280_v49 = vadd.f32 %v8491_v34, %v6888_v58  ;;  %v2786_v59 = vpop.permute.xlu0 %2785 }
 0x2d8   : > { %v2274_v50 = vpop.f32.mrf.mxu0  ;;  %2871 = vst.msk [vmem:[#allocation3 + $0xb0] sm:$0xff] %vm2859_vm2, %v2786_v59 }
 0x2d9   : > { %v2977_v62 = vpop.permute.xlu1 %2976  ;;  %v2354_v38 = vmax.f32 %v2280_v49, 0.0  ;;  %v2275_v47 = vadd.f32 %v8491_v34, %v2274_v50  ;;  %3374 = vrot.lane.b32.xlu0 %v3871_v10, %s7217_s12 }
 0x2da   : > { %3063 = vst.msk [vmem:[#allocation3 + $0xa0] sm:$0xff] %vm3052_vm6, %v2977_v62 }
 0x2db   : > { %3951 = vrot.lane.b32.xlu1 %v3872_v27, %s7220_s23  ;;  %2431 = vst.msk [vmem:[#allocation2 + $0x111] sm:$0xff] %vm2365_vm5, %v2354_v38  ;;  %v2353_v15 = vmax.f32 %v2275_v47, 0.0  ;;  %v3554_v63 = vpop.permute.xlu0 %3553 }
 0x2dc   : > { %3641 = vst.msk [vmem:[#allocation3 + $0x90] sm:$0xff] %vm3631_vm9, %v3554_v63 }
 0x2dd   : > { %v3745_v17 = vpop.permute.xlu1 %3744  ;;  %2430 = vst.msk [vmem:[#allocation2 + $0x109] sm:$0xff] %vm2365_vm5, %v2353_v15  ;;  %2608 = vrot.lane.b32.xlu0 %v3679_v11, %s7210_s13 }
 0x2de   : > { %3833 = vst.msk [vmem:[#allocation3 + $0x80] sm:$0xff] %vm3824_vm10, %v3745_v17 }
 0x2df   : > { %2799 = vrot.lane.b32.xlu1 %v3871_v10, %s7214_s17  ;;  %v2979_v19 = vpop.permute.xlu0 %2978 }
 0x2e0   : > { %3064 = vst.msk [vmem:[#allocation3 + $0xb0] sm:$0xff] %vm3052_vm6, %v2979_v19  ;;  %v3085_v19 = vld [vmem:[#allocation2 + $0x19] sm:$0xff] }
 0x2e1   : > { %v3170_v60 = vpop.permute.xlu1 %3169  ;;  %3376 = vrot.lane.b32.xlu0 %v3872_v27, %s7217_s12 }
 0x2e2   : > { %3256 = vst.msk [vmem:[#allocation3 + $0xa0] sm:$0xff] %vm3245_vm7, %v3170_v60 }
 0x2e3   : > { %3567 = vrot.lane.b32.xlu1 %v8610_v56, %s7218_s14  ;;  %v3747_v24 = vpop.permute.xlu0 %3746 }
 0x2e4   : > { %v8660_v20 = vld [vmem:[#allocation2 + $0x108] sm:$0xff]  ;;  %v8662_v22 = vld [vmem:[#allocation2 + $0x110] sm:$0xff]  ;;  %3834 = vst.msk [vmem:[#allocation3 + $0x90] sm:$0xff] %vm3824_vm10, %v3747_v24 }
 0x2e5   : > { %v3938_v61 = vpop.permute.xlu1 %3937  ;;  %2496 = vst.msk [vmem:[#allocation3 + $0x160] sm:$0xff] %vm2365_vm5, %v8660_v20  ;;  %2497 = vst.msk [vmem:[#allocation3 + $0x170] sm:$0xff] %vm2365_vm5, %v8662_v22  ;;  %2801 = vrot.lane.b32.xlu0 %v3872_v27, %s7214_s17  ;;  %v3683_v24 = vld [vmem:[#allocation2 + $0x111] sm:$0xff] }
 0x2e6   : > { %4026 = vst.msk [vmem:[#allocation3 + $0x80] sm:$0xff] %vm4017_vm11, %v3938_v61 }
 0x2e7   : > { %2992 = vrot.lane.b32.xlu1 %v8610_v56, %s7215_s10  ;;  %v2595_v16 = vpop.permute.xlu0 %2594  ;;  %v2507_v56 = vld [vmem:[#allocation2 + $0x9] sm:$0xff] }
 0x2e8   : > { %2679 = vst.msk [vmem:[#allocation3 + $0xc0] sm:$0xff] %vm2666_vm1, %v2595_v16 }
 0x2e9   : > { %v3172_v26 = vpop.permute.xlu1 %3171  ;;  %3569 = vrot.lane.b32.xlu0 %v8612_v2, %s7218_s14 }
 0x2ea   : > { %3257 = vst.msk [vmem:[#allocation3 + $0xb0] sm:$0xff] %vm3245_vm7, %v3172_v26 }
 0x2eb   : > { %3760 = vrot.lane.b32.xlu1 %v3680_v29, %s7219_s15  ;;  %v3363_v30 = vpop.permute.xlu0 %3362 }
 0x2ec   : > { %3449 = vst.msk [vmem:[#allocation3 + $0xa0] sm:$0xff] %vm3438_vm8, %v3363_v30 }
 0x2ed   : > { %v3940_v31 = vpop.permute.xlu1 %3939  ;;  %v4058_v52 = vld [vmem:[#allocation3 + $0x80] sm:$0xff]  ;;  %2994 = vrot.lane.b32.xlu0 %v8612_v2, %s7215_s10 }
 0x2ee   : > { %4027 = vst.msk [vmem:[#allocation3 + $0x90] sm:$0xff] %vm4017_vm11, %v3940_v31  ;;  %6926 = vmatprep.mubr.msk.f32.mxu1 %vm4093_vm12, %v4058_v52  ;;  %v3086_v52 = vld [vmem:[#allocation2 + $0x21] sm:$0xff] }
 0x2ef   : > { %3185 = vrot.lane.b32.xlu1 %v3680_v29, %s7216_s11  ;;  %v2597_v33 = vpop.permute.xlu0 %2596 }
 0x2f0   : > { %2680 = vst.msk [vmem:[#allocation3 + $0xd0] sm:$0xff] %vm2666_vm1, %v2597_v33  ;;  %v3278_v33 = vld [vmem:[#allocation2 + $0x1a] sm:$0xff] }
 0x2f1   : > { %v2788_v54 = vpop.permute.xlu1 %2787  ;;  %3762 = vrot.lane.b32.xlu0 %v3681_v18, %s7219_s15 }
 0x2f2   : > { %2872 = vst.msk [vmem:[#allocation3 + $0xc0] sm:$0xff] %vm2859_vm2, %v2788_v54 }
 0x2f3   : > { %3953 = vrot.lane.b32.xlu1 %v3873_v12, %s7220_s23  ;;  %v3365_v37 = vpop.permute.xlu0 %3364 }
 0x2f4   : > { %3450 = vst.msk [vmem:[#allocation3 + $0xb0] sm:$0xff] %vm3438_vm8, %v3365_v37 }
 0x2f5   : > { %v3556_v35 = vpop.permute.xlu1 %3555  ;;  %v4059_v41 = vld [vmem:[#allocation3 + $0x90] sm:$0xff]  ;;  %2570 = vrot.lane.b32.xlu0 %v2506_v36, %s7210_s13 }
 0x2f6   : > { %3642 = vst.msk [vmem:[#allocation3 + $0xa0] sm:$0xff] %vm3631_vm9, %v3556_v35  ;;  %6927 = vmatmul.mubr.msk.f32.gmra.mxu1 %vm4093_vm12, %v4059_v41  ;;  %v6891_v57 = vpop.f32.mrf.mxu0  ;;  %v3876_v35 = vld [vmem:[#allocation2 + $0x112] sm:$0xff] }
 0x2f7   : > { %2610 = vrot.lane.b32.xlu1 %v3680_v29, %s7210_s13  ;;  %v2290_v28 = vadd.f32 %v8491_v34, %v6891_v57  ;;  %v2790_v7 = vpop.permute.xlu0 %2789 }
 0x2f8   : > { %v2284_v42 = vpop.f32.mrf.mxu0  ;;  %2873 = vst.msk [vmem:[#allocation3 + $0xd0] sm:$0xff] %vm2859_vm2, %v2790_v7 }
 0x2f9   : > { %v2981_v45 = vpop.permute.xlu1 %2980  ;;  %v2356_v14 = vmax.f32 %v2290_v28, 0.0  ;;  %v2285_v39 = vadd.f32 %v8491_v34, %v2284_v42  ;;  %3187 = vrot.lane.b32.xlu0 %v3681_v18, %s7216_s11 }
 0x2fa   : > { %3065 = vst.msk [vmem:[#allocation3 + $0xc0] sm:$0xff] %vm3052_vm6, %v2981_v45 }
 0x2fb   : > { %3378 = vrot.lane.b32.xlu1 %v3873_v12, %s7217_s12  ;;  %2433 = vst.msk [vmem:[#allocation2 + $0x129] sm:$0xff] %vm2365_vm5, %v2356_v14  ;;  %v2355_v55 = vmax.f32 %v2285_v39, 0.0  ;;  %v3558_v43 = vpop.permute.xlu0 %3557 }
 0x2fc   : > { %3643 = vst.msk [vmem:[#allocation3 + $0xb0] sm:$0xff] %vm3631_vm9, %v3558_v43  ;;  %v3279_v43 = vld [vmem:[#allocation2 + $0x22] sm:$0xff] }
 0x2fd   : > { %v3749_v2 = vpop.permute.xlu1 %3748  ;;  %2432 = vst.msk [vmem:[#allocation2 + $0x121] sm:$0xff] %vm2365_vm5, %v2355_v55  ;;  %3955 = vrot.lane.b32.xlu0 %v3874_v3, %s7220_s23 }
 0x2fe   : > { %3835 = vst.msk [vmem:[#allocation3 + $0xa0] sm:$0xff] %vm3824_vm10, %v3749_v2 }
 0x2ff   : > { %2572 = vrot.lane.b32.xlu1 %v2507_v56, %s7210_s13  ;;  %v2983_v44 = vpop.permute.xlu0 %2982 }
 0x300   : > { %3066 = vst.msk [vmem:[#allocation3 + $0xd0] sm:$0xff] %vm3052_vm6, %v2983_v44 }
 0x301   : > { %v3174_v4 = vpop.permute.xlu1 %3173  ;;  %2612 = vrot.lane.b32.xlu0 %v3681_v18, %s7210_s13 }
 0x302   : > { %3258 = vst.msk [vmem:[#allocation3 + $0xc0] sm:$0xff] %vm3245_vm7, %v3174_v4 }
 0x303   : > { %2763 = vrot.lane.b32.xlu1 %v2699_v53, %s7214_s17  ;;  %v3751_v8 = vpop.permute.xlu0 %3750 }
 0x304   : > { %v8711_v6 = vld [vmem:[#allocation2 + $0x120] sm:$0xff]  ;;  %v8713_v5 = vld [vmem:[#allocation2 + $0x128] sm:$0xff]  ;;  %3836 = vst.msk [vmem:[#allocation3 + $0xb0] sm:$0xff] %vm3824_vm10, %v3751_v8 }
 0x305   : > { %v3942_v46 = vpop.permute.xlu1 %3941  ;;  %2498 = vst.msk [vmem:[#allocation3 + $0x180] sm:$0xff] %vm2365_vm5, %v8711_v6  ;;  %2499 = vst.msk [vmem:[#allocation3 + $0x190] sm:$0xff] %vm2365_vm5, %v8713_v5  ;;  %2803 = vrot.lane.b32.xlu0 %v3873_v12, %s7214_s17 }
 0x306   : > { %4028 = vst.msk [vmem:[#allocation3 + $0xa0] sm:$0xff] %vm4017_vm11, %v3942_v46 }
 0x307   : > { %3380 = vrot.lane.b32.xlu1 %v3874_v3, %s7217_s12  ;;  %v2599_v11 = vpop.permute.xlu0 %2598 }
 0x308   : > { %2681 = vst.msk [vmem:[#allocation3 + $0xe0] sm:$0xff] %vm2666_vm1, %v2599_v11 }
 0x309   : > { %v3176_v10 = vpop.permute.xlu1 %3175  ;;  %3571 = vrot.lane.b32.xlu0 %v8660_v20, %s7218_s14 }
 0x30a   : > { %3259 = vst.msk [vmem:[#allocation3 + $0xd0] sm:$0xff] %vm3245_vm7, %v3176_v10 }
 0x30b   : > { %2765 = vrot.lane.b32.xlu1 %v2700_v9, %s7214_s17  ;;  %v3367_v40 = vpop.permute.xlu0 %3366 }
 0x30c   : > { %3451 = vst.msk [vmem:[#allocation3 + $0xc0] sm:$0xff] %vm3438_vm8, %v3367_v40 }
 0x30d   : > { %v3944_v1 = vpop.permute.xlu1 %3943  ;;  %v4060_v13 = vld [vmem:[#allocation3 + $0xa0] sm:$0xff]  ;;  %2805 = vrot.lane.b32.xlu0 %v3874_v3, %s7214_s17 }
 0x30e   : > { %4029 = vst.msk [vmem:[#allocation3 + $0xb0] sm:$0xff] %vm4017_vm11, %v3944_v1  ;;  %6929 = vmatprep.mubr.msk.f32.mxu1 %vm4093_vm12, %v4060_v13 }
 0x30f   : > { %2956 = vrot.lane.b32.xlu1 %v8106_v48, %s7215_s10  ;;  %v2601_v49 = vpop.permute.xlu0 %2600  ;;  %v3682_v48 = vld [vmem:[#allocation2 + $0x109] sm:$0xff] }
 0x310   : > { %2682 = vst.msk [vmem:[#allocation3 + $0xf0] sm:$0xff] %vm2666_vm1, %v2601_v49 }
 0x311   : > { %v2792_v58 = vpop.permute.xlu1 %2791  ;;  %2996 = vrot.lane.b32.xlu0 %v8660_v20, %s7215_s10 }
 0x312   : > { %2874 = vst.msk [vmem:[#allocation3 + $0xe0] sm:$0xff] %vm2859_vm2, %v2792_v58 }
 0x313   : > { %3573 = vrot.lane.b32.xlu1 %v8662_v22, %s7218_s14  ;;  %v3369_v62 = vpop.permute.xlu0 %3368 }
 0x314   : > { %3452 = vst.msk [vmem:[#allocation3 + $0xd0] sm:$0xff] %vm3438_vm8, %v3369_v62 }
 0x315   : > { %v3560_v50 = vpop.permute.xlu1 %3559  ;;  %v4061_v59 = vld [vmem:[#allocation3 + $0xb0] sm:$0xff]  ;;  %3764 = vrot.lane.b32.xlu0 %v3682_v48, %s7219_s15 }
 0x316   : > { %3644 = vst.msk [vmem:[#allocation3 + $0xc0] sm:$0xff] %vm3631_vm9, %v3560_v50  ;;  %6930 = vmatmul.mubr.msk.f32.gmra.mxu1 %vm4093_vm12, %v4061_v59  ;;  %v6894_v38 = vpop.f32.mrf.mxu0 }
 0x317   : > { %2958 = vrot.lane.b32.xlu1 %v8108_v51, %s7215_s10  ;;  %v2300_v47 = vadd.f32 %v8491_v34, %v6894_v38  ;;  %v2794_v17 = vpop.permute.xlu0 %2793 }
 0x318   : > { %v2294_v27 = vpop.f32.mrf.mxu0  ;;  %2875 = vst.msk [vmem:[#allocation3 + $0xf0] sm:$0xff] %vm2859_vm2, %v2794_v17 }
 0x319   : > { %v2985_v15 = vpop.permute.xlu1 %2984  ;;  %v2358_v63 = vmax.f32 %v2300_v47, 0.0  ;;  %v2295_v60 = vadd.f32 %v8491_v34, %v2294_v27  ;;  %2998 = vrot.lane.b32.xlu0 %v8662_v22, %s7215_s10  ;;  %v3875_v22 = vld [vmem:[#allocation2 + $0x10a] sm:$0xff] }
 0x31a   : > { %3067 = vst.msk [vmem:[#allocation3 + $0xe0] sm:$0xff] %vm3052_vm6, %v2985_v15 }
 0x31b   : > { %3149 = vrot.lane.b32.xlu1 %v3085_v19, %s7216_s11  ;;  %2435 = vst.msk [vmem:[#allocation2 + $0x141] sm:$0xff] %vm2365_vm5, %v2358_v63  ;;  %v2357_v51 = vmax.f32 %v2295_v60, 0.0  ;;  %v3562_v61 = vpop.permute.xlu0 %3561  ;;  %v3685_v60 = vld [vmem:[#allocation2 + $0x129] sm:$0xff] }
 0x31c   : > { %3645 = vst.msk [vmem:[#allocation3 + $0xd0] sm:$0xff] %vm3631_vm9, %v3562_v61 }
 0x31d   : > { %v3753_v20 = vpop.permute.xlu1 %3752  ;;  %2434 = vst.msk [vmem:[#allocation2 + $0x139] sm:$0xff] %vm2365_vm5, %v2357_v51  ;;  %3189 = vrot.lane.b32.xlu0 %v3682_v48, %s7216_s11 }
 0x31e   : > { %3837 = vst.msk [vmem:[#allocation3 + $0xc0] sm:$0xff] %vm3824_vm10, %v3753_v20 }
 0x31f   : > { %3766 = vrot.lane.b32.xlu1 %v3683_v24, %s7219_s15  ;;  %v2987_v26 = vpop.permute.xlu0 %2986 }
 0x320   : > { %3068 = vst.msk [vmem:[#allocation3 + $0xf0] sm:$0xff] %vm3052_vm6, %v2987_v26 }
 0x321   : > { %v3178_v25 = vpop.permute.xlu1 %3177  ;;  %3957 = vrot.lane.b32.xlu0 %v3875_v22, %s7220_s23 }
 0x322   : > { %3260 = vst.msk [vmem:[#allocation3 + $0xe0] sm:$0xff] %vm3245_vm7, %v3178_v25 }
 0x323   : > { %2574 = vrot.lane.b32.xlu1 %v3085_v19, %s7210_s13  ;;  %v3755_v30 = vpop.permute.xlu0 %3754  ;;  %v3665_v19 = vld [vmem:[#allocation2 + $0x39] sm:$0xff] }
 0x324   : > { %v8763_v16 = vld [vmem:[#allocation2 + $0x138] sm:$0xff]  ;;  %v8765_v29 = vld [vmem:[#allocation2 + $0x140] sm:$0xff]  ;;  %3838 = vst.msk [vmem:[#allocation3 + $0xd0] sm:$0xff] %vm3824_vm10, %v3755_v30 }
 0x325   : > { %v3946_v31 = vpop.permute.xlu1 %3945  ;;  %2500 = vst.msk [vmem:[#allocation3 + $0x1a0] sm:$0xff] %vm2365_vm5, %v8763_v16  ;;  %2501 = vst.msk [vmem:[#allocation3 + $0x1b0] sm:$0xff] %vm2365_vm5, %v8765_v29  ;;  %2614 = vrot.lane.b32.xlu0 %v3682_v48, %s7210_s13 }
 0x326   : > { %4030 = vst.msk [vmem:[#allocation3 + $0xc0] sm:$0xff] %vm4017_vm11, %v3946_v31 }
 0x327   : > { %3151 = vrot.lane.b32.xlu1 %v3086_v52, %s7216_s11  ;;  %v2603_v54 = vpop.permute.xlu0 %2602 }
 0x328   : > { %2683 = vst.msk [vmem:[#allocation3 + $0x100] sm:$0xff] %vm2666_vm1, %v2603_v54  ;;  %v7142_v54 = vld [vmem:[%s10203_s2] ss:$0 sm:$0xff] }
 0x329   : > { %v3180_v32 = vpop.permute.xlu1 %3179  ;;  %3191 = vrot.lane.b32.xlu0 %v3683_v24, %s7216_s11 }
 0x32a   : > { %3261 = vst.msk [vmem:[#allocation3 + $0xf0] sm:$0xff] %vm3245_vm7, %v3180_v32 }
 0x32b   : > { %3342 = vrot.lane.b32.xlu1 %v3278_v33, %s7217_s12  ;;  %v3371_v18 = vpop.permute.xlu0 %3370 }
 0x32c   : > { %3453 = vst.msk [vmem:[#allocation3 + $0xe0] sm:$0xff] %vm3438_vm8, %v3371_v18 }
 0x32d   : > { %v3948_v12 = vpop.permute.xlu1 %3947  ;;  %v4062_v36 = vld [vmem:[#allocation3 + $0xc0] sm:$0xff]  ;;  %3382 = vrot.lane.b32.xlu0 %v3875_v22, %s7217_s12 }
 0x32e   : > { %4031 = vst.msk [vmem:[#allocation3 + $0xd0] sm:$0xff] %vm4017_vm11, %v3948_v12  ;;  %6932 = vmatprep.mubr.msk.f32.mxu1 %vm4093_vm12, %v4062_v36 }
 0x32f   : > { %3959 = vrot.lane.b32.xlu1 %v3876_v35, %s7220_s23  ;;  %v2605_v41 = vpop.permute.xlu0 %2604 }
 0x330   : > { %2684 = vst.msk [vmem:[#allocation3 + $0x110] sm:$0xff] %vm2666_vm1, %v2605_v41 }
 0x331   : > { %v2796_v37 = vpop.permute.xlu1 %2795  ;;  %2576 = vrot.lane.b32.xlu0 %v3086_v52, %s7210_s13 }
 0x332   : > { %2876 = vst.msk [vmem:[#allocation3 + $0x100] sm:$0xff] %vm2859_vm2, %v2796_v37 }
 0x333   : > { %2616 = vrot.lane.b32.xlu1 %v3683_v24, %s7210_s13  ;;  %v3373_v28 = vpop.permute.xlu0 %3372  ;;  %v3857_v24 = vld [vmem:[#allocation2 + $0x32] sm:$0xff] }
 0x334   : > { %3454 = vst.msk [vmem:[#allocation3 + $0xf0] sm:$0xff] %vm3438_vm8, %v3373_v28 }
 0x335   : > { %v3564_v57 = vpop.permute.xlu1 %3563  ;;  %v4063_v42 = vld [vmem:[#allocation3 + $0xd0] sm:$0xff]  ;;  %2767 = vrot.lane.b32.xlu0 %v3278_v33, %s7214_s17 }
 0x336   : > { %3646 = vst.msk [vmem:[#allocation3 + $0xe0] sm:$0xff] %vm3631_vm9, %v3564_v57  ;;  %6933 = vmatmul.mubr.msk.f32.gmra.mxu1 %vm4093_vm12, %v4063_v42  ;;  %v6897_v45 = vpop.f32.mrf.mxu0 }
 0x337   : > { %2807 = vrot.lane.b32.xlu1 %v3875_v22, %s7214_s17  ;;  %v2310_v7 = vadd.f32 %v8491_v34, %v6897_v45  ;;  %v2798_v55 = vpop.permute.xlu0 %2797  ;;  %v3878_v45 = vld [vmem:[#allocation2 + $0x12a] sm:$0xff] }
 0x338   : > { %v2304_v14 = vpop.f32.mrf.mxu0  ;;  %2877 = vst.msk [vmem:[#allocation3 + $0x110] sm:$0xff] %vm2859_vm2, %v2798_v55 }
 0x339   : > { %v2989_v39 = vpop.permute.xlu1 %2988  ;;  %v2360_v56 = vmax.f32 %v2310_v7, 0.0  ;;  %v2305_v2 = vadd.f32 %v8491_v34, %v2304_v14  ;;  %3344 = vrot.lane.b32.xlu0 %v3279_v43, %s7217_s12  ;;  %v3858_v7 = vld [vmem:[#allocation2 + $0x3a] sm:$0xff] }
 0x33a   : > { %3069 = vst.msk [vmem:[#allocation3 + $0x100] sm:$0xff] %vm3052_vm6, %v2989_v39 }
 0x33b   : > { %3384 = vrot.lane.b32.xlu1 %v3876_v35, %s7217_s12  ;;  %2437 = vst.msk [vmem:[#allocation2 + $0x159] sm:$0xff] %vm2365_vm5, %v2360_v56  ;;  %v2359_v3 = vmax.f32 %v2305_v2, 0.0  ;;  %v3566_v4 = vpop.permute.xlu0 %3565 }
 0x33c   : > { %3647 = vst.msk [vmem:[#allocation3 + $0xf0] sm:$0xff] %vm3631_vm9, %v3566_v4 }
 0x33d   : > { %v3757_v53 = vpop.permute.xlu1 %3756  ;;  %2436 = vst.msk [vmem:[#allocation2 + $0x151] sm:$0xff] %vm2365_vm5, %v2359_v3  ;;  %3535 = vrot.lane.b32.xlu0 %v8181_v23, %s7218_s14 }
 0x33e   : > { %3839 = vst.msk [vmem:[#allocation3 + $0xe0] sm:$0xff] %vm3824_vm10, %v3757_v53 }
 0x33f   : > { %3575 = vrot.lane.b32.xlu1 %v8711_v6, %s7218_s14  ;;  %v2991_v46 = vpop.permute.xlu0 %2990 }
 0x340   : > { %3070 = vst.msk [vmem:[#allocation3 + $0x110] sm:$0xff] %vm3052_vm6, %v2991_v46 }
 0x341   : > { %v3182_v44 = vpop.permute.xlu1 %3181  ;;  %2769 = vrot.lane.b32.xlu0 %v3279_v43, %s7214_s17 }
 0x342   : > { %3262 = vst.msk [vmem:[#allocation3 + $0x100] sm:$0xff] %vm3245_vm7, %v3182_v44  ;;  %v3473_v44 = vld [vmem:[#allocation2 + $0x48] sm:$0xff] }
 0x343   : > { %2809 = vrot.lane.b32.xlu1 %v3876_v35, %s7214_s17  ;;  %v3759_v11 = vpop.permute.xlu0 %3758 }
 0x344   : > { %v8811_v8 = vld [vmem:[#allocation2 + $0x150] sm:$0xff]  ;;  %v8813_v9 = vld [vmem:[#allocation2 + $0x158] sm:$0xff]  ;;  %3840 = vst.msk [vmem:[#allocation3 + $0xf0] sm:$0xff] %vm3824_vm10, %v3759_v11 }
 0x345   : > { %v3950_v10 = vpop.permute.xlu1 %3949  ;;  %2502 = vst.msk [vmem:[#allocation3 + $0x1c0] sm:$0xff] %vm2365_vm5, %v8811_v8  ;;  %2503 = vst.msk [vmem:[#allocation3 + $0x1d0] sm:$0xff] %vm2365_vm5, %v8813_v9  ;;  %2960 = vrot.lane.b32.xlu0 %v8181_v23, %s7215_s10  ;;  %v3684_v23 = vld [vmem:[#allocation2 + $0x121] sm:$0xff] }
 0x346   : > { %4032 = vst.msk [vmem:[#allocation3 + $0xe0] sm:$0xff] %vm4017_vm11, %v3950_v10 }
 0x347   : > { %3000 = vrot.lane.b32.xlu1 %v8711_v6, %s7215_s10  ;;  %v2607_v40 = vpop.permute.xlu0 %2606  ;;  %v3664_v6 = vld [vmem:[#allocation2 + $0x31] sm:$0xff] }
 0x348   : > { %2685 = vst.msk [vmem:[#allocation3 + $0x120] sm:$0xff] %vm2666_vm1, %v2607_v40 }
 0x349   : > { %v3184_v1 = vpop.permute.xlu1 %3183  ;;  %3537 = vrot.lane.b32.xlu0 %v8183_v21, %s7218_s14 }
 0x34a   : > { %3263 = vst.msk [vmem:[#allocation3 + $0x110] sm:$0xff] %vm3245_vm7, %v3184_v1 }
 0x34b   : > { %3577 = vrot.lane.b32.xlu1 %v8713_v5, %s7218_s14  ;;  %v3375_v58 = vpop.permute.xlu0 %3374 }
 0x34c   : > { %3455 = vst.msk [vmem:[#allocation3 + $0x100] sm:$0xff] %vm3438_vm8, %v3375_v58  ;;  %v3474_v58 = vld [vmem:[#allocation2 + $0x50] sm:$0xff] }
 0x34d   : > { %v3952_v13 = vpop.permute.xlu1 %3951  ;;  %v4064_v49 = vld [vmem:[#allocation3 + $0xe0] sm:$0xff]  ;;  %3728 = vrot.lane.b32.xlu0 %v3664_v6, %s7219_s15 }
 0x34e   : > { %4033 = vst.msk [vmem:[#allocation3 + $0xf0] sm:$0xff] %vm4017_vm11, %v3952_v13  ;;  %6935 = vmatprep.mubr.msk.f32.mxu1 %vm4093_vm12, %v4064_v49 }
 0x34f   : > { %3768 = vrot.lane.b32.xlu1 %v3684_v23, %s7219_s15  ;;  %v2609_v62 = vpop.permute.xlu0 %2608 }
 0x350   : > { %2686 = vst.msk [vmem:[#allocation3 + $0x130] sm:$0xff] %vm2666_vm1, %v2609_v62 }
 0x351   : > { %v2800_v50 = vpop.permute.xlu1 %2799  ;;  %2962 = vrot.lane.b32.xlu0 %v8183_v21, %s7215_s10 }
 0x352   : > { %2878 = vst.msk [vmem:[#allocation3 + $0x120] sm:$0xff] %vm2859_vm2, %v2800_v50 }
 0x353   : > { %3002 = vrot.lane.b32.xlu1 %v8713_v5, %s7215_s10  ;;  %v3377_v48 = vpop.permute.xlu0 %3376 }
 0x354   : > { %3456 = vst.msk [vmem:[#allocation3 + $0x110] sm:$0xff] %vm3438_vm8, %v3377_v48  ;;  %v6900_v47 = vpop.f32.mrf.mxu0 }
 0x355   : > { %v3568_v59 = vpop.permute.xlu1 %3567  ;;  %v4065_v38 = vld [vmem:[#allocation3 + $0xf0] sm:$0xff]  ;;  %v2320_v27 = vadd.f32 %v8491_v34, %v6900_v47  ;;  %3153 = vrot.lane.b32.xlu0 %v3664_v6, %s7216_s11 }
 0x356   : > { %3648 = vst.msk [vmem:[#allocation3 + $0x100] sm:$0xff] %vm3631_vm9, %v3568_v59  ;;  %6936 = vmatmul.mubr.msk.f32.gmra.mxu1 %vm4093_vm12, %v4065_v38  ;;  %v2314_v5 = vpop.f32.mrf.mxu0  ;;  %v8933_v59 = vld [vmem:[%s10203_s2 + $0x1] ss:$0 sm:$0xff] }
 0x357   : > { %3193 = vrot.lane.b32.xlu1 %v3684_v23, %s7216_s11  ;;  %v2362_v15 = vmax.f32 %v2320_v27, 0.0  ;;  %v2315_v21 = vadd.f32 %v8491_v34, %v2314_v5  ;;  %v2802_v63 = vpop.permute.xlu0 %2801  ;;  %v3877_v34 = vld [vmem:[#allocation2 + $0x122] sm:$0xff] }
 0x358   : > { %2879 = vst.msk [vmem:[#allocation3 + $0x130] sm:$0xff] %vm2859_vm2, %v2802_v63  ;;  %v3667_v63 = vld [vmem:[#allocation2 + $0x51] sm:$0xff] }
 0x359   : > { %v2993_v17 = vpop.permute.xlu1 %2992  ;;  %2439 = vst.msk [vmem:[#allocation2 + $0x171] sm:$0xff] %vm2365_vm5, %v2362_v15  ;;  %v2361_v51 = vmax.f32 %v2315_v21, 0.0  ;;  %3730 = vrot.lane.b32.xlu0 %v3665_v19, %s7219_s15 }
 0x35a   : > { %3071 = vst.msk [vmem:[#allocation3 + $0x120] sm:$0xff] %vm3052_vm6, %v2993_v17 }
 0x35b   : > { %3770 = vrot.lane.b32.xlu1 %v3685_v60, %s7219_s15  ;;  %2438 = vst.msk [vmem:[#allocation2 + $0x169] sm:$0xff] %vm2365_vm5, %v2361_v51  ;;  %v3570_v61 = vpop.permute.xlu0 %3569  ;;  %v3860_v51 = vld [vmem:[#allocation2 + $0x52] sm:$0xff] }
 0x35c   : > { %3649 = vst.msk [vmem:[#allocation3 + $0x110] sm:$0xff] %vm3631_vm9, %v3570_v61 }
 0x35d   : > { %v3761_v20 = vpop.permute.xlu1 %3760  ;;  %3921 = vrot.lane.b32.xlu0 %v3857_v24, %s7220_s23 }
 0x35e   : > { %3841 = vst.msk [vmem:[#allocation3 + $0x100] sm:$0xff] %vm3824_vm10, %v3761_v20 }
 0x35f   : > { %3961 = vrot.lane.b32.xlu1 %v3877_v34, %s7220_s23  ;;  %v2995_v26 = vpop.permute.xlu0 %2994 }
 0x360   : > { %3072 = vst.msk [vmem:[#allocation3 + $0x130] sm:$0xff] %vm3052_vm6, %v2995_v26 }
 0x361   : > { %v3186_v25 = vpop.permute.xlu1 %3185  ;;  %2578 = vrot.lane.b32.xlu0 %v3664_v6, %s7210_s13  ;;  %v3666_v6 = vld [vmem:[#allocation2 + $0x49] sm:$0xff] }
 0x362   : > { %3264 = vst.msk [vmem:[#allocation3 + $0x120] sm:$0xff] %vm3245_vm7, %v3186_v25  ;;  %v6903_v22 = vpop.f32.mrf.mxu0  ;;  %v8863_v31 = vld [vmem:[#allocation2 + $0x168] sm:$0xff]  ;;  %v8865_v30 = vld [vmem:[#allocation2 + $0x170] sm:$0xff]  ;;  %v3879_v25 = vld [vmem:[#allocation2 + $0x13a] sm:$0xff] }
 0x363   : > { %2618 = vrot.lane.b32.xlu1 %v3684_v23, %s7210_s13  ;;  %v3763_v32 = vpop.permute.xlu0 %3762  ;;  %v2330_v33 = vadd.f32 %v7142_v54, %v6903_v22  ;;  %2504 = vst.msk [vmem:[#allocation3 + $0x1e0] sm:$0xff] %vm2365_vm5, %v8863_v31  ;;  %2505 = vst.msk [vmem:[#allocation3 + $0x1f0] sm:$0xff] %vm2365_vm5, %v8865_v30 }
 0x364   : > { %3842 = vst.msk [vmem:[#allocation3 + $0x110] sm:$0xff] %vm3824_vm10, %v3763_v32  ;;  %v2324_v12 = vpop.f32.mrf.mxu0 }
 0x365   : > { %v3954_v52 = vpop.permute.xlu1 %3953  ;;  %3155 = vrot.lane.b32.xlu0 %v3665_v19, %s7216_s11  ;;  %v2364_v18 = vmax.f32 %v2330_v33, 0.0  ;;  %v2325_v36 = vadd.f32 %v7142_v54, %v2324_v12 }
 0x366   : > { %4034 = vst.msk [vmem:[#allocation3 + $0x100] sm:$0xff] %vm4017_vm11, %v3954_v52 }
 0x367   : > { %3195 = vrot.lane.b32.xlu1 %v3685_v60, %s7216_s11  ;;  %2441 = vst.msk [vmem:[#allocation2 + $0x189] sm:$0xff] %vm2365_vm5, %v2364_v18  ;;  %v2571_v37 = vpop.permute.xlu0 %2570  ;;  %v2363_v41 = vmax.f32 %v2325_v36, 0.0 }
 0x368   : > { %2667 = vst.msk [vmem:[#allocation3] sm:$0xff] %vm2666_vm1, %v2571_v37 }
 0x369   : > { %v2611_v35 = vpop.permute.xlu1 %2610  ;;  %2440 = vst.msk [vmem:[#allocation2 + $0x181] sm:$0xff] %vm2365_vm5, %v2363_v41  ;;  %3346 = vrot.lane.b32.xlu0 %v3857_v24, %s7217_s12 }
 0x36a   : > { %2687 = vst.msk [vmem:[#allocation3 + $0x140] sm:$0xff] %vm2666_vm1, %v2611_v35  ;;  %v3880_v35 = vld [vmem:[#allocation2 + $0x142] sm:$0xff] }
 0x36b   : > { %3386 = vrot.lane.b32.xlu1 %v3877_v34, %s7217_s12  ;;  %v3188_v28 = vpop.permute.xlu0 %3187 }
 0x36c   : > { %3265 = vst.msk [vmem:[#allocation3 + $0x130] sm:$0xff] %vm3245_vm7, %v3188_v28 }
 0x36d   : > { %v3379_v57 = vpop.permute.xlu1 %3378  ;;  %v4066_v42 = vld [vmem:[#allocation3 + $0x100] sm:$0xff]  ;;  %3923 = vrot.lane.b32.xlu0 %v3858_v7, %s7220_s23 }
 0x36e   : > { %3457 = vst.msk [vmem:[#allocation3 + $0x120] sm:$0xff] %vm3438_vm8, %v3379_v57  ;;  %6938 = vmatprep.mubr.msk.f32.mxu1 %vm4093_vm12, %v4066_v42 }
 0x36f   : > { %3963 = vrot.lane.b32.xlu1 %v3878_v45, %s7220_s23  ;;  %v3956_v39 = vpop.permute.xlu0 %3955 }
 0x370   : > { %4035 = vst.msk [vmem:[#allocation3 + $0x110] sm:$0xff] %vm4017_vm11, %v3956_v39 }
 0x371   : > { %v2573_v14 = vpop.permute.xlu1 %2572  ;;  %2580 = vrot.lane.b32.xlu0 %v3665_v19, %s7210_s13  ;;  %v3859_v19 = vld [vmem:[#allocation2 + $0x4a] sm:$0xff] }
 0x372   : > { %2668 = vst.msk [vmem:[#allocation3 + $0x10] sm:$0xff] %vm2666_vm1, %v2573_v14 }
 0x373   : > { %2620 = vrot.lane.b32.xlu1 %v3685_v60, %s7210_s13  ;;  %v2613_v56 = vpop.permute.xlu0 %2612  ;;  %v3687_v60 = vld [vmem:[#allocation2 + $0x141] sm:$0xff] }
 0x374   : > { %2688 = vst.msk [vmem:[#allocation3 + $0x150] sm:$0xff] %vm2666_vm1, %v2613_v56 }
 0x375   : > { %v2764_v55 = vpop.permute.xlu1 %2763  ;;  %2771 = vrot.lane.b32.xlu0 %v3857_v24, %s7214_s17 }
 0x376   : > { %2860 = vst.msk [vmem:[#allocation3] sm:$0xff] %vm2859_vm2, %v2764_v55 }
 0x377   : > { %2811 = vrot.lane.b32.xlu1 %v3877_v34, %s7214_s17  ;;  %v2804_v43 = vpop.permute.xlu0 %2803  ;;  %v4067_v3 = vld [vmem:[#allocation3 + $0x110] sm:$0xff] }
 0x378   : > { %2880 = vst.msk [vmem:[#allocation3 + $0x140] sm:$0xff] %vm2859_vm2, %v2804_v43  ;;  %6939 = vmatmul.mubr.msk.f32.gmra.mxu1 %vm4093_vm12, %v4067_v3  ;;  %v3669_v43 = vld [vmem:[#allocation2 + $0x69] sm:$0xff] }
 0x379   : > { %v3381_v2 = vpop.permute.xlu1 %3380  ;;  %3348 = vrot.lane.b32.xlu0 %v3858_v7, %s7217_s12  ;;  %v8990_v3 = vld [vmem:[#allocation2 + $0x6a] sm:$0xff] }
 0x37a   : > { %3458 = vst.msk [vmem:[#allocation3 + $0x130] sm:$0xff] %vm3438_vm8, %v3381_v2 }
 0x37b   : > { %3388 = vrot.lane.b32.xlu1 %v3878_v45, %s7217_s12  ;;  %v3572_v4 = vpop.permute.xlu0 %3571 }
 0x37c   : > { %3650 = vst.msk [vmem:[#allocation3 + $0x120] sm:$0xff] %vm3631_vm9, %v3572_v4  ;;  %v3668_v4 = vld [vmem:[#allocation2 + $0x61] sm:$0xff] }
 0x37d   : > { %v2766_v53 = vpop.permute.xlu1 %2765  ;;  %3539 = vrot.lane.b32.xlu0 %v3473_v44, %s7218_s14 }
 0x37e   : > { %2861 = vst.msk [vmem:[#allocation3 + $0x10] sm:$0xff] %vm2859_vm2, %v2766_v53  ;;  %v3476_v53 = vld [vmem:[#allocation2 + $0x68] sm:$0xff] }
 0x37f   : > { %3579 = vrot.lane.b32.xlu1 %v8763_v16, %s7218_s14  ;;  %v2806_v10 = vpop.permute.xlu0 %2805 }
 0x380   : > { %2881 = vst.msk [vmem:[#allocation3 + $0x150] sm:$0xff] %vm2859_vm2, %v2806_v10 }
 0x381   : > { %v2957_v46 = vpop.permute.xlu1 %2956  ;;  %2773 = vrot.lane.b32.xlu0 %v3858_v7, %s7214_s17 }
 0x382   : > { %3053 = vst.msk [vmem:[#allocation3] sm:$0xff] %vm3052_vm6, %v2957_v46 }
 0x383   : > { %2813 = vrot.lane.b32.xlu1 %v3878_v45, %s7214_s17  ;;  %v2997_v1 = vpop.permute.xlu0 %2996  ;;  %v3475_v45 = vld [vmem:[#allocation2 + $0x60] sm:$0xff] }
 0x384   : > { %3073 = vst.msk [vmem:[#allocation3 + $0x140] sm:$0xff] %vm3052_vm6, %v2997_v1 }
 0x385   : > { %v3574_v11 = vpop.permute.xlu1 %3573  ;;  %2964 = vrot.lane.b32.xlu0 %v3473_v44, %s7215_s10  ;;  %v3861_v44 = vld [vmem:[#allocation2 + $0x62] sm:$0xff] }
 0x386   : > { %3651 = vst.msk [vmem:[#allocation3 + $0x130] sm:$0xff] %vm3631_vm9, %v3574_v11 }
 0x387   : > { %3004 = vrot.lane.b32.xlu1 %v8763_v16, %s7215_s10  ;;  %v3765_v13 = vpop.permute.xlu0 %3764  ;;  %v3686_v16 = vld [vmem:[#allocation2 + $0x139] sm:$0xff] }
 0x388   : > { %3843 = vst.msk [vmem:[#allocation3 + $0x120] sm:$0xff] %vm3824_vm10, %v3765_v13 }
 0x389   : > { %v2959_v40 = vpop.permute.xlu1 %2958  ;;  %3541 = vrot.lane.b32.xlu0 %v3474_v58, %s7218_s14 }
 0x38a   : > { %3054 = vst.msk [vmem:[#allocation3 + $0x10] sm:$0xff] %vm3052_vm6, %v2959_v40 }
 0x38b   : > { %3581 = vrot.lane.b32.xlu1 %v8765_v29, %s7218_s14  ;;  %v2999_v23 = vpop.permute.xlu0 %2998 }
 0x38c   : > { %3074 = vst.msk [vmem:[#allocation3 + $0x150] sm:$0xff] %vm3052_vm6, %v2999_v23 }
 0x38d   : > { %v3150_v49 = vpop.permute.xlu1 %3149  ;;  %3732 = vrot.lane.b32.xlu0 %v3666_v6, %s7219_s15 }
 0x38e   : > { %3246 = vst.msk [vmem:[#allocation3] sm:$0xff] %vm3245_vm7, %v3150_v49  ;;  %v3688_v49 = vld [vmem:[#allocation2 + $0x151] sm:$0xff] }
 0x38f   : > { %3772 = vrot.lane.b32.xlu1 %v3686_v16, %s7219_s15  ;;  %v3190_v62 = vpop.permute.xlu0 %3189 }
 0x390   : > { %3266 = vst.msk [vmem:[#allocation3 + $0x140] sm:$0xff] %vm3245_vm7, %v3190_v62 }
 0x391   : > { %v3767_v50 = vpop.permute.xlu1 %3766  ;;  %2966 = vrot.lane.b32.xlu0 %v3474_v58, %s7215_s10 }
 0x392   : > { %3844 = vst.msk [vmem:[#allocation3 + $0x130] sm:$0xff] %vm3824_vm10, %v3767_v50  ;;  %v3689_v50 = vld [vmem:[#allocation2 + $0x159] sm:$0xff] }
 0x393   : > { %3006 = vrot.lane.b32.xlu1 %v8765_v29, %s7215_s10  ;;  %v3958_v38 = vpop.permute.xlu0 %3957 }
 0x394   : > { %4036 = vst.msk [vmem:[#allocation3 + $0x120] sm:$0xff] %vm4017_vm11, %v3958_v38 }
 0x395   : > { %v2575_v48 = vpop.permute.xlu1 %2574  ;;  %3157 = vrot.lane.b32.xlu0 %v3666_v6, %s7216_s11 }
 0x396   : > { %2669 = vst.msk [vmem:[#allocation3 + $0x20] sm:$0xff] %vm2666_vm1, %v2575_v48  ;;  %v6925_v47 = vpop.f32.mrf.mxu1  ;;  %v3881_v48 = vld [vmem:[#allocation2 + $0x152] sm:$0xff] }
 0x397   : > { %v4296_v27 = vadd.f32 %v6925_v47, %v8933_v59  ;;  %3197 = vrot.lane.b32.xlu1 %v3686_v16, %s7216_s11  ;;  %v2615_v17 = vpop.permute.xlu0 %2614 }
 0x398   : > { %v4290_v29 = vpop.f32.mrf.mxu1  ;;  %2689 = vst.msk [vmem:[#allocation3 + $0x160] sm:$0xff] %vm2666_vm1, %v2615_v17 }
 0x399   : > { %v4426_v5 = vmax.f32 %v4296_v27, 0.0  ;;  %v4291_v15 = vadd.f32 %v8933_v59, %v4290_v29  ;;  %v3152_v21 = vpop.permute.xlu1 %3151  ;;  %3734 = vrot.lane.b32.xlu0 %v3667_v63, %s7219_s15 }
 0x39a   : > { %3247 = vst.msk [vmem:[#allocation3 + $0x10] sm:$0xff] %vm3245_vm7, %v3152_v21 }
 0x39b   : > { %4458 = vst.msk [vmem:[%s8945_s9 + $0x38] sm:$0xff] %vm2365_vm5, %v4426_v5  ;;  %v4425_v20 = vmax.f32 %v4291_v15, 0.0  ;;  %3774 = vrot.lane.b32.xlu1 %v3687_v60, %s7219_s15  ;;  %4490 = vst.msk [vmem:[#allocation2 + $0x50] sm:$0xff] %vm2365_vm5, %v4426_v5  ;;  %v3192_v34 = vpop.permute.xlu0 %3191  ;;  %v4068_v24 = vld [vmem:[#allocation3 + $0x120] sm:$0xff] }
 0x39c   : > { %3267 = vst.msk [vmem:[#allocation3 + $0x150] sm:$0xff] %vm3245_vm7, %v3192_v34  ;;  %6941 = vmatprep.mubr.msk.f32.mxu1 %vm4093_vm12, %v4068_v24 }
 0x39d   : > { %4457 = vst.msk [vmem:[%s8945_s9 + $0x30] sm:$0xff] %vm2365_vm5, %v4425_v20  ;;  %v3343_v61 = vpop.permute.xlu1 %3342  ;;  %4489 = vst.msk [vmem:[#allocation2 + $0x48] sm:$0xff] %vm2365_vm5, %v4425_v20  ;;  %3925 = vrot.lane.b32.xlu0 %v3859_v19, %s7220_s23 }
 0x39e   : > { %3439 = vst.msk [vmem:[#allocation3] sm:$0xff] %vm3438_vm8, %v3343_v61 }
 0x39f   : > { %3965 = vrot.lane.b32.xlu1 %v3879_v25, %s7220_s23  ;;  %v3383_v22 = vpop.permute.xlu0 %3382 }
 0x3a0   : > { %3459 = vst.msk [vmem:[#allocation3 + $0x140] sm:$0xff] %vm3438_vm8, %v3383_v22 }
 0x3a1   : > { %v3960_v26 = vpop.permute.xlu1 %3959  ;;  %2622 = vrot.lane.b32.xlu0 %v3686_v16, %s7210_s13 }
 0x3a2   : > { %4037 = vst.msk [vmem:[#allocation3 + $0x130] sm:$0xff] %vm4017_vm11, %v3960_v26 }
 0x3a3   : > { %3159 = vrot.lane.b32.xlu1 %v3667_v63, %s7216_s11  ;;  %v2577_v32 = vpop.permute.xlu0 %2576 }
 0x3a4   : > { %2670 = vst.msk [vmem:[#allocation3 + $0x30] sm:$0xff] %vm2666_vm1, %v2577_v32 }
 0x3a5   : > { %v2617_v52 = vpop.permute.xlu1 %2616  ;;  %3199 = vrot.lane.b32.xlu0 %v3687_v60, %s7216_s11 }
 0x3a6   : > { %2690 = vst.msk [vmem:[#allocation3 + $0x170] sm:$0xff] %vm2666_vm1, %v2617_v52 }
 0x3a7   : > { %3350 = vrot.lane.b32.xlu1 %v3859_v19, %s7217_s12  ;;  %v2768_v33 = vpop.permute.xlu0 %2767 }
 0x3a8   : > { %2862 = vst.msk [vmem:[#allocation3 + $0x20] sm:$0xff] %vm2859_vm2, %v2768_v33 }
 0x3a9   : > { %v2808_v54 = vpop.permute.xlu1 %2807  ;;  %v4069_v12 = vld [vmem:[#allocation3 + $0x130] sm:$0xff]  ;;  %3390 = vrot.lane.b32.xlu0 %v3879_v25, %s7217_s12 }
 0x3aa   : > { %2882 = vst.msk [vmem:[#allocation3 + $0x160] sm:$0xff] %vm2859_vm2, %v2808_v54  ;;  %6942 = vmatmul.mubr.msk.f32.gmra.mxu1 %vm4093_vm12, %v4069_v12  ;;  %v3690_v12 = vld [vmem:[#allocation2 + $0x169] sm:$0xff] }
 0x3ab   : > { %3927 = vrot.lane.b32.xlu1 %v3860_v51, %s7220_s23  ;;  %v3345_v36 = vpop.permute.xlu0 %3344 }
 0x3ac   : > { %3440 = vst.msk [vmem:[#allocation3 + $0x10] sm:$0xff] %vm3438_vm8, %v3345_v36 }
 0x3ad   : > { %v3385_v18 = vpop.permute.xlu1 %3384  ;;  %3967 = vrot.lane.b32.xlu0 %v3880_v35, %s7220_s23 }
 0x3ae   : > { %3460 = vst.msk [vmem:[#allocation3 + $0x150] sm:$0xff] %vm3438_vm8, %v3385_v18 }
 0x3af   : > { %2624 = vrot.lane.b32.xlu1 %v3687_v60, %s7210_s13  ;;  %v3536_v41 = vpop.permute.xlu0 %3535 }
 0x3b0   : > { %3632 = vst.msk [vmem:[#allocation3] sm:$0xff] %vm3631_vm9, %v3536_v41  ;;  %v3691_v41 = vld [vmem:[#allocation2 + $0x171] sm:$0xff] }
 0x3b1   : > { %v3576_v37 = vpop.permute.xlu1 %3575  ;;  %2815 = vrot.lane.b32.xlu0 %v3879_v25, %s7214_s17 }
 0x3b2   : > { %3652 = vst.msk [vmem:[#allocation3 + $0x140] sm:$0xff] %vm3631_vm9, %v3576_v37  ;;  %v3883_v37 = vld [vmem:[#allocation2 + $0x16a] sm:$0xff] }
 0x3b3   : > { %3352 = vrot.lane.b32.xlu1 %v3860_v51, %s7217_s12  ;;  %v2770_v28 = vpop.permute.xlu0 %2769  ;;  %v3882_v51 = vld [vmem:[#allocation2 + $0x15a] sm:$0xff] }
 0x3b4   : > { %2863 = vst.msk [vmem:[#allocation3 + $0x30] sm:$0xff] %vm2859_vm2, %v2770_v28 }
 0x3b5   : > { %v2810_v57 = vpop.permute.xlu1 %2809  ;;  %3392 = vrot.lane.b32.xlu0 %v3880_v35, %s7217_s12 }
 0x3b6   : > { %2883 = vst.msk [vmem:[#allocation3 + $0x170] sm:$0xff] %vm2859_vm2, %v2810_v57  ;;  %v6928_v42 = vpop.f32.mrf.mxu1 }
 0x3b7   : > { %v4306_v7 = vadd.f32 %v6928_v42, %v8933_v59  ;;  %3543 = vrot.lane.b32.xlu1 %v3475_v45, %s7218_s14  ;;  %v2961_v2 = vpop.permute.xlu0 %2960 }
 0x3b8   : > { %v4300_v14 = vpop.f32.mrf.mxu1  ;;  %3055 = vst.msk [vmem:[#allocation3 + $0x20] sm:$0xff] %vm3052_vm6, %v2961_v2 }
 0x3b9   : > { %v4428_v39 = vmax.f32 %v4306_v7, 0.0  ;;  %v4301_v55 = vadd.f32 %v8933_v59, %v4300_v14  ;;  %v3001_v56 = vpop.permute.xlu1 %3000  ;;  %3583 = vrot.lane.b32.xlu0 %v8811_v8, %s7218_s14 }
 0x3ba   : > { %3075 = vst.msk [vmem:[#allocation3 + $0x160] sm:$0xff] %vm3052_vm6, %v3001_v56  ;;  %v3884_v56 = vld [vmem:[#allocation2 + $0x172] sm:$0xff] }
 0x3bb   : > { %4460 = vst.msk [vmem:[%s8945_s9 + $0x48] sm:$0xff] %vm2365_vm5, %v4428_v39  ;;  %v4427_v46 = vmax.f32 %v4301_v55, 0.0  ;;  %2817 = vrot.lane.b32.xlu1 %v3880_v35, %s7214_s17  ;;  %4492 = vst.msk [vmem:[#allocation2 + $0x68] sm:$0xff] %vm2365_vm5, %v4428_v39  ;;  %v3538_v11 = vpop.permute.xlu0 %3537 }
 0x3bc   : > { %3633 = vst.msk [vmem:[#allocation3 + $0x10] sm:$0xff] %vm3631_vm9, %v3538_v11 }
 0x3bd   : > { %4459 = vst.msk [vmem:[%s8945_s9 + $0x40] sm:$0xff] %vm2365_vm5, %v4427_v46  ;;  %v3578_v10 = vpop.permute.xlu1 %3577  ;;  %4491 = vst.msk [vmem:[#allocation2 + $0x60] sm:$0xff] %vm2365_vm5, %v4427_v46  ;;  %3008 = vrot.lane.b32.xlu0 %v8811_v8, %s7215_s10 }
 0x3be   : > { %3653 = vst.msk [vmem:[#allocation3 + $0x150] sm:$0xff] %vm3631_vm9, %v3578_v10 }
 0x3bf   : > { %3545 = vrot.lane.b32.xlu1 %v3476_v53, %s7218_s14  ;;  %v3729_v40 = vpop.permute.xlu0 %3728 }
 0x3c0   : > { %3825 = vst.msk [vmem:[#allocation3] sm:$0xff] %vm3824_vm10, %v3729_v40  ;;  %v3692_v40 = vld [vmem:[#allocation2 + $0x181] sm:$0xff] }
 0x3c1   : > { %v3769_v1 = vpop.permute.xlu1 %3768  ;;  %3585 = vrot.lane.b32.xlu0 %v8813_v9, %s7218_s14 }
 0x3c2   : > { %3845 = vst.msk [vmem:[#allocation3 + $0x140] sm:$0xff] %vm3824_vm10, %v3769_v1 }
 0x3c3   : > { %3736 = vrot.lane.b32.xlu1 %v3668_v4, %s7219_s15  ;;  %v2963_v58 = vpop.permute.xlu0 %2962 }
 0x3c4   : > { %3056 = vst.msk [vmem:[#allocation3 + $0x30] sm:$0xff] %vm3052_vm6, %v2963_v58 }
 0x3c5   : > { %v3003_v13 = vpop.permute.xlu1 %3002  ;;  %3776 = vrot.lane.b32.xlu0 %v3688_v49, %s7219_s15 }
 0x3c6   : > { %3076 = vst.msk [vmem:[#allocation3 + $0x170] sm:$0xff] %vm3052_vm6, %v3003_v13  ;;  %v3500_v13 = vld [vmem:[#allocation2 + $0x188] sm:$0xff] }
 0x3c7   : > { %3010 = vrot.lane.b32.xlu1 %v8813_v9, %s7215_s10  ;;  %v3154_v23 = vpop.permute.xlu0 %3153 }
 0x3c8   : > { %3248 = vst.msk [vmem:[#allocation3 + $0x20] sm:$0xff] %vm3245_vm7, %v3154_v23 }
 0x3c9   : > { %v3194_v8 = vpop.permute.xlu1 %3193  ;;  %3201 = vrot.lane.b32.xlu0 %v3688_v49, %s7216_s11 }
 0x3ca   : > { %3268 = vst.msk [vmem:[#allocation3 + $0x160] sm:$0xff] %vm3245_vm7, %v3194_v8 }
 0x3cb   : > { %3738 = vrot.lane.b32.xlu1 %v3669_v43, %s7219_s15  ;;  %v3731_v6 = vpop.permute.xlu0 %3730 }
 0x3cc   : > { %3826 = vst.msk [vmem:[#allocation3 + $0x10] sm:$0xff] %vm3824_vm10, %v3731_v6  ;;  %v3693_v6 = vld [vmem:[#allocation2 + $0x189] sm:$0xff] }
 0x3cd   : > { %v3771_v16 = vpop.permute.xlu1 %3770  ;;  %3778 = vrot.lane.b32.xlu0 %v3689_v50, %s7219_s15 }
 0x3ce   : > { %3846 = vst.msk [vmem:[#allocation3 + $0x150] sm:$0xff] %vm3824_vm10, %v3771_v16  ;;  %v3885_v16 = vld [vmem:[#allocation2 + $0x182] sm:$0xff] }
 0x3cf   : > { %3929 = vrot.lane.b32.xlu1 %v3861_v44, %s7220_s23  ;;  %v3922_v62 = vpop.permute.xlu0 %3921  ;;  %v3499_v44 = vld [vmem:[#allocation2 + $0x180] sm:$0xff] }
 0x3d0   : > { %4018 = vst.msk [vmem:[#allocation3] sm:$0xff] %vm4017_vm11, %v3922_v62 }
 0x3d1   : > { %v3962_v9 = vpop.permute.xlu1 %3961  ;;  %3969 = vrot.lane.b32.xlu0 %v3881_v48, %s7220_s23 }
 0x3d2   : > { %4038 = vst.msk [vmem:[#allocation3 + $0x140] sm:$0xff] %vm4017_vm11, %v3962_v9 }
 0x3d3   : > { %2626 = vrot.lane.b32.xlu1 %v3688_v49, %s7210_s13  ;;  %v2579_v47 = vpop.permute.xlu0 %2578 }
 0x3d4   : > { %2671 = vst.msk [vmem:[#allocation3 + $0x40] sm:$0xff] %vm2666_vm1, %v2579_v47 }
 0x3d5   : > { %v2619_v38 = vpop.permute.xlu1 %2618  ;;  %3203 = vrot.lane.b32.xlu0 %v3689_v50, %s7216_s11 }
 0x3d6   : > { %2691 = vst.msk [vmem:[#allocation3 + $0x180] sm:$0xff] %vm2666_vm1, %v2619_v38  ;;  %v6931_v27 = vpop.f32.mrf.mxu1 }
 0x3d7   : > { %v4316_v29 = vadd.f32 %v6931_v27, %v8933_v59  ;;  %3394 = vrot.lane.b32.xlu1 %v3881_v48, %s7217_s12  ;;  %v3156_v63 = vpop.permute.xlu0 %3155  ;;  %v4050_v60 = vld [vmem:[#allocation3] sm:$0xff] }
 0x3d8   : > { %v4310_v5 = vpop.f32.mrf.mxu1  ;;  %3249 = vst.msk [vmem:[#allocation3 + $0x30] sm:$0xff] %vm3245_vm7, %v3156_v63  ;;  %6914 = vmatprep.mubr.msk.f32.mxu0 %vm4093_vm12, %v4050_v60  ;;  %v3501_v60 = vld [vmem:[#allocation2 + $0x198] sm:$0xff] }
 0x3d9   : > { %v4430_v15 = vmax.f32 %v4316_v29, 0.0  ;;  %v4311_v21 = vadd.f32 %v8933_v59, %v4310_v5  ;;  %v3196_v17 = vpop.permute.xlu1 %3195  ;;  %v4070_v19 = vld [vmem:[#allocation3 + $0x140] sm:$0xff]  ;;  %3931 = vrot.lane.b32.xlu0 %v8990_v3, %s7220_s23 }
 0x3da   : > { %3269 = vst.msk [vmem:[#allocation3 + $0x170] sm:$0xff] %vm3245_vm7, %v3196_v17  ;;  %6944 = vmatprep.mubr.msk.f32.mxu1 %vm4093_vm12, %v4070_v19  ;;  %v3309_v17 = vld [vmem:[#allocation2 + $0x18a] sm:$0xff]  ;;  %v3502_v19 = vld [vmem:[#allocation2 + $0x1a0] sm:$0xff] }
 0x3db   : > { %4462 = vst.msk [vmem:[%s8945_s9 + $0x58] sm:$0xff] %vm2365_vm5, %v4430_v15  ;;  %4494 = vst.msk [vmem:[#allocation2 + $0x80] sm:$0xff] %vm2365_vm5, %v4430_v15  ;;  %v4429_v20 = vmax.f32 %v4311_v21, 0.0  ;;  %3971 = vrot.lane.b32.xlu1 %v3882_v51, %s7220_s23  ;;  %v3347_v34 = vpop.permute.xlu0 %3346 }
 0x3dc   : > { %3441 = vst.msk [vmem:[#allocation3 + $0x20] sm:$0xff] %vm3438_vm8, %v3347_v34  ;;  %v3695_v34 = vld [vmem:[#allocation2 + $0x1a1] sm:$0xff] }
 0x3dd   : > { %4461 = vst.msk [vmem:[%s8945_s9 + $0x50] sm:$0xff] %vm2365_vm5, %v4429_v20  ;;  %4493 = vst.msk [vmem:[#allocation2 + $0x78] sm:$0xff] %vm2365_vm5, %v4429_v20  ;;  %v3387_v61 = vpop.permute.xlu1 %3386  ;;  %2628 = vrot.lane.b32.xlu0 %v3689_v50, %s7210_s13 }
 0x3de   : > { %3461 = vst.msk [vmem:[#allocation3 + $0x160] sm:$0xff] %vm3438_vm8, %v3387_v61  ;;  %v3694_v61 = vld [vmem:[#allocation2 + $0x199] sm:$0xff] }
 0x3df   : > { %2819 = vrot.lane.b32.xlu1 %v3881_v48, %s7214_s17  ;;  %v3924_v25 = vpop.permute.xlu0 %3923 }
 0x3e0   : > { %4019 = vst.msk [vmem:[#allocation3 + $0x10] sm:$0xff] %vm4017_vm11, %v3924_v25 }
 0x3e1   : > { %v3964_v24 = vpop.permute.xlu1 %3963  ;;  %3396 = vrot.lane.b32.xlu0 %v3882_v51, %s7217_s12 }
 0x3e2   : > { %4039 = vst.msk [vmem:[#allocation3 + $0x150] sm:$0xff] %vm4017_vm11, %v3964_v24 }
 0x3e3   : > { %3587 = vrot.lane.b32.xlu1 %v8863_v31, %s7218_s14  ;;  %v2581_v22 = vpop.permute.xlu0 %2580 }
 0x3e4   : > { %2672 = vst.msk [vmem:[#allocation3 + $0x50] sm:$0xff] %vm2666_vm1, %v2581_v22 }
 0x3e5   : > { %v2621_v26 = vpop.permute.xlu1 %2620  ;;  %2821 = vrot.lane.b32.xlu0 %v3882_v51, %s7214_s17 }
 0x3e6   : > { %2692 = vst.msk [vmem:[#allocation3 + $0x190] sm:$0xff] %vm2666_vm1, %v2621_v26 }
 0x3e7   : > { %3012 = vrot.lane.b32.xlu1 %v8863_v31, %s7215_s10  ;;  %v2772_v32 = vpop.permute.xlu0 %2771  ;;  %v4051_v54 = vld [vmem:[#allocation3 + $0x10] sm:$0xff] }
 0x3e8   : > { %2864 = vst.msk [vmem:[#allocation3 + $0x40] sm:$0xff] %vm2859_vm2, %v2772_v32  ;;  %6915 = vmatmul.mubr.msk.f32.vlgmr.msra.gmra.mxu0 %vm4093_vm12, %v4051_v54  ;;  %v9145_v32 = vld [vmem:[#allocation2 + $0x50] sm:$0xff] }
 0x3e9   : > { %v2812_v52 = vpop.permute.xlu1 %2811  ;;  %v4071_v33 = vld [vmem:[#allocation3 + $0x150] sm:$0xff]  ;;  %3589 = vrot.lane.b32.xlu0 %v8865_v30, %s7218_s14 }
 0x3ea   : > { %2884 = vst.msk [vmem:[#allocation3 + $0x180] sm:$0xff] %vm2859_vm2, %v2812_v52  ;;  %6945 = vmatmul.mubr.msk.f32.gmra.mxu1 %vm4093_vm12, %v4071_v33  ;;  %v3887_v52 = vld [vmem:[#allocation2 + $0x19a] sm:$0xff]  ;;  %v3888_v33 = vld [vmem:[#allocation2 + $0x1a2] sm:$0xff] }
 0x3eb   : > { %3780 = vrot.lane.b32.xlu1 %v3690_v12, %s7219_s15  ;;  %v3349_v18 = vpop.permute.xlu0 %3348 }
 0x3ec   : > { %3442 = vst.msk [vmem:[#allocation3 + $0x30] sm:$0xff] %vm3438_vm8, %v3349_v18 }
 0x3ed   : > { %v3389_v31 = vpop.permute.xlu1 %3388  ;;  %3014 = vrot.lane.b32.xlu0 %v8865_v30, %s7215_s10 }
 0x3ee   : > { %3462 = vst.msk [vmem:[#allocation3 + $0x170] sm:$0xff] %vm3438_vm8, %v3389_v31 }
 0x3ef   : > { %3205 = vrot.lane.b32.xlu1 %v3690_v12, %s7216_s11  ;;  %v3540_v35 = vpop.permute.xlu0 %3539 }
 0x3f0   : > { %3634 = vst.msk [vmem:[#allocation3 + $0x20] sm:$0xff] %vm3631_vm9, %v3540_v35 }
 0x3f1   : > { %v3580_v36 = vpop.permute.xlu1 %3579  ;;  %3782 = vrot.lane.b32.xlu0 %v3691_v41, %s7219_s15 }
 0x3f2   : > { %3654 = vst.msk [vmem:[#allocation3 + $0x160] sm:$0xff] %vm3631_vm9, %v3580_v36 }
 0x3f3   : > { %3973 = vrot.lane.b32.xlu1 %v3883_v37, %s7220_s23  ;;  %v2774_v28 = vpop.permute.xlu0 %2773 }
 0x3f4   : > { %2865 = vst.msk [vmem:[#allocation3 + $0x50] sm:$0xff] %vm2859_vm2, %v2774_v28 }
 0x3f5   : > { %v2814_v57 = vpop.permute.xlu1 %2813  ;;  %2630 = vrot.lane.b32.xlu0 %v3690_v12, %s7210_s13 }
 0x3f6   : > { %2885 = vst.msk [vmem:[#allocation3 + $0x190] sm:$0xff] %vm2859_vm2, %v2814_v57  ;;  %v6934_v30 = vpop.f32.mrf.mxu1 }
 0x3f7   : > { %v4326_v42 = vadd.f32 %v6934_v30, %v8933_v59  ;;  %3207 = vrot.lane.b32.xlu1 %v3691_v41, %s7216_s11  ;;  %v2965_v55 = vpop.permute.xlu0 %2964 }
 0x3f8   : > { %v4320_v45 = vpop.f32.mrf.mxu1  ;;  %3057 = vst.msk [vmem:[#allocation3 + $0x40] sm:$0xff] %vm3052_vm6, %v2965_v55 }
 0x3f9   : > { %v4432_v7 = vmax.f32 %v4326_v42, 0.0  ;;  %v4321_v14 = vadd.f32 %v8933_v59, %v4320_v45  ;;  %v3005_v39 = vpop.permute.xlu1 %3004  ;;  %3398 = vrot.lane.b32.xlu0 %v3883_v37, %s7217_s12 }
 0x3fa   : > { %3077 = vst.msk [vmem:[#allocation3 + $0x180] sm:$0xff] %vm3052_vm6, %v3005_v39 }
 0x3fb   : > { %4464 = vst.msk [vmem:[%s8945_s9 + $0x68] sm:$0xff] %vm2365_vm5, %v4432_v7  ;;  %4496 = vst.msk [vmem:[#allocation2 + $0x98] sm:$0xff] %vm2365_vm5, %v4432_v7  ;;  %v4431_v2 = vmax.f32 %v4321_v14, 0.0  ;;  %3975 = vrot.lane.b32.xlu1 %v3884_v56, %s7220_s23  ;;  %v3542_v3 = vpop.permute.xlu0 %3541 }
 0x3fc   : > { %3635 = vst.msk [vmem:[#allocation3 + $0x30] sm:$0xff] %vm3631_vm9, %v3542_v3 }
 0x3fd   : > { %4463 = vst.msk [vmem:[%s8945_s9 + $0x60] sm:$0xff] %vm2365_vm5, %v4431_v2  ;;  %4495 = vst.msk [vmem:[#allocation2 + $0x90] sm:$0xff] %vm2365_vm5, %v4431_v2  ;;  %v3582_v43 = vpop.permute.xlu1 %3581  ;;  %2632 = vrot.lane.b32.xlu0 %v3691_v41, %s7210_s13  ;;  %v9151_v41 = vld [vmem:[#allocation2 + $0x48] sm:$0xff] }
 0x3fe   : > { %3655 = vst.msk [vmem:[#allocation3 + $0x170] sm:$0xff] %vm3631_vm9, %v3582_v43 }
 0x3ff   : > { %2823 = vrot.lane.b32.xlu1 %v3883_v37, %s7214_s17  ;;  %v3733_v4 = vpop.permute.xlu0 %3732 }
 0x400   : > { %3827 = vst.msk [vmem:[#allocation3 + $0x20] sm:$0xff] %vm3824_vm10, %v3733_v4 }
 0x401   : > { %v3773_v53 = vpop.permute.xlu1 %3772  ;;  %3400 = vrot.lane.b32.xlu0 %v3884_v56, %s7217_s12 }
 0x402   : > { %3847 = vst.msk [vmem:[#allocation3 + $0x160] sm:$0xff] %vm3824_vm10, %v3773_v53  ;;  %v4522_v26 = vld [vmem:[#allocation2 + $0x98] sm:$0xff] }
 0x403   : > { %3591 = vrot.lane.b32.xlu1 %v3499_v44, %s7218_s14  ;;  %v2967_v10 = vpop.permute.xlu0 %2966 }
 0x404   : > { %3058 = vst.msk [vmem:[#allocation3 + $0x50] sm:$0xff] %vm3052_vm6, %v2967_v10  ;;  %v4521_v12 = vld [vmem:[#allocation2 + $0x90] sm:$0xff] }
 0x405   : > { %v3007_v46 = vpop.permute.xlu1 %3006  ;;  %2825 = vrot.lane.b32.xlu0 %v3884_v56, %s7214_s17 }
 0x406   : > { %3078 = vst.msk [vmem:[#allocation3 + $0x190] sm:$0xff] %vm3052_vm6, %v3007_v46 }
 0x407   : > { %3016 = vrot.lane.b32.xlu1 %v3499_v44, %s7215_s10  ;;  %v3158_v1 = vpop.permute.xlu0 %3157 }
 0x408   : > { %3250 = vst.msk [vmem:[#allocation3 + $0x40] sm:$0xff] %vm3245_vm7, %v3158_v1 }
 0x409   : > { %v3198_v11 = vpop.permute.xlu1 %3197  ;;  %3593 = vrot.lane.b32.xlu0 %v3500_v13, %s7218_s14 }
 0x40a   : > { %3270 = vst.msk [vmem:[#allocation3 + $0x180] sm:$0xff] %vm3245_vm7, %v3198_v11 }
 0x40b   : > { %3784 = vrot.lane.b32.xlu1 %v3692_v40, %s7219_s15  ;;  %v3735_v49 = vpop.permute.xlu0 %3734 }
 0x40c   : > { %3828 = vst.msk [vmem:[#allocation3 + $0x30] sm:$0xff] %vm3824_vm10, %v3735_v49 }
 0x40d   : > { %v3775_v58 = vpop.permute.xlu1 %3774  ;;  %3018 = vrot.lane.b32.xlu0 %v3500_v13, %s7215_s10 }
 0x40e   : > { %3848 = vst.msk [vmem:[#allocation3 + $0x170] sm:$0xff] %vm3824_vm10, %v3775_v58 }
 0x40f   : > { %3209 = vrot.lane.b32.xlu1 %v3692_v40, %s7216_s11  ;;  %v3926_v23 = vpop.permute.xlu0 %3925 }
 0x410   : > { %4020 = vst.msk [vmem:[#allocation3 + $0x20] sm:$0xff] %vm4017_vm11, %v3926_v23 }
 0x411   : > { %v3966_v8 = vpop.permute.xlu1 %3965  ;;  %3786 = vrot.lane.b32.xlu0 %v3693_v6, %s7219_s15 }
 0x412   : > { %4040 = vst.msk [vmem:[#allocation3 + $0x160] sm:$0xff] %vm4017_vm11, %v3966_v8 }
 0x413   : > { %3977 = vrot.lane.b32.xlu1 %v3885_v16, %s7220_s23  ;;  %v2623_v9 = vpop.permute.xlu0 %2622 }
 0x414   : > { %2693 = vst.msk [vmem:[#allocation3 + $0x1a0] sm:$0xff] %vm2666_vm1, %v2623_v9 }
 0x415   : > { %v3160_v50 = vpop.permute.xlu1 %3159  ;;  %3211 = vrot.lane.b32.xlu0 %v3693_v6, %s7216_s11 }
 0x416   : > { %3251 = vst.msk [vmem:[#allocation3 + $0x50] sm:$0xff] %vm3245_vm7, %v3160_v50  ;;  %v6937_v62 = vpop.f32.mrf.mxu1 }
 0x417   : > { %v4336_v48 = vadd.f32 %v6937_v62, %v8933_v59  ;;  %3402 = vrot.lane.b32.xlu1 %v3885_v16, %s7217_s12  ;;  %v3200_v5 = vpop.permute.xlu0 %3199  ;;  %v4052_v15 = vld [vmem:[#allocation3 + $0x20] sm:$0xff] }
 0x418   : > { %v4330_v38 = vpop.f32.mrf.mxu1  ;;  %3271 = vst.msk [vmem:[#allocation3 + $0x190] sm:$0xff] %vm3245_vm7, %v3200_v5  ;;  %6917 = vmatprep.mubr.msk.f32.mxu0 %vm4093_vm12, %v4052_v15 }
 0x419   : > { %v4434_v47 = vmax.f32 %v4336_v48, 0.0  ;;  %v4331_v27 = vadd.f32 %v8933_v59, %v4330_v38  ;;  %v3351_v29 = vpop.permute.xlu1 %3350  ;;  %v4072_v21 = vld [vmem:[#allocation3 + $0x160] sm:$0xff]  ;;  %3979 = vrot.lane.b32.xlu0 %v3309_v17, %s7220_s23 }
 0x41a   : > { %3443 = vst.msk [vmem:[#allocation3 + $0x40] sm:$0xff] %vm3438_vm8, %v3351_v29  ;;  %6947 = vmatprep.mubr.msk.f32.mxu1 %vm4093_vm12, %v4072_v21 }
 0x41b   : > { %4466 = vst.msk [vmem:[%s8945_s9 + $0x78] sm:$0xff] %vm2365_vm5, %v4434_v47  ;;  %4498 = vst.msk [vmem:[#allocation2 + $0xb0] sm:$0xff] %vm2365_vm5, %v4434_v47  ;;  %v4433_v63 = vmax.f32 %v4331_v27, 0.0  ;;  %3404 = vrot.lane.b32.xlu1 %v3309_v17, %s7217_s12  ;;  %v3391_v20 = vpop.permute.xlu0 %3390 }
 0x41c   : > { %3463 = vst.msk [vmem:[#allocation3 + $0x180] sm:$0xff] %vm3438_vm8, %v3391_v20 }
 0x41d   : > { %4465 = vst.msk [vmem:[%s8945_s9 + $0x70] sm:$0xff] %vm2365_vm5, %v4433_v63  ;;  %4497 = vst.msk [vmem:[#allocation2 + $0xa8] sm:$0xff] %vm2365_vm5, %v4433_v63  ;;  %v3928_v51 = vpop.permute.xlu1 %3927  ;;  %3595 = vrot.lane.b32.xlu0 %v3501_v60, %s7218_s14 }
 0x41e   : > { %4021 = vst.msk [vmem:[#allocation3 + $0x30] sm:$0xff] %vm4017_vm11, %v3928_v51 }
 0x41f   : > { %3597 = vrot.lane.b32.xlu1 %v3502_v19, %s7218_s14  ;;  %v3968_v25 = vpop.permute.xlu0 %3967 }
 0x420   : > { %4041 = vst.msk [vmem:[#allocation3 + $0x170] sm:$0xff] %vm4017_vm11, %v3968_v25 }
 0x421   : > { %v2625_v24 = vpop.permute.xlu1 %2624  ;;  %3788 = vrot.lane.b32.xlu0 %v3694_v61, %s7219_s15 }
 0x422   : > { %2694 = vst.msk [vmem:[#allocation3 + $0x1b0] sm:$0xff] %vm2666_vm1, %v2625_v24  ;;  %v4538_v22 = vld [vmem:[#allocation2 + $0xb0] sm:$0xff] }
 0x423   : > { %3790 = vrot.lane.b32.xlu1 %v3695_v34, %s7219_s15  ;;  %v4554_v54 = vmax.f32 %v4522_v26, %v4538_v22  ;;  %v2816_v36 = vpop.permute.xlu0 %2815 }
 0x424   : > { %v4537_v31 = vld [vmem:[#allocation2 + $0xa8] sm:$0xff]  ;;  %2886 = vst.msk [vmem:[#allocation3 + $0x1a0] sm:$0xff] %vm2859_vm2, %v2816_v36 }
 0x425   : > { %v3353_v18 = vpop.permute.xlu1 %3352  ;;  %v4053_v35 = vld [vmem:[#allocation3 + $0x30] sm:$0xff]  ;;  %v4553_v37 = vmax.f32 %v4521_v12, %v4537_v31  ;;  %4570 = vst.msk [vmem:[#allocation2 + $0x50] sm:$0xff] %vm2365_vm5, %v4554_v54  ;;  %3981 = vrot.lane.b32.xlu0 %v3887_v52, %s7220_s23 }
 0x426   : > { %3444 = vst.msk [vmem:[#allocation3 + $0x50] sm:$0xff] %vm3438_vm8, %v3353_v18  ;;  %6918 = vmatmul.mubr.msk.f32.gmra.mxu0 %vm4093_vm12, %v4053_v35 }
 0x427   : > { %3983 = vrot.lane.b32.xlu1 %v3888_v33, %s7220_s23  ;;  %4569 = vst.msk [vmem:[#allocation2 + $0x48] sm:$0xff] %vm2365_vm5, %v4553_v37  ;;  %v3393_v28 = vpop.permute.xlu0 %3392  ;;  %v4073_v30 = vld [vmem:[#allocation3 + $0x170] sm:$0xff] }
 0x428   : > { %3464 = vst.msk [vmem:[#allocation3 + $0x190] sm:$0xff] %vm3438_vm8, %v3393_v28  ;;  %6948 = vmatmul.mubr.msk.f32.gmra.mxu1 %vm4093_vm12, %v4073_v30 }
 0x429   : > { %v3544_v57 = vpop.permute.xlu1 %3543 }
 0x42a   : > { %3636 = vst.msk [vmem:[#allocation3 + $0x40] sm:$0xff] %vm3631_vm9, %v3544_v57 }
 0x42b   : > { %v3584_v45 = vpop.permute.xlu0 %3583 }
 0x42c   : > { %3656 = vst.msk [vmem:[#allocation3 + $0x180] sm:$0xff] %vm3631_vm9, %v3584_v45  ;;  %v9238_v45 = vld [vmem:[#allocation2 + $0x68] sm:$0xff] }
 0x42d   : > { %v2818_v42 = vpop.permute.xlu1 %2817 }
 0x42e   : > { %2887 = vst.msk [vmem:[#allocation3 + $0x1b0] sm:$0xff] %vm2859_vm2, %v2818_v42  ;;  %v9161_v7 = vld [vmem:[#allocation2 + $0x48] ss:$2 sm:$0xff]  ;;  %v9163_v14 = vld [vmem:[#allocation2 + $0x49] ss:$2 sm:$0xff] }
 0x42f   : > { %4626 = vst.msk [vmem:[#allocation2 + $0x48] sm:$0x1] %vm2373_vm4, %v7206_v0  ;;  %4636 = vst.msk [vmem:[#allocation2 + $0x51] sm:$0x1] %vm2373_vm4, %v7206_v0  ;;  %v3009_v55 = vpop.permute.xlu0 %3008 }
 0x430   : > { %3079 = vst.msk [vmem:[#allocation3 + $0x1a0] sm:$0xff] %vm3052_vm6, %v3009_v55 }
 0x431   : > { %v3546_v39 = vpop.permute.xlu1 %3545 }
 0x432   : > { %3637 = vst.msk [vmem:[#allocation3 + $0x50] sm:$0xff] %vm3631_vm9, %v3546_v39 }
 0x433   : > { %v3586_v2 = vpop.permute.xlu0 %3585 }
 0x434   : > { %3657 = vst.msk [vmem:[#allocation3 + $0x190] sm:$0xff] %vm3631_vm9, %v3586_v2 }
 0x435   : > { %v3737_v56 = vpop.permute.xlu1 %3736 }
 0x436   : > { %3829 = vst.msk [vmem:[#allocation3 + $0x40] sm:$0xff] %vm3824_vm10, %v3737_v56 }
 0x437   : > { %v3777_v3 = vpop.permute.xlu0 %3776 }
 0x438   : > { %3849 = vst.msk [vmem:[#allocation3 + $0x180] sm:$0xff] %vm3824_vm10, %v3777_v3  ;;  %v6940_v53 = vpop.f32.mrf.mxu1 }
 0x439   : > { %v3011_v43 = vpop.permute.xlu1 %3010  ;;  %v4346_v4 = vadd.f32 %v6940_v53, %v8933_v59 }
 0x43a   : > { %3080 = vst.msk [vmem:[#allocation3 + $0x1b0] sm:$0xff] %vm3052_vm6, %v3011_v43  ;;  %v4340_v44 = vpop.f32.mrf.mxu1  ;;  %v9246_v43 = vld [vmem:[#allocation2 + $0x60] sm:$0xff] }
 0x43b   : > { %v4436_v46 = vmax.f32 %v4346_v4, 0.0  ;;  %v4341_v10 = vadd.f32 %v8933_v59, %v4340_v44  ;;  %v3202_v1 = vpop.permute.xlu0 %3201 }
 0x43c   : > { %3272 = vst.msk [vmem:[#allocation3 + $0x1a0] sm:$0xff] %vm3245_vm7, %v3202_v1 }
 0x43d   : > { %v3739_v11 = vpop.permute.xlu1 %3738  ;;  %4468 = vst.msk [vmem:[%s8945_s9 + $0x88] sm:$0xff] %vm2365_vm5, %v4436_v46  ;;  %4500 = vst.msk [vmem:[#allocation2 + $0xc8] sm:$0xff] %vm2365_vm5, %v4436_v46  ;;  %v4435_v40 = vmax.f32 %v4341_v10, 0.0  ;;  %v4613_v46 = vmax.f32 %v9161_v7, %v9163_v14 }
 0x43e   : > { %3830 = vst.msk [vmem:[#allocation3 + $0x50] sm:$0xff] %vm3824_vm10, %v3739_v11 }
 0x43f   : > { %4467 = vst.msk [vmem:[%s8945_s9 + $0x80] sm:$0xff] %vm2365_vm5, %v4435_v40  ;;  %4499 = vst.msk [vmem:[#allocation2 + $0xc0] sm:$0xff] %vm2365_vm5, %v4435_v40  ;;  %v3779_v58 = vpop.permute.xlu0 %3778 }
 0x440   : > { %3850 = vst.msk [vmem:[#allocation3 + $0x190] sm:$0xff] %vm3824_vm10, %v3779_v58 }
 0x441   : > { %v3930_v13 = vpop.permute.xlu1 %3929 }
 0x442   : > { %4022 = vst.msk [vmem:[#allocation3 + $0x40] sm:$0xff] %vm4017_vm11, %v3930_v13 }
 0x443   : > { %v3970_v8 = vpop.permute.xlu0 %3969 }
 0x444   : > { %4042 = vst.msk [vmem:[#allocation3 + $0x180] sm:$0xff] %vm4017_vm11, %v3970_v8  ;;  %v9189_v23 = vld [vmem:[#allocation2 + $0xc8] sm:$0xff] }
 0x445   : > { %v2627_v49 = vpop.permute.xlu1 %2626  ;;  %4641 = vst.msk [vmem:[#allocation2 + $0xc9] sm:$0x1] %vm2373_vm4, %v7206_v0 }
 0x446   : > { %2695 = vst.msk [vmem:[#allocation3 + $0x1c0] sm:$0xff] %vm2666_vm1, %v2627_v49  ;;  %v9193_v16 = vld [vmem:[#allocation2 + $0xc0] sm:$0xff] }
 0x447   : > { %v3204_v50 = vpop.permute.xlu0 %3203  ;;  %4631 = vst.msk [vmem:[#allocation2 + $0xc0] sm:$0x1] %vm2373_vm4, %v7206_v0 }
 0x448   : > { %3273 = vst.msk [vmem:[#allocation3 + $0x1b0] sm:$0xff] %vm3245_vm7, %v3204_v50 }
 0x449   : > { %v3395_v6 = vpop.permute.xlu1 %3394  ;;  %v4054_v9 = vld [vmem:[#allocation3 + $0x40] sm:$0xff] }
 0x44a   : > { %3465 = vst.msk [vmem:[#allocation3 + $0x1a0] sm:$0xff] %vm3438_vm8, %v3395_v6  ;;  %6920 = vmatprep.mubr.msk.f32.mxu0 %vm4093_vm12, %v4054_v9 }
 0x44b   : > { %v3932_v48 = vpop.permute.xlu0 %3931  ;;  %v4074_v38 = vld [vmem:[#allocation3 + $0x180] sm:$0xff] }
 0x44c   : > { %4023 = vst.msk [vmem:[#allocation3 + $0x50] sm:$0xff] %vm4017_vm11, %v3932_v48  ;;  %6950 = vmatprep.mubr.msk.f32.mxu1 %vm4093_vm12, %v4074_v38 }
 0x44d   : > { %v3972_v62 = vpop.permute.xlu1 %3971 }
 0x44e   : > { %4043 = vst.msk [vmem:[#allocation3 + $0x190] sm:$0xff] %vm4017_vm11, %v3972_v62 }
 0x44f   : > { %v2629_v27 = vpop.permute.xlu0 %2628 }
 0x450   : > { %2696 = vst.msk [vmem:[#allocation3 + $0x1d0] sm:$0xff] %vm2666_vm1, %v2629_v27 }
 0x451   : > { %v2820_v47 = vpop.permute.xlu1 %2819 }
 0x452   : > { %2888 = vst.msk [vmem:[#allocation3 + $0x1c0] sm:$0xff] %vm2859_vm2, %v2820_v47 }
 0x453   : > { %v3397_v5 = vpop.permute.xlu0 %3396  ;;  %v4055_v15 = vld [vmem:[#allocation3 + $0x50] sm:$0xff] }
 0x454   : > { %3466 = vst.msk [vmem:[#allocation3 + $0x1b0] sm:$0xff] %vm3438_vm8, %v3397_v5  ;;  %6921 = vmatmul.mubr.msk.f32.gmra.mxu0 %vm4093_vm12, %v4055_v15  ;;  %v9291_v5 = vld [vmem:[%s10203_s2 + $0x1] ss:$0 sm:$0xff] }
 0x455   : > { %v3588_v29 = vpop.permute.xlu1 %3587  ;;  %v4075_v21 = vld [vmem:[#allocation3 + $0x190] sm:$0xff] }
 0x456   : > { %3658 = vst.msk [vmem:[#allocation3 + $0x1a0] sm:$0xff] %vm3631_vm9, %v3588_v29  ;;  %6951 = vmatmul.mubr.msk.f32.gmra.mxu1 %vm4093_vm12, %v4075_v21 }
 0x457   : > { %v2822_v63 = vpop.permute.xlu0 %2821 }
 0x458   : > { %2889 = vst.msk [vmem:[#allocation3 + $0x1d0] sm:$0xff] %vm2859_vm2, %v2822_v63 }
 0x459   : > { %v3013_v17 = vpop.permute.xlu1 %3012 }
 0x45a   : > { %3081 = vst.msk [vmem:[#allocation3 + $0x1c0] sm:$0xff] %vm3052_vm6, %v3013_v17 }
 0x45b   : > { %v3590_v19 = vpop.permute.xlu0 %3589 }
 0x45c   : > { %3659 = vst.msk [vmem:[#allocation3 + $0x1b0] sm:$0xff] %vm3631_vm9, %v3590_v19 }
 0x45d   : > { %v3781_v60 = vpop.permute.xlu1 %3780 }
 0x45e   : > { %3851 = vst.msk [vmem:[#allocation3 + $0x1a0] sm:$0xff] %vm3824_vm10, %v3781_v60 }
 0x45f   : > { %v3015_v20 = vpop.permute.xlu0 %3014 }
 0x460   : > { %3082 = vst.msk [vmem:[#allocation3 + $0x1d0] sm:$0xff] %vm3052_vm6, %v3015_v20 }
 0x461   : > { %v3206_v51 = vpop.permute.xlu1 %3205 }
 0x462   : > { %3274 = vst.msk [vmem:[#allocation3 + $0x1c0] sm:$0xff] %vm3245_vm7, %v3206_v51 }
 0x463   : > { %v3783_v34 = vpop.permute.xlu0 %3782 }
 0x464   : > { %3852 = vst.msk [vmem:[#allocation3 + $0x1b0] sm:$0xff] %vm3824_vm10, %v3783_v34 }
 0x465   : > { %v3974_v61 = vpop.permute.xlu1 %3973 }
 0x466   : > { %4044 = vst.msk [vmem:[#allocation3 + $0x1a0] sm:$0xff] %vm4017_vm11, %v3974_v61 }
 0x467   : > { %v2631_v25 = vpop.permute.xlu0 %2630 }
 0x468   : > { %2697 = vst.msk [vmem:[#allocation3 + $0x1e0] sm:$0xff] %vm2666_vm1, %v2631_v25 }
 0x469   : > { %v3208_v24 = vpop.permute.xlu1 %3207 }
 0x46a   : > { %3275 = vst.msk [vmem:[#allocation3 + $0x1d0] sm:$0xff] %vm3245_vm7, %v3208_v24  ;;  %v6943_v26 = vpop.f32.mrf.mxu1 }
 0x46b   : > { %v4356_v22 = vadd.f32 %v6943_v26, %v8933_v59  ;;  %v3399_v31 = vpop.permute.xlu0 %3398 }
 0x46c   : > { %v4350_v52 = vpop.f32.mrf.mxu1  ;;  %3467 = vst.msk [vmem:[#allocation3 + $0x1c0] sm:$0xff] %vm3438_vm8, %v3399_v31 }
 0x46d   : > { %v4438_v54 = vmax.f32 %v4356_v22, 0.0  ;;  %v4351_v33 = vadd.f32 %v8933_v59, %v4350_v52  ;;  %v3976_v12 = vpop.permute.xlu1 %3975  ;;  %v4076_v18 = vld [vmem:[#allocation3 + $0x1a0] sm:$0xff] }
 0x46e   : > { %4045 = vst.msk [vmem:[#allocation3 + $0x1b0] sm:$0xff] %vm4017_vm11, %v3976_v12  ;;  %6953 = vmatprep.mubr.msk.f32.mxu1 %vm4093_vm12, %v4076_v18 }
 0x46f   : > { %4470 = vst.msk [vmem:[%s8945_s9 + $0x98] sm:$0xff] %vm2365_vm5, %v4438_v54  ;;  %4502 = vst.msk [vmem:[#allocation2 + $0xe0] sm:$0xff] %vm2365_vm5, %v4438_v54  ;;  %v4437_v36 = vmax.f32 %v4351_v33, 0.0  ;;  %v2633_v59 = vpop.permute.xlu0 %2632 }
 0x470   : > { %2698 = vst.msk [vmem:[#allocation3 + $0x1f0] sm:$0xff] %vm2666_vm1, %v2633_v59 }
 0x471   : > { %4469 = vst.msk [vmem:[%s8945_s9 + $0x90] sm:$0xff] %vm2365_vm5, %v4437_v36  ;;  %4501 = vst.msk [vmem:[#allocation2 + $0xd8] sm:$0xff] %vm2365_vm5, %v4437_v36  ;;  %v2824_v35 = vpop.permute.xlu1 %2823 }
 0x472   : > { %2890 = vst.msk [vmem:[#allocation3 + $0x1e0] sm:$0xff] %vm2859_vm2, %v2824_v35 }
 0x473   : > { %v3401_v57 = vpop.permute.xlu0 %3400 }
 0x474   : > { %3468 = vst.msk [vmem:[#allocation3 + $0x1d0] sm:$0xff] %vm3438_vm8, %v3401_v57 }
 0x475   : > { %v3592_v37 = vpop.permute.xlu1 %3591  ;;  %v4077_v28 = vld [vmem:[#allocation3 + $0x1b0] sm:$0xff] }
 0x476   : > { %3660 = vst.msk [vmem:[#allocation3 + $0x1c0] sm:$0xff] %vm3631_vm9, %v3592_v37  ;;  %6954 = vmatmul.mubr.msk.f32.gmra.mxu1 %vm4093_vm12, %v4077_v28  ;;  %v4540_v30 = vld [vmem:[#allocation2 + $0xe0] sm:$0xff] }
 0x477   : > { %v4556_v42 = vmax.f32 %v9189_v23, %v4540_v30  ;;  %4622 = vst.msk [vmem:[#allocation2 + $0xe0] sm:$0x3] %vm2368_vm3, %v7206_v0  ;;  %v2826_v56 = vpop.permute.xlu0 %2825 }
 0x478   : > { %v4539_v39 = vld [vmem:[#allocation2 + $0xd8] sm:$0xff]  ;;  %4642 = vst.msk [vmem:[#allocation2 + $0xe1] sm:$0x1] %vm2373_vm4, %v7206_v0 }
 0x479   : > { %v3017_v55 = vpop.permute.xlu1 %3016  ;;  %v4555_v2 = vmax.f32 %v9193_v16, %v4539_v39  ;;  %4572 = vst.msk [vmem:[#allocation2 + $0x68] sm:$0xff] %vm2365_vm5, %v4556_v42  ;;  %4621 = vst.msk [vmem:[#allocation2 + $0xd8] sm:$0xff] %vm2365_vm5, %v7206_v0 }
 0x47a   : > { %3083 = vst.msk [vmem:[#allocation3 + $0x1e0] sm:$0xff] %vm3052_vm6, %v3017_v55 }
 0x47b   : > { %2891 = vst.msk [vmem:[#allocation3 + $0x1f0] sm:$0xff] %vm2859_vm2, %v2826_v56  ;;  %v3594_v53 = vpop.permute.xlu0 %3593 }
 0x47c   : > { %4632 = vst.msk [vmem:[#allocation2 + $0xd8] sm:$0x1] %vm2373_vm4, %v7206_v0 }
 0x47d   : > { %4571 = vst.msk [vmem:[#allocation2 + $0x60] sm:$0xff] %vm2365_vm5, %v4555_v2  ;;  %v3785_v3 = vpop.permute.xlu1 %3784  ;;  %v4536_v2 = vld [vmem:[#allocation2 + $0x80] sm:$0xff] }
 0x47e   : > { %3853 = vst.msk [vmem:[#allocation3 + $0x1c0] sm:$0xff] %vm3824_vm10, %v3785_v3 }
 0x47f   : > { %3661 = vst.msk [vmem:[#allocation3 + $0x1d0] sm:$0xff] %vm3631_vm9, %v3594_v53  ;;  %v3019_v44 = vpop.permute.xlu0 %3018 }
 0x480   : > { %3084 = vst.msk [vmem:[#allocation3 + $0x1f0] sm:$0xff] %vm3052_vm6, %v3019_v44  ;;  %v4535_v44 = vld [vmem:[#allocation2 + $0x78] sm:$0xff] }
 0x481   : > { %v3210_v4 = vpop.permute.xlu1 %3209 }
 0x482   : > { %3276 = vst.msk [vmem:[#allocation3 + $0x1e0] sm:$0xff] %vm3245_vm7, %v3210_v4 }
 0x483   : > { %v3787_v40 = vpop.permute.xlu0 %3786 }
 0x484   : > { %v9259_v10 = vld [vmem:[#allocation2 + $0x60] ss:$2 sm:$0xff]  ;;  %v9261_v11 = vld [vmem:[#allocation2 + $0x61] ss:$2 sm:$0xff]  ;;  %3854 = vst.msk [vmem:[#allocation3 + $0x1d0] sm:$0xff] %vm3824_vm10, %v3787_v40 }
 0x485   : > { %4627 = vst.msk [vmem:[#allocation2 + $0x60] sm:$0x1] %vm2373_vm4, %v7206_v0  ;;  %4637 = vst.msk [vmem:[#allocation2 + $0x69] sm:$0x1] %vm2373_vm4, %v7206_v0  ;;  %v3978_v1 = vpop.permute.xlu1 %3977  ;;  %v4614_v40 = vmax.f32 %v9259_v10, %v9261_v11 }
 0x486   : > { %4646 = vst.msk [vmem:[#allocation2 + $0x61] sm:$0xff] %vm2365_vm5, %v4613_v46 }
 0x487   : > { %4046 = vst.msk [vmem:[#allocation3 + $0x1c0] sm:$0xff] %vm4017_vm11, %v3978_v1  ;;  %v3212_v14 = vpop.permute.xlu0 %3211 }
 0x488   : > { %3277 = vst.msk [vmem:[#allocation3 + $0x1f0] sm:$0xff] %vm3245_vm7, %v3212_v14 }
 0x489   : > { %v3403_v7 = vpop.permute.xlu1 %3402 }
 0x48a   : > { %3469 = vst.msk [vmem:[#allocation3 + $0x1e0] sm:$0xff] %vm3438_vm8, %v3403_v7 }
 0x48b   : > { %v3980_v49 = vpop.permute.xlu0 %3979 }
 0x48c   : > { %4047 = vst.msk [vmem:[#allocation3 + $0x1d0] sm:$0xff] %vm4017_vm11, %v3980_v49 }
 0x48d   : > { %v9272_v13 = vld [vmem:[#allocation2 + $0x60] sm:$0xff]  ;;  %v3405_v58 = vpop.permute.xlu1 %3404 }
 0x48e   : > { %4663 = vst.msk [vmem:[#allocation3 + $0x40] sm:$0xff] %vm2365_vm5, %v9272_v13  ;;  %v4078_v8 = vld [vmem:[#allocation3 + $0x1c0] sm:$0xff] }
 0x48f   : > { %3470 = vst.msk [vmem:[#allocation3 + $0x1f0] sm:$0xff] %vm3438_vm8, %v3405_v58  ;;  %6956 = vmatprep.mubr.msk.f32.mxu1 %vm4093_vm12, %v4078_v8  ;;  %v3596_v23 = vpop.permute.xlu0 %3595 }
 0x490   : > { %3662 = vst.msk [vmem:[#allocation3 + $0x1e0] sm:$0xff] %vm3631_vm9, %v3596_v23 }
 0x491   : > { %v3598_v16 = vpop.permute.xlu1 %3597 }
 0x492   : > { %3663 = vst.msk [vmem:[#allocation3 + $0x1f0] sm:$0xff] %vm3631_vm9, %v3598_v16 }
 0x493   : > { %v3789_v6 = vpop.permute.xlu0 %3788  ;;  %v4079_v9 = vld [vmem:[#allocation3 + $0x1d0] sm:$0xff] }
 0x494   : > { %3855 = vst.msk [vmem:[#allocation3 + $0x1e0] sm:$0xff] %vm3824_vm10, %v3789_v6  ;;  %6957 = vmatmul.mubr.msk.f32.gmra.mxu1 %vm4093_vm12, %v4079_v9 }
 0x495   : > { %v3791_v50 = vpop.permute.xlu1 %3790 }
 0x496   : > { %3856 = vst.msk [vmem:[#allocation3 + $0x1f0] sm:$0xff] %vm3824_vm10, %v3791_v50 }
 0x497   : > { %v3982_v62 = vpop.permute.xlu0 %3981 }
 0x498   : > { %4048 = vst.msk [vmem:[#allocation3 + $0x1e0] sm:$0xff] %vm4017_vm11, %v3982_v62 }
 0x499   : > { %v3984_v48 = vpop.permute.xlu1 %3983 }
 0x49a   : > { %4049 = vst.msk [vmem:[#allocation3 + $0x1f0] sm:$0xff] %vm4017_vm11, %v3984_v48 }
 0x49f   : > { %v4080_v38 = vld [vmem:[#allocation3 + $0x1e0] sm:$0xff] }
 0x4a0   : > { %6959 = vmatprep.mubr.msk.f32.mxu1 %vm4093_vm12, %v4080_v38 }
 0x4a1   : > { %v4081_v47 = vld [vmem:[#allocation3 + $0x1f0] sm:$0xff] }
 0x4a2   : > { %6960 = vmatmul.mubr.msk.f32.gmra.mxu1 %vm4093_vm12, %v4081_v47 }
 0x4a8   : > { %v6916_v27 = vpop.f32.mrf.mxu0 }
 0x4a9   : > { %v4266_v15 = vadd.f32 %v9291_v5, %v6916_v27 }
 0x4aa   : > { %v6946_v29 = vpop.f32.mrf.mxu1  ;;  %v4260_v17 = vpop.f32.mrf.mxu0 }
 0x4ab   : > { %v4366_v21 = vadd.f32 %v9291_v5, %v6946_v29  ;;  %v4420_v60 = vmax.f32 %v4266_v15, 0.0  ;;  %v4261_v51 = vadd.f32 %v9291_v5, %v4260_v17  ;;  %v4552_v15 = vmax.f32 %v9238_v45, %v4536_v2 }
 0x4ac   : > { %v4360_v63 = vpop.f32.mrf.mxu1 }
 0x4ad   : > { %v4440_v19 = vmax.f32 %v4366_v21, 0.0  ;;  %v4361_v20 = vadd.f32 %v9291_v5, %v4360_v63  ;;  %4452 = vst.msk [vmem:[%s8945_s9 + $0x8] sm:$0xff] %vm2365_vm5, %v4420_v60  ;;  %4484 = vst.msk [vmem:[#allocation2 + $0x8] sm:$0xff] %vm2365_vm5, %v4420_v60  ;;  %v4419_v61 = vmax.f32 %v4261_v51, 0.0  ;;  %v4551_v63 = vmax.f32 %v9246_v43, %v4535_v44  ;;  %v9379_v60 = vld [vmem:[#allocation2 + $0x62] sm:$0xff] }
 0x4af   : > { %4472 = vst.msk [vmem:[%s8945_s9 + $0xa8] sm:$0xff] %vm2365_vm5, %v4440_v19  ;;  %4504 = vst.msk [vmem:[#allocation2 + $0xf8] sm:$0xff] %vm2365_vm5, %v4440_v19  ;;  %v4439_v34 = vmax.f32 %v4361_v20, 0.0 }
 0x4b0   : > { %4451 = vst.msk [vmem:[%s8945_s9] sm:$0xff] %vm2365_vm5, %v4419_v61  ;;  %4483 = vst.msk [vmem:[#allocation2] sm:$0xff] %vm2365_vm5, %v4419_v61 }
 0x4b1   : > { %4471 = vst.msk [vmem:[%s8945_s9 + $0xa0] sm:$0xff] %vm2365_vm5, %v4439_v34  ;;  %4503 = vst.msk [vmem:[#allocation2 + $0xf0] sm:$0xff] %vm2365_vm5, %v4439_v34 }
 0x4b4   : > { %v4516_v59 = vld [vmem:[#allocation2 + $0x8] sm:$0xff] }
 0x4b6   : > { %v4526_v39 = vld [vmem:[#allocation2 + $0xf8] sm:$0xff] }
 0x4b7   : > { %v4515_v28 = vld [vmem:[#allocation2] sm:$0xff] }
 0x4b8   : > { %v4525_v3 = vld [vmem:[#allocation2 + $0xf0] sm:$0xff] }
 0x4e6   : > { %v6919_v24 = vpop.f32.mrf.mxu0 }
 0x4e7   : > { %v4276_v25 = vadd.f32 %v9291_v5, %v6919_v24 }
 0x4e8   : > { %v4270_v26 = vpop.f32.mrf.mxu0  ;;  %v6949_v54 = vpop.f32.mrf.mxu1 }
 0x4e9   : > { %v4422_v22 = vmax.f32 %v4276_v25, 0.0  ;;  %v4271_v52 = vadd.f32 %v9291_v5, %v4270_v26  ;;  %v4376_v12 = vadd.f32 %v9291_v5, %v6949_v54 }
 0x4ea   : > { %v4370_v31 = vpop.f32.mrf.mxu1 }
 0x4eb   : > { %4454 = vst.msk [vmem:[%s8945_s9 + $0x18] sm:$0xff] %vm2365_vm5, %v4422_v22  ;;  %4486 = vst.msk [vmem:[#allocation2 + $0x20] sm:$0xff] %vm2365_vm5, %v4422_v22  ;;  %v4421_v33 = vmax.f32 %v4271_v52, 0.0  ;;  %v4442_v18 = vmax.f32 %v4376_v12, 0.0  ;;  %v4371_v36 = vadd.f32 %v9291_v5, %v4370_v31 }
 0x4ed   : > { %4453 = vst.msk [vmem:[%s8945_s9 + $0x10] sm:$0xff] %vm2365_vm5, %v4421_v33  ;;  %4485 = vst.msk [vmem:[#allocation2 + $0x18] sm:$0xff] %vm2365_vm5, %v4421_v33  ;;  %v4441_v35 = vmax.f32 %v4371_v36, 0.0 }
 0x4ee   : > { %4474 = vst.msk [vmem:[%s8945_s9 + $0xb8] sm:$0xff] %vm2365_vm5, %v4442_v18  ;;  %4506 = vst.msk [vmem:[#allocation2 + $0x110] sm:$0xff] %vm2365_vm5, %v4442_v18 }
 0x4ef   : > { %4473 = vst.msk [vmem:[%s8945_s9 + $0xb0] sm:$0xff] %vm2365_vm5, %v4441_v35  ;;  %4505 = vst.msk [vmem:[#allocation2 + $0x108] sm:$0xff] %vm2365_vm5, %v4441_v35 }
 0x4f2   : > { %v4532_v37 = vld [vmem:[#allocation2 + $0x20] sm:$0xff] }
 0x4f3   : > { %v4548_v57 = vmax.f32 %v4516_v59, %v4532_v37 }
 0x4f4   : > { %v4531_v30 = vld [vmem:[#allocation2 + $0x18] sm:$0xff] }
 0x4f5   : > { %v4547_v42 = vmax.f32 %v4515_v28, %v4531_v30  ;;  %4564 = vst.msk [vmem:[#allocation2 + $0x8] sm:$0xff] %vm2365_vm5, %v4548_v57  ;;  %v4542_v55 = vld [vmem:[#allocation2 + $0x110] sm:$0xff] }
 0x4f6   : > { %v4558_v56 = vmax.f32 %v4526_v39, %v4542_v55  ;;  %v4541_v53 = vld [vmem:[#allocation2 + $0x108] sm:$0xff] }
 0x4f7   : > { %4563 = vst.msk [vmem:[#allocation2] sm:$0xff] %vm2365_vm5, %v4547_v42  ;;  %v4557_v4 = vmax.f32 %v4525_v3, %v4541_v53 }
 0x4f8   : > { %4574 = vst.msk [vmem:[#allocation2 + $0x80] sm:$0xff] %vm2365_vm5, %v4558_v56 }
 0x4f9   : > { %4573 = vst.msk [vmem:[#allocation2 + $0x78] sm:$0xff] %vm2365_vm5, %v4557_v4 }
 0x4fe   : > { %v9329_v46 = vld [vmem:[#allocation2] ss:$2 sm:$0xff]  ;;  %v9331_v1 = vld [vmem:[#allocation2 + $0x1] ss:$2 sm:$0xff] }
 0x4ff   : > { %4618 = vst.msk [vmem:[#allocation2] sm:$0xff] %vm2365_vm5, %v7206_v0  ;;  %v4610_v20 = vmax.f32 %v9329_v46, %v9331_v1 }
 0x500   : > { %4619 = vst.msk [vmem:[#allocation2 + $0x8] sm:$0x3] %vm2368_vm3, %v7206_v0  ;;  %v9343_v7 = vld [vmem:[#allocation2 + $0x78] ss:$2 sm:$0xff]  ;;  %v9345_v14 = vld [vmem:[#allocation2 + $0x79] ss:$2 sm:$0xff] }
 0x501   : > { %4623 = vst.msk [vmem:[#allocation2] sm:$0x1] %vm2373_vm4, %v7206_v0  ;;  %4633 = vst.msk [vmem:[#allocation2 + $0x9] sm:$0x1] %vm2373_vm4, %v7206_v0  ;;  %vm5216_vm3 = vcmask 57344   ;;  %v4615_v3 = vmax.f32 %v9343_v7, %v9345_v14 }
 0x502   : > { %4647 = vst.msk [vmem:[#allocation2 + $0x79] sm:$0xff] %vm2365_vm5, %v4614_v40  ;;  %v6669_v7 = vld [vmem:[%s10202_s1 + $0x140] sm:$0xf] }
 0x503   : > { %4628 = vst.msk [vmem:[#allocation2 + $0x78] sm:$0x1] %vm2373_vm4, %v7206_v0  ;;  %4638 = vst.msk [vmem:[#allocation2 + $0x81] sm:$0x1] %vm2373_vm4, %v7206_v0  ;;  %6962 = vmatprep.subr.msk.mxu0 %vm4190_vm0, %v6669_v7 }
 0x504   : > { %5231 = vst.msk [vmem:[#allocation2 + $0x69] sm:$0x1] %vm5216_vm3, %v7206_v0  ;;  %5221 = vst.msk [vmem:[#allocation2 + $0x60] sm:$0x1] %vm5216_vm3, %v7206_v0  ;;  %6963 = vmatpush3.msk.msra.mxu0 %vm4190_vm0, %v6669_v7  ;;  %vm5448_vm0 = vcmask 326912  }
 0x507   : > { %v4667_v58 = vld [vmem:[#allocation2 + $0x1] sm:$0xff] }
 0x508   : > { %4683 = vrot.lane.b32.xlu0 %v4667_v58, %s7210_s13  ;;  %v4715_v49 = vld [vmem:[#allocation2 + $0x2] sm:$0xff] }
 0x509   : > { %v4651_v29 = vld [vmem:[#allocation2] sm:$0xff] }
 0x50a   : > { %v9353_v8 = vld [vmem:[#allocation2 + $0x78] sm:$0xff]  ;;  %4659 = vst.msk [vmem:[#allocation3] sm:$0xff] %vm2365_vm5, %v4651_v29 }
 0x50b   : > { %4664 = vst.msk [vmem:[#allocation3 + $0x50] sm:$0xff] %vm2365_vm5, %v9353_v8  ;;  %v9381_v19 = vld [vmem:[#allocation2 + $0x7a] sm:$0xff] }
 0x50c   : > { %4731 = vrot.lane.b32.xlu0 %v4715_v49, %s7214_s17  ;;  %5232 = vst.msk [vmem:[#allocation2 + $0x81] sm:$0x1] %vm5216_vm3, %v7206_v0  ;;  %5222 = vst.msk [vmem:[#allocation2 + $0x78] sm:$0x1] %vm5216_vm3, %v7206_v0 }
 0x514   : > { %v6922_v10 = vpop.f32.mrf.mxu0 }
 0x515   : > { %v4286_v23 = vadd.f32 %v9291_v5, %v6922_v10  ;;  %v4671_v10 = vld [vmem:[#allocation2 + $0x61] sm:$0xff] }
 0x516   : > { %v6952_v11 = vpop.f32.mrf.mxu1  ;;  %v4280_v6 = vpop.f32.mrf.mxu0 }
 0x517   : > { %v4386_v16 = vadd.f32 %v9291_v5, %v6952_v11  ;;  %v4424_v9 = vmax.f32 %v4286_v23, 0.0  ;;  %v4281_v48 = vadd.f32 %v9291_v5, %v4280_v6  ;;  %v6668_v11 = vld [vmem:[%s10202_s1 + $0x138] sm:$0xff]  ;;  %v6666_v6 = vld [vmem:[%s10202_s1 + $0x128] sm:$0xff] }
 0x518   : > { %v4380_v50 = vpop.f32.mrf.mxu1  ;;  %6964 = vmatprep.subr.mxu0 %v6668_v11 }
 0x519   : > { %v4444_v62 = vmax.f32 %v4386_v16, 0.0  ;;  %v4381_v38 = vadd.f32 %v9291_v5, %v4380_v50  ;;  %4456 = vst.msk [vmem:[%s8945_s9 + $0x28] sm:$0xff] %vm2365_vm5, %v4424_v9  ;;  %4488 = vst.msk [vmem:[#allocation2 + $0x38] sm:$0xff] %vm2365_vm5, %v4424_v9  ;;  %v4423_v47 = vmax.f32 %v4281_v48, 0.0  ;;  %v6667_v16 = vld [vmem:[%s10202_s1 + $0x130] sm:$0xff]  ;;  %6965 = vmatpush3.msra.mxu0 %v6668_v11  ;;  %v6665_v50 = vld [vmem:[%s10202_s1 + $0x120] sm:$0xff] }
 0x51a   : > { %6966 = vmatprep.subr.mxu0 %v6667_v16  ;;  %v4672_v9 = vld [vmem:[#allocation2 + $0x79] sm:$0xff] }
 0x51b   : > { %4476 = vst.msk [vmem:[%s8945_s9 + $0xc8] sm:$0xff] %vm2365_vm5, %v4444_v62  ;;  %4508 = vst.msk [vmem:[#allocation2 + $0x128] sm:$0xff] %vm2365_vm5, %v4444_v62  ;;  %v4443_v27 = vmax.f32 %v4381_v38, 0.0  ;;  %6967 = vmatpush3.msra.mxu0 %v6667_v16 }
 0x51c   : > { %4455 = vst.msk [vmem:[%s8945_s9 + $0x20] sm:$0xff] %vm2365_vm5, %v4423_v47  ;;  %4487 = vst.msk [vmem:[#allocation2 + $0x30] sm:$0xff] %vm2365_vm5, %v4423_v47  ;;  %6968 = vmatprep.subr.mxu0 %v6666_v6 }
 0x51d   : > { %4475 = vst.msk [vmem:[%s8945_s9 + $0xc0] sm:$0xff] %vm2365_vm5, %v4443_v27  ;;  %4507 = vst.msk [vmem:[#allocation2 + $0x120] sm:$0xff] %vm2365_vm5, %v4443_v27  ;;  %6969 = vmatpush3.msra.mxu0 %v6666_v6 }
 0x51e   : > { %6970 = vmatprep.subr.mxu0 %v6665_v50 }
 0x51f   : > { %6971 = vmatpush3.msra.mxu0 %v6665_v50 }
 0x520   : > { %v4518_v21 = vld [vmem:[#allocation2 + $0x38] sm:$0xff] }
 0x521   : > { %v4550_v17 = vmax.f32 %v4518_v21, %v9145_v32  ;;  %4568 = vst.msk [vmem:[#allocation2 + $0x38] sm:$0xff] %vm2365_vm5, %v4552_v15 }
 0x522   : > { %v4528_v30 = vld [vmem:[#allocation2 + $0x128] sm:$0xff] }
 0x523   : > { %v4517_v51 = vld [vmem:[#allocation2 + $0x30] sm:$0xff]  ;;  %4566 = vst.msk [vmem:[#allocation2 + $0x20] sm:$0xff] %vm2365_vm5, %v4550_v17 }
 0x524   : > { %v4549_v32 = vmax.f32 %v4517_v51, %v9151_v41  ;;  %4567 = vst.msk [vmem:[#allocation2 + $0x30] sm:$0xff] %vm2365_vm5, %v4551_v63  ;;  %v4527_v55 = vld [vmem:[#allocation2 + $0x120] sm:$0xff] }
 0x526   : > { %4565 = vst.msk [vmem:[#allocation2 + $0x18] sm:$0xff] %vm2365_vm5, %v4549_v32 }
 0x52b   : > { %v4583_v45 = vld [vmem:[#allocation2 + $0x30] ss:$2 sm:$0xff]  ;;  %v4599_v43 = vld [vmem:[#allocation2 + $0x31] ss:$2 sm:$0xff] }
 0x52c   : > { %v4612_v61 = vmax.f32 %v4583_v45, %v4599_v43  ;;  %4625 = vst.msk [vmem:[#allocation2 + $0x30] sm:$0x1] %vm2373_vm4, %v7206_v0  ;;  %4635 = vst.msk [vmem:[#allocation2 + $0x39] sm:$0x1] %vm2373_vm4, %v7206_v0 }
 0x52d   : > { %v4581_v34 = vld [vmem:[#allocation2 + $0x18] ss:$2 sm:$0xff]  ;;  %v4597_v41 = vld [vmem:[#allocation2 + $0x19] ss:$2 sm:$0xff] }
 0x52e   : > { %4643 = vst.msk [vmem:[#allocation2 + $0x19] sm:$0xff] %vm2365_vm5, %v4610_v20  ;;  %v4611_v24 = vmax.f32 %v4581_v34, %v4597_v41  ;;  %4645 = vst.msk [vmem:[#allocation2 + $0x49] sm:$0xff] %vm2365_vm5, %v4612_v61 }
 0x52f   : > { %4624 = vst.msk [vmem:[#allocation2 + $0x18] sm:$0x1] %vm2373_vm4, %v7206_v0  ;;  %4634 = vst.msk [vmem:[#allocation2 + $0x21] sm:$0x1] %vm2373_vm4, %v7206_v0 }
 0x530   : > { %4644 = vst.msk [vmem:[#allocation2 + $0x31] sm:$0xff] %vm2365_vm5, %v4611_v24 }
 0x535   : > { %v4668_v26 = vld [vmem:[#allocation2 + $0x19] sm:$0xff]  ;;  %v9411_v33 = vld [vmem:[#allocation2 + $0x4a] sm:$0xff] }
 0x536   : > { %v6955_v25 = vpop.f32.mrf.mxu1  ;;  %v4763_v22 = vld [vmem:[#allocation2 + $0x18] sm:$0xff]  ;;  %4685 = vrot.lane.b32.xlu1 %v4668_v26, %s7210_s13  ;;  %v4908_v12 = vld [vmem:[#allocation2 + $0x48] sm:$0xff]  ;;  %5230 = vst.msk [vmem:[#allocation2 + $0x51] sm:$0x1] %vm5216_vm3, %v7206_v0 }
 0x537   : > { %v4716_v52 = vld [vmem:[#allocation2 + $0x1a] sm:$0xff]  ;;  %v4396_v54 = vadd.f32 %v9291_v5, %v6955_v25  ;;  %4779 = vrot.lane.b32.xlu0 %v4763_v22, %s7215_s10  ;;  %4660 = vst.msk [vmem:[#allocation3 + $0x10] sm:$0xff] %vm2365_vm5, %v4763_v22  ;;  %v4764_v18 = vld [vmem:[#allocation2 + $0x30] sm:$0xff]  ;;  %4662 = vst.msk [vmem:[#allocation3 + $0x30] sm:$0xff] %vm2365_vm5, %v4908_v12 }
 0x538   : > { %5228 = vst.msk [vmem:[#allocation2 + $0x21] sm:$0x1] %vm5216_vm3, %v7206_v0  ;;  %5218 = vst.msk [vmem:[#allocation2 + $0x18] sm:$0x1] %vm5216_vm3, %v7206_v0  ;;  %v4390_v31 = vpop.f32.mrf.mxu1  ;;  %v9418_v36 = vld [vmem:[#allocation2 + $0x32] sm:$0xff]  ;;  %v4670_v28 = vld [vmem:[#allocation2 + $0x49] sm:$0xff] }
 0x539   : > { %5220 = vst.msk [vmem:[#allocation2 + $0x48] sm:$0x1] %vm5216_vm3, %v7206_v0  ;;  %v4446_v35 = vmax.f32 %v4396_v54, 0.0  ;;  %v4391_v59 = vadd.f32 %v9291_v5, %v4390_v31  ;;  %5229 = vst.msk [vmem:[#allocation2 + $0x39] sm:$0x1] %vm5216_vm3, %v7206_v0  ;;  %v4812_v57 = vld [vmem:[#allocation2 + $0x31] sm:$0xff] }
 0x53a   : > { %4661 = vst.msk [vmem:[#allocation3 + $0x20] sm:$0xff] %vm2365_vm5, %v4764_v18  ;;  %4733 = vrot.lane.b32.xlu1 %v4716_v52, %s7214_s17  ;;  %v4962_v54 = vld [vmem:[#allocation2 + $0xd9] sm:$0xff] }
 0x53b   : > { %5219 = vst.msk [vmem:[#allocation2 + $0x30] sm:$0x1] %vm5216_vm3, %v7206_v0  ;;  %v4445_v37 = vmax.f32 %v4391_v59, 0.0  ;;  %4827 = vrot.lane.b32.xlu0 %v4668_v26, %s7216_s11  ;;  %v5010_v31 = vld [vmem:[#allocation2 + $0xda] sm:$0xff] }
 0x53c   : > { %4478 = vst.msk [vmem:[%s8945_s9 + $0xd8] sm:$0xff] %vm2365_vm5, %v4446_v35  ;;  %4510 = vst.msk [vmem:[#allocation2 + $0x140] sm:$0xff] %vm2365_vm5, %v4446_v35 }
 0x53d   : > { %4477 = vst.msk [vmem:[%s8945_s9 + $0xd0] sm:$0xff] %vm2365_vm5, %v4445_v37  ;;  %4509 = vst.msk [vmem:[#allocation2 + $0x138] sm:$0xff] %vm2365_vm5, %v4445_v37 }
 0x53e   : > { %4781 = vrot.lane.b32.xlu1 %v4764_v18, %s7215_s10 }
 0x53f   : > { %4829 = vrot.lane.b32.xlu0 %v4812_v57, %s7216_s11 }
 0x542   : > { %4687 = vrot.lane.b32.xlu1 %v4812_v57, %s7210_s13 }
 0x543   : > { %v4544_v42 = vld [vmem:[#allocation2 + $0x140] sm:$0xff]  ;;  %4689 = vrot.lane.b32.xlu0 %v4670_v28, %s7210_s13 }
 0x544   : > { %v4560_v39 = vmax.f32 %v4528_v30, %v4544_v42  ;;  %v4543_v56 = vld [vmem:[#allocation2 + $0x138] sm:$0xff] }
 0x545   : > { %v4559_v2 = vmax.f32 %v4527_v55, %v4543_v56 }
 0x546   : > { %4576 = vst.msk [vmem:[#allocation2 + $0x98] sm:$0xff] %vm2365_vm5, %v4560_v39  ;;  %4875 = vrot.lane.b32.xlu1 %v4716_v52, %s7217_s12 }
 0x547   : > { %4877 = vrot.lane.b32.xlu0 %v9418_v36, %s7217_s12  ;;  %4575 = vst.msk [vmem:[#allocation2 + $0x90] sm:$0xff] %vm2365_vm5, %v4559_v2 }
 0x54a   : > { %4735 = vrot.lane.b32.xlu1 %v9418_v36, %s7214_s17 }
 0x54b   : > { %4737 = vrot.lane.b32.xlu0 %v9411_v33, %s7214_s17 }
 0x54e   : > { %v9454_v53 = vld [vmem:[#allocation2 + $0x90] ss:$2 sm:$0xff]  ;;  %v9456_v4 = vld [vmem:[#allocation2 + $0x91] ss:$2 sm:$0xff]  ;;  %4923 = vrot.lane.b32.xlu1 %v4764_v18, %s7218_s14 }
 0x54f   : > { %4925 = vrot.lane.b32.xlu0 %v4908_v12, %s7218_s14  ;;  %4629 = vst.msk [vmem:[#allocation2 + $0x90] sm:$0x1] %vm2373_vm4, %v7206_v0  ;;  %4639 = vst.msk [vmem:[#allocation2 + $0x99] sm:$0x1] %vm2373_vm4, %v7206_v0  ;;  %v4616_v32 = vmax.f32 %v9454_v53, %v9456_v4 }
 0x550   : > { %4648 = vst.msk [vmem:[#allocation2 + $0x91] sm:$0xff] %vm2365_vm5, %v4615_v3 }
 0x552   : > { %4783 = vrot.lane.b32.xlu1 %v4908_v12, %s7215_s10 }
 0x553   : > { %4785 = vrot.lane.b32.xlu0 %v9272_v13, %s7215_s10 }
 0x554   : > { %v6958_v44 = vpop.f32.mrf.mxu1 }
 0x555   : > { %v4406_v40 = vadd.f32 %v9291_v5, %v6958_v44 }
 0x556   : > { %4971 = vrot.lane.b32.xlu1 %v4812_v57, %s7219_s15  ;;  %v4400_v14 = vpop.f32.mrf.mxu1 }
 0x557   : > { %v9468_v46 = vld [vmem:[#allocation2 + $0x90] sm:$0xff]  ;;  %4973 = vrot.lane.b32.xlu0 %v4670_v28, %s7219_s15  ;;  %v4448_v58 = vmax.f32 %v4406_v40, 0.0  ;;  %v4401_v49 = vadd.f32 %v9291_v5, %v4400_v14 }
 0x558   : > { %v9470_v1 = vld [vmem:[#allocation2 + $0x92] sm:$0xff]  ;;  %4665 = vst.msk [vmem:[#allocation3 + $0x60] sm:$0xff] %vm2365_vm5, %v9468_v46 }
 0x559   : > { %5233 = vst.msk [vmem:[#allocation2 + $0x99] sm:$0x1] %vm5216_vm3, %v7206_v0  ;;  %5223 = vst.msk [vmem:[#allocation2 + $0x90] sm:$0x1] %vm5216_vm3, %v7206_v0  ;;  %v4447_v23 = vmax.f32 %v4401_v49, 0.0  ;;  %v4673_v45 = vld [vmem:[#allocation2 + $0x91] sm:$0xff] }
 0x55a   : > { %4480 = vst.msk [vmem:[%s8945_s9 + $0xe8] sm:$0xff] %vm2365_vm5, %v4448_v58  ;;  %4512 = vst.msk [vmem:[#allocation2 + $0x158] sm:$0xff] %vm2365_vm5, %v4448_v58  ;;  %4831 = vrot.lane.b32.xlu1 %v4670_v28, %s7216_s11 }
 0x55b   : > { %4691 = vrot.lane.b32.xlu0 %v4671_v10, %s7210_s13  ;;  %4479 = vst.msk [vmem:[%s8945_s9 + $0xe0] sm:$0xff] %vm2365_vm5, %v4447_v23  ;;  %4511 = vst.msk [vmem:[#allocation2 + $0x150] sm:$0xff] %vm2365_vm5, %v4447_v23 }
 0x55e   : > { %5019 = vrot.lane.b32.xlu1 %v9418_v36, %s7220_s23 }
 0x55f   : > { %4879 = vrot.lane.b32.xlu0 %v9411_v33, %s7217_s12 }
 0x562   : > { %v6961_v62 = vpop.f32.mrf.mxu1  ;;  %4833 = vrot.lane.b32.xlu1 %v4671_v10, %s7216_s11  ;;  %v4529_v17 = vld [vmem:[#allocation2 + $0x150] sm:$0xff] }
 0x563   : > { %4693 = vrot.lane.b32.xlu0 %v4672_v9, %s7210_s13  ;;  %v4416_v48 = vadd.f32 %v9291_v5, %v6961_v62 }
 0x564   : > { %v4410_v38 = vpop.f32.mrf.mxu1 }
 0x565   : > { %v4450_v47 = vmax.f32 %v4416_v48, 0.0  ;;  %v4411_v27 = vadd.f32 %v9291_v5, %v4410_v38  ;;  %v4530_v5 = vld [vmem:[#allocation2 + $0x158] sm:$0xff] }
 0x566   : > { %5021 = vrot.lane.b32.xlu1 %v9411_v33, %s7220_s23 }
 0x567   : > { %4881 = vrot.lane.b32.xlu0 %v9379_v60, %s7217_s12  ;;  %4482 = vst.msk [vmem:[%s8945_s9 + $0xf8] sm:$0xff] %vm2365_vm5, %v4450_v47  ;;  %4514 = vst.msk [vmem:[#allocation2 + $0x170] sm:$0xff] %vm2365_vm5, %v4450_v47  ;;  %v4449_v29 = vmax.f32 %v4411_v27, 0.0 }
 0x569   : > { %4481 = vst.msk [vmem:[%s8945_s9 + $0xf0] sm:$0xff] %vm2365_vm5, %v4449_v29  ;;  %4513 = vst.msk [vmem:[#allocation2 + $0x168] sm:$0xff] %vm2365_vm5, %v4449_v29 }
 0x56a   : > { %4739 = vrot.lane.b32.xlu1 %v9379_v60, %s7214_s17 }
 0x56b   : > { %4741 = vrot.lane.b32.xlu0 %v9381_v19, %s7214_s17 }
 0x56e   : > { %4927 = vrot.lane.b32.xlu1 %v9272_v13, %s7218_s14  ;;  %v4546_v15 = vld [vmem:[#allocation2 + $0x170] sm:$0xff] }
 0x56f   : > { %4929 = vrot.lane.b32.xlu0 %v9353_v8, %s7218_s14  ;;  %v4562_v21 = vmax.f32 %v4530_v5, %v4546_v15 }
 0x570   : > { %v4545_v63 = vld [vmem:[#allocation2 + $0x168] sm:$0xff] }
 0x571   : > { %v4561_v51 = vmax.f32 %v4529_v17, %v4545_v63  ;;  %4578 = vst.msk [vmem:[#allocation2 + $0xb0] sm:$0xff] %vm2365_vm5, %v4562_v21 }
 0x572   : > { %4787 = vrot.lane.b32.xlu1 %v9353_v8, %s7215_s10 }
 0x573   : > { %4789 = vrot.lane.b32.xlu0 %v9468_v46, %s7215_s10  ;;  %4577 = vst.msk [vmem:[#allocation2 + $0xa8] sm:$0xff] %vm2365_vm5, %v4561_v51 }
 0x576   : > { %4975 = vrot.lane.b32.xlu1 %v4671_v10, %s7219_s15 }
 0x577   : > { %4977 = vrot.lane.b32.xlu0 %v4672_v9, %s7219_s15 }
 0x57a   : > { %v4684_v13 = vpop.permute.xlu0 %4683  ;;  %4835 = vrot.lane.b32.xlu1 %v4672_v9, %s7216_s11  ;;  %v4593_v43 = vld [vmem:[#allocation2 + $0xa8] ss:$2 sm:$0xff]  ;;  %v4609_v20 = vld [vmem:[#allocation2 + $0xa9] ss:$2 sm:$0xff] }
 0x57b   : > { %4707 = vst.msk [vmem:[#allocation3] sm:$0xff] %vm2666_vm1, %v4684_v13  ;;  %4695 = vrot.lane.b32.xlu0 %v4673_v45, %s7210_s13  ;;  %v4617_v8 = vmax.f32 %v4593_v43, %v4609_v20 }
 0x57c   : > { %4649 = vst.msk [vmem:[#allocation2 + $0xa9] sm:$0xff] %vm2365_vm5, %v4616_v32 }
 0x57d   : > { %4630 = vst.msk [vmem:[#allocation2 + $0xa8] sm:$0x1] %vm2373_vm4, %v7206_v0  ;;  %4640 = vst.msk [vmem:[#allocation2 + $0xb1] sm:$0x1] %vm2373_vm4, %v7206_v0  ;;  %vm5210_vm4 = vcmask 64512  }
 0x57e   : > { %v4732_v61 = vpop.permute.xlu0 %4731  ;;  %4650 = vst.msk [vmem:[#allocation2 + $0xc1] sm:$0xff] %vm2365_vm5, %v4617_v8  ;;  %5023 = vrot.lane.b32.xlu1 %v9379_v60, %s7220_s23 }
 0x57f   : > { %4755 = vst.msk [vmem:[#allocation3] sm:$0xff] %vm2859_vm2, %v4732_v61  ;;  %4883 = vrot.lane.b32.xlu0 %v9381_v19, %s7217_s12 }
 0x580   : > { %5211 = vst.msk [vmem:[#allocation2] sm:$0xff] %vm5210_vm4, %v7206_v0 }
 0x581   : > { %5217 = vst.msk [vmem:[#allocation2] sm:$0x1] %vm5216_vm3, %v7206_v0 }
 0x582   : > { %4837 = vrot.lane.b32.xlu1 %v4673_v45, %s7216_s11 }
 0x583   : > { %v4674_v34 = vld [vmem:[#allocation2 + $0xa9] sm:$0xff] }
 0x584   : > { %v4722_v41 = vld [vmem:[#allocation2 + $0xaa] sm:$0xff]  ;;  %4697 = vrot.lane.b32.xlu0 %v4674_v34, %s7210_s13  ;;  %s7224_s13 = smov 64  }
 0x585   : > { %v4912_v24 = vld [vmem:[#allocation2 + $0xa8] sm:$0xff]  ;;  %5234 = vst.msk [vmem:[#allocation2 + $0xb1] sm:$0x1] %vm5216_vm3, %v7206_v0  ;;  %v4770_v25 = vld [vmem:[#allocation2 + $0xc0] sm:$0xff] }
 0x586   : > { %4666 = vst.msk [vmem:[#allocation3 + $0x70] sm:$0xff] %vm2365_vm5, %v4912_v24  ;;  %v4866_v26 = vld [vmem:[#allocation2 + $0xc2] sm:$0xff]  ;;  %5025 = vrot.lane.b32.xlu1 %v9381_v19, %s7220_s23  ;;  %v4914_v19 = vld [vmem:[#allocation2 + $0xd8] sm:$0xff]  ;;  %vm5212_vm5 = vcmask 58368  }
 0x587   : > { %5224 = vst.msk [vmem:[#allocation2 + $0xa8] sm:$0x1] %vm5216_vm3, %v7206_v0  ;;  %5225 = vst.msk [vmem:[#allocation2 + $0xc0] sm:$0x1] %vm5216_vm3, %v7206_v0  ;;  %v4818_v60 = vld [vmem:[#allocation2 + $0xc1] sm:$0xff] }
 0x588   : > { %5235 = vst.msk [vmem:[#allocation2 + $0xc9] sm:$0x1] %vm5216_vm3, %v7206_v0  ;;  %4885 = vrot.lane.b32.xlu0 %v9470_v1, %s7217_s12 }
 0x589   : > { %5213 = vst.msk [vmem:[#allocation2 + $0x8] sm:$0x3] %vm5212_vm5, %v7206_v0  ;;  %5215 = vst.msk [vmem:[#allocation2 + $0xe0] sm:$0x3] %vm5212_vm5, %v7206_v0  ;;  %vm6195_vm5 = vcmask 261248  }
 0x58a   : > { %4743 = vrot.lane.b32.xlu1 %v9470_v1, %s7214_s17  ;;  %5214 = vst.msk [vmem:[#allocation2 + $0xd8] sm:$0xff] %vm5210_vm4, %v7206_v0 }
 0x58b   : > { %5227 = vst.msk [vmem:[#allocation2 + $0x9] sm:$0x1] %vm5216_vm3, %v7206_v0  ;;  %5226 = vst.msk [vmem:[#allocation2 + $0xd8] sm:$0x1] %vm5216_vm3, %v7206_v0 }
 0x58c   : > { %4745 = vrot.lane.b32.xlu0 %v4722_v41, %s7214_s17  ;;  %5236 = vst.msk [vmem:[#allocation2 + $0xe1] sm:$0x1] %vm5216_vm3, %v7206_v0 }
 0x58e   : > { %4931 = vrot.lane.b32.xlu1 %v9468_v46, %s7218_s14 }
 0x590   : > { %4933 = vrot.lane.b32.xlu0 %v4912_v24, %s7218_s14 }
 0x592   : > { %4791 = vrot.lane.b32.xlu1 %v4912_v24, %s7215_s10 }
 0x594   : > { %4793 = vrot.lane.b32.xlu0 %v4770_v25, %s7215_s10 }
 0x596   : > { %4979 = vrot.lane.b32.xlu1 %v4673_v45, %s7219_s15 }
 0x598   : > { %4981 = vrot.lane.b32.xlu0 %v4674_v34, %s7219_s15 }
 0x59a   : > { %4839 = vrot.lane.b32.xlu1 %v4674_v34, %s7216_s11 }
 0x59c   : > { %4841 = vrot.lane.b32.xlu0 %v4818_v60, %s7216_s11 }
 0x59e   : > { %5027 = vrot.lane.b32.xlu1 %v9470_v1, %s7220_s23 }
 0x5a0   : > { %5029 = vrot.lane.b32.xlu0 %v4722_v41, %s7220_s23 }
 0x5a2   : > { %4887 = vrot.lane.b32.xlu1 %v4722_v41, %s7217_s12 }
 0x5a4   : > { %4935 = vrot.lane.b32.xlu0 %v4770_v25, %s7218_s14 }
 0x5a6   : > { %4889 = vrot.lane.b32.xlu1 %v4866_v26, %s7217_s12  ;;  %s7221_s12 = smov 40  }
 0x5a8   : > { %4983 = vrot.lane.b32.xlu0 %v4818_v60, %s7219_s15  ;;  %v4686_v22 = vpop.permute.xlu1 %4685 }
 0x5a9   : > { %v4780_v52 = vpop.permute.xlu0 %4779  ;;  %4708 = vst.msk [vmem:[#allocation3 + $0x10] sm:$0xff] %vm2666_vm1, %v4686_v22 }
 0x5aa   : > { %4803 = vst.msk [vmem:[#allocation3] sm:$0xff] %vm3052_vm6, %v4780_v52  ;;  %4937 = vrot.lane.b32.xlu1 %v4914_v19, %s7218_s14 }
 0x5ac   : > { %5031 = vrot.lane.b32.xlu0 %v4866_v26, %s7220_s23  ;;  %v4734_v33 = vpop.permute.xlu1 %4733 }
 0x5ad   : > { %v4828_v12 = vpop.permute.xlu0 %4827  ;;  %4756 = vst.msk [vmem:[#allocation3 + $0x10] sm:$0xff] %vm2859_vm2, %v4734_v33 }
 0x5ae   : > { %4851 = vst.msk [vmem:[#allocation3] sm:$0xff] %vm3245_vm7, %v4828_v12  ;;  %4985 = vrot.lane.b32.xlu1 %v4962_v54, %s7219_s15  ;;  %s7222_s15 = smov 48  }
 0x5b0   : > { %v4782_v36 = vpop.permute.xlu1 %4781 }
 0x5b1   : > { %v4830_v18 = vpop.permute.xlu0 %4829  ;;  %4804 = vst.msk [vmem:[#allocation3 + $0x10] sm:$0xff] %vm3052_vm6, %v4782_v36 }
 0x5b2   : > { %4852 = vst.msk [vmem:[#allocation3 + $0x10] sm:$0xff] %vm3245_vm7, %v4830_v18  ;;  %5033 = vrot.lane.b32.xlu1 %v5010_v31, %s7220_s23 }
 0x5b4   : > { %v4688_v59 = vpop.permute.xlu1 %4687 }
 0x5b5   : > { %v4690_v35 = vpop.permute.xlu0 %4689  ;;  %4709 = vst.msk [vmem:[#allocation3 + $0x20] sm:$0xff] %vm2666_vm1, %v4688_v59  ;;  %v5310_v59 = vld [vmem:[#allocation2 + $0x2] sm:$0xff] }
 0x5b6   : > { %4710 = vst.msk [vmem:[#allocation3 + $0x30] sm:$0xff] %vm2666_vm1, %v4690_v35  ;;  %v5261_v35 = vld [vmem:[#allocation2 + $0x1] sm:$0xff] }
 0x5b7   : > { %5277 = vrot.lane.b32.xlu0 %v5261_v35, %s7214_s17 }
 0x5b8   : > { %v4876_v57 = vpop.permute.xlu1 %4875 }
 0x5b9   : > { %v4878_v37 = vpop.permute.xlu0 %4877  ;;  %4899 = vst.msk [vmem:[#allocation3] sm:$0xff] %vm3438_vm8, %v4876_v57  ;;  %v5245_v57 = vld [vmem:[#allocation2] sm:$0xff] }
 0x5ba   : > { %4900 = vst.msk [vmem:[#allocation3 + $0x10] sm:$0xff] %vm3438_vm8, %v4878_v37 }
 0x5bb   : > { %5326 = vrot.lane.b32.xlu0 %v5310_v59, %s7216_s11 }
 0x5bc   : > { %v4736_v30 = vpop.permute.xlu1 %4735 }
 0x5bd   : > { %v4738_v28 = vpop.permute.xlu0 %4737  ;;  %4757 = vst.msk [vmem:[#allocation3 + $0x20] sm:$0xff] %vm2859_vm2, %v4736_v30  ;;  %v9686_v30 = vld [vmem:[%s10203_s2 + $0x2] ss:$0 sm:$0xff] }
 0x5be   : > { %4758 = vst.msk [vmem:[#allocation3 + $0x30] sm:$0xff] %vm2859_vm2, %v4738_v28 }
 0x5c0   : > { %v4924_v39 = vpop.permute.xlu1 %4923 }
 0x5c1   : > { %v4926_v42 = vpop.permute.xlu0 %4925  ;;  %4947 = vst.msk [vmem:[#allocation3] sm:$0xff] %vm3631_vm9, %v4924_v39 }
 0x5c2   : > { %4948 = vst.msk [vmem:[#allocation3 + $0x10] sm:$0xff] %vm3631_vm9, %v4926_v42 }
 0x5c4   : > { %v4784_v56 = vpop.permute.xlu1 %4783 }
 0x5c5   : > { %v4786_v55 = vpop.permute.xlu0 %4785  ;;  %4805 = vst.msk [vmem:[#allocation3 + $0x20] sm:$0xff] %vm3052_vm6, %v4784_v56 }
 0x5c6   : > { %4806 = vst.msk [vmem:[#allocation3 + $0x30] sm:$0xff] %vm3052_vm6, %v4786_v55 }
 0x5c8   : > { %v4972_v3 = vpop.permute.xlu1 %4971 }
 0x5c9   : > { %v4974_v2 = vpop.permute.xlu0 %4973  ;;  %4995 = vst.msk [vmem:[#allocation3] sm:$0xff] %vm3824_vm10, %v4972_v3 }
 0x5ca   : > { %4996 = vst.msk [vmem:[#allocation3 + $0x10] sm:$0xff] %vm3824_vm10, %v4974_v2 }
 0x5cc   : > { %v4832_v4 = vpop.permute.xlu1 %4831 }
 0x5cd   : > { %v4692_v53 = vpop.permute.xlu0 %4691  ;;  %4853 = vst.msk [vmem:[#allocation3 + $0x20] sm:$0xff] %vm3245_vm7, %v4832_v4 }
 0x5ce   : > { %4711 = vst.msk [vmem:[#allocation3 + $0x40] sm:$0xff] %vm2666_vm1, %v4692_v53 }
 0x5d0   : > { %v5020_v46 = vpop.permute.xlu1 %5019 }
 0x5d1   : > { %v4880_v44 = vpop.permute.xlu0 %4879  ;;  %5043 = vst.msk [vmem:[#allocation3] sm:$0xff] %vm4017_vm11, %v5020_v46 }
 0x5d2   : > { %4901 = vst.msk [vmem:[#allocation3 + $0x20] sm:$0xff] %vm3438_vm8, %v4880_v44 }
 0x5d4   : > { %v4834_v40 = vpop.permute.xlu1 %4833 }
 0x5d5   : > { %v4694_v1 = vpop.permute.xlu0 %4693  ;;  %4854 = vst.msk [vmem:[#allocation3 + $0x30] sm:$0xff] %vm3245_vm7, %v4834_v40 }
 0x5d6   : > { %4712 = vst.msk [vmem:[#allocation3 + $0x50] sm:$0xff] %vm2666_vm1, %v4694_v1 }
 0x5d8   : > { %v5022_v14 = vpop.permute.xlu1 %5021  ;;  %v5051_v58 = vld [vmem:[#allocation3] sm:$0xff] }
 0x5d9   : > { %v4882_v7 = vpop.permute.xlu0 %4881  ;;  %5044 = vst.msk [vmem:[#allocation3 + $0x10] sm:$0xff] %vm4017_vm11, %v5022_v14  ;;  %6972 = vmatprep.mubr.msk.f32.mxu0 %vm4093_vm12, %v5051_v58 }
 0x5da   : > { %4902 = vst.msk [vmem:[#allocation3 + $0x30] sm:$0xff] %vm3438_vm8, %v4882_v7 }
 0x5db   : > { %5253 = vst.msk [vmem:[#allocation3] sm:$0xff] %vm5210_vm4, %v5245_v57 }
 0x5dc   : > { %v4740_v10 = vpop.permute.xlu1 %4739 }
 0x5dd   : > { %v4742_v49 = vpop.permute.xlu0 %4741  ;;  %4759 = vst.msk [vmem:[#allocation3 + $0x40] sm:$0xff] %vm2859_vm2, %v4740_v10 }
 0x5de   : > { %4760 = vst.msk [vmem:[#allocation3 + $0x50] sm:$0xff] %vm2859_vm2, %v4742_v49 }
 0x5e0   : > { %v4928_v23 = vpop.permute.xlu1 %4927  ;;  %v5052_v16 = vld [vmem:[#allocation3 + $0x10] sm:$0xff] }
 0x5e1   : > { %v4930_v11 = vpop.permute.xlu0 %4929  ;;  %4949 = vst.msk [vmem:[#allocation3 + $0x20] sm:$0xff] %vm3631_vm9, %v4928_v23  ;;  %6973 = vmatmul.mubr.msk.f32.vlgmr.msra.gmra.mxu0 %vm4093_vm12, %v5052_v16  ;;  %v6688_v16 = vld [vmem:[%s10202_s1 + $0x1f0] sm:$0xff] }
 0x5e2   : > { %4950 = vst.msk [vmem:[#allocation3 + $0x30] sm:$0xff] %vm3631_vm9, %v4930_v11  ;;  %6984 = vmatprep.subr.mxu1 %v6688_v16 }
 0x5e3   : > { %6985 = vmatpush3.msra.mxu1 %v6688_v16 }
 0x5e4   : > { %v4788_v50 = vpop.permute.xlu1 %4787 }
 0x5e5   : > { %v4790_v6 = vpop.permute.xlu0 %4789  ;;  %4807 = vst.msk [vmem:[#allocation3 + $0x40] sm:$0xff] %vm3052_vm6, %v4788_v50 }
 0x5e6   : > { %4808 = vst.msk [vmem:[#allocation3 + $0x50] sm:$0xff] %vm3052_vm6, %v4790_v6 }
 0x5e8   : > { %v4976_v62 = vpop.permute.xlu1 %4975 }
 0x5e9   : > { %v4978_v9 = vpop.permute.xlu0 %4977  ;;  %4997 = vst.msk [vmem:[#allocation3 + $0x20] sm:$0xff] %vm3824_vm10, %v4976_v62  ;;  %v6687_v62 = vld [vmem:[%s10202_s1 + $0x1e8] sm:$0xff] }
 0x5ea   : > { %4998 = vst.msk [vmem:[#allocation3 + $0x30] sm:$0xff] %vm3824_vm10, %v4978_v9  ;;  %6986 = vmatprep.subr.mxu1 %v6687_v62 }
 0x5eb   : > { %6987 = vmatpush3.msra.mxu1 %v6687_v62 }
 0x5ec   : > { %v4836_v38 = vpop.permute.xlu1 %4835 }
 0x5ed   : > { %v4696_v48 = vpop.permute.xlu0 %4695  ;;  %4855 = vst.msk [vmem:[#allocation3 + $0x40] sm:$0xff] %vm3245_vm7, %v4836_v38  ;;  %v6685_v38 = vld [vmem:[%s10202_s1 + $0x1d8] sm:$0xff] }
 0x5ee   : > { %4713 = vst.msk [vmem:[#allocation3 + $0x60] sm:$0xff] %vm2666_vm1, %v4696_v48  ;;  %v6686_v48 = vld [vmem:[%s10202_s1 + $0x1e0] sm:$0xff] }
 0x5ef   : > { %6988 = vmatprep.subr.mxu1 %v6686_v48 }
 0x5f0   : > { %v5024_v27 = vpop.permute.xlu1 %5023  ;;  %6989 = vmatpush3.msra.mxu1 %v6686_v48 }
 0x5f1   : > { %v4884_v47 = vpop.permute.xlu0 %4883  ;;  %5045 = vst.msk [vmem:[#allocation3 + $0x20] sm:$0xff] %vm4017_vm11, %v5024_v27  ;;  %6990 = vmatprep.subr.mxu1 %v6685_v38 }
 0x5f2   : > { %4903 = vst.msk [vmem:[#allocation3 + $0x40] sm:$0xff] %vm3438_vm8, %v4884_v47  ;;  %v6684_v47 = vld [vmem:[%s10202_s1 + $0x1d0] sm:$0xff]  ;;  %6991 = vmatpush3.msra.mxu1 %v6685_v38 }
 0x5f3   : > { %6992 = vmatprep.subr.mxu1 %v6684_v47 }
 0x5f4   : > { %v4838_v29 = vpop.permute.xlu1 %4837  ;;  %6993 = vmatpush3.msra.mxu1 %v6684_v47 }
 0x5f5   : > { %4856 = vst.msk [vmem:[#allocation3 + $0x50] sm:$0xff] %vm3245_vm7, %v4838_v29  ;;  %v6683_v29 = vld [vmem:[%s10202_s1 + $0x1c8] sm:$0xff] }
 0x5f6   : > { %v4698_v5 = vpop.permute.xlu0 %4697  ;;  %6994 = vmatprep.subr.mxu1 %v6683_v29 }
 0x5f7   : > { %4714 = vst.msk [vmem:[#allocation3 + $0x70] sm:$0xff] %vm2666_vm1, %v4698_v5  ;;  %6995 = vmatpush3.msra.mxu1 %v6683_v29  ;;  %vm5497_vm1 = vcmask 392512  }
 0x5f8   : > { %v5026_v15 = vpop.permute.xlu1 %5025  ;;  %v5053_v21 = vld [vmem:[#allocation3 + $0x20] sm:$0xff] }
 0x5f9   : > { %5046 = vst.msk [vmem:[#allocation3 + $0x30] sm:$0xff] %vm4017_vm11, %v5026_v15  ;;  %6975 = vmatprep.mubr.msk.f32.mxu0 %vm4093_vm12, %v5053_v21  ;;  %v6682_v21 = vld [vmem:[%s10202_s1 + $0x1c0] sm:$0xff] }
 0x5fa   : > { %v4886_v17 = vpop.permute.xlu0 %4885  ;;  %6996 = vmatprep.subr.mxu1 %v6682_v21 }
 0x5fb   : > { %4904 = vst.msk [vmem:[#allocation3 + $0x50] sm:$0xff] %vm3438_vm8, %v4886_v17  ;;  %6997 = vmatpush3.msra.mxu1 %v6682_v21 }
 0x5fc   : > { %v4744_v63 = vpop.permute.xlu1 %4743 }
 0x5fd   : > { %4761 = vst.msk [vmem:[#allocation3 + $0x60] sm:$0xff] %vm2859_vm2, %v4744_v63 }
 0x5fe   : > { %v4746_v51 = vpop.permute.xlu0 %4745 }
 0x5ff   : > { %4762 = vst.msk [vmem:[#allocation3 + $0x70] sm:$0xff] %vm2859_vm2, %v4746_v51  ;;  %vm5546_vm2 = vcmask 458112  }
 0x600   : > { %v4932_v13 = vpop.permute.xlu1 %4931  ;;  %v5054_v32 = vld [vmem:[#allocation3 + $0x30] sm:$0xff] }
 0x601   : > { %4951 = vst.msk [vmem:[#allocation3 + $0x40] sm:$0xff] %vm3631_vm9, %v4932_v13  ;;  %6976 = vmatmul.mubr.msk.f32.gmra.mxu0 %vm4093_vm12, %v5054_v32  ;;  %v6681_v13 = vld [vmem:[%s10202_s1 + $0x1b8] sm:$0xff] }
 0x602   : > { %v4934_v45 = vpop.permute.xlu0 %4933  ;;  %6998 = vmatprep.subr.mxu1 %v6681_v13 }
 0x603   : > { %4952 = vst.msk [vmem:[#allocation3 + $0x50] sm:$0xff] %vm3631_vm9, %v4934_v45  ;;  %6999 = vmatpush3.msra.mxu1 %v6681_v13 }
 0x604   : > { %v4792_v43 = vpop.permute.xlu1 %4791 }
 0x605   : > { %4809 = vst.msk [vmem:[#allocation3 + $0x60] sm:$0xff] %vm3052_vm6, %v4792_v43  ;;  %v6680_v43 = vld [vmem:[%s10202_s1 + $0x1b0] sm:$0xff] }
 0x606   : > { %v4794_v20 = vpop.permute.xlu0 %4793  ;;  %7000 = vmatprep.subr.mxu1 %v6680_v43 }
 0x607   : > { %4810 = vst.msk [vmem:[#allocation3 + $0x70] sm:$0xff] %vm3052_vm6, %v4794_v20  ;;  %7001 = vmatpush3.msra.mxu1 %v6680_v43  ;;  %vm5595_vm6 = vcmask 523712  }
 0x608   : > { %v4980_v8 = vpop.permute.xlu1 %4979  ;;  %6360 = vmatprep.subr.mxu1 %v7206_v0 }
 0x609   : > { %4999 = vst.msk [vmem:[#allocation3 + $0x40] sm:$0xff] %vm3824_vm10, %v4980_v8 }
 0x60a   : > { %v4982_v61 = vpop.permute.xlu0 %4981 }
 0x60b   : > { %5000 = vst.msk [vmem:[#allocation3 + $0x50] sm:$0xff] %vm3824_vm10, %v4982_v61 }
 0x60c   : > { %v4840_v34 = vpop.permute.xlu1 %4839 }
 0x60d   : > { %4857 = vst.msk [vmem:[#allocation3 + $0x60] sm:$0xff] %vm3245_vm7, %v4840_v34 }
 0x60e   : > { %v4842_v41 = vpop.permute.xlu0 %4841 }
 0x60f   : > { %4858 = vst.msk [vmem:[#allocation3 + $0x70] sm:$0xff] %vm3245_vm7, %v4842_v41  ;;  %vm5644_vm7 = vcmask 589312  }
 0x610   : > { %v5028_v24 = vpop.permute.xlu1 %5027 }
 0x611   : > { %5047 = vst.msk [vmem:[#allocation3 + $0x40] sm:$0xff] %vm4017_vm11, %v5028_v24 }
 0x612   : > { %v5030_v25 = vpop.permute.xlu0 %5029 }
 0x613   : > { %5048 = vst.msk [vmem:[#allocation3 + $0x50] sm:$0xff] %vm4017_vm11, %v5030_v25 }
 0x614   : > { %v4888_v26 = vpop.permute.xlu1 %4887 }
 0x615   : > { %4905 = vst.msk [vmem:[#allocation3 + $0x60] sm:$0xff] %vm3438_vm8, %v4888_v26 }
 0x616   : > { %v4936_v60 = vpop.permute.xlu0 %4935 }
 0x617   : > { %4953 = vst.msk [vmem:[#allocation3 + $0x60] sm:$0xff] %vm3631_vm9, %v4936_v60 }
 0x618   : > { %v4890_v19 = vpop.permute.xlu1 %4889  ;;  %v5055_v22 = vld [vmem:[#allocation3 + $0x40] sm:$0xff] }
 0x619   : > { %4906 = vst.msk [vmem:[#allocation3 + $0x70] sm:$0xff] %vm3438_vm8, %v4890_v19  ;;  %6978 = vmatprep.mubr.msk.f32.mxu0 %vm4093_vm12, %v5055_v22  ;;  %vm5676_vm8 = vcmask 588800  }
 0x61a   : > { %v4984_v52 = vpop.permute.xlu0 %4983  ;;  %v5056_v54 = vld [vmem:[#allocation3 + $0x50] sm:$0xff] }
 0x61b   : > { %5001 = vst.msk [vmem:[#allocation3 + $0x60] sm:$0xff] %vm3824_vm10, %v4984_v52  ;;  %6979 = vmatmul.mubr.msk.f32.gmra.mxu0 %vm4093_vm12, %v5056_v54 }
 0x61c   : > { %v4938_v33 = vpop.permute.xlu1 %4937 }
 0x61d   : > { %4954 = vst.msk [vmem:[#allocation3 + $0x70] sm:$0xff] %vm3631_vm9, %v4938_v33  ;;  %vm5858_vm9 = vcmask 62464  }
 0x61e   : > { %v5032_v12 = vpop.permute.xlu0 %5031 }
 0x61f   : > { %5049 = vst.msk [vmem:[#allocation3 + $0x60] sm:$0xff] %vm4017_vm11, %v5032_v12 }
 0x620   : > { %v4986_v31 = vpop.permute.xlu1 %4985 }
 0x621   : > { %5002 = vst.msk [vmem:[#allocation3 + $0x70] sm:$0xff] %vm3824_vm10, %v4986_v31  ;;  %vm5874_vm10 = vcmask 60416  }
 0x624   : > { %v5034_v18 = vpop.permute.xlu1 %5033 }
 0x625   : > { %5050 = vst.msk [vmem:[#allocation3 + $0x70] sm:$0xff] %vm4017_vm11, %v5034_v18  ;;  %vm6143_vm11 = vcmask 128000  }
 0x626   : > { %v5057_v36 = vld [vmem:[#allocation3 + $0x60] sm:$0xff] }
 0x627   : > { %6981 = vmatprep.mubr.msk.f32.mxu0 %vm4093_vm12, %v5057_v36 }
 0x629   : > { %v5278_v28 = vpop.permute.xlu0 %5277 }
 0x62a   : > { %5302 = vst.msk [vmem:[#allocation3] sm:$0xff] %vm5301_vm13, %v5278_v28 }
 0x62c   : > { %v5058_v37 = vld [vmem:[#allocation3 + $0x70] sm:$0xff] }
 0x62d   : > { %6982 = vmatmul.mubr.msk.f32.gmra.mxu0 %vm4093_vm12, %v5058_v37  ;;  %v5327_v42 = vpop.permute.xlu0 %5326  ;;  %v5513_v37 = vld [vmem:[#allocation2 + $0xd8] sm:$0xff]  ;;  %vm6146_vm12 = vcmask 122880  }
 0x62e   : > { %5351 = vst.msk [vmem:[#allocation3] sm:$0xff] %vm5350_vm14, %v5327_v42  ;;  %v5562_v42 = vld [vmem:[#allocation2 + $0xd9] sm:$0xff] }
 0x6a1   : > { %v6974_v39 = vpop.f32.mrf.mxu0 }
 0x6a2   : > { %v5169_v55 = vadd.f32 %v6974_v39, %v9686_v30 }
 0x6a3   : > { %v5163_v56 = vpop.f32.mrf.mxu0 }
 0x6a4   : > { %v5203_v2 = vmax.f32 %v5169_v55, 0.0  ;;  %v5164_v3 = vadd.f32 %v9686_v30, %v5163_v56  ;;  %v5611_v56 = vld [vmem:[#allocation2 + $0xda] sm:$0xff] }
 0x6a6   : > { %v5202_v53 = vmax.f32 %v5164_v3, 0.0  ;;  %5238 = vst.msk [vmem:[#allocation2 + $0x31] sm:$0xff] %vm5210_vm4, %v5203_v2 }
 0x6a8   : > { %5237 = vst.msk [vmem:[#allocation2 + $0x19] sm:$0xff] %vm5210_vm4, %v5202_v53 }
 0x6ad   : > { %v5360_v4 = vld [vmem:[#allocation2 + $0x30] sm:$0xff] }
 0x6ae   : > { %5255 = vst.msk [vmem:[#allocation3 + $0x20] sm:$0xff] %vm5210_vm4, %v5360_v4  ;;  %v5409_v40 = vld [vmem:[#allocation2 + $0x31] sm:$0xff] }
 0x6af   : > { %v5359_v44 = vld [vmem:[#allocation2 + $0x18] sm:$0xff] }
 0x6b0   : > { %v5262_v46 = vld [vmem:[#allocation2 + $0x19] sm:$0xff]  ;;  %5375 = vrot.lane.b32.xlu0 %v5359_v44, %s7218_s14  ;;  %5254 = vst.msk [vmem:[#allocation3 + $0x10] sm:$0xff] %vm5210_vm4, %v5359_v44 }
 0x6b1   : > { %5279 = vrot.lane.b32.xlu1 %v5262_v46, %s7214_s17  ;;  %v5311_v1 = vld [vmem:[#allocation2 + $0x1a] sm:$0xff]  ;;  %v5312_v49 = vld [vmem:[#allocation2 + $0x32] sm:$0xff] }
 0x6b4   : > { %5424 = vrot.lane.b32.xlu0 %v5262_v46, %s7220_s23 }
 0x6b5   : > { %5328 = vrot.lane.b32.xlu1 %v5311_v1, %s7216_s11 }
 0x6b8   : > { %5426 = vrot.lane.b32.xlu0 %v5409_v40, %s7220_s23 }
 0x6b9   : > { %5377 = vrot.lane.b32.xlu1 %v5360_v4, %s7218_s14 }
 0x6bd   : > { %5281 = vrot.lane.b32.xlu1 %v5409_v40, %s7214_s17 }
 0x6c1   : > { %5473 = vrot.lane.b32.xlu1 %v5311_v1, %s7221_s12  ;;  %v6977_v7 = vpop.f32.mrf.mxu0 }
 0x6c2   : > { %v5179_v14 = vadd.f32 %v6977_v7, %v9686_v30 }
 0x6c3   : > { %v5173_v58 = vpop.f32.mrf.mxu0 }
 0x6c4   : > { %v5205_v10 = vmax.f32 %v5179_v14, 0.0  ;;  %v5174_v11 = vadd.f32 %v9686_v30, %v5173_v58 }
 0x6c5   : > { %5330 = vrot.lane.b32.xlu1 %v5312_v49, %s7216_s11 }
 0x6c6   : > { %5240 = vst.msk [vmem:[#allocation2 + $0x61] sm:$0xff] %vm5210_vm4, %v5205_v10  ;;  %v5204_v23 = vmax.f32 %v5174_v11, 0.0 }
 0x6c8   : > { %5239 = vst.msk [vmem:[#allocation2 + $0x49] sm:$0xff] %vm5210_vm4, %v5204_v23 }
 0x6c9   : > { %5522 = vrot.lane.b32.xlu1 %v5360_v4, %s7222_s15 }
 0x6cd   : > { %v5362_v6 = vld [vmem:[#allocation2 + $0x60] sm:$0xff] }
 0x6ce   : > { %5257 = vst.msk [vmem:[#allocation3 + $0x40] sm:$0xff] %vm5210_vm4, %v5362_v6  ;;  %v5411_v45 = vld [vmem:[#allocation2 + $0x61] sm:$0xff] }
 0x6cf   : > { %v5361_v50 = vld [vmem:[#allocation2 + $0x48] sm:$0xff] }
 0x6d0   : > { %v5264_v9 = vld [vmem:[#allocation2 + $0x49] sm:$0xff]  ;;  %5379 = vrot.lane.b32.xlu1 %v5361_v50, %s7218_s14  ;;  %5256 = vst.msk [vmem:[#allocation3 + $0x30] sm:$0xff] %vm5210_vm4, %v5361_v50 }
 0x6d1   : > { %5283 = vrot.lane.b32.xlu0 %v5264_v9, %s7214_s17  ;;  %v5313_v27 = vld [vmem:[#allocation2 + $0x4a] sm:$0xff]  ;;  %v5314_v8 = vld [vmem:[#allocation2 + $0x62] sm:$0xff] }
 0x6d4   : > { %5571 = vrot.lane.b32.xlu1 %v5409_v40, %s7223_s8 }
 0x6d5   : > { %5475 = vrot.lane.b32.xlu0 %v5312_v49, %s7221_s12 }
 0x6d8   : > { %5428 = vrot.lane.b32.xlu1 %v5264_v9, %s7220_s23 }
 0x6d9   : > { %5332 = vrot.lane.b32.xlu0 %v5313_v27, %s7216_s11 }
 0x6db   : > { %v6980_v5 = vpop.f32.mrf.mxu0 }
 0x6dc   : > { %v5189_v15 = vadd.f32 %v6980_v5, %v9686_v30  ;;  %5620 = vrot.lane.b32.xlu1 %v5312_v49, %s7224_s13 }
 0x6dd   : > { %v5183_v17 = vpop.f32.mrf.mxu0  ;;  %5524 = vrot.lane.b32.xlu0 %v5361_v50, %s7222_s15 }
 0x6de   : > { %v5207_v63 = vmax.f32 %v5189_v15, 0.0  ;;  %v5184_v51 = vadd.f32 %v9686_v30, %v5183_v17 }
 0x6e0   : > { %5242 = vst.msk [vmem:[#allocation2 + $0x91] sm:$0xff] %vm5210_vm4, %v5207_v63  ;;  %v5206_v32 = vmax.f32 %v5184_v51, 0.0  ;;  %5430 = vrot.lane.b32.xlu1 %v5411_v45, %s7220_s23 }
 0x6e1   : > { %5381 = vrot.lane.b32.xlu0 %v5362_v6, %s7218_s14 }
 0x6e2   : > { %5241 = vst.msk [vmem:[#allocation2 + $0x79] sm:$0xff] %vm5210_vm4, %v5206_v32 }
 0x6e4   : > { %5622 = vrot.lane.b32.xlu1 %v5313_v27, %s7224_s13 }
 0x6e5   : > { %5573 = vrot.lane.b32.xlu0 %v5264_v9, %s7223_s8 }
 0x6e7   : > { %v5364_v20 = vld [vmem:[#allocation2 + $0x90] sm:$0xff] }
 0x6e8   : > { %5259 = vst.msk [vmem:[#allocation3 + $0x60] sm:$0xff] %vm5210_vm4, %v5364_v20  ;;  %5334 = vrot.lane.b32.xlu1 %v5314_v8, %s7216_s11  ;;  %v5413_v54 = vld [vmem:[#allocation2 + $0x91] sm:$0xff] }
 0x6e9   : > { %5285 = vrot.lane.b32.xlu0 %v5411_v45, %s7214_s17  ;;  %v5363_v61 = vld [vmem:[#allocation2 + $0x78] sm:$0xff] }
 0x6ea   : > { %5258 = vst.msk [vmem:[#allocation3 + $0x50] sm:$0xff] %vm5210_vm4, %v5363_v61  ;;  %v5266_v24 = vld [vmem:[#allocation2 + $0x79] sm:$0xff] }
 0x6eb   : > { %v5315_v22 = vld [vmem:[#allocation2 + $0x7a] sm:$0xff]  ;;  %v5316_v33 = vld [vmem:[#allocation2 + $0x92] sm:$0xff] }
 0x6ec   : > { %5526 = vrot.lane.b32.xlu1 %v5362_v6, %s7222_s15 }
 0x6ed   : > { %5477 = vrot.lane.b32.xlu0 %v5313_v27, %s7221_s12  ;;  %v6983_v34 = vpop.f32.mrf.mxu0 }
 0x6ee   : > { %v5199_v41 = vadd.f32 %v6983_v34, %v9686_v30 }
 0x6ef   : > { %v5193_v25 = vpop.f32.mrf.mxu0 }
 0x6f0   : > { %5383 = vrot.lane.b32.xlu1 %v5363_v61, %s7218_s14  ;;  %v5209_v26 = vmax.f32 %v5199_v41, 0.0  ;;  %v5194_v60 = vadd.f32 %v9686_v30, %v5193_v25 }
 0x6f1   : > { %5287 = vrot.lane.b32.xlu0 %v5266_v24, %s7214_s17 }
 0x6f2   : > { %5244 = vst.msk [vmem:[#allocation2 + $0xc1] sm:$0xff] %vm5210_vm4, %v5209_v26  ;;  %v5208_v19 = vmax.f32 %v5194_v60, 0.0 }
 0x6f4   : > { %5575 = vrot.lane.b32.xlu1 %v5411_v45, %s7223_s8  ;;  %5243 = vst.msk [vmem:[#allocation2 + $0xa9] sm:$0xff] %vm5210_vm4, %v5208_v19 }
 0x6f5   : > { %5479 = vrot.lane.b32.xlu0 %v5314_v8, %s7221_s12 }
 0x6f8   : > { %5432 = vrot.lane.b32.xlu1 %v5266_v24, %s7220_s23 }
 0x6f9   : > { %5336 = vrot.lane.b32.xlu0 %v5315_v22, %s7216_s11  ;;  %v5366_v18 = vld [vmem:[#allocation2 + $0xc0] sm:$0xff] }
 0x6fa   : > { %v5464_v59 = vld [vmem:[#allocation2 + $0xc2] sm:$0xff] }
 0x6fb   : > { %v5365_v52 = vld [vmem:[#allocation2 + $0xa8] sm:$0xff] }
 0x6fc   : > { %5624 = vrot.lane.b32.xlu1 %v5314_v8, %s7224_s13  ;;  %5260 = vst.msk [vmem:[#allocation3 + $0x70] sm:$0xff] %vm5210_vm4, %v5365_v52  ;;  %v5268_v12 = vld [vmem:[#allocation2 + $0xa9] sm:$0xff]  ;;  %v5415_v30 = vld [vmem:[#allocation2 + $0xc1] sm:$0xff] }
 0x6fd   : > { %5528 = vrot.lane.b32.xlu0 %v5363_v61, %s7222_s15  ;;  %v5317_v31 = vld [vmem:[#allocation2 + $0xaa] sm:$0xff] }
 0x700   : > { %5434 = vrot.lane.b32.xlu1 %v5413_v54, %s7220_s23 }
 0x701   : > { %5385 = vrot.lane.b32.xlu0 %v5364_v20, %s7218_s14 }
 0x704   : > { %5626 = vrot.lane.b32.xlu1 %v5315_v22, %s7224_s13 }
 0x705   : > { %5577 = vrot.lane.b32.xlu0 %v5266_v24, %s7223_s8 }
 0x708   : > { %5338 = vrot.lane.b32.xlu1 %v5316_v33, %s7216_s11 }
 0x709   : > { %5289 = vrot.lane.b32.xlu0 %v5413_v54, %s7214_s17 }
 0x70c   : > { %5530 = vrot.lane.b32.xlu1 %v5364_v20, %s7222_s15 }
 0x70d   : > { %5481 = vrot.lane.b32.xlu0 %v5315_v22, %s7221_s12 }
 0x710   : > { %5387 = vrot.lane.b32.xlu1 %v5365_v52, %s7218_s14 }
 0x711   : > { %5291 = vrot.lane.b32.xlu0 %v5268_v12, %s7214_s17 }
 0x714   : > { %5579 = vrot.lane.b32.xlu1 %v5413_v54, %s7223_s8 }
 0x715   : > { %5483 = vrot.lane.b32.xlu0 %v5316_v33, %s7221_s12 }
 0x718   : > { %5436 = vrot.lane.b32.xlu1 %v5268_v12, %s7220_s23 }
 0x719   : > { %5340 = vrot.lane.b32.xlu0 %v5317_v31, %s7216_s11 }
 0x71c   : > { %5628 = vrot.lane.b32.xlu1 %v5316_v33, %s7224_s13 }
 0x71d   : > { %5532 = vrot.lane.b32.xlu0 %v5365_v52, %s7222_s15 }
 0x720   : > { %5485 = vrot.lane.b32.xlu1 %v5317_v31, %s7221_s12 }
 0x721   : > { %5389 = vrot.lane.b32.xlu0 %v5366_v18, %s7218_s14 }
 0x722   : > { %v5376_v36 = vpop.permute.xlu0 %5375 }
 0x723   : > { %v5280_v35 = vpop.permute.xlu1 %5279  ;;  %5400 = vst.msk [vmem:[#allocation3] sm:$0xff] %vm5399_vm15, %v5376_v36 }
 0x724   : > { %5303 = vst.msk [vmem:[#allocation3 + $0x10] sm:$0xff] %vm5301_vm13, %v5280_v35  ;;  %5487 = vrot.lane.b32.xlu1 %v5464_v59, %s7221_s12 }
 0x725   : > { %5581 = vrot.lane.b32.xlu0 %v5268_v12, %s7223_s8 }
 0x726   : > { %v5425_v57 = vpop.permute.xlu0 %5424 }
 0x727   : > { %v5329_v28 = vpop.permute.xlu1 %5328  ;;  %5449 = vst.msk [vmem:[#allocation3] sm:$0xff] %vm5448_vm0, %v5425_v57 }
 0x728   : > { %5352 = vst.msk [vmem:[#allocation3 + $0x10] sm:$0xff] %vm5350_vm14, %v5329_v28  ;;  %5536 = vrot.lane.b32.xlu1 %v5513_v37, %s7222_s15 }
 0x729   : > { %5438 = vrot.lane.b32.xlu0 %v5415_v30, %s7220_s23 }
 0x72a   : > { %v5427_v39 = vpop.permute.xlu0 %5426 }
 0x72b   : > { %v5378_v55 = vpop.permute.xlu1 %5377 }
 0x72c   : > { %5401 = vst.msk [vmem:[#allocation3 + $0x10] sm:$0xff] %vm5399_vm15, %v5378_v55  ;;  %5585 = vrot.lane.b32.xlu1 %v5562_v42, %s7223_s8 }
 0x72d   : > { %5450 = vst.msk [vmem:[#allocation3 + $0x10] sm:$0xff] %vm5448_vm0, %v5427_v39  ;;  %5630 = vrot.lane.b32.xlu0 %v5317_v31, %s7224_s13 }
 0x72f   : > { %v5282_v2 = vpop.permute.xlu1 %5281 }
 0x730   : > { %5304 = vst.msk [vmem:[#allocation3 + $0x20] sm:$0xff] %vm5301_vm13, %v5282_v2  ;;  %5634 = vrot.lane.b32.xlu1 %v5611_v56, %s7224_s13 }
 0x731   : > { %5534 = vrot.lane.b32.xlu0 %v5366_v18, %s7222_s15 }
 0x733   : > { %v5474_v3 = vpop.permute.xlu1 %5473 }
 0x734   : > { %5498 = vst.msk [vmem:[#allocation3] sm:$0xff] %vm5497_vm1, %v5474_v3  ;;  %v9875_v3 = vld [vmem:[%s10203_s2 + $0x3] ss:$0 sm:$0xff] }
 0x735   : > { %5583 = vrot.lane.b32.xlu0 %v5415_v30, %s7223_s8 }
 0x737   : > { %v5331_v53 = vpop.permute.xlu1 %5330 }
 0x738   : > { %5353 = vst.msk [vmem:[#allocation3 + $0x20] sm:$0xff] %vm5350_vm14, %v5331_v53 }
 0x739   : > { %5632 = vrot.lane.b32.xlu0 %v5464_v59, %s7224_s13 }
 0x73b   : > { %v5523_v4 = vpop.permute.xlu1 %5522 }
 0x73c   : > { %5547 = vst.msk [vmem:[#allocation3] sm:$0xff] %vm5546_vm2, %v5523_v4 }
 0x742   : > { %v5380_v44 = vpop.permute.xlu1 %5379 }
 0x743   : > { %v5284_v46 = vpop.permute.xlu0 %5283  ;;  %5402 = vst.msk [vmem:[#allocation3 + $0x20] sm:$0xff] %vm5399_vm15, %v5380_v44 }
 0x744   : > { %5305 = vst.msk [vmem:[#allocation3 + $0x30] sm:$0xff] %vm5301_vm13, %v5284_v46 }
 0x746   : > { %v5572_v1 = vpop.permute.xlu1 %5571 }
 0x747   : > { %v5476_v40 = vpop.permute.xlu0 %5475  ;;  %5596 = vst.msk [vmem:[#allocation3] sm:$0xff] %vm5595_vm6, %v5572_v1 }
 0x748   : > { %5499 = vst.msk [vmem:[#allocation3 + $0x10] sm:$0xff] %vm5497_vm1, %v5476_v40 }
 0x74a   : > { %v5429_v7 = vpop.permute.xlu1 %5428 }
 0x74b   : > { %v5333_v14 = vpop.permute.xlu0 %5332  ;;  %5451 = vst.msk [vmem:[#allocation3 + $0x20] sm:$0xff] %vm5448_vm0, %v5429_v7 }
 0x74c   : > { %5354 = vst.msk [vmem:[#allocation3 + $0x30] sm:$0xff] %vm5350_vm14, %v5333_v14 }
 0x74e   : > { %v5621_v58 = vpop.permute.xlu1 %5620 }
 0x74f   : > { %v5525_v49 = vpop.permute.xlu0 %5524  ;;  %5645 = vst.msk [vmem:[#allocation3] sm:$0xff] %vm5644_vm7, %v5621_v58 }
 0x750   : > { %5548 = vst.msk [vmem:[#allocation3 + $0x10] sm:$0xff] %vm5546_vm2, %v5525_v49 }
 0x752   : > { %v5431_v10 = vpop.permute.xlu1 %5430 }
 0x753   : > { %v5382_v11 = vpop.permute.xlu0 %5381 }
 0x754   : > { %5403 = vst.msk [vmem:[#allocation3 + $0x30] sm:$0xff] %vm5399_vm15, %v5382_v11 }
 0x755   : > { %5452 = vst.msk [vmem:[#allocation3 + $0x30] sm:$0xff] %vm5448_vm0, %v5431_v10 }
 0x756   : > { %v5623_v23 = vpop.permute.xlu1 %5622  ;;  %v5653_v6 = vld [vmem:[#allocation3] sm:$0xff] }
 0x757   : > { %v5574_v16 = vpop.permute.xlu0 %5573  ;;  %7002 = vmatprep.mubr.msk.f32.mxu1 %vm5676_vm8, %v5653_v6 }
 0x758   : > { %5597 = vst.msk [vmem:[#allocation3 + $0x10] sm:$0xff] %vm5595_vm6, %v5574_v16 }
 0x759   : > { %5646 = vst.msk [vmem:[#allocation3 + $0x10] sm:$0xff] %vm5644_vm7, %v5623_v23 }
 0x75a   : > { %v5335_v50 = vpop.permute.xlu1 %5334 }
 0x75b   : > { %v5286_v9 = vpop.permute.xlu0 %5285 }
 0x75c   : > { %5306 = vst.msk [vmem:[#allocation3 + $0x40] sm:$0xff] %vm5301_vm13, %v5286_v9 }
 0x75d   : > { %5355 = vst.msk [vmem:[#allocation3 + $0x40] sm:$0xff] %vm5350_vm14, %v5335_v50 }
 0x75e   : > { %v5527_v62 = vpop.permute.xlu1 %5526 }
 0x75f   : > { %v5478_v48 = vpop.permute.xlu0 %5477 }
 0x760   : > { %5500 = vst.msk [vmem:[#allocation3 + $0x20] sm:$0xff] %vm5497_vm1, %v5478_v48  ;;  %v5654_v38 = vld [vmem:[#allocation3 + $0x10] sm:$0xff] }
 0x761   : > { %5549 = vst.msk [vmem:[#allocation3 + $0x20] sm:$0xff] %vm5546_vm2, %v5527_v62  ;;  %7003 = vmatmul.mubr.msk.f32.vlgmr.msra.gmra.mxu1 %vm5676_vm8, %v5654_v38 }
 0x762   : > { %v5384_v47 = vpop.permute.xlu1 %5383 }
 0x763   : > { %v5288_v27 = vpop.permute.xlu0 %5287  ;;  %5404 = vst.msk [vmem:[#allocation3 + $0x40] sm:$0xff] %vm5399_vm15, %v5384_v47 }
 0x764   : > { %5307 = vst.msk [vmem:[#allocation3 + $0x50] sm:$0xff] %vm5301_vm13, %v5288_v27 }
 0x766   : > { %v5576_v29 = vpop.permute.xlu1 %5575 }
 0x767   : > { %v5480_v5 = vpop.permute.xlu0 %5479  ;;  %5598 = vst.msk [vmem:[#allocation3 + $0x20] sm:$0xff] %vm5595_vm6, %v5576_v29 }
 0x768   : > { %5501 = vst.msk [vmem:[#allocation3 + $0x30] sm:$0xff] %vm5497_vm1, %v5480_v5 }
 0x76a   : > { %v5433_v15 = vpop.permute.xlu1 %5432 }
 0x76b   : > { %v5337_v21 = vpop.permute.xlu0 %5336  ;;  %5453 = vst.msk [vmem:[#allocation3 + $0x40] sm:$0xff] %vm5448_vm0, %v5433_v15 }
 0x76c   : > { %5356 = vst.msk [vmem:[#allocation3 + $0x50] sm:$0xff] %vm5350_vm14, %v5337_v21 }
 0x76e   : > { %v5625_v17 = vpop.permute.xlu1 %5624 }
 0x76f   : > { %v5529_v63 = vpop.permute.xlu0 %5528  ;;  %5647 = vst.msk [vmem:[#allocation3 + $0x20] sm:$0xff] %vm5644_vm7, %v5625_v17 }
 0x770   : > { %5550 = vst.msk [vmem:[#allocation3 + $0x30] sm:$0xff] %vm5546_vm2, %v5529_v63 }
 0x772   : > { %v5435_v51 = vpop.permute.xlu1 %5434 }
 0x773   : > { %v5386_v13 = vpop.permute.xlu0 %5385 }
 0x774   : > { %5405 = vst.msk [vmem:[#allocation3 + $0x50] sm:$0xff] %vm5399_vm15, %v5386_v13 }
 0x775   : > { %5454 = vst.msk [vmem:[#allocation3 + $0x50] sm:$0xff] %vm5448_vm0, %v5435_v51 }
 0x776   : > { %v5627_v32 = vpop.permute.xlu1 %5626  ;;  %v5655_v43 = vld [vmem:[#allocation3 + $0x20] sm:$0xff] }
 0x777   : > { %v5578_v45 = vpop.permute.xlu0 %5577  ;;  %7005 = vmatprep.mubr.msk.f32.mxu1 %vm5676_vm8, %v5655_v43 }
 0x778   : > { %5599 = vst.msk [vmem:[#allocation3 + $0x30] sm:$0xff] %vm5595_vm6, %v5578_v45 }
 0x779   : > { %5648 = vst.msk [vmem:[#allocation3 + $0x30] sm:$0xff] %vm5644_vm7, %v5627_v32 }
 0x77a   : > { %v5339_v20 = vpop.permute.xlu1 %5338 }
 0x77b   : > { %v5290_v8 = vpop.permute.xlu0 %5289 }
 0x77c   : > { %5308 = vst.msk [vmem:[#allocation3 + $0x60] sm:$0xff] %vm5301_vm13, %v5290_v8 }
 0x77d   : > { %5357 = vst.msk [vmem:[#allocation3 + $0x60] sm:$0xff] %vm5350_vm14, %v5339_v20 }
 0x77e   : > { %v5531_v61 = vpop.permute.xlu1 %5530 }
 0x77f   : > { %v5482_v34 = vpop.permute.xlu0 %5481 }
 0x780   : > { %5502 = vst.msk [vmem:[#allocation3 + $0x40] sm:$0xff] %vm5497_vm1, %v5482_v34  ;;  %v5656_v41 = vld [vmem:[#allocation3 + $0x30] sm:$0xff] }
 0x781   : > { %5551 = vst.msk [vmem:[#allocation3 + $0x40] sm:$0xff] %vm5546_vm2, %v5531_v61  ;;  %7006 = vmatmul.mubr.msk.f32.gmra.mxu1 %vm5676_vm8, %v5656_v41 }
 0x782   : > { %v5388_v24 = vpop.permute.xlu1 %5387 }
 0x783   : > { %v5292_v25 = vpop.permute.xlu0 %5291  ;;  %5406 = vst.msk [vmem:[#allocation3 + $0x60] sm:$0xff] %vm5399_vm15, %v5388_v24 }
 0x784   : > { %5309 = vst.msk [vmem:[#allocation3 + $0x70] sm:$0xff] %vm5301_vm13, %v5292_v25 }
 0x786   : > { %v5580_v26 = vpop.permute.xlu1 %5579 }
 0x787   : > { %v5484_v60 = vpop.permute.xlu0 %5483  ;;  %5600 = vst.msk [vmem:[#allocation3 + $0x40] sm:$0xff] %vm5595_vm6, %v5580_v26 }
 0x788   : > { %5503 = vst.msk [vmem:[#allocation3 + $0x50] sm:$0xff] %vm5497_vm1, %v5484_v60 }
 0x78a   : > { %v5437_v19 = vpop.permute.xlu1 %5436 }
 0x78b   : > { %v5341_v22 = vpop.permute.xlu0 %5340  ;;  %5455 = vst.msk [vmem:[#allocation3 + $0x60] sm:$0xff] %vm5448_vm0, %v5437_v19 }
 0x78c   : > { %5358 = vst.msk [vmem:[#allocation3 + $0x70] sm:$0xff] %vm5350_vm14, %v5341_v22 }
 0x78e   : > { %v5629_v52 = vpop.permute.xlu1 %5628 }
 0x78f   : > { %v5533_v54 = vpop.permute.xlu0 %5532  ;;  %5649 = vst.msk [vmem:[#allocation3 + $0x40] sm:$0xff] %vm5644_vm7, %v5629_v52 }
 0x790   : > { %5552 = vst.msk [vmem:[#allocation3 + $0x50] sm:$0xff] %vm5546_vm2, %v5533_v54 }
 0x792   : > { %v5486_v33 = vpop.permute.xlu1 %5485 }
 0x793   : > { %v5390_v12 = vpop.permute.xlu0 %5389  ;;  %5504 = vst.msk [vmem:[#allocation3 + $0x60] sm:$0xff] %vm5497_vm1, %v5486_v33 }
 0x794   : > { %5407 = vst.msk [vmem:[#allocation3 + $0x70] sm:$0xff] %vm5399_vm15, %v5390_v12 }
 0x796   : > { %v5488_v31 = vpop.permute.xlu1 %5487  ;;  %v5657_v36 = vld [vmem:[#allocation3 + $0x40] sm:$0xff] }
 0x797   : > { %v5582_v18 = vpop.permute.xlu0 %5581  ;;  %7008 = vmatprep.mubr.msk.f32.mxu1 %vm5676_vm8, %v5657_v36 }
 0x798   : > { %5601 = vst.msk [vmem:[#allocation3 + $0x50] sm:$0xff] %vm5595_vm6, %v5582_v18 }
 0x79a   : > { %v5537_v59 = vpop.permute.xlu1 %5536 }
 0x79b   : > { %v5439_v35 = vpop.permute.xlu0 %5438 }
 0x79c   : > { %5456 = vst.msk [vmem:[#allocation3 + $0x70] sm:$0xff] %vm5448_vm0, %v5439_v35 }
 0x79d   : > { %5505 = vst.msk [vmem:[#allocation3 + $0x70] sm:$0xff] %vm5497_vm1, %v5488_v31 }
 0x79e   : > { %5554 = vst.msk [vmem:[#allocation3 + $0x70] sm:$0xff] %vm5546_vm2, %v5537_v59  ;;  %v5586_v57 = vpop.permute.xlu1 %5585 }
 0x79f   : > { %v5631_v37 = vpop.permute.xlu0 %5630  ;;  %5603 = vst.msk [vmem:[#allocation3 + $0x70] sm:$0xff] %vm5595_vm6, %v5586_v57 }
 0x7a0   : > { %5650 = vst.msk [vmem:[#allocation3 + $0x50] sm:$0xff] %vm5644_vm7, %v5631_v37 }
 0x7a2   : > { %v5635_v30 = vpop.permute.xlu1 %5634 }
 0x7a3   : > { %v5535_v28 = vpop.permute.xlu0 %5534  ;;  %5652 = vst.msk [vmem:[#allocation3 + $0x70] sm:$0xff] %vm5644_vm7, %v5635_v30 }
 0x7a4   : > { %5553 = vst.msk [vmem:[#allocation3 + $0x60] sm:$0xff] %vm5546_vm2, %v5535_v28 }
 0x7a7   : > { %v5584_v42 = vpop.permute.xlu0 %5583  ;;  %v5658_v39 = vld [vmem:[#allocation3 + $0x50] sm:$0xff] }
 0x7a8   : > { %5602 = vst.msk [vmem:[#allocation3 + $0x60] sm:$0xff] %vm5595_vm6, %v5584_v42  ;;  %7009 = vmatmul.mubr.msk.f32.gmra.mxu1 %vm5676_vm8, %v5658_v39 }
 0x7aa   : > { %v5660_v56 = vld [vmem:[#allocation3 + $0x70] sm:$0xff] }
 0x7ab   : > { %v5633_v55 = vpop.permute.xlu0 %5632 }
 0x7ac   : > { %5651 = vst.msk [vmem:[#allocation3 + $0x60] sm:$0xff] %vm5644_vm7, %v5633_v55 }
 0x7b3   : > { %v5659_v2 = vld [vmem:[#allocation3 + $0x60] sm:$0xff] }
 0x7b4   : > { %7011 = vmatprep.mubr.msk.f32.mxu1 %vm5676_vm8, %v5659_v2 }
 0x7b5   : > { %7012 = vmatmul.mubr.msk.f32.gmra.mxu1 %vm5676_vm8, %v5660_v56 }
 0x821   : > { %v7004_v53 = vpop.f32.mrf.mxu1 }
 0x822   : > { %v5773_v4 = vadd.f32 %v7004_v53, %v9875_v3 }
 0x823   : > { %v5767_v44 = vpop.f32.mrf.mxu1 }
 0x824   : > { %v5807_v46 = vmax.f32 %v5773_v4, 0.0  ;;  %v5768_v1 = vadd.f32 %v9875_v3, %v5767_v44 }
 0x826   : > { %5815 = vst.msk [vmem:[%s9882_s6 + $0x8] sm:$0xff] %vm5210_vm4, %v5807_v46  ;;  %5823 = vst.msk [vmem:[#allocation2 + $0x18] sm:$0xff] %vm5210_vm4, %v5807_v46  ;;  %v5806_v40 = vmax.f32 %v5768_v1, 0.0 }
 0x828   : > { %5814 = vst.msk [vmem:[%s9882_s6] sm:$0xff] %vm5210_vm4, %v5806_v40  ;;  %5822 = vst.msk [vmem:[#allocation2] sm:$0xff] %vm5210_vm4, %v5806_v40  ;;  %v6706_v40 = vld [vmem:[%s10202_s1 + $0x280] sm:$0xff] }
 0x829   : > { %7014 = vmatprep.subr.mxu0 %v6706_v40 }
 0x82a   : > { %7015 = vmatpush3.msra.mxu0 %v6706_v40 }
 0x82d   : > { %v5834_v14 = vld [vmem:[#allocation2 + $0x18] sm:$0xff] }
 0x82f   : > { %v5830_v7 = vld [vmem:[#allocation2] sm:$0xff] }
 0x830   : > { %v5838_v58 = vmax.f32 %v5830_v7, %v5834_v14  ;;  %v6705_v14 = vld [vmem:[%s10202_s1 + $0x278] sm:$0xff] }
 0x831   : > { %7016 = vmatprep.subr.mxu0 %v6705_v14 }
 0x832   : > { %5842 = vst.msk [vmem:[#allocation2] sm:$0xff] %vm5210_vm4, %v5838_v58  ;;  %v6704_v58 = vld [vmem:[%s10202_s1 + $0x270] sm:$0xff]  ;;  %7017 = vmatpush3.msra.mxu0 %v6705_v14 }
 0x833   : > { %7018 = vmatprep.subr.mxu0 %v6704_v58 }
 0x834   : > { %7019 = vmatpush3.msra.mxu0 %v6704_v58  ;;  %v6712_v58 = vld [vmem:[%s10202_s1 + $0x2e0] sm:$0xff] }
 0x839   : > { %v5846_v49 = vld [vmem:[#allocation2] ss:$2 sm:$0xf]  ;;  %v5850_v10 = vld [vmem:[#allocation2 + $0x1] ss:$2 sm:$0xf] }
 0x83a   : > { %5859 = vst.msk [vmem:[#allocation2] sm:$0x3f] %vm5858_vm9, %v7206_v0  ;;  %v5854_v47 = vmax.f32 %v5846_v49, %v5850_v10  ;;  %v6703_v10 = vld [vmem:[%s10202_s1 + $0x268] sm:$0xff] }
 0x83b   : > { %5862 = vst.msk [vmem:[#allocation2] sm:$0x1] %vm5216_vm3, %v7206_v0  ;;  %5868 = vst.msk [vmem:[#allocation2 + $0x5] sm:$0x1] %vm5216_vm3, %v7206_v0  ;;  %7020 = vmatprep.subr.mxu0 %v6703_v10 }
 0x83c   : > { %7021 = vmatpush3.msra.mxu0 %v6703_v10  ;;  %v6711_v10 = vld [vmem:[%s10202_s1 + $0x2d8] sm:$0xff] }
 0x841   : > { %v7007_v11 = vpop.f32.mrf.mxu1 }
 0x842   : > { %v5783_v23 = vadd.f32 %v7007_v11, %v9875_v3  ;;  %v5879_v5 = vld [vmem:[#allocation2] sm:$0xf] }
 0x843   : > { %v5777_v16 = vpop.f32.mrf.mxu1  ;;  %v6702_v11 = vld [vmem:[%s10202_s1 + $0x260] sm:$0xff] }
 0x844   : > { %v5809_v6 = vmax.f32 %v5783_v23, 0.0  ;;  %v5778_v50 = vadd.f32 %v9875_v3, %v5777_v16  ;;  %7022 = vmatprep.subr.mxu0 %v6702_v11  ;;  %v6701_v23 = vld [vmem:[%s10202_s1 + $0x258] sm:$0xff]  ;;  %v6700_v16 = vld [vmem:[%s10202_s1 + $0x250] sm:$0xff] }
 0x845   : > { %7023 = vmatpush3.msra.mxu0 %v6702_v11 }
 0x846   : > { %5817 = vst.msk [vmem:[%s9882_s6 + $0x18] sm:$0xff] %vm5210_vm4, %v5809_v6  ;;  %5825 = vst.msk [vmem:[#allocation2 + $0x48] sm:$0xff] %vm5210_vm4, %v5809_v6  ;;  %v5808_v9 = vmax.f32 %v5778_v50, 0.0  ;;  %7024 = vmatprep.subr.mxu0 %v6701_v23  ;;  %v6699_v6 = vld [vmem:[%s10202_s1 + $0x248] sm:$0xff]  ;;  %v6698_v50 = vld [vmem:[%s10202_s1 + $0x240] sm:$0xff] }
 0x847   : > { %7025 = vmatpush3.msra.mxu0 %v6701_v23  ;;  %v6710_v23 = vld [vmem:[%s10202_s1 + $0x2d0] sm:$0xff] }
 0x848   : > { %5816 = vst.msk [vmem:[%s9882_s6 + $0x10] sm:$0xff] %vm5210_vm4, %v5808_v9  ;;  %5824 = vst.msk [vmem:[#allocation2 + $0x30] sm:$0xff] %vm5210_vm4, %v5808_v9  ;;  %7026 = vmatprep.subr.mxu0 %v6700_v16 }
 0x849   : > { %7027 = vmatpush3.msra.mxu0 %v6700_v16 }
 0x84a   : > { %7028 = vmatprep.subr.mxu0 %v6699_v6 }
 0x84b   : > { %7029 = vmatpush3.msra.mxu0 %v6699_v6  ;;  %v6727_v6 = vld [vmem:[%s10202_s1 + $0x358] sm:$0xff] }
 0x84c   : > { %7030 = vmatprep.subr.mxu0 %v6698_v50 }
 0x84d   : > { %v5835_v48 = vld [vmem:[#allocation2 + $0x48] sm:$0xff]  ;;  %7031 = vmatpush3.msra.mxu0 %v6698_v50 }
 0x84f   : > { %v5831_v62 = vld [vmem:[#allocation2 + $0x30] sm:$0xff] }
 0x850   : > { %v5839_v38 = vmax.f32 %v5831_v62, %v5835_v48 }
 0x852   : > { %5843 = vst.msk [vmem:[#allocation2 + $0x18] sm:$0xff] %vm5210_vm4, %v5839_v38 }
 0x859   : > { %v5847_v27 = vld [vmem:[#allocation2 + $0x18] ss:$2 sm:$0xf]  ;;  %v5851_v29 = vld [vmem:[#allocation2 + $0x19] ss:$2 sm:$0xf] }
 0x85a   : > { %5875 = vst.msk [vmem:[#allocation2 + $0x19] sm:$0xf] %vm5874_vm10, %v5854_v47  ;;  %v5855_v22 = vmax.f32 %v5847_v27, %v5851_v29 }
 0x85b   : > { %5863 = vst.msk [vmem:[#allocation2 + $0x18] sm:$0x1] %vm5216_vm3, %v7206_v0  ;;  %5869 = vst.msk [vmem:[#allocation2 + $0x1d] sm:$0x1] %vm5216_vm3, %v7206_v0 }
 0x861   : > { %v7107_v15 = vld [vmem:[#allocation2 + $0x1] ss:$24 sps:$4 sm:$0xff]  }
 0x862   : > { %v7108_v21 = vld [vmem:[#allocation2 + $0x2] ss:$24 sps:$4 sm:$0xff]   ;;  %5903 = vrot.lane.b32.xlu0 %v7107_v15, %s7214_s17 }
 0x863   : > { %6144 = vst.msk [vmem:[#allocation2] sm:$0x3f] %vm6143_vm11, %v7206_v0  ;;  %v5880_v17 = vld [vmem:[#allocation2 + $0x18] sm:$0xf] }
 0x864   : > { %6147 = vst.msk [vmem:[#allocation2] sm:$0x1] %vm6146_vm12, %v7206_v0  ;;  %v5887_v63 = vcombine.low %v5879_v5, %v5880_v17  ;;  %6153 = vst.msk [vmem:[#allocation2 + $0x5] sm:$0x1] %vm6146_vm12, %v7206_v0 }
 0x866   : > { %5891 = vst.msk [vmem:[#allocation3] sm:$0xff] %vm5210_vm4, %v5887_v63  ;;  %5921 = vrot.lane.b32.xlu0 %v7108_v21, %s7216_s11 }
 0x868   : > { %v7010_v51 = vpop.f32.mrf.mxu1 }
 0x869   : > { %v5793_v13 = vadd.f32 %v7010_v51, %v9875_v3 }
 0x86a   : > { %v5787_v32 = vpop.f32.mrf.mxu1 }
 0x86b   : > { %v5811_v45 = vmax.f32 %v5793_v13, 0.0  ;;  %v5788_v43 = vadd.f32 %v9875_v3, %v5787_v32 }
 0x86d   : > { %5819 = vst.msk [vmem:[%s9882_s6 + $0x28] sm:$0xff] %vm5210_vm4, %v5811_v45  ;;  %5827 = vst.msk [vmem:[#allocation2 + $0x78] sm:$0xff] %vm5210_vm4, %v5811_v45  ;;  %v5810_v20 = vmax.f32 %v5788_v43, 0.0 }
 0x86f   : > { %5818 = vst.msk [vmem:[%s9882_s6 + $0x20] sm:$0xff] %vm5210_vm4, %v5810_v20  ;;  %5826 = vst.msk [vmem:[#allocation2 + $0x60] sm:$0xff] %vm5210_vm4, %v5810_v20 }
 0x874   : > { %v5836_v8 = vld [vmem:[#allocation2 + $0x78] sm:$0xff] }
 0x875   : > { %v7013_v61 = vpop.f32.mrf.mxu1  ;;  %5861 = vst.msk [vmem:[#allocation2 + $0x78] sm:$0x3f] %vm5858_vm9, %v7206_v0 }
 0x876   : > { %v5803_v34 = vadd.f32 %v7013_v61, %v9875_v3  ;;  %v5832_v41 = vld [vmem:[#allocation2 + $0x60] sm:$0xff]  ;;  %5867 = vst.msk [vmem:[#allocation2 + $0x78] sm:$0x1] %vm5216_vm3, %v7206_v0  ;;  %5873 = vst.msk [vmem:[#allocation2 + $0x7d] sm:$0x1] %vm5216_vm3, %v7206_v0 }
 0x877   : > { %v5797_v24 = vpop.f32.mrf.mxu1  ;;  %v5840_v25 = vmax.f32 %v5832_v41, %v5836_v8  ;;  %5866 = vst.msk [vmem:[#allocation2 + $0x60] sm:$0x1] %vm5216_vm3, %v7206_v0  ;;  %5872 = vst.msk [vmem:[#allocation2 + $0x65] sm:$0x1] %vm5216_vm3, %v7206_v0  ;;  %v6725_v8 = vld [vmem:[%s10202_s1 + $0x348] sm:$0xff]  ;;  %v6724_v61 = vld [vmem:[%s10202_s1 + $0x340] sm:$0xff] }
 0x878   : > { %v5813_v26 = vmax.f32 %v5803_v34, 0.0  ;;  %v5798_v60 = vadd.f32 %v9875_v3, %v5797_v24  ;;  %6361 = vmatpush1.msra.mxu1 %v6725_v8  ;;  %v6723_v34 = vld [vmem:[%s10202_s1 + $0x338] sm:$0xff]  ;;  %v6722_v41 = vld [vmem:[%s10202_s1 + $0x330] sm:$0xff]  ;;  %v6707_v24 = vld [vmem:[%s10203_s2 + $0x4] ss:$0 sm:$0xff] }
 0x879   : > { %5844 = vst.msk [vmem:[#allocation2 + $0x30] sm:$0xff] %vm5210_vm4, %v5840_v25  ;;  %6362 = vmatprep.subr.mxu1 %v7206_v0 }
 0x87a   : > { %5821 = vst.msk [vmem:[%s9882_s6 + $0x38] sm:$0xff] %vm5210_vm4, %v5813_v26  ;;  %5829 = vst.msk [vmem:[#allocation2 + $0xa8] sm:$0xff] %vm5210_vm4, %v5813_v26  ;;  %v5812_v19 = vmax.f32 %v5798_v60, 0.0  ;;  %6363 = vmatpush1.msra.mxu1 %v6724_v61 }
 0x87b   : > { %6364 = vmatprep.subr.mxu1 %v7206_v0 }
 0x87c   : > { %5820 = vst.msk [vmem:[%s9882_s6 + $0x30] sm:$0xff] %vm5210_vm4, %v5812_v19  ;;  %5828 = vst.msk [vmem:[#allocation2 + $0x90] sm:$0xff] %vm5210_vm4, %v5812_v19  ;;  %6365 = vmatpush1.msra.mxu1 %v6723_v34 }
 0x87d   : > { %6366 = vmatprep.subr.mxu1 %v7206_v0 }
 0x87e   : > { %6367 = vmatpush1.msra.mxu1 %v6722_v41 }
 0x87f   : > { %6368 = vmatprep.subr.mxu1 %v7206_v0 }
 0x880   : > { %v5848_v52 = vld [vmem:[#allocation2 + $0x30] ss:$2 sm:$0xf]  ;;  %v5852_v54 = vld [vmem:[#allocation2 + $0x31] ss:$2 sm:$0xf] }
 0x881   : > { %5864 = vst.msk [vmem:[#allocation2 + $0x30] sm:$0x1] %vm5216_vm3, %v7206_v0  ;;  %5870 = vst.msk [vmem:[#allocation2 + $0x35] sm:$0x1] %vm5216_vm3, %v7206_v0  ;;  %v5837_v12 = vld [vmem:[#allocation2 + $0xa8] sm:$0xff]  ;;  %v5856_v35 = vmax.f32 %v5848_v52, %v5852_v54  ;;  %v6720_v54 = vld [vmem:[%s10202_s1 + $0x320] sm:$0xff] }
 0x882   : > { %5876 = vst.msk [vmem:[#allocation2 + $0x31] sm:$0xf] %vm5874_vm10, %v5855_v22  ;;  %v6721_v52 = vld [vmem:[%s10202_s1 + $0x328] sm:$0xff] }
 0x883   : > { %v5833_v33 = vld [vmem:[#allocation2 + $0x90] sm:$0xff]  ;;  %6369 = vmatpush1.msra.mxu1 %v6721_v52 }
 0x884   : > { %v5841_v31 = vmax.f32 %v5833_v33, %v5837_v12  ;;  %6370 = vmatprep.subr.mxu1 %v7206_v0 }
 0x885   : > { %6371 = vmatpush1.msra.mxu1 %v6720_v54 }
 0x886   : > { %5845 = vst.msk [vmem:[#allocation2 + $0x48] sm:$0xff] %vm5210_vm4, %v5841_v31  ;;  %6372 = vmatprep.subr.mxu1 %v7206_v0 }
 0x889   : > { %v7109_v18 = vld [vmem:[#allocation2 + $0x18] ss:$24 sps:$4 sm:$0xff]  }
 0x88a   : > { %v7111_v36 = vld [vmem:[#allocation2 + $0x1a] ss:$24 sps:$4 sm:$0xff]   ;;  %6148 = vst.msk [vmem:[#allocation2 + $0x18] sm:$0x1] %vm6146_vm12, %v7206_v0  ;;  %5939 = vrot.lane.b32.xlu0 %v7109_v18, %s7218_s14 }
 0x88b   : > { %6154 = vst.msk [vmem:[#allocation2 + $0x1d] sm:$0x1] %vm6146_vm12, %v7206_v0  ;;  %v7110_v59 = vld [vmem:[#allocation2 + $0x19] ss:$24 sps:$4 sm:$0xff]  }
 0x88c   : > { %v5881_v30 = vld [vmem:[#allocation2 + $0x30] sm:$0xf]  ;;  %v6719_v18 = vld [vmem:[%s10202_s1 + $0x318] sm:$0xff] }
 0x88d   : > { %v5849_v37 = vld [vmem:[#allocation2 + $0x48] ss:$2 sm:$0xf]  ;;  %v5853_v57 = vld [vmem:[#allocation2 + $0x49] ss:$2 sm:$0xf]  ;;  %6373 = vmatpush1.msra.mxu1 %v6719_v18 }
 0x88e   : > { %5957 = vrot.lane.b32.xlu0 %v7110_v59, %s7220_s23  ;;  %v5857_v28 = vmax.f32 %v5849_v37, %v5853_v57  ;;  %5865 = vst.msk [vmem:[#allocation2 + $0x48] sm:$0x1] %vm5216_vm3, %v7206_v0  ;;  %5871 = vst.msk [vmem:[#allocation2 + $0x4d] sm:$0x1] %vm5216_vm3, %v7206_v0  ;;  %vm6159_vm3 = vcmask 125952   ;;  %6374 = vmatprep.subr.mxu1 %v7206_v0  ;;  %v6716_v59 = vld [vmem:[%s10202_s1 + $0x300] sm:$0xff] }
 0x88f   : > { %5877 = vst.msk [vmem:[#allocation2 + $0x49] sm:$0xf] %vm5874_vm10, %v5856_v35  ;;  %v6717_v35 = vld [vmem:[%s10202_s1 + $0x308] sm:$0xff] }
 0x890   : > { %5878 = vst.msk [vmem:[#allocation2 + $0x61] sm:$0xf] %vm5874_vm10, %v5857_v28 }
 0x892   : > { %5975 = vrot.lane.b32.xlu0 %v7111_v36, %s7221_s12  ;;  %v6718_v36 = vld [vmem:[%s10202_s1 + $0x310] sm:$0xff] }
 0x893   : > { %6375 = vmatpush1.msra.mxu1 %v6718_v36 }
 0x894   : > { %6376 = vmatprep.subr.mxu1 %v7206_v0 }
 0x895   : > { %6377 = vmatpush1.msra.mxu1 %v6717_v35 }
 0x896   : > { %v7112_v42 = vld [vmem:[#allocation2 + $0x30] ss:$24 sps:$4 sm:$0xff]   ;;  %6378 = vmatprep.subr.mxu1 %v7206_v0 }
 0x897   : > { %v7113_v39 = vld [vmem:[#allocation2 + $0x31] ss:$24 sps:$4 sm:$0xff]   ;;  %6149 = vst.msk [vmem:[#allocation2 + $0x30] sm:$0x1] %vm6146_vm12, %v7206_v0  ;;  %5993 = vrot.lane.b32.xlu0 %v7112_v42, %s7222_s15  ;;  %v7120_v4 = vld [vmem:[#allocation2 + $0x60] ss:$24 sps:$4 sm:$0xff]   ;;  %6379 = vmatpush1.msra.mxu1 %v6716_v59 }
 0x898   : > { %v7115_v55 = vld [vmem:[#allocation2 + $0x32] ss:$24 sps:$4 sm:$0xff]   ;;  %5905 = vrot.lane.b32.xlu1 %v7113_v39, %s7214_s17  ;;  %v7121_v44 = vld [vmem:[#allocation2 + $0x61] ss:$24 sps:$4 sm:$0xff]   ;;  %6380 = vmatprep.subr.mxu1 %v7206_v0 }
 0x899   : > { %v7116_v56 = vld [vmem:[#allocation2 + $0x32] ss:$24 sps:$4 sm:$0xff]   ;;  %v7122_v46 = vld [vmem:[#allocation2 + $0x62] ss:$24 sps:$4 sm:$0xff]  }
 0x89a   : > { %v7114_v2 = vld [vmem:[#allocation2 + $0x31] ss:$24 sps:$4 sm:$0xff]   ;;  %6155 = vst.msk [vmem:[#allocation2 + $0x35] sm:$0x1] %vm6146_vm12, %v7206_v0 }
 0x89b   : > { %v7117_v3 = vld [vmem:[#allocation2 + $0x48] ss:$24 sps:$4 sm:$0xff]   ;;  %6011 = vrot.lane.b32.xlu0 %v7114_v2, %s7223_s8  ;;  %6145 = vst.msk [vmem:[#allocation2 + $0x78] sm:$0x3f] %vm6143_vm11, %v7206_v0 }
 0x89c   : > { %v7119_v53 = vld [vmem:[#allocation2 + $0x4a] ss:$24 sps:$4 sm:$0xff]   ;;  %5923 = vrot.lane.b32.xlu1 %v7115_v55, %s7216_s11  ;;  %6151 = vst.msk [vmem:[#allocation2 + $0x60] sm:$0x1] %vm6146_vm12, %v7206_v0  ;;  %6152 = vst.msk [vmem:[#allocation2 + $0x78] sm:$0x1] %vm6146_vm12, %v7206_v0 }
 0x89d   : > { %6156 = vst.msk [vmem:[#allocation2 + $0x4d] sm:$0x1] %vm6146_vm12, %v7206_v0  ;;  %v5882_v1 = vld [vmem:[#allocation2 + $0x48] sm:$0xf]  ;;  %6157 = vst.msk [vmem:[#allocation2 + $0x65] sm:$0x1] %vm6146_vm12, %v7206_v0 }
 0x89e   : > { %6150 = vst.msk [vmem:[#allocation2 + $0x48] sm:$0x1] %vm6146_vm12, %v7206_v0  ;;  %v5888_v7 = vcombine.low %v5881_v30, %v5882_v1  ;;  %6158 = vst.msk [vmem:[#allocation2 + $0x7d] sm:$0x1] %vm6146_vm12, %v7206_v0  ;;  %v7118_v49 = vld [vmem:[#allocation2 + $0x49] ss:$24 sps:$4 sm:$0xff]  }
 0x89f   : > { %6029 = vrot.lane.b32.xlu0 %v7116_v56, %s7224_s13 }
 0x8a0   : > { %5941 = vrot.lane.b32.xlu1 %v7117_v3, %s7218_s14  ;;  %5892 = vst.msk [vmem:[#allocation3 + $0x10] sm:$0xff] %vm5210_vm4, %v5888_v7  ;;  %vm6176_vm4 = vcmask 130048   ;;  %v6713_v7 = vld [vmem:[%s10202_s1 + $0x2e8] sm:$0xff] }
 0x8a4   : > { %5959 = vrot.lane.b32.xlu1 %v7118_v49, %s7220_s23 }
 0x8a8   : > { %5977 = vrot.lane.b32.xlu1 %v7119_v53, %s7221_s12  ;;  %s7225_s12 = smov 80  }
 0x8ac   : > { %5995 = vrot.lane.b32.xlu1 %v7120_v4, %s7222_s15  ;;  %v6715_v4 = vld [vmem:[%s10202_s1 + $0x2f8] sm:$0xff] }
 0x8ad   : > { %6381 = vmatpush1.msra.mxu1 %v6715_v4 }
 0x8ae   : > { %6382 = vmatprep.subr.mxu1 %v7206_v0 }
 0x8b0   : > { %6013 = vrot.lane.b32.xlu1 %v7121_v44, %s7223_s8  ;;  %v6714_v44 = vld [vmem:[%s10202_s1 + $0x2f0] sm:$0xff] }
 0x8b1   : > { %6383 = vmatpush1.msra.mxu1 %v6714_v44 }
 0x8b2   : > { %6384 = vmatprep.subr.mxu1 %v7206_v0 }
 0x8b3   : > { %6385 = vmatpush1.msra.mxu1 %v6713_v7 }
 0x8b4   : > { %6031 = vrot.lane.b32.xlu1 %v7122_v46, %s7224_s13  ;;  %6386 = vmatprep.subr.mxu1 %v7206_v0 }
 0x8b5   : > { %6387 = vmatpush1.msra.mxu1 %v6712_v58 }
 0x8b6   : > { %6388 = vmatprep.subr.mxu1 %v7206_v0 }
 0x8b7   : > { %6389 = vmatpush1.msra.mxu1 %v6711_v10 }
 0x8b8   : > { %6390 = vmatprep.subr.mxu1 %v7206_v0 }
 0x8b9   : > { %6391 = vmatpush1.msra.mxu1 %v6710_v23 }
 0x8ba   : > { %6420 = vmatprep.subr.mxu1 %v7206_v0 }
 0x8bb   : > { %6421 = vmatpush2.msra.mxu1 %v6727_v6 }
 0x8bc   : > { %6422 = vmatprep.subr.mxu1 %v7206_v0 }
 0x8d4   : > { %v5904_v9 = vpop.permute.xlu0 %5903 }
 0x8d5   : > { %5909 = vst.msk [vmem:[#allocation3] sm:$0xff] %vm5301_vm13, %v5904_v9  ;;  %v6726_v9 = vld [vmem:[%s10202_s1 + $0x350] sm:$0xff] }
 0x8d6   : > { %6423 = vmatpush2.msra.mxu1 %v6726_v9 }
 0x8d8   : > { %v5922_v62 = vpop.permute.xlu0 %5921 }
 0x8d9   : > { %5927 = vst.msk [vmem:[#allocation3] sm:$0xff] %vm5350_vm14, %v5922_v62 }
 0x8fc   : > { %v5940_v48 = vpop.permute.xlu0 %5939 }
 0x8fd   : > { %5945 = vst.msk [vmem:[#allocation3] sm:$0xff] %vm5399_vm15, %v5940_v48 }
 0x900   : > { %v5958_v38 = vpop.permute.xlu0 %5957 }
 0x901   : > { %5963 = vst.msk [vmem:[#allocation3] sm:$0xff] %vm5448_vm0, %v5958_v38 }
 0x904   : > { %v5976_v47 = vpop.permute.xlu0 %5975 }
 0x905   : > { %5981 = vst.msk [vmem:[#allocation3] sm:$0xff] %vm5497_vm1, %v5976_v47 }
 0x909   : > { %v5994_v27 = vpop.permute.xlu0 %5993 }
 0x90a   : > { %5999 = vst.msk [vmem:[#allocation3] sm:$0xff] %vm5546_vm2, %v5994_v27  ;;  %v5906_v29 = vpop.permute.xlu1 %5905 }
 0x90b   : > { %5910 = vst.msk [vmem:[#allocation3 + $0x10] sm:$0xff] %vm5301_vm13, %v5906_v29  ;;  %vm6214_vm13 = vcmask 392448  }
 0x90d   : > { %v6012_v5 = vpop.permute.xlu0 %6011 }
 0x90e   : > { %6017 = vst.msk [vmem:[#allocation3] sm:$0xff] %vm5595_vm6, %v6012_v5  ;;  %v5924_v15 = vpop.permute.xlu1 %5923 }
 0x90f   : > { %5928 = vst.msk [vmem:[#allocation3 + $0x10] sm:$0xff] %vm5350_vm14, %v5924_v15  ;;  %vm6233_vm14 = vcmask 523648  }
 0x911   : > { %v6030_v21 = vpop.permute.xlu0 %6029 }
 0x912   : > { %6035 = vst.msk [vmem:[#allocation3] sm:$0xff] %vm5644_vm7, %v6030_v21  ;;  %v5942_v17 = vpop.permute.xlu1 %5941 }
 0x913   : > { %5946 = vst.msk [vmem:[#allocation3 + $0x10] sm:$0xff] %vm5399_vm15, %v5942_v17  ;;  %vm6252_vm15 = vcmask 654848  }
 0x916   : > { %v5960_v63 = vpop.permute.xlu1 %5959 }
 0x917   : > { %5964 = vst.msk [vmem:[#allocation3 + $0x10] sm:$0xff] %vm5448_vm0, %v5960_v63  ;;  %vm6271_vm0 = vcmask 786048  }
 0x919   : > { %v6037_v51 = vld [vmem:[#allocation3] sm:$0xff] }
 0x91a   : > { %v5978_v13 = vpop.permute.xlu1 %5977  ;;  %7032 = vmatprep.mubr.msk.f32.mxu0 %vm5676_vm8, %v6037_v51 }
 0x91b   : > { %5982 = vst.msk [vmem:[#allocation3 + $0x10] sm:$0xff] %vm5497_vm1, %v5978_v13  ;;  %vm6290_vm1 = vcmask 917248  }
 0x91e   : > { %v5996_v32 = vpop.permute.xlu1 %5995 }
 0x91f   : > { %6000 = vst.msk [vmem:[#allocation3 + $0x10] sm:$0xff] %vm5546_vm2, %v5996_v32  ;;  %vm6309_vm2 = vcmask 1048448  }
 0x922   : > { %v6014_v45 = vpop.permute.xlu1 %6013 }
 0x923   : > { %6018 = vst.msk [vmem:[#allocation3 + $0x10] sm:$0xff] %vm5595_vm6, %v6014_v45 }
 0x926   : > { %v6032_v43 = vpop.permute.xlu1 %6031 }
 0x927   : > { %6036 = vst.msk [vmem:[#allocation3 + $0x10] sm:$0xff] %vm5644_vm7, %v6032_v43 }
 0x92e   : > { %v6038_v20 = vld [vmem:[#allocation3 + $0x10] sm:$0xff] }
 0x92f   : > { %7033 = vmatmul.mubr.msk.f32.vlgmr.msra.gmra.mxu0 %vm5676_vm8, %v6038_v20  ;;  %v6728_v20 = vld [vmem:[%s10203_s2 + $0x5] ss:$0 sm:$0xff] }
 0x9ef   : > { %v7034_v25 = vpop.f32.mrf.mxu0 }
 0x9f0   : > { %v6132_v26 = vadd.f32 %v7034_v25, %v6707_v24 }
 0x9f1   : > { %v6126_v60 = vpop.f32.mrf.mxu0 }
 0x9f2   : > { %v6136_v19 = vmax.f32 %v6132_v26, 0.0  ;;  %v6127_v22 = vadd.f32 %v6707_v24, %v6126_v60 }
 0x9f4   : > { %v6140_v33 = vcombine.high %v6136_v19, %v6136_v19  ;;  %v6135_v12 = vmax.f32 %v6127_v22, 0.0  ;;  %6162 = vst.msk [vmem:[#allocation2 + $0x49] sm:$0xf] %vm6159_vm3, %v6136_v19 }
 0x9f6   : > { %v6139_v31 = vcombine.high %v6135_v12, %v6135_v12  ;;  %6160 = vst.msk [vmem:[#allocation2 + $0x19] sm:$0xf] %vm6159_vm3, %v6135_v12  ;;  %6163 = vst.msk [vmem:[#allocation2 + $0x61] sm:$0xf] %vm6159_vm3, %v6140_v33 }
 0x9f8   : > { %6161 = vst.msk [vmem:[#allocation2 + $0x31] sm:$0xf] %vm6159_vm3, %v6139_v31 }
 0x9fd   : > { %v7123_v37 = vld [vmem:[#allocation2 + $0x2] ss:$24 sps:$4 sm:$0xff]  }
 0x9fe   : > { %v7124_v57 = vld [vmem:[#allocation2 + $0x1] ss:$24 sps:$4 sm:$0xff]   ;;  %6208 = vrot.lane.b32.xlu1 %v7123_v37, %s7220_s23 }
 0x9ff   : > { %6189 = vrot.lane.b32.xlu0 %v7124_v57, %s7216_s11  ;;  %v7125_v28 = vld [vmem:[#allocation2 + $0x4a] ss:$24 sps:$4 sm:$0xff]   ;;  %v7128_v55 = vld [vmem:[#allocation2 + $0x19] ss:$24 sps:$4 sm:$0xff]  }
 0xa00   : > { %v7126_v30 = vld [vmem:[#allocation2 + $0x48] ss:$24 sps:$4 sm:$0xff]   ;;  %v7131_v2 = vld [vmem:[#allocation2 + $0x1a] ss:$24 sps:$4 sm:$0xff]  }
 0xa01   : > { %v7129_v42 = vld [vmem:[#allocation2 + $0x32] ss:$24 sps:$4 sm:$0xff]   ;;  %v7130_v39 = vld [vmem:[#allocation2 + $0x62] ss:$24 sps:$4 sm:$0xff]  }
 0xa02   : > { %6267 = vrot.lane.b32.xlu1 %v7125_v28, %s7225_s12  ;;  %6324 = vst.msk [vmem:[#allocation3 + $0x8] sm:$0xff] %vm6176_vm4, %v7129_v42  ;;  %6325 = vst.msk [vmem:[#allocation3 + $0x18] sm:$0xff] %vm6176_vm4, %v7130_v39  ;;  %v7127_v56 = vld [vmem:[#allocation2 + $0x49] ss:$24 sps:$4 sm:$0xff]   ;;  %v7132_v53 = vld [vmem:[#allocation2 + $0x18] ss:$24 sps:$4 sm:$0xff]  }
 0xa03   : > { %6229 = vrot.lane.b32.xlu0 %v7126_v30, %s7222_s15  ;;  %v7139_v3 = vld [vmem:[#allocation2] ss:$24 sps:$4 sm:$0xff]   ;;  %v7140_v1 = vld [vmem:[#allocation2 + $0x30] ss:$24 sps:$4 sm:$0xff]  }
 0xa04   : > { %6177 = vst.msk [vmem:[#allocation3] sm:$0xff] %vm6176_vm4, %v7139_v3  ;;  %v7133_v40 = vld [vmem:[#allocation2 + $0x30] ss:$24 sps:$4 sm:$0xff]   ;;  %6178 = vst.msk [vmem:[#allocation3 + $0x10] sm:$0xff] %vm6176_vm4, %v7140_v1  ;;  %v7137_v16 = vld [vmem:[#allocation2 + $0x61] ss:$24 sps:$4 sm:$0xff]  }
 0xa05   : > { %v7134_v14 = vld [vmem:[#allocation2 + $0x31] ss:$24 sps:$4 sm:$0xff]   ;;  %v7138_v50 = vld [vmem:[#allocation2 + $0x60] ss:$24 sps:$4 sm:$0xff]  }
 0xa06   : > { %6246 = vrot.lane.b32.xlu1 %v7128_v55, %s7224_s13  ;;  %v7135_v49 = vld [vmem:[#allocation2 + $0x31] ss:$24 sps:$4 sm:$0xff]  }
 0xa07   : > { %6248 = vrot.lane.b32.xlu0 %v7127_v56, %s7224_s13  ;;  %v7136_v11 = vld [vmem:[#allocation2 + $0x32] ss:$24 sps:$4 sm:$0xff]  }
 0xa09   : > { %v6327_v46 = vld [vmem:[#allocation3 + $0x8] sm:$0xff]  ;;  %v6329_v45 = vld [vmem:[#allocation3 + $0x18] sm:$0xff] }
 0xa0a   : > { %6265 = vrot.lane.b32.xlu1 %v7131_v2, %s7225_s12  ;;  %6729 = vmatprep.mubr.msk.f32.mxu1 %vm6176_vm4, %v6327_v46 }
 0xa0b   : > { %6227 = vrot.lane.b32.xlu0 %v7132_v53, %s7222_s15  ;;  %s6739_s15 = sshll.u32 %s7281_s22, 8  ;;  %s7228_s22 = smov [#allocation4]  }
 0xa0c   : > { %s10157_s12 = scalar_lea.hbm %s10206_s5, %s6739_s15  ;;  %s7148_s16 = sshll.u32 %s7228_s22, 4  ;;  %s7149_s16 = int_to_ptr.vmem [resolvable:$false] %s7148_s16 }
 0xa0d   : > { %s7150_s14 = scalar_lea.vmem %s7149_s16, 512 }
 0xa0e   : > { %6284 = vrot.lane.b32.xlu1 %v7133_v40, %s7226_s7 }
 0xa0f   : > { %6191 = vrot.lane.b32.xlu0 %v7134_v14, %s7216_s11 }
 0xa12   : > { %6303 = vrot.lane.b32.xlu1 %v7135_v49, %s7227_s30 }
 0xa13   : > { %6210 = vrot.lane.b32.xlu0 %v7136_v11, %s7220_s23  ;;  %s230_s23 = sand.u32 1, %s7196_s19  }
 0xa14   : > { %s10160_s8 = scalar_lea.sflag [#allocation5], %s230_s23 }
 0xa16   : > { %6305 = vrot.lane.b32.xlu1 %v7137_v16, %s7227_s30 }
 0xa17   : > { %6286 = vrot.lane.b32.xlu0 %v7138_v50, %s7226_s7  ;;  %s6585_s7 = sshll.u32 %s230_s23, 4 }
 0xa18   : > { %s232_s10 = scalar_lea.vmem [#allocation4], %s6585_s7 }
 0xa19   : > { %s6469_s9 = sshll.u32 %s232_s10, 4  ;;  %s10152_s9 = int_to_ptr.vmem [resolvable:$true] %s6469_s9 }
 0xa1a   : > { %s7144_s11 = scalar_lea.vmem %s10152_s9, 256  ;;  %p7151_p0 = scmp.lt.s32.totalorder %s10152_s9, %s7149_s16 }
 0xa1b   : > { %p7145_p11 = scmp.ne.s32.totalorder %s10152_s9, %s7144_s11  ;;  %p7152_p1 = scmp.lt.s32.totalorder %s7150_s14, %s7144_s11 }
 0xa1d   : > { %p7146_p12 = pnand %p7145_p11, %p7298_p5  ;;  %p7153_p2 = por %p7152_p1, %p7151_p0 }
 0xa1f   : > { %p7147_p13 = pneg %p7146_p12 }
 0xa21   : > { %p7154_p3 = pnand %p7153_p2, %p7147_p13 }
 0xa70   : > { %v6209_v62 = vpop.permute.xlu1 %6208 }
 0xa71   : > { %v6190_v48 = vpop.permute.xlu0 %6189 }
 0xa72   : > { %6196 = vst.msk [vmem:[#allocation3] sm:$0xff] %vm6195_vm5, %v6190_v48 }
 0xa73   : > { %6215 = vst.msk [vmem:[#allocation3] sm:$0xff] %vm6214_vm13, %v6209_v62 }
 0xa74   : > { %v6268_v38 = vpop.permute.xlu1 %6267 }
 0xa75   : > { %v6230_v47 = vpop.permute.xlu0 %6229 }
 0xa78   : > { %v6247_v27 = vpop.permute.xlu1 %6246 }
 0xa79   : > { %v6249_v29 = vpop.permute.xlu0 %6248 }
 0xa7c   : > { %v6266_v5 = vpop.permute.xlu1 %6265 }
 0xa7d   : > { %v6228_v15 = vpop.permute.xlu0 %6227 }
 0xa7e   : > { %6234 = vst.msk [vmem:[#allocation3] sm:$0xff] %vm6233_vm14, %v6228_v15 }
 0xa7f   : > { %6253 = vst.msk [vmem:[#allocation3] sm:$0xff] %vm6252_vm15, %v6247_v27 }
 0xa80   : > { %v6285_v0 = vpop.permute.xlu1 %6284  ;;  %6272 = vst.msk [vmem:[#allocation3] sm:$0xff] %vm6271_vm0, %v6266_v5 }
 0xa81   : > { %6291 = vst.msk [vmem:[#allocation3] sm:$0xff] %vm6290_vm1, %v6285_v0  ;;  %v6192_v21 = vpop.permute.xlu0 %6191 }
 0xa82   : > { %6197 = vst.msk [vmem:[#allocation3 + $0x10] sm:$0xff] %vm6195_vm5, %v6192_v21 }
 0xa84   : > { %v6304_v17 = vpop.permute.xlu1 %6303 }
 0xa85   : > { %6310 = vst.msk [vmem:[#allocation3] sm:$0xff] %vm6309_vm2, %v6304_v17  ;;  %v6211_v63 = vpop.permute.xlu0 %6210 }
 0xa86   : > { %6216 = vst.msk [vmem:[#allocation3 + $0x10] sm:$0xff] %vm6214_vm13, %v6211_v63 }
 0xa87   : > { %6235 = vst.msk [vmem:[#allocation3 + $0x10] sm:$0xff] %vm6233_vm14, %v6230_v47 }
 0xa88   : > { %6254 = vst.msk [vmem:[#allocation3 + $0x10] sm:$0xff] %vm6252_vm15, %v6249_v29  ;;  %v6306_v51 = vpop.permute.xlu1 %6305 }
 0xa89   : > { %6273 = vst.msk [vmem:[#allocation3 + $0x10] sm:$0xff] %vm6271_vm0, %v6268_v38  ;;  %v6287_v13 = vpop.permute.xlu0 %6286 }
 0xa8a   : > { %6292 = vst.msk [vmem:[#allocation3 + $0x10] sm:$0xff] %vm6290_vm1, %v6287_v13 }
 0xa8b   : > { %6311 = vst.msk [vmem:[#allocation3 + $0x10] sm:$0xff] %vm6309_vm2, %v6306_v51 }
 0xa8c   : > { %v6326_v32 = vld [vmem:[#allocation3] sm:$0xff] }
 0xa8d   : > { %6425 = vmatmul.mubr.f32.vlgmr.msra.gmra.mxu1 %v6326_v32 }
 0xa8e   : > { %6730 = vmatprep.mubr.msk.f32.mxu1 %vm6176_vm4, %v6329_v45 }
 0xa92   : > { %v6328_v43 = vld [vmem:[#allocation3 + $0x10] sm:$0xff] }
 0xa93   : > { %6430 = vmatmul.mubr.f32.gmra.mxu1 %v6328_v43 }
 0xb4d   : > { %v6426_v8 = vpop.f32.mrf.mxu1 }
 0xb4e   : > { %v6427_v61 = vadd.f32 %v6728_v20, %v6426_v8 }
 0xb4f   : > { %v6428_v34 = vpop.f32.mrf.mxu1 }
 0xb50   : > { %v6435_v41 = vmax.f32 %v6427_v61, 0.0 }
 0xb52   : > { %6437 = vst.msk [vmem:[%s232_s10] sm:$0xff] %vm6176_vm4, %v6435_v41 }
 0xb53   : > { %v6431_v24 = vpop.f32.mrf.mxu1 }
 0xb54   : > { %v6432_v25 = vadd.f32 %v6728_v20, %v6431_v24 }
 0xb55   : > { %v6433_v26 = vpop.f32.mrf.mxu1 }
 0xb56   : > { %v6436_v60 = vmax.f32 %v6432_v25, 0.0 }
 0xb58   : > { %6438 = vst.msk [vmem:[%s232_s10 + $0x8] sm:$0xff] %vm6176_vm4, %v6436_v60 }
 0xb59   : > { %7157 = shalt.err (!%p7154_p3)
}
 0xb5a   : > { %s7158_s25 = scalar_lea.hbm %s10157_s12, 256  ;;  %s7162_s26 = scalar_lea.hbm %s10206_s5, 512 }
 0xb5b   : > { %p7159_p4 = scmp.ne.s32.totalorder %s10157_s12, %s7158_s25  ;;  %p7163_p9 = scmp.lt.s32.totalorder %s10157_s12, %s10206_s5 }
 0xb5c   : > { %p7164_p10 = scmp.lt.s32.totalorder %s7162_s26, %s7158_s25 }
 0xb5d   : > { %p7160_p7 = pnand %p7159_p4, %p7298_p5 }
 0xb5e   : > { %p7165_p11 = por %p7164_p10, %p7163_p9 }
 0xb5f   : > { %p7161_p8 = pneg %p7160_p7 }
 0xb61   : > { %p7166_p12 = pnand %p7165_p11, %p7161_p8 }
 0xb63   : > { %7169 = shalt.err (!%p7166_p12)
}
 0xb64   : > { %s7229_s15 = smov 128  }
 0xb65   : > { %7045 = dma.vmem_to_hbm [thread:$0]  (%p7298_p5), %s10152_s9, 256, %s10157_s12, %s10160_s8, %s7229_s15, %s7229_s15, %s7214_s17  }
 0xb66 PF: > { %p7051_p13 = scmp.ge.s32.totalorder %s7204_s21, 2  ;;  %s6500_s6 = sand.u32 1, %s7192_s18  }
 0xb67   : > { %s6501_s30 = scalar_lea.sflag [#allocation5], %s6500_s6 }
 0xb68   : > { %p7048_p0 = pnand %p7051_p13, %p7302_p6 }
 0xb6a   : > { %p7049_p1 = pneg %p7048_p0 }
 0xb6c   : > { %7187 = dma.done.wait (%p7049_p1), %s6501_s30, 256  }
 0xb6d   : > { %7189 = vsyncadd (%p7049_p1), %s6501_s30, 4294967040  ;;  %p16_p2 = scmp.ge.s32.totalorder %s7285_s24, 4   ;;  %s10209_s18 = smov %s7196_s19 }
 0xb6e   : > { %s10210_s19 = smov %s7200_s20  ;;  %s10211_s20 = smov %s7296_s27 }
 0xb6f   : > { %s10212_s21 = smov %s7285_s24  ;;  %18 = sbr.rel (!%p16_p2) target bundleno = 3 (0x3), region = 116 }
 0xb74   :  { %6506 = vsyncpa [#allocation5], 1 }
 0xb75   :  { %6508 = vsyncpa [#allocation5 + $0x1], 1 }

</bundles_post_ra>
